<compile_context>
chip_gen: v7x
topology: tpu7x:2x2x1
jax: 0.10.0
libtpu: 0.0.40
codegen_flags: <defaults>
</compile_context>

<pallas_src>
import functools

import jax
import jax.numpy as jnp
import numpy as np
from jax import lax
from jax.experimental import pallas as pl
from jax.experimental.pallas import tpu as pltpu


def _round_up(x, m):
    return ((x + m - 1) // m) * m


# ----------------------------- Pallas kernel -------------------------------

def _upconv3d_kernel(*refs, td: int, wp: int, splane: int):
    """Fused 3x3x3 conv + bias + ReLU over one (TD, C_out, plane) output slab.

    refs = [slab_0 .. slab_{td+1}, w_ref, b_ref, o_ref]
      slab_i : (1, 1, C_in_p, Sp2)   bf16  depth slice (j*td + i) of the
               zero-padded, plane-flattened activation (guard band included).
      w_ref  : (27, C_out_p, C_in_p) bf16  per-tap weight matrices.
      b_ref  : (C_out_p, 1)          f32   bias.
      o_ref  : (1, td, C_out_p, splane) f32
    """
    nslab = td + 2
    slabs = refs[:nslab]
    w_ref = refs[nslab]
    b_ref = refs[nslab + 1]
    o_ref = refs[nslab + 2]

    b = b_ref[...]                               # (C_out_p, 1) f32

    for dd in range(td):                         # output depths in this tile
        acc = None
        for kd in range(3):
            slab = slabs[dd + kd]                # depth tap
            for kh in range(3):
                for kw in range(3):
                    t = (kd * 3 + kh) * 3 + kw
                    # Shifted-tap window: static lane-offset slice of the
                    # padded flattened plane (no im2col materialization).
                    x_t = slab[0, 0, :, pl.ds(kh * wp + kw, splane)]
                    part = jnp.dot(w_ref[t], x_t,
                                   preferred_element_type=jnp.float32)
                    acc = part if acc is None else acc + part
        acc = acc + b                            # f32 epilogue (v5e friendly)
        o_ref[0, dd] = jnp.maximum(acc, 0.0).astype(o_ref.dtype)


# ------------------------------ JAX glue ------------------------------------

def _upsample_linear_axis(x, axis):
    """Linear x2 upsample along `axis`, align_corners=True (PyTorch semantics)."""
    n = x.shape[axis]
    out_n = 2 * n
    scale = (n - 1) / (out_n - 1) if out_n > 1 else 0.0
    pos = jnp.arange(out_n, dtype=jnp.float32) * scale
    i0 = jnp.clip(jnp.floor(pos).astype(jnp.int32), 0, n - 1)
    i1 = jnp.minimum(i0 + 1, n - 1)
    w = pos - i0.astype(jnp.float32)
    x0 = jnp.take(x, i0, axis=axis)
    x1 = jnp.take(x, i1, axis=axis)
    wshape = [1] * x.ndim
    wshape[axis] = out_n
    w = w.reshape(wshape)
    return x0 * (1.0 - w) + x1 * w


@jax.jit
def upsampling_function_forward(x_ncdhw, weight, bias):
    """Forward of Upsampling_function (mode_upsampling=1, stride=2, no norm).

    x_ncdhw: (N, C_in, D, H, W)      -- PyTorch layout
    weight:  (C_out, C_in, 3, 3, 3)  -- PyTorch Conv3d layout
    bias:    (C_out,)
    returns: (N, C_out, 2D, 2H, 2W)  float32
    """
    N, C_in, D, H, W = x_ncdhw.shape
    C_out = weight.shape[0]
    D2, H2, W2 = 2 * D, 2 * H, 2 * W
    Dp, Hp, Wp = D2 + 2, H2 + 2, W2 + 2

    C_in_p = _round_up(C_in, 16)    # bf16 sublane packing alignment
    C_out_p = _round_up(C_out, 8)   # f32 sublane alignment

    # ---- trilinear x2 upsample (align_corners=True), separable, in f32 ----
    # TODO(synk): fuse the separable trilinear interpolation into the Pallas
    # kernel (read the 8x-smaller pre-upsample tensor) to cut HBM reads further.
    xt = jnp.transpose(x_ncdhw, (0, 2, 1, 3, 4)).astype(jnp.float32)  # (N,D,C,H,W)
    xu = _upsample_linear_axis(xt, 1)
    xu = _upsample_linear_axis(xu, 3)
    xu = _upsample_linear_axis(xu, 4)                # (N, D2, C_in, H2, W2)

    # ---- zero halo for conv padding=1, pad channels, cast to bf16 ----
    xu = xu.astype(jnp.bfloat16)
    xu = jnp.pad(xu, ((0, 0), (1, 1), (0, C_in_p - C_in), (1, 1), (1, 1)))
    # flatten the (Hp, Wp) plane and add a (Wp+1)-wide guard band so every one
    # of the 9 in-plane taps is a constant-offset contiguous window.
    m2 = Wp + 1
    splane = Hp * Wp
    sp2 = splane + 2 * m2
    xp = xu.reshape(N, Dp, C_in_p, splane)
    xp = jnp.pad(xp, ((0, 0), (0, 0), (0, 0), (m2, m2)))   # (N, Dp, C_in_p, Sp2)

    # ---- weights: (C_out, C_in, 3,3,3) -> (27, C_out_p, C_in_p) bf16 ----
    w = jnp.transpose(weight, (2, 3, 4, 0, 1)).reshape(27, C_out, C_in)
    w = jnp.pad(w.astype(jnp.bfloat16),
                ((0, 0), (0, C_out_p - C_out), (0, C_in_p - C_in)))
    b2 = jnp.pad(bias.astype(jnp.float32), (0, C_out_p - C_out)).reshape(C_out_p, 1)

    # ---- Pallas call: grid over (batch, depth tiles) ----
    td = next(t for t in (4, 2, 1) if D2 % t == 0)
    grid = (N, D2 // td)

    kernel = functools.partial(_upconv3d_kernel, td=td, wp=Wp, splane=splane)

    # td+2 overlapping depth-slice views of the same padded activation.
    slab_specs = [
        pl.BlockSpec((1, 1, C_in_p, sp2),
                     (lambda n, j, i=i: (n, j * td + i, 0, 0)))
        for i in range(td + 2)
    ]

    out = pl.pallas_call(
        kernel,
        out_shape=jax.ShapeDtypeStruct((N, D2, C_out_p, splane), jnp.float32),
        grid_spec=pltpu.PrefetchScalarGridSpec(
            num_scalar_prefetch=0,
            grid=grid,
            in_specs=slab_specs + [
                pl.BlockSpec((27, C_out_p, C_in_p), lambda n, j: (0, 0, 0)),
                pl.BlockSpec((C_out_p, 1), lambda n, j: (0, 0)),
            ],
            out_specs=pl.BlockSpec((1, td, C_out_p, splane),
                                   lambda n, j: (n, j, 0, 0)),
        ),
        compiler_params=pltpu.CompilerParams(
            dimension_semantics=("parallel", "parallel"),
        ),
    )(*([xp] * (td + 2)), w, b2)

    # ---- unflatten plane, drop halo / channel padding, go to NCDHW ----
    out = out.reshape(N, D2, C_out_p, Hp, Wp)
    out = out[:, :, :C_out, 1:1 + H2, 1:1 + W2]      # (N, D2, C_out, H2, W2)
    return jnp.transpose(out, (0, 2, 1, 3, 4))       # (N, C_out, D2, H2, W2)


# ------------------------------ reference -----------------------------------

def _reference_forward(x_ncdhw, weight, bias):
    """Pure-JAX (f32, lax.conv) reference for correctness checking."""
    xu = x_ncdhw.astype(jnp.float32)
    xu = _upsample_linear_axis(xu, 2)
    xu = _upsample_linear_axis(xu, 3)
    xu = _upsample_linear_axis(xu, 4)
    y = lax.conv_general_dilated(
        xu, weight.astype(jnp.float32),
        window_strides=(1, 1, 1),
        padding=((1, 1), (1, 1), (1, 1)),
        dimension_numbers=("NCDHW", "OIDHW", "NCDHW"),
        precision=lax.Precision.HIGHEST,
    )
    y = y + bias.reshape(1, -1, 1, 1, 1)
    return jnp.maximum(y, 0.0)


# -------------------------------- main ---------------------------------------

if __name__ == "__main__":
    key = jax.random.PRNGKey(0)
    k_x, k_w, k_b = jax.random.split(key, 3)

    N, C_in, C_out = 2, 4, 8
    D = H = W = 8  # upsampled to 16^3

    x = jax.random.normal(k_x, (N, C_in, D, H, W), dtype=jnp.float32)

    # Deterministic parameter init (PyTorch Conv3d shapes), kaiming-like scale.
    fan_in = C_in * 3 * 3 * 3
    bound = 1.0 / np.sqrt(fan_in)
    weight = jax.random.uniform(
        k_w, (C_out, C_in, 3, 3, 3), minval=-bound, maxval=bound, dtype=jnp.float32
    )
    bias = jax.random.uniform(
        k_b, (C_out,), minval=-bound, maxval=bound, dtype=jnp.float32
    )

    out = jax.block_until_ready(upsampling_function_forward(x, weight, bias))
    ref = jax.block_until_ready(_reference_forward(x, weight, bias))

    # bf16 matmul operands (f32 accumulation) => relaxed tolerance vs f32 ref.
    np.testing.assert_allclose(np.asarray(out), np.asarray(ref), rtol=2e-2, atol=2e-2)
    assert out.shape == (N, C_out, 2 * D, 2 * H, 2 * W)

    print("KERNEL_OK")
</pallas_src>

<mosaic_0001>
module attributes {stable_mosaic.version = 11 : i64} {
  func.func @_upconv3d_kernel(%arg0: i32, %arg1: i32, %arg2: memref<1x1x16x362xbf16, #tpu.memory_space<vmem>>, %arg3: memref<1x1x16x362xbf16, #tpu.memory_space<vmem>>, %arg4: memref<1x1x16x362xbf16, #tpu.memory_space<vmem>>, %arg5: memref<1x1x16x362xbf16, #tpu.memory_space<vmem>>, %arg6: memref<1x1x16x362xbf16, #tpu.memory_space<vmem>>, %arg7: memref<1x1x16x362xbf16, #tpu.memory_space<vmem>>, %arg8: memref<27x8x16xbf16, #tpu.memory_space<vmem>>, %arg9: memref<8x1xf32, #tpu.memory_space<vmem>>, %arg10: memref<1x4x8x324xf32, #tpu.memory_space<vmem>>) attributes {dimension_semantics = [#tpu.dimension_semantics<parallel>, #tpu.dimension_semantics<parallel>], iteration_bounds = array<i64: 2, 4>, scalar_prefetch = 0 : i64, scratch_operands = 0 : i64, tpu.core_type = #tpu.core_type<tc>, window_params = [{transform_indices = @transform_0, window_bounds = array<i64: 1, 1, 16, 362>}, {transform_indices = @transform_1, window_bounds = array<i64: 1, 1, 16, 362>}, {transform_indices = @transform_2, window_bounds = array<i64: 1, 1, 16, 362>}, {transform_indices = @transform_3, window_bounds = array<i64: 1, 1, 16, 362>}, {transform_indices = @transform_4, window_bounds = array<i64: 1, 1, 16, 362>}, {transform_indices = @transform_5, window_bounds = array<i64: 1, 1, 16, 362>}, {pipeline_mode = #tpu.pipeline_mode<synchronous>, transform_indices = @transform_6, window_bounds = array<i64: 27, 8, 16>}, {pipeline_mode = #tpu.pipeline_mode<synchronous>, transform_indices = @transform_7, window_bounds = array<i64: 8, 1>}, {transform_indices = @transform_8, window_bounds = array<i64: 1, 4, 8, 324>}]} {
    %c0 = arith.constant 0 : index
    %c0_0 = arith.constant 0 : index
    %0 = vector.load %arg9[%c0, %c0_0] : memref<8x1xf32, #tpu.memory_space<vmem>>, vector<8x1xf32>
    %c0_1 = arith.constant 0 : index
    %c0_2 = arith.constant 0 : index
    %c0_3 = arith.constant 0 : index
    %c0_4 = arith.constant 0 : index
    %1 = vector.load %arg2[%c0_1, %c0_2, %c0_3, %c0_4] : memref<1x1x16x362xbf16, #tpu.memory_space<vmem>>, vector<1x1x16x324xbf16>
    %2 = vector.shape_cast %1 : vector<1x1x16x324xbf16> to vector<16x324xbf16>
    %c0_5 = arith.constant 0 : index
    %c0_6 = arith.constant 0 : index
    %c0_7 = arith.constant 0 : index
    %3 = vector.load %arg8[%c0_5, %c0_6, %c0_7] : memref<27x8x16xbf16, #tpu.memory_space<vmem>>, vector<1x8x16xbf16>
    %4 = vector.shape_cast %3 : vector<1x8x16xbf16> to vector<8x16xbf16>
    %cst = arith.constant dense<0.000000e+00> : vector<8x324xf32>
    %5 = tpu.matmul %4, %2, %cst {dimension_numbers = #tpu.dot_dimension_numbers<[1], [0], [0], [1], [0, 0, 1, 1], [], []>} : vector<8x16xbf16>, vector<16x324xbf16>, vector<8x324xf32> -> vector<8x324xf32>
    %c0_8 = arith.constant 0 : index
    %c0_9 = arith.constant 0 : index
    %c0_10 = arith.constant 0 : index
    %c1 = arith.constant 1 : index
    %6 = vector.load %arg2[%c0_8, %c0_9, %c0_10, %c1] : memref<1x1x16x362xbf16, #tpu.memory_space<vmem>>, vector<1x1x16x324xbf16>
    %7 = vector.shape_cast %6 : vector<1x1x16x324xbf16> to vector<16x324xbf16>
    %c1_11 = arith.constant 1 : index
    %c0_12 = arith.constant 0 : index
    %c0_13 = arith.constant 0 : index
    %8 = vector.load %arg8[%c1_11, %c0_12, %c0_13] : memref<27x8x16xbf16, #tpu.memory_space<vmem>>, vector<1x8x16xbf16>
    %9 = vector.shape_cast %8 : vector<1x8x16xbf16> to vector<8x16xbf16>
    %cst_14 = arith.constant dense<0.000000e+00> : vector<8x324xf32>
    %10 = tpu.matmul %9, %7, %cst_14 {dimension_numbers = #tpu.dot_dimension_numbers<[1], [0], [0], [1], [0, 0, 1, 1], [], []>} : vector<8x16xbf16>, vector<16x324xbf16>, vector<8x324xf32> -> vector<8x324xf32>
    %11 = arith.addf %5, %10 : vector<8x324xf32>
    %c0_15 = arith.constant 0 : index
    %c0_16 = arith.constant 0 : index
    %c0_17 = arith.constant 0 : index
    %c2 = arith.constant 2 : index
    %12 = vector.load %arg2[%c0_15, %c0_16, %c0_17, %c2] : memref<1x1x16x362xbf16, #tpu.memory_space<vmem>>, vector<1x1x16x324xbf16>
    %13 = vector.shape_cast %12 : vector<1x1x16x324xbf16> to vector<16x324xbf16>
    %c2_18 = arith.constant 2 : index
    %c0_19 = arith.constant 0 : index
    %c0_20 = arith.constant 0 : index
    %14 = vector.load %arg8[%c2_18, %c0_19, %c0_20] : memref<27x8x16xbf16, #tpu.memory_space<vmem>>, vector<1x8x16xbf16>
    %15 = vector.shape_cast %14 : vector<1x8x16xbf16> to vector<8x16xbf16>
    %cst_21 = arith.constant dense<0.000000e+00> : vector<8x324xf32>
    %16 = tpu.matmul %15, %13, %cst_21 {dimension_numbers = #tpu.dot_dimension_numbers<[1], [0], [0], [1], [0, 0, 1, 1], [], []>} : vector<8x16xbf16>, vector<16x324xbf16>, vector<8x324xf32> -> vector<8x324xf32>
    %17 = arith.addf %11, %16 : vector<8x324xf32>
    %c0_22 = arith.constant 0 : index
    %c0_23 = arith.constant 0 : index
    %c0_24 = arith.constant 0 : index
    %c18 = arith.constant 18 : index
    %18 = vector.load %arg2[%c0_22, %c0_23, %c0_24, %c18] : memref<1x1x16x362xbf16, #tpu.memory_space<vmem>>, vector<1x1x16x324xbf16>
    %19 = vector.shape_cast %18 : vector<1x1x16x324xbf16> to vector<16x324xbf16>
    %c3 = arith.constant 3 : index
    %c0_25 = arith.constant 0 : index
    %c0_26 = arith.constant 0 : index
    %20 = vector.load %arg8[%c3, %c0_25, %c0_26] : memref<27x8x16xbf16, #tpu.memory_space<vmem>>, vector<1x8x16xbf16>
    %21 = vector.shape_cast %20 : vector<1x8x16xbf16> to vector<8x16xbf16>
    %cst_27 = arith.constant dense<0.000000e+00> : vector<8x324xf32>
    %22 = tpu.matmul %21, %19, %cst_27 {dimension_numbers = #tpu.dot_dimension_numbers<[1], [0], [0], [1], [0, 0, 1, 1], [], []>} : vector<8x16xbf16>, vector<16x324xbf16>, vector<8x324xf32> -> vector<8x324xf32>
    %23 = arith.addf %17, %22 : vector<8x324xf32>
    %c0_28 = arith.constant 0 : index
    %c0_29 = arith.constant 0 : index
    %c0_30 = arith.constant 0 : index
    %c19 = arith.constant 19 : index
    %24 = vector.load %arg2[%c0_28, %c0_29, %c0_30, %c19] : memref<1x1x16x362xbf16, #tpu.memory_space<vmem>>, vector<1x1x16x324xbf16>
    %25 = vector.shape_cast %24 : vector<1x1x16x324xbf16> to vector<16x324xbf16>
    %c4 = arith.constant 4 : index
    %c0_31 = arith.constant 0 : index
    %c0_32 = arith.constant 0 : index
    %26 = vector.load %arg8[%c4, %c0_31, %c0_32] : memref<27x8x16xbf16, #tpu.memory_space<vmem>>, vector<1x8x16xbf16>
    %27 = vector.shape_cast %26 : vector<1x8x16xbf16> to vector<8x16xbf16>
    %cst_33 = arith.constant dense<0.000000e+00> : vector<8x324xf32>
    %28 = tpu.matmul %27, %25, %cst_33 {dimension_numbers = #tpu.dot_dimension_numbers<[1], [0], [0], [1], [0, 0, 1, 1], [], []>} : vector<8x16xbf16>, vector<16x324xbf16>, vector<8x324xf32> -> vector<8x324xf32>
    %29 = arith.addf %23, %28 : vector<8x324xf32>
    %c0_34 = arith.constant 0 : index
    %c0_35 = arith.constant 0 : index
    %c0_36 = arith.constant 0 : index
    %c20 = arith.constant 20 : index
    %30 = vector.load %arg2[%c0_34, %c0_35, %c0_36, %c20] : memref<1x1x16x362xbf16, #tpu.memory_space<vmem>>, vector<1x1x16x324xbf16>
    %31 = vector.shape_cast %30 : vector<1x1x16x324xbf16> to vector<16x324xbf16>
    %c5 = arith.constant 5 : index
    %c0_37 = arith.constant 0 : index
    %c0_38 = arith.constant 0 : index
    %32 = vector.load %arg8[%c5, %c0_37, %c0_38] : memref<27x8x16xbf16, #tpu.memory_space<vmem>>, vector<1x8x16xbf16>
    %33 = vector.shape_cast %32 : vector<1x8x16xbf16> to vector<8x16xbf16>
    %cst_39 = arith.constant dense<0.000000e+00> : vector<8x324xf32>
    %34 = tpu.matmul %33, %31, %cst_39 {dimension_numbers = #tpu.dot_dimension_numbers<[1], [0], [0], [1], [0, 0, 1, 1], [], []>} : vector<8x16xbf16>, vector<16x324xbf16>, vector<8x324xf32> -> vector<8x324xf32>
    %35 = arith.addf %29, %34 : vector<8x324xf32>
    %c0_40 = arith.constant 0 : index
    %c0_41 = arith.constant 0 : index
    %c0_42 = arith.constant 0 : index
    %c36 = arith.constant 36 : index
    %36 = vector.load %arg2[%c0_40, %c0_41, %c0_42, %c36] : memref<1x1x16x362xbf16, #tpu.memory_space<vmem>>, vector<1x1x16x324xbf16>
    %37 = vector.shape_cast %36 : vector<1x1x16x324xbf16> to vector<16x324xbf16>
    %c6 = arith.constant 6 : index
    %c0_43 = arith.constant 0 : index
    %c0_44 = arith.constant 0 : index
    %38 = vector.load %arg8[%c6, %c0_43, %c0_44] : memref<27x8x16xbf16, #tpu.memory_space<vmem>>, vector<1x8x16xbf16>
    %39 = vector.shape_cast %38 : vector<1x8x16xbf16> to vector<8x16xbf16>
    %cst_45 = arith.constant dense<0.000000e+00> : vector<8x324xf32>
    %40 = tpu.matmul %39, %37, %cst_45 {dimension_numbers = #tpu.dot_dimension_numbers<[1], [0], [0], [1], [0, 0, 1, 1], [], []>} : vector<8x16xbf16>, vector<16x324xbf16>, vector<8x324xf32> -> vector<8x324xf32>
    %41 = arith.addf %35, %40 : vector<8x324xf32>
    %c0_46 = arith.constant 0 : index
    %c0_47 = arith.constant 0 : index
    %c0_48 = arith.constant 0 : index
    %c37 = arith.constant 37 : index
    %42 = vector.load %arg2[%c0_46, %c0_47, %c0_48, %c37] : memref<1x1x16x362xbf16, #tpu.memory_space<vmem>>, vector<1x1x16x324xbf16>
    %43 = vector.shape_cast %42 : vector<1x1x16x324xbf16> to vector<16x324xbf16>
    %c7 = arith.constant 7 : index
    %c0_49 = arith.constant 0 : index
    %c0_50 = arith.constant 0 : index
    %44 = vector.load %arg8[%c7, %c0_49, %c0_50] : memref<27x8x16xbf16, #tpu.memory_space<vmem>>, vector<1x8x16xbf16>
    %45 = vector.shape_cast %44 : vector<1x8x16xbf16> to vector<8x16xbf16>
    %cst_51 = arith.constant dense<0.000000e+00> : vector<8x324xf32>
    %46 = tpu.matmul %45, %43, %cst_51 {dimension_numbers = #tpu.dot_dimension_numbers<[1], [0], [0], [1], [0, 0, 1, 1], [], []>} : vector<8x16xbf16>, vector<16x324xbf16>, vector<8x324xf32> -> vector<8x324xf32>
    %47 = arith.addf %41, %46 : vector<8x324xf32>
    %c0_52 = arith.constant 0 : index
    %c0_53 = arith.constant 0 : index
    %c0_54 = arith.constant 0 : index
    %c38 = arith.constant 38 : index
    %48 = vector.load %arg2[%c0_52, %c0_53, %c0_54, %c38] : memref<1x1x16x362xbf16, #tpu.memory_space<vmem>>, vector<1x1x16x324xbf16>
    %49 = vector.shape_cast %48 : vector<1x1x16x324xbf16> to vector<16x324xbf16>
    %c8 = arith.constant 8 : index
    %c0_55 = arith.constant 0 : index
    %c0_56 = arith.constant 0 : index
    %50 = vector.load %arg8[%c8, %c0_55, %c0_56] : memref<27x8x16xbf16, #tpu.memory_space<vmem>>, vector<1x8x16xbf16>
    %51 = vector.shape_cast %50 : vector<1x8x16xbf16> to vector<8x16xbf16>
    %cst_57 = arith.constant dense<0.000000e+00> : vector<8x324xf32>
    %52 = tpu.matmul %51, %49, %cst_57 {dimension_numbers = #tpu.dot_dimension_numbers<[1], [0], [0], [1], [0, 0, 1, 1], [], []>} : vector<8x16xbf16>, vector<16x324xbf16>, vector<8x324xf32> -> vector<8x324xf32>
    %53 = arith.addf %47, %52 : vector<8x324xf32>
    %c0_58 = arith.constant 0 : index
    %c0_59 = arith.constant 0 : index
    %c0_60 = arith.constant 0 : index
    %c0_61 = arith.constant 0 : index
    %54 = vector.load %arg3[%c0_58, %c0_59, %c0_60, %c0_61] : memref<1x1x16x362xbf16, #tpu.memory_space<vmem>>, vector<1x1x16x324xbf16>
    %55 = vector.shape_cast %54 : vector<1x1x16x324xbf16> to vector<16x324xbf16>
    %c9 = arith.constant 9 : index
    %c0_62 = arith.constant 0 : index
    %c0_63 = arith.constant 0 : index
    %56 = vector.load %arg8[%c9, %c0_62, %c0_63] : memref<27x8x16xbf16, #tpu.memory_space<vmem>>, vector<1x8x16xbf16>
    %57 = vector.shape_cast %56 : vector<1x8x16xbf16> to vector<8x16xbf16>
    %cst_64 = arith.constant dense<0.000000e+00> : vector<8x324xf32>
    %58 = tpu.matmul %57, %55, %cst_64 {dimension_numbers = #tpu.dot_dimension_numbers<[1], [0], [0], [1], [0, 0, 1, 1], [], []>} : vector<8x16xbf16>, vector<16x324xbf16>, vector<8x324xf32> -> vector<8x324xf32>
    %59 = arith.addf %53, %58 : vector<8x324xf32>
    %c0_65 = arith.constant 0 : index
    %c0_66 = arith.constant 0 : index
    %c0_67 = arith.constant 0 : index
    %c1_68 = arith.constant 1 : index
    %60 = vector.load %arg3[%c0_65, %c0_66, %c0_67, %c1_68] : memref<1x1x16x362xbf16, #tpu.memory_space<vmem>>, vector<1x1x16x324xbf16>
    %61 = vector.shape_cast %60 : vector<1x1x16x324xbf16> to vector<16x324xbf16>
    %c10 = arith.constant 10 : index
    %c0_69 = arith.constant 0 : index
    %c0_70 = arith.constant 0 : index
    %62 = vector.load %arg8[%c10, %c0_69, %c0_70] : memref<27x8x16xbf16, #tpu.memory_space<vmem>>, vector<1x8x16xbf16>
    %63 = vector.shape_cast %62 : vector<1x8x16xbf16> to vector<8x16xbf16>
    %cst_71 = arith.constant dense<0.000000e+00> : vector<8x324xf32>
    %64 = tpu.matmul %63, %61, %cst_71 {dimension_numbers = #tpu.dot_dimension_numbers<[1], [0], [0], [1], [0, 0, 1, 1], [], []>} : vector<8x16xbf16>, vector<16x324xbf16>, vector<8x324xf32> -> vector<8x324xf32>
    %65 = arith.addf %59, %64 : vector<8x324xf32>
    %c0_72 = arith.constant 0 : index
    %c0_73 = arith.constant 0 : index
    %c0_74 = arith.constant 0 : index
    %c2_75 = arith.constant 2 : index
    %66 = vector.load %arg3[%c0_72, %c0_73, %c0_74, %c2_75] : memref<1x1x16x362xbf16, #tpu.memory_space<vmem>>, vector<1x1x16x324xbf16>
    %67 = vector.shape_cast %66 : vector<1x1x16x324xbf16> to vector<16x324xbf16>
    %c11 = arith.constant 11 : index
    %c0_76 = arith.constant 0 : index
    %c0_77 = arith.constant 0 : index
    %68 = vector.load %arg8[%c11, %c0_76, %c0_77] : memref<27x8x16xbf16, #tpu.memory_space<vmem>>, vector<1x8x16xbf16>
    %69 = vector.shape_cast %68 : vector<1x8x16xbf16> to vector<8x16xbf16>
    %cst_78 = arith.constant dense<0.000000e+00> : vector<8x324xf32>
    %70 = tpu.matmul %69, %67, %cst_78 {dimension_numbers = #tpu.dot_dimension_numbers<[1], [0], [0], [1], [0, 0, 1, 1], [], []>} : vector<8x16xbf16>, vector<16x324xbf16>, vector<8x324xf32> -> vector<8x324xf32>
    %71 = arith.addf %65, %70 : vector<8x324xf32>
    %c0_79 = arith.constant 0 : index
    %c0_80 = arith.constant 0 : index
    %c0_81 = arith.constant 0 : index
    %c18_82 = arith.constant 18 : index
    %72 = vector.load %arg3[%c0_79, %c0_80, %c0_81, %c18_82] : memref<1x1x16x362xbf16, #tpu.memory_space<vmem>>, vector<1x1x16x324xbf16>
    %73 = vector.shape_cast %72 : vector<1x1x16x324xbf16> to vector<16x324xbf16>
    %c12 = arith.constant 12 : index
    %c0_83 = arith.constant 0 : index
    %c0_84 = arith.constant 0 : index
    %74 = vector.load %arg8[%c12, %c0_83, %c0_84] : memref<27x8x16xbf16, #tpu.memory_space<vmem>>, vector<1x8x16xbf16>
    %75 = vector.shape_cast %74 : vector<1x8x16xbf16> to vector<8x16xbf16>
    %cst_85 = arith.constant dense<0.000000e+00> : vector<8x324xf32>
    %76 = tpu.matmul %75, %73, %cst_85 {dimension_numbers = #tpu.dot_dimension_numbers<[1], [0], [0], [1], [0, 0, 1, 1], [], []>} : vector<8x16xbf16>, vector<16x324xbf16>, vector<8x324xf32> -> vector<8x324xf32>
    %77 = arith.addf %71, %76 : vector<8x324xf32>
    %c0_86 = arith.constant 0 : index
    %c0_87 = arith.constant 0 : index
    %c0_88 = arith.constant 0 : index
    %c19_89 = arith.constant 19 : index
    %78 = vector.load %arg3[%c0_86, %c0_87, %c0_88, %c19_89] : memref<1x1x16x362xbf16, #tpu.memory_space<vmem>>, vector<1x1x16x324xbf16>
    %79 = vector.shape_cast %78 : vector<1x1x16x324xbf16> to vector<16x324xbf16>
    %c13 = arith.constant 13 : index
    %c0_90 = arith.constant 0 : index
    %c0_91 = arith.constant 0 : index
    %80 = vector.load %arg8[%c13, %c0_90, %c0_91] : memref<27x8x16xbf16, #tpu.memory_space<vmem>>, vector<1x8x16xbf16>
    %81 = vector.shape_cast %80 : vector<1x8x16xbf16> to vector<8x16xbf16>
    %cst_92 = arith.constant dense<0.000000e+00> : vector<8x324xf32>
    %82 = tpu.matmul %81, %79, %cst_92 {dimension_numbers = #tpu.dot_dimension_numbers<[1], [0], [0], [1], [0, 0, 1, 1], [], []>} : vector<8x16xbf16>, vector<16x324xbf16>, vector<8x324xf32> -> vector<8x324xf32>
    %83 = arith.addf %77, %82 : vector<8x324xf32>
    %c0_93 = arith.constant 0 : index
    %c0_94 = arith.constant 0 : index
    %c0_95 = arith.constant 0 : index
    %c20_96 = arith.constant 20 : index
    %84 = vector.load %arg3[%c0_93, %c0_94, %c0_95, %c20_96] : memref<1x1x16x362xbf16, #tpu.memory_space<vmem>>, vector<1x1x16x324xbf16>
    %85 = vector.shape_cast %84 : vector<1x1x16x324xbf16> to vector<16x324xbf16>
    %c14 = arith.constant 14 : index
    %c0_97 = arith.constant 0 : index
    %c0_98 = arith.constant 0 : index
    %86 = vector.load %arg8[%c14, %c0_97, %c0_98] : memref<27x8x16xbf16, #tpu.memory_space<vmem>>, vector<1x8x16xbf16>
    %87 = vector.shape_cast %86 : vector<1x8x16xbf16> to vector<8x16xbf16>
    %cst_99 = arith.constant dense<0.000000e+00> : vector<8x324xf32>
    %88 = tpu.matmul %87, %85, %cst_99 {dimension_numbers = #tpu.dot_dimension_numbers<[1], [0], [0], [1], [0, 0, 1, 1], [], []>} : vector<8x16xbf16>, vector<16x324xbf16>, vector<8x324xf32> -> vector<8x324xf32>
    %89 = arith.addf %83, %88 : vector<8x324xf32>
    %c0_100 = arith.constant 0 : index
    %c0_101 = arith.constant 0 : index
    %c0_102 = arith.constant 0 : index
    %c36_103 = arith.constant 36 : index
    %90 = vector.load %arg3[%c0_100, %c0_101, %c0_102, %c36_103] : memref<1x1x16x362xbf16, #tpu.memory_space<vmem>>, vector<1x1x16x324xbf16>
    %91 = vector.shape_cast %90 : vector<1x1x16x324xbf16> to vector<16x324xbf16>
    %c15 = arith.constant 15 : index
    %c0_104 = arith.constant 0 : index
    %c0_105 = arith.constant 0 : index
    %92 = vector.load %arg8[%c15, %c0_104, %c0_105] : memref<27x8x16xbf16, #tpu.memory_space<vmem>>, vector<1x8x16xbf16>
    %93 = vector.shape_cast %92 : vector<1x8x16xbf16> to vector<8x16xbf16>
    %cst_106 = arith.constant dense<0.000000e+00> : vector<8x324xf32>
    %94 = tpu.matmul %93, %91, %cst_106 {dimension_numbers = #tpu.dot_dimension_numbers<[1], [0], [0], [1], [0, 0, 1, 1], [], []>} : vector<8x16xbf16>, vector<16x324xbf16>, vector<8x324xf32> -> vector<8x324xf32>
    %95 = arith.addf %89, %94 : vector<8x324xf32>
    %c0_107 = arith.constant 0 : index
    %c0_108 = arith.constant 0 : index
    %c0_109 = arith.constant 0 : index
    %c37_110 = arith.constant 37 : index
    %96 = vector.load %arg3[%c0_107, %c0_108, %c0_109, %c37_110] : memref<1x1x16x362xbf16, #tpu.memory_space<vmem>>, vector<1x1x16x324xbf16>
    %97 = vector.shape_cast %96 : vector<1x1x16x324xbf16> to vector<16x324xbf16>
    %c16 = arith.constant 16 : index
    %c0_111 = arith.constant 0 : index
    %c0_112 = arith.constant 0 : index
    %98 = vector.load %arg8[%c16, %c0_111, %c0_112] : memref<27x8x16xbf16, #tpu.memory_space<vmem>>, vector<1x8x16xbf16>
    %99 = vector.shape_cast %98 : vector<1x8x16xbf16> to vector<8x16xbf16>
    %cst_113 = arith.constant dense<0.000000e+00> : vector<8x324xf32>
    %100 = tpu.matmul %99, %97, %cst_113 {dimension_numbers = #tpu.dot_dimension_numbers<[1], [0], [0], [1], [0, 0, 1, 1], [], []>} : vector<8x16xbf16>, vector<16x324xbf16>, vector<8x324xf32> -> vector<8x324xf32>
    %101 = arith.addf %95, %100 : vector<8x324xf32>
    %c0_114 = arith.constant 0 : index
    %c0_115 = arith.constant 0 : index
    %c0_116 = arith.constant 0 : index
    %c38_117 = arith.constant 38 : index
    %102 = vector.load %arg3[%c0_114, %c0_115, %c0_116, %c38_117] : memref<1x1x16x362xbf16, #tpu.memory_space<vmem>>, vector<1x1x16x324xbf16>
    %103 = vector.shape_cast %102 : vector<1x1x16x324xbf16> to vector<16x324xbf16>
    %c17 = arith.constant 17 : index
    %c0_118 = arith.constant 0 : index
    %c0_119 = arith.constant 0 : index
    %104 = vector.load %arg8[%c17, %c0_118, %c0_119] : memref<27x8x16xbf16, #tpu.memory_space<vmem>>, vector<1x8x16xbf16>
    %105 = vector.shape_cast %104 : vector<1x8x16xbf16> to vector<8x16xbf16>
    %cst_120 = arith.constant dense<0.000000e+00> : vector<8x324xf32>
    %106 = tpu.matmul %105, %103, %cst_120 {dimension_numbers = #tpu.dot_dimension_numbers<[1], [0], [0], [1], [0, 0, 1, 1], [], []>} : vector<8x16xbf16>, vector<16x324xbf16>, vector<8x324xf32> -> vector<8x324xf32>
    %107 = arith.addf %101, %106 : vector<8x324xf32>
    %c0_121 = arith.constant 0 : index
    %c0_122 = arith.constant 0 : index
    %c0_123 = arith.constant 0 : index
    %c0_124 = arith.constant 0 : index
    %108 = vector.load %arg4[%c0_121, %c0_122, %c0_123, %c0_124] : memref<1x1x16x362xbf16, #tpu.memory_space<vmem>>, vector<1x1x16x324xbf16>
    %109 = vector.shape_cast %108 : vector<1x1x16x324xbf16> to vector<16x324xbf16>
    %c18_125 = arith.constant 18 : index
    %c0_126 = arith.constant 0 : index
    %c0_127 = arith.constant 0 : index
    %110 = vector.load %arg8[%c18_125, %c0_126, %c0_127] : memref<27x8x16xbf16, #tpu.memory_space<vmem>>, vector<1x8x16xbf16>
    %111 = vector.shape_cast %110 : vector<1x8x16xbf16> to vector<8x16xbf16>
    %cst_128 = arith.constant dense<0.000000e+00> : vector<8x324xf32>
    %112 = tpu.matmul %111, %109, %cst_128 {dimension_numbers = #tpu.dot_dimension_numbers<[1], [0], [0], [1], [0, 0, 1, 1], [], []>} : vector<8x16xbf16>, vector<16x324xbf16>, vector<8x324xf32> -> vector<8x324xf32>
    %113 = arith.addf %107, %112 : vector<8x324xf32>
    %c0_129 = arith.constant 0 : index
    %c0_130 = arith.constant 0 : index
    %c0_131 = arith.constant 0 : index
    %c1_132 = arith.constant 1 : index
    %114 = vector.load %arg4[%c0_129, %c0_130, %c0_131, %c1_132] : memref<1x1x16x362xbf16, #tpu.memory_space<vmem>>, vector<1x1x16x324xbf16>
    %115 = vector.shape_cast %114 : vector<1x1x16x324xbf16> to vector<16x324xbf16>
    %c19_133 = arith.constant 19 : index
    %c0_134 = arith.constant 0 : index
    %c0_135 = arith.constant 0 : index
    %116 = vector.load %arg8[%c19_133, %c0_134, %c0_135] : memref<27x8x16xbf16, #tpu.memory_space<vmem>>, vector<1x8x16xbf16>
    %117 = vector.shape_cast %116 : vector<1x8x16xbf16> to vector<8x16xbf16>
    %cst_136 = arith.constant dense<0.000000e+00> : vector<8x324xf32>
    %118 = tpu.matmul %117, %115, %cst_136 {dimension_numbers = #tpu.dot_dimension_numbers<[1], [0], [0], [1], [0, 0, 1, 1], [], []>} : vector<8x16xbf16>, vector<16x324xbf16>, vector<8x324xf32> -> vector<8x324xf32>
    %119 = arith.addf %113, %118 : vector<8x324xf32>
    %c0_137 = arith.constant 0 : index
    %c0_138 = arith.constant 0 : index
    %c0_139 = arith.constant 0 : index
    %c2_140 = arith.constant 2 : index
    %120 = vector.load %arg4[%c0_137, %c0_138, %c0_139, %c2_140] : memref<1x1x16x362xbf16, #tpu.memory_space<vmem>>, vector<1x1x16x324xbf16>
    %121 = vector.shape_cast %120 : vector<1x1x16x324xbf16> to vector<16x324xbf16>
    %c20_141 = arith.constant 20 : index
    %c0_142 = arith.constant 0 : index
    %c0_143 = arith.constant 0 : index
    %122 = vector.load %arg8[%c20_141, %c0_142, %c0_143] : memref<27x8x16xbf16, #tpu.memory_space<vmem>>, vector<1x8x16xbf16>
    %123 = vector.shape_cast %122 : vector<1x8x16xbf16> to vector<8x16xbf16>
    %cst_144 = arith.constant dense<0.000000e+00> : vector<8x324xf32>
    %124 = tpu.matmul %123, %121, %cst_144 {dimension_numbers = #tpu.dot_dimension_numbers<[1], [0], [0], [1], [0, 0, 1, 1], [], []>} : vector<8x16xbf16>, vector<16x324xbf16>, vector<8x324xf32> -> vector<8x324xf32>
    %125 = arith.addf %119, %124 : vector<8x324xf32>
    %c0_145 = arith.constant 0 : index
    %c0_146 = arith.constant 0 : index
    %c0_147 = arith.constant 0 : index
    %c18_148 = arith.constant 18 : index
    %126 = vector.load %arg4[%c0_145, %c0_146, %c0_147, %c18_148] : memref<1x1x16x362xbf16, #tpu.memory_space<vmem>>, vector<1x1x16x324xbf16>
    %127 = vector.shape_cast %126 : vector<1x1x16x324xbf16> to vector<16x324xbf16>
    %c21 = arith.constant 21 : index
    %c0_149 = arith.constant 0 : index
    %c0_150 = arith.constant 0 : index
    %128 = vector.load %arg8[%c21, %c0_149, %c0_150] : memref<27x8x16xbf16, #tpu.memory_space<vmem>>, vector<1x8x16xbf16>
    %129 = vector.shape_cast %128 : vector<1x8x16xbf16> to vector<8x16xbf16>
    %cst_151 = arith.constant dense<0.000000e+00> : vector<8x324xf32>
    %130 = tpu.matmul %129, %127, %cst_151 {dimension_numbers = #tpu.dot_dimension_numbers<[1], [0], [0], [1], [0, 0, 1, 1], [], []>} : vector<8x16xbf16>, vector<16x324xbf16>, vector<8x324xf32> -> vector<8x324xf32>
    %131 = arith.addf %125, %130 : vector<8x324xf32>
    %c0_152 = arith.constant 0 : index
    %c0_153 = arith.constant 0 : index
    %c0_154 = arith.constant 0 : index
    %c19_155 = arith.constant 19 : index
    %132 = vector.load %arg4[%c0_152, %c0_153, %c0_154, %c19_155] : memref<1x1x16x362xbf16, #tpu.memory_space<vmem>>, vector<1x1x16x324xbf16>
    %133 = vector.shape_cast %132 : vector<1x1x16x324xbf16> to vector<16x324xbf16>
    %c22 = arith.constant 22 : index
    %c0_156 = arith.constant 0 : index
    %c0_157 = arith.constant 0 : index
    %134 = vector.load %arg8[%c22, %c0_156, %c0_157] : memref<27x8x16xbf16, #tpu.memory_space<vmem>>, vector<1x8x16xbf16>
    %135 = vector.shape_cast %134 : vector<1x8x16xbf16> to vector<8x16xbf16>
    %cst_158 = arith.constant dense<0.000000e+00> : vector<8x324xf32>
    %136 = tpu.matmul %135, %133, %cst_158 {dimension_numbers = #tpu.dot_dimension_numbers<[1], [0], [0], [1], [0, 0, 1, 1], [], []>} : vector<8x16xbf16>, vector<16x324xbf16>, vector<8x324xf32> -> vector<8x324xf32>
    %137 = arith.addf %131, %136 : vector<8x324xf32>
    %c0_159 = arith.constant 0 : index
    %c0_160 = arith.constant 0 : index
    %c0_161 = arith.constant 0 : index
    %c20_162 = arith.constant 20 : index
    %138 = vector.load %arg4[%c0_159, %c0_160, %c0_161, %c20_162] : memref<1x1x16x362xbf16, #tpu.memory_space<vmem>>, vector<1x1x16x324xbf16>
    %139 = vector.shape_cast %138 : vector<1x1x16x324xbf16> to vector<16x324xbf16>
    %c23 = arith.constant 23 : index
    %c0_163 = arith.constant 0 : index
    %c0_164 = arith.constant 0 : index
    %140 = vector.load %arg8[%c23, %c0_163, %c0_164] : memref<27x8x16xbf16, #tpu.memory_space<vmem>>, vector<1x8x16xbf16>
    %141 = vector.shape_cast %140 : vector<1x8x16xbf16> to vector<8x16xbf16>
    %cst_165 = arith.constant dense<0.000000e+00> : vector<8x324xf32>
    %142 = tpu.matmul %141, %139, %cst_165 {dimension_numbers = #tpu.dot_dimension_numbers<[1], [0], [0], [1], [0, 0, 1, 1], [], []>} : vector<8x16xbf16>, vector<16x324xbf16>, vector<8x324xf32> -> vector<8x324xf32>
    %143 = arith.addf %137, %142 : vector<8x324xf32>
    %c0_166 = arith.constant 0 : index
    %c0_167 = arith.constant 0 : index
    %c0_168 = arith.constant 0 : index
    %c36_169 = arith.constant 36 : index
    %144 = vector.load %arg4[%c0_166, %c0_167, %c0_168, %c36_169] : memref<1x1x16x362xbf16, #tpu.memory_space<vmem>>, vector<1x1x16x324xbf16>
    %145 = vector.shape_cast %144 : vector<1x1x16x324xbf16> to vector<16x324xbf16>
    %c24 = arith.constant 24 : index
    %c0_170 = arith.constant 0 : index
    %c0_171 = arith.constant 0 : index
    %146 = vector.load %arg8[%c24, %c0_170, %c0_171] : memref<27x8x16xbf16, #tpu.memory_space<vmem>>, vector<1x8x16xbf16>
    %147 = vector.shape_cast %146 : vector<1x8x16xbf16> to vector<8x16xbf16>
    %cst_172 = arith.constant dense<0.000000e+00> : vector<8x324xf32>
    %148 = tpu.matmul %147, %145, %cst_172 {dimension_numbers = #tpu.dot_dimension_numbers<[1], [0], [0], [1], [0, 0, 1, 1], [], []>} : vector<8x16xbf16>, vector<16x324xbf16>, vector<8x324xf32> -> vector<8x324xf32>
    %149 = arith.addf %143, %148 : vector<8x324xf32>
    %c0_173 = arith.constant 0 : index
    %c0_174 = arith.constant 0 : index
    %c0_175 = arith.constant 0 : index
    %c37_176 = arith.constant 37 : index
    %150 = vector.load %arg4[%c0_173, %c0_174, %c0_175, %c37_176] : memref<1x1x16x362xbf16, #tpu.memory_space<vmem>>, vector<1x1x16x324xbf16>
    %151 = vector.shape_cast %150 : vector<1x1x16x324xbf16> to vector<16x324xbf16>
    %c25 = arith.constant 25 : index
    %c0_177 = arith.constant 0 : index
    %c0_178 = arith.constant 0 : index
    %152 = vector.load %arg8[%c25, %c0_177, %c0_178] : memref<27x8x16xbf16, #tpu.memory_space<vmem>>, vector<1x8x16xbf16>
    %153 = vector.shape_cast %152 : vector<1x8x16xbf16> to vector<8x16xbf16>
    %cst_179 = arith.constant dense<0.000000e+00> : vector<8x324xf32>
    %154 = tpu.matmul %153, %151, %cst_179 {dimension_numbers = #tpu.dot_dimension_numbers<[1], [0], [0], [1], [0, 0, 1, 1], [], []>} : vector<8x16xbf16>, vector<16x324xbf16>, vector<8x324xf32> -> vector<8x324xf32>
    %155 = arith.addf %149, %154 : vector<8x324xf32>
    %c0_180 = arith.constant 0 : index
    %c0_181 = arith.constant 0 : index
    %c0_182 = arith.constant 0 : index
    %c38_183 = arith.constant 38 : index
    %156 = vector.load %arg4[%c0_180, %c0_181, %c0_182, %c38_183] : memref<1x1x16x362xbf16, #tpu.memory_space<vmem>>, vector<1x1x16x324xbf16>
    %157 = vector.shape_cast %156 : vector<1x1x16x324xbf16> to vector<16x324xbf16>
    %c26 = arith.constant 26 : index
    %c0_184 = arith.constant 0 : index
    %c0_185 = arith.constant 0 : index
    %158 = vector.load %arg8[%c26, %c0_184, %c0_185] : memref<27x8x16xbf16, #tpu.memory_space<vmem>>, vector<1x8x16xbf16>
    %159 = vector.shape_cast %158 : vector<1x8x16xbf16> to vector<8x16xbf16>
    %cst_186 = arith.constant dense<0.000000e+00> : vector<8x324xf32>
    %160 = tpu.matmul %159, %157, %cst_186 {dimension_numbers = #tpu.dot_dimension_numbers<[1], [0], [0], [1], [0, 0, 1, 1], [], []>} : vector<8x16xbf16>, vector<16x324xbf16>, vector<8x324xf32> -> vector<8x324xf32>
    %161 = arith.addf %155, %160 : vector<8x324xf32>
    %162 = vector.broadcast %0 : vector<8x1xf32> to vector<8x324xf32>
    %163 = arith.addf %161, %162 : vector<8x324xf32>
    %cst_187 = arith.constant 0.000000e+00 : f32
    %164 = vector.broadcast %cst_187 : f32 to vector<8x324xf32>
    %165 = arith.maximumf %163, %164 : vector<8x324xf32>
    %c0_188 = arith.constant 0 : index
    %c0_189 = arith.constant 0 : index
    %c0_190 = arith.constant 0 : index
    %c0_191 = arith.constant 0 : index
    %166 = vector.load %arg10[%c0_188, %c0_189, %c0_190, %c0_191] : memref<1x4x8x324xf32, #tpu.memory_space<vmem>>, vector<1x1x8x324xf32>
    %167 = vector.shape_cast %166 : vector<1x1x8x324xf32> to vector<8x324xf32>
    %168 = vector.shape_cast %165 : vector<8x324xf32> to vector<1x1x8x324xf32>
    tpu.vector_store %arg10[%c0_188, %c0_189, %c0_190, %c0_191], %168 {strides = array<i32>} : memref<1x4x8x324xf32, #tpu.memory_space<vmem>>, vector<1x1x8x324xf32>,
    %c0_192 = arith.constant 0 : index
    %c0_193 = arith.constant 0 : index
    %c0_194 = arith.constant 0 : index
    %c0_195 = arith.constant 0 : index
    %169 = vector.load %arg3[%c0_192, %c0_193, %c0_194, %c0_195] : memref<1x1x16x362xbf16, #tpu.memory_space<vmem>>, vector<1x1x16x324xbf16>
    %170 = vector.shape_cast %169 : vector<1x1x16x324xbf16> to vector<16x324xbf16>
    %c0_196 = arith.constant 0 : index
    %c0_197 = arith.constant 0 : index
    %c0_198 = arith.constant 0 : index
    %171 = vector.load %arg8[%c0_196, %c0_197, %c0_198] : memref<27x8x16xbf16, #tpu.memory_space<vmem>>, vector<1x8x16xbf16>
    %172 = vector.shape_cast %171 : vector<1x8x16xbf16> to vector<8x16xbf16>
    %cst_199 = arith.constant dense<0.000000e+00> : vector<8x324xf32>
    %173 = tpu.matmul %172, %170, %cst_199 {dimension_numbers = #tpu.dot_dimension_numbers<[1], [0], [0], [1], [0, 0, 1, 1], [], []>} : vector<8x16xbf16>, vector<16x324xbf16>, vector<8x324xf32> -> vector<8x324xf32>
    %c0_200 = arith.constant 0 : index
    %c0_201 = arith.constant 0 : index
    %c0_202 = arith.constant 0 : index
    %c1_203 = arith.constant 1 : index
    %174 = vector.load %arg3[%c0_200, %c0_201, %c0_202, %c1_203] : memref<1x1x16x362xbf16, #tpu.memory_space<vmem>>, vector<1x1x16x324xbf16>
    %175 = vector.shape_cast %174 : vector<1x1x16x324xbf16> to vector<16x324xbf16>
    %c1_204 = arith.constant 1 : index
    %c0_205 = arith.constant 0 : index
    %c0_206 = arith.constant 0 : index
    %176 = vector.load %arg8[%c1_204, %c0_205, %c0_206] : memref<27x8x16xbf16, #tpu.memory_space<vmem>>, vector<1x8x16xbf16>
    %177 = vector.shape_cast %176 : vector<1x8x16xbf16> to vector<8x16xbf16>
    %cst_207 = arith.constant dense<0.000000e+00> : vector<8x324xf32>
    %178 = tpu.matmul %177, %175, %cst_207 {dimension_numbers = #tpu.dot_dimension_numbers<[1], [0], [0], [1], [0, 0, 1, 1], [], []>} : vector<8x16xbf16>, vector<16x324xbf16>, vector<8x324xf32> -> vector<8x324xf32>
    %179 = arith.addf %173, %178 : vector<8x324xf32>
    %c0_208 = arith.constant 0 : index
    %c0_209 = arith.constant 0 : index
    %c0_210 = arith.constant 0 : index
    %c2_211 = arith.constant 2 : index
    %180 = vector.load %arg3[%c0_208, %c0_209, %c0_210, %c2_211] : memref<1x1x16x362xbf16, #tpu.memory_space<vmem>>, vector<1x1x16x324xbf16>
    %181 = vector.shape_cast %180 : vector<1x1x16x324xbf16> to vector<16x324xbf16>
    %c2_212 = arith.constant 2 : index
    %c0_213 = arith.constant 0 : index
    %c0_214 = arith.constant 0 : index
    %182 = vector.load %arg8[%c2_212, %c0_213, %c0_214] : memref<27x8x16xbf16, #tpu.memory_space<vmem>>, vector<1x8x16xbf16>
    %183 = vector.shape_cast %182 : vector<1x8x16xbf16> to vector<8x16xbf16>
    %cst_215 = arith.constant dense<0.000000e+00> : vector<8x324xf32>
    %184 = tpu.matmul %183, %181, %cst_215 {dimension_numbers = #tpu.dot_dimension_numbers<[1], [0], [0], [1], [0, 0, 1, 1], [], []>} : vector<8x16xbf16>, vector<16x324xbf16>, vector<8x324xf32> -> vector<8x324xf32>
    %185 = arith.addf %179, %184 : vector<8x324xf32>
    %c0_216 = arith.constant 0 : index
    %c0_217 = arith.constant 0 : index
    %c0_218 = arith.constant 0 : index
    %c18_219 = arith.constant 18 : index
    %186 = vector.load %arg3[%c0_216, %c0_217, %c0_218, %c18_219] : memref<1x1x16x362xbf16, #tpu.memory_space<vmem>>, vector<1x1x16x324xbf16>
    %187 = vector.shape_cast %186 : vector<1x1x16x324xbf16> to vector<16x324xbf16>
    %c3_220 = arith.constant 3 : index
    %c0_221 = arith.constant 0 : index
    %c0_222 = arith.constant 0 : index
    %188 = vector.load %arg8[%c3_220, %c0_221, %c0_222] : memref<27x8x16xbf16, #tpu.memory_space<vmem>>, vector<1x8x16xbf16>
    %189 = vector.shape_cast %188 : vector<1x8x16xbf16> to vector<8x16xbf16>
    %cst_223 = arith.constant dense<0.000000e+00> : vector<8x324xf32>
    %190 = tpu.matmul %189, %187, %cst_223 {dimension_numbers = #tpu.dot_dimension_numbers<[1], [0], [0], [1], [0, 0, 1, 1], [], []>} : vector<8x16xbf16>, vector<16x324xbf16>, vector<8x324xf32> -> vector<8x324xf32>
    %191 = arith.addf %185, %190 : vector<8x324xf32>
    %c0_224 = arith.constant 0 : index
    %c0_225 = arith.constant 0 : index
    %c0_226 = arith.constant 0 : index
    %c19_227 = arith.constant 19 : index
    %192 = vector.load %arg3[%c0_224, %c0_225, %c0_226, %c19_227] : memref<1x1x16x362xbf16, #tpu.memory_space<vmem>>, vector<1x1x16x324xbf16>
    %193 = vector.shape_cast %192 : vector<1x1x16x324xbf16> to vector<16x324xbf16>
    %c4_228 = arith.constant 4 : index
    %c0_229 = arith.constant 0 : index
    %c0_230 = arith.constant 0 : index
    %194 = vector.load %arg8[%c4_228, %c0_229, %c0_230] : memref<27x8x16xbf16, #tpu.memory_space<vmem>>, vector<1x8x16xbf16>
    %195 = vector.shape_cast %194 : vector<1x8x16xbf16> to vector<8x16xbf16>
    %cst_231 = arith.constant dense<0.000000e+00> : vector<8x324xf32>
    %196 = tpu.matmul %195, %193, %cst_231 {dimension_numbers = #tpu.dot_dimension_numbers<[1], [0], [0], [1], [0, 0, 1, 1], [], []>} : vector<8x16xbf16>, vector<16x324xbf16>, vector<8x324xf32> -> vector<8x324xf32>
    %197 = arith.addf %191, %196 : vector<8x324xf32>
    %c0_232 = arith.constant 0 : index
    %c0_233 = arith.constant 0 : index
    %c0_234 = arith.constant 0 : index
    %c20_235 = arith.constant 20 : index
    %198 = vector.load %arg3[%c0_232, %c0_233, %c0_234, %c20_235] : memref<1x1x16x362xbf16, #tpu.memory_space<vmem>>, vector<1x1x16x324xbf16>
    %199 = vector.shape_cast %198 : vector<1x1x16x324xbf16> to vector<16x324xbf16>
    %c5_236 = arith.constant 5 : index
    %c0_237 = arith.constant 0 : index
    %c0_238 = arith.constant 0 : index
    %200 = vector.load %arg8[%c5_236, %c0_237, %c0_238] : memref<27x8x16xbf16, #tpu.memory_space<vmem>>, vector<1x8x16xbf16>
    %201 = vector.shape_cast %200 : vector<1x8x16xbf16> to vector<8x16xbf16>
    %cst_239 = arith.constant dense<0.000000e+00> : vector<8x324xf32>
    %202 = tpu.matmul %201, %199, %cst_239 {dimension_numbers = #tpu.dot_dimension_numbers<[1], [0], [0], [1], [0, 0, 1, 1], [], []>} : vector<8x16xbf16>, vector<16x324xbf16>, vector<8x324xf32> -> vector<8x324xf32>
    %203 = arith.addf %197, %202 : vector<8x324xf32>
    %c0_240 = arith.constant 0 : index
    %c0_241 = arith.constant 0 : index
    %c0_242 = arith.constant 0 : index
    %c36_243 = arith.constant 36 : index
    %204 = vector.load %arg3[%c0_240, %c0_241, %c0_242, %c36_243] : memref<1x1x16x362xbf16, #tpu.memory_space<vmem>>, vector<1x1x16x324xbf16>
    %205 = vector.shape_cast %204 : vector<1x1x16x324xbf16> to vector<16x324xbf16>
    %c6_244 = arith.constant 6 : index
    %c0_245 = arith.constant 0 : index
    %c0_246 = arith.constant 0 : index
    %206 = vector.load %arg8[%c6_244, %c0_245, %c0_246] : memref<27x8x16xbf16, #tpu.memory_space<vmem>>, vector<1x8x16xbf16>
    %207 = vector.shape_cast %206 : vector<1x8x16xbf16> to vector<8x16xbf16>
    %cst_247 = arith.constant dense<0.000000e+00> : vector<8x324xf32>
    %208 = tpu.matmul %207, %205, %cst_247 {dimension_numbers = #tpu.dot_dimension_numbers<[1], [0], [0], [1], [0, 0, 1, 1], [], []>} : vector<8x16xbf16>, vector<16x324xbf16>, vector<8x324xf32> -> vector<8x324xf32>
    %209 = arith.addf %203, %208 : vector<8x324xf32>
    %c0_248 = arith.constant 0 : index
    %c0_249 = arith.constant 0 : index
    %c0_250 = arith.constant 0 : index
    %c37_251 = arith.constant 37 : index
    %210 = vector.load %arg3[%c0_248, %c0_249, %c0_250, %c37_251] : memref<1x1x16x362xbf16, #tpu.memory_space<vmem>>, vector<1x1x16x324xbf16>
    %211 = vector.shape_cast %210 : vector<1x1x16x324xbf16> to vector<16x324xbf16>
    %c7_252 = arith.constant 7 : index
    %c0_253 = arith.constant 0 : index
    %c0_254 = arith.constant 0 : index
    %212 = vector.load %arg8[%c7_252, %c0_253, %c0_254] : memref<27x8x16xbf16, #tpu.memory_space<vmem>>, vector<1x8x16xbf16>
    %213 = vector.shape_cast %212 : vector<1x8x16xbf16> to vector<8x16xbf16>
    %cst_255 = arith.constant dense<0.000000e+00> : vector<8x324xf32>
    %214 = tpu.matmul %213, %211, %cst_255 {dimension_numbers = #tpu.dot_dimension_numbers<[1], [0], [0], [1], [0, 0, 1, 1], [], []>} : vector<8x16xbf16>, vector<16x324xbf16>, vector<8x324xf32> -> vector<8x324xf32>
    %215 = arith.addf %209, %214 : vector<8x324xf32>
    %c0_256 = arith.constant 0 : index
    %c0_257 = arith.constant 0 : index
    %c0_258 = arith.constant 0 : index
    %c38_259 = arith.constant 38 : index
    %216 = vector.load %arg3[%c0_256, %c0_257, %c0_258, %c38_259] : memref<1x1x16x362xbf16, #tpu.memory_space<vmem>>, vector<1x1x16x324xbf16>
    %217 = vector.shape_cast %216 : vector<1x1x16x324xbf16> to vector<16x324xbf16>
    %c8_260 = arith.constant 8 : index
    %c0_261 = arith.constant 0 : index
    %c0_262 = arith.constant 0 : index
    %218 = vector.load %arg8[%c8_260, %c0_261, %c0_262] : memref<27x8x16xbf16, #tpu.memory_space<vmem>>, vector<1x8x16xbf16>
    %219 = vector.shape_cast %218 : vector<1x8x16xbf16> to vector<8x16xbf16>
    %cst_263 = arith.constant dense<0.000000e+00> : vector<8x324xf32>
    %220 = tpu.matmul %219, %217, %cst_263 {dimension_numbers = #tpu.dot_dimension_numbers<[1], [0], [0], [1], [0, 0, 1, 1], [], []>} : vector<8x16xbf16>, vector<16x324xbf16>, vector<8x324xf32> -> vector<8x324xf32>
    %221 = arith.addf %215, %220 : vector<8x324xf32>
    %c0_264 = arith.constant 0 : index
    %c0_265 = arith.constant 0 : index
    %c0_266 = arith.constant 0 : index
    %c0_267 = arith.constant 0 : index
    %222 = vector.load %arg4[%c0_264, %c0_265, %c0_266, %c0_267] : memref<1x1x16x362xbf16, #tpu.memory_space<vmem>>, vector<1x1x16x324xbf16>
    %223 = vector.shape_cast %222 : vector<1x1x16x324xbf16> to vector<16x324xbf16>
    %c9_268 = arith.constant 9 : index
    %c0_269 = arith.constant 0 : index
    %c0_270 = arith.constant 0 : index
    %224 = vector.load %arg8[%c9_268, %c0_269, %c0_270] : memref<27x8x16xbf16, #tpu.memory_space<vmem>>, vector<1x8x16xbf16>
    %225 = vector.shape_cast %224 : vector<1x8x16xbf16> to vector<8x16xbf16>
    %cst_271 = arith.constant dense<0.000000e+00> : vector<8x324xf32>
    %226 = tpu.matmul %225, %223, %cst_271 {dimension_numbers = #tpu.dot_dimension_numbers<[1], [0], [0], [1], [0, 0, 1, 1], [], []>} : vector<8x16xbf16>, vector<16x324xbf16>, vector<8x324xf32> -> vector<8x324xf32>
    %227 = arith.addf %221, %226 : vector<8x324xf32>
    %c0_272 = arith.constant 0 : index
    %c0_273 = arith.constant 0 : index
    %c0_274 = arith.constant 0 : index
    %c1_275 = arith.constant 1 : index
    %228 = vector.load %arg4[%c0_272, %c0_273, %c0_274, %c1_275] : memref<1x1x16x362xbf16, #tpu.memory_space<vmem>>, vector<1x1x16x324xbf16>
    %229 = vector.shape_cast %228 : vector<1x1x16x324xbf16> to vector<16x324xbf16>
    %c10_276 = arith.constant 10 : index
    %c0_277 = arith.constant 0 : index
    %c0_278 = arith.constant 0 : index
    %230 = vector.load %arg8[%c10_276, %c0_277, %c0_278] : memref<27x8x16xbf16, #tpu.memory_space<vmem>>, vector<1x8x16xbf16>
    %231 = vector.shape_cast %230 : vector<1x8x16xbf16> to vector<8x16xbf16>
    %cst_279 = arith.constant dense<0.000000e+00> : vector<8x324xf32>
    %232 = tpu.matmul %231, %229, %cst_279 {dimension_numbers = #tpu.dot_dimension_numbers<[1], [0], [0], [1], [0, 0, 1, 1], [], []>} : vector<8x16xbf16>, vector<16x324xbf16>, vector<8x324xf32> -> vector<8x324xf32>
    %233 = arith.addf %227, %232 : vector<8x324xf32>
    %c0_280 = arith.constant 0 : index
    %c0_281 = arith.constant 0 : index
    %c0_282 = arith.constant 0 : index
    %c2_283 = arith.constant 2 : index
    %234 = vector.load %arg4[%c0_280, %c0_281, %c0_282, %c2_283] : memref<1x1x16x362xbf16, #tpu.memory_space<vmem>>, vector<1x1x16x324xbf16>
    %235 = vector.shape_cast %234 : vector<1x1x16x324xbf16> to vector<16x324xbf16>
    %c11_284 = arith.constant 11 : index
    %c0_285 = arith.constant 0 : index
    %c0_286 = arith.constant 0 : index
    %236 = vector.load %arg8[%c11_284, %c0_285, %c0_286] : memref<27x8x16xbf16, #tpu.memory_space<vmem>>, vector<1x8x16xbf16>
    %237 = vector.shape_cast %236 : vector<1x8x16xbf16> to vector<8x16xbf16>
    %cst_287 = arith.constant dense<0.000000e+00> : vector<8x324xf32>
    %238 = tpu.matmul %237, %235, %cst_287 {dimension_numbers = #tpu.dot_dimension_numbers<[1], [0], [0], [1], [0, 0, 1, 1], [], []>} : vector<8x16xbf16>, vector<16x324xbf16>, vector<8x324xf32> -> vector<8x324xf32>
    %239 = arith.addf %233, %238 : vector<8x324xf32>
    %c0_288 = arith.constant 0 : index
    %c0_289 = arith.constant 0 : index
    %c0_290 = arith.constant 0 : index
    %c18_291 = arith.constant 18 : index
    %240 = vector.load %arg4[%c0_288, %c0_289, %c0_290, %c18_291] : memref<1x1x16x362xbf16, #tpu.memory_space<vmem>>, vector<1x1x16x324xbf16>
    %241 = vector.shape_cast %240 : vector<1x1x16x324xbf16> to vector<16x324xbf16>
    %c12_292 = arith.constant 12 : index
    %c0_293 = arith.constant 0 : index
    %c0_294 = arith.constant 0 : index
    %242 = vector.load %arg8[%c12_292, %c0_293, %c0_294] : memref<27x8x16xbf16, #tpu.memory_space<vmem>>, vector<1x8x16xbf16>
    %243 = vector.shape_cast %242 : vector<1x8x16xbf16> to vector<8x16xbf16>
    %cst_295 = arith.constant dense<0.000000e+00> : vector<8x324xf32>
    %244 = tpu.matmul %243, %241, %cst_295 {dimension_numbers = #tpu.dot_dimension_numbers<[1], [0], [0], [1], [0, 0, 1, 1], [], []>} : vector<8x16xbf16>, vector<16x324xbf16>, vector<8x324xf32> -> vector<8x324xf32>
    %245 = arith.addf %239, %244 : vector<8x324xf32>
    %c0_296 = arith.constant 0 : index
    %c0_297 = arith.constant 0 : index
    %c0_298 = arith.constant 0 : index
    %c19_299 = arith.constant 19 : index
    %246 = vector.load %arg4[%c0_296, %c0_297, %c0_298, %c19_299] : memref<1x1x16x362xbf16, #tpu.memory_space<vmem>>, vector<1x1x16x324xbf16>
    %247 = vector.shape_cast %246 : vector<1x1x16x324xbf16> to vector<16x324xbf16>
    %c13_300 = arith.constant 13 : index
    %c0_301 = arith.constant 0 : index
    %c0_302 = arith.constant 0 : index
    %248 = vector.load %arg8[%c13_300, %c0_301, %c0_302] : memref<27x8x16xbf16, #tpu.memory_space<vmem>>, vector<1x8x16xbf16>
    %249 = vector.shape_cast %248 : vector<1x8x16xbf16> to vector<8x16xbf16>
    %cst_303 = arith.constant dense<0.000000e+00> : vector<8x324xf32>
    %250 = tpu.matmul %249, %247, %cst_303 {dimension_numbers = #tpu.dot_dimension_numbers<[1], [0], [0], [1], [0, 0, 1, 1], [], []>} : vector<8x16xbf16>, vector<16x324xbf16>, vector<8x324xf32> -> vector<8x324xf32>
    %251 = arith.addf %245, %250 : vector<8x324xf32>
    %c0_304 = arith.constant 0 : index
    %c0_305 = arith.constant 0 : index
    %c0_306 = arith.constant 0 : index
    %c20_307 = arith.constant 20 : index
    %252 = vector.load %arg4[%c0_304, %c0_305, %c0_306, %c20_307] : memref<1x1x16x362xbf16, #tpu.memory_space<vmem>>, vector<1x1x16x324xbf16>
    %253 = vector.shape_cast %252 : vector<1x1x16x324xbf16> to vector<16x324xbf16>
    %c14_308 = arith.constant 14 : index
    %c0_309 = arith.constant 0 : index
    %c0_310 = arith.constant 0 : index
    %254 = vector.load %arg8[%c14_308, %c0_309, %c0_310] : memref<27x8x16xbf16, #tpu.memory_space<vmem>>, vector<1x8x16xbf16>
    %255 = vector.shape_cast %254 : vector<1x8x16xbf16> to vector<8x16xbf16>
    %cst_311 = arith.constant dense<0.000000e+00> : vector<8x324xf32>
    %256 = tpu.matmul %255, %253, %cst_311 {dimension_numbers = #tpu.dot_dimension_numbers<[1], [0], [0], [1], [0, 0, 1, 1], [], []>} : vector<8x16xbf16>, vector<16x324xbf16>, vector<8x324xf32> -> vector<8x324xf32>
    %257 = arith.addf %251, %256 : vector<8x324xf32>
    %c0_312 = arith.constant 0 : index
    %c0_313 = arith.constant 0 : index
    %c0_314 = arith.constant 0 : index
    %c36_315 = arith.constant 36 : index
    %258 = vector.load %arg4[%c0_312, %c0_313, %c0_314, %c36_315] : memref<1x1x16x362xbf16, #tpu.memory_space<vmem>>, vector<1x1x16x324xbf16>
    %259 = vector.shape_cast %258 : vector<1x1x16x324xbf16> to vector<16x324xbf16>
    %c15_316 = arith.constant 15 : index
    %c0_317 = arith.constant 0 : index
    %c0_318 = arith.constant 0 : index
    %260 = vector.load %arg8[%c15_316, %c0_317, %c0_318] : memref<27x8x16xbf16, #tpu.memory_space<vmem>>, vector<1x8x16xbf16>
    %261 = vector.shape_cast %260 : vector<1x8x16xbf16> to vector<8x16xbf16>
    %cst_319 = arith.constant dense<0.000000e+00> : vector<8x324xf32>
    %262 = tpu.matmul %261, %259, %cst_319 {dimension_numbers = #tpu.dot_dimension_numbers<[1], [0], [0], [1], [0, 0, 1, 1], [], []>} : vector<8x16xbf16>, vector<16x324xbf16>, vector<8x324xf32> -> vector<8x324xf32>
    %263 = arith.addf %257, %262 : vector<8x324xf32>
    %c0_320 = arith.constant 0 : index
    %c0_321 = arith.constant 0 : index
    %c0_322 = arith.constant 0 : index
    %c37_323 = arith.constant 37 : index
    %264 = vector.load %arg4[%c0_320, %c0_321, %c0_322, %c37_323] : memref<1x1x16x362xbf16, #tpu.memory_space<vmem>>, vector<1x1x16x324xbf16>
    %265 = vector.shape_cast %264 : vector<1x1x16x324xbf16> to vector<16x324xbf16>
    %c16_324 = arith.constant 16 : index
    %c0_325 = arith.constant 0 : index
    %c0_326 = arith.constant 0 : index
    %266 = vector.load %arg8[%c16_324, %c0_325, %c0_326] : memref<27x8x16xbf16, #tpu.memory_space<vmem>>, vector<1x8x16xbf16>
    %267 = vector.shape_cast %266 : vector<1x8x16xbf16> to vector<8x16xbf16>
    %cst_327 = arith.constant dense<0.000000e+00> : vector<8x324xf32>
    %268 = tpu.matmul %267, %265, %cst_327 {dimension_numbers = #tpu.dot_dimension_numbers<[1], [0], [0], [1], [0, 0, 1, 1], [], []>} : vector<8x16xbf16>, vector<16x324xbf16>, vector<8x324xf32> -> vector<8x324xf32>
    %269 = arith.addf %263, %268 : vector<8x324xf32>
    %c0_328 = arith.constant 0 : index
    %c0_329 = arith.constant 0 : index
    %c0_330 = arith.constant 0 : index
    %c38_331 = arith.constant 38 : index
    %270 = vector.load %arg4[%c0_328, %c0_329, %c0_330, %c38_331] : memref<1x1x16x362xbf16, #tpu.memory_space<vmem>>, vector<1x1x16x324xbf16>
    %271 = vector.shape_cast %270 : vector<1x1x16x324xbf16> to vector<16x324xbf16>
    %c17_332 = arith.constant 17 : index
    %c0_333 = arith.constant 0 : index
    %c0_334 = arith.constant 0 : index
    %272 = vector.load %arg8[%c17_332, %c0_333, %c0_334] : memref<27x8x16xbf16, #tpu.memory_space<vmem>>, vector<1x8x16xbf16>
    %273 = vector.shape_cast %272 : vector<1x8x16xbf16> to vector<8x16xbf16>
    %cst_335 = arith.constant dense<0.000000e+00> : vector<8x324xf32>
    %274 = tpu.matmul %273, %271, %cst_335 {dimension_numbers = #tpu.dot_dimension_numbers<[1], [0], [0], [1], [0, 0, 1, 1], [], []>} : vector<8x16xbf16>, vector<16x324xbf16>, vector<8x324xf32> -> vector<8x324xf32>
    %275 = arith.addf %269, %274 : vector<8x324xf32>
    %c0_336 = arith.constant 0 : index
    %c0_337 = arith.constant 0 : index
    %c0_338 = arith.constant 0 : index
    %c0_339 = arith.constant 0 : index
    %276 = vector.load %arg5[%c0_336, %c0_337, %c0_338, %c0_339] : memref<1x1x16x362xbf16, #tpu.memory_space<vmem>>, vector<1x1x16x324xbf16>
    %277 = vector.shape_cast %276 : vector<1x1x16x324xbf16> to vector<16x324xbf16>
    %c18_340 = arith.constant 18 : index
    %c0_341 = arith.constant 0 : index
    %c0_342 = arith.constant 0 : index
    %278 = vector.load %arg8[%c18_340, %c0_341, %c0_342] : memref<27x8x16xbf16, #tpu.memory_space<vmem>>, vector<1x8x16xbf16>
    %279 = vector.shape_cast %278 : vector<1x8x16xbf16> to vector<8x16xbf16>
    %cst_343 = arith.constant dense<0.000000e+00> : vector<8x324xf32>
    %280 = tpu.matmul %279, %277, %cst_343 {dimension_numbers = #tpu.dot_dimension_numbers<[1], [0], [0], [1], [0, 0, 1, 1], [], []>} : vector<8x16xbf16>, vector<16x324xbf16>, vector<8x324xf32> -> vector<8x324xf32>
    %281 = arith.addf %275, %280 : vector<8x324xf32>
    %c0_344 = arith.constant 0 : index
    %c0_345 = arith.constant 0 : index
    %c0_346 = arith.constant 0 : index
    %c1_347 = arith.constant 1 : index
    %282 = vector.load %arg5[%c0_344, %c0_345, %c0_346, %c1_347] : memref<1x1x16x362xbf16, #tpu.memory_space<vmem>>, vector<1x1x16x324xbf16>
    %283 = vector.shape_cast %282 : vector<1x1x16x324xbf16> to vector<16x324xbf16>
    %c19_348 = arith.constant 19 : index
    %c0_349 = arith.constant 0 : index
    %c0_350 = arith.constant 0 : index
    %284 = vector.load %arg8[%c19_348, %c0_349, %c0_350] : memref<27x8x16xbf16, #tpu.memory_space<vmem>>, vector<1x8x16xbf16>
    %285 = vector.shape_cast %284 : vector<1x8x16xbf16> to vector<8x16xbf16>
    %cst_351 = arith.constant dense<0.000000e+00> : vector<8x324xf32>
    %286 = tpu.matmul %285, %283, %cst_351 {dimension_numbers = #tpu.dot_dimension_numbers<[1], [0], [0], [1], [0, 0, 1, 1], [], []>} : vector<8x16xbf16>, vector<16x324xbf16>, vector<8x324xf32> -> vector<8x324xf32>
    %287 = arith.addf %281, %286 : vector<8x324xf32>
    %c0_352 = arith.constant 0 : index
    %c0_353 = arith.constant 0 : index
    %c0_354 = arith.constant 0 : index
    %c2_355 = arith.constant 2 : index
    %288 = vector.load %arg5[%c0_352, %c0_353, %c0_354, %c2_355] : memref<1x1x16x362xbf16, #tpu.memory_space<vmem>>, vector<1x1x16x324xbf16>
    %289 = vector.shape_cast %288 : vector<1x1x16x324xbf16> to vector<16x324xbf16>
    %c20_356 = arith.constant 20 : index
    %c0_357 = arith.constant 0 : index
    %c0_358 = arith.constant 0 : index
    %290 = vector.load %arg8[%c20_356, %c0_357, %c0_358] : memref<27x8x16xbf16, #tpu.memory_space<vmem>>, vector<1x8x16xbf16>
    %291 = vector.shape_cast %290 : vector<1x8x16xbf16> to vector<8x16xbf16>
    %cst_359 = arith.constant dense<0.000000e+00> : vector<8x324xf32>
    %292 = tpu.matmul %291, %289, %cst_359 {dimension_numbers = #tpu.dot_dimension_numbers<[1], [0], [0], [1], [0, 0, 1, 1], [], []>} : vector<8x16xbf16>, vector<16x324xbf16>, vector<8x324xf32> -> vector<8x324xf32>
    %293 = arith.addf %287, %292 : vector<8x324xf32>
    %c0_360 = arith.constant 0 : index
    %c0_361 = arith.constant 0 : index
    %c0_362 = arith.constant 0 : index
    %c18_363 = arith.constant 18 : index
    %294 = vector.load %arg5[%c0_360, %c0_361, %c0_362, %c18_363] : memref<1x1x16x362xbf16, #tpu.memory_space<vmem>>, vector<1x1x16x324xbf16>
    %295 = vector.shape_cast %294 : vector<1x1x16x324xbf16> to vector<16x324xbf16>
    %c21_364 = arith.constant 21 : index
    %c0_365 = arith.constant 0 : index
    %c0_366 = arith.constant 0 : index
    %296 = vector.load %arg8[%c21_364, %c0_365, %c0_366] : memref<27x8x16xbf16, #tpu.memory_space<vmem>>, vector<1x8x16xbf16>
    %297 = vector.shape_cast %296 : vector<1x8x16xbf16> to vector<8x16xbf16>
    %cst_367 = arith.constant dense<0.000000e+00> : vector<8x324xf32>
    %298 = tpu.matmul %297, %295, %cst_367 {dimension_numbers = #tpu.dot_dimension_numbers<[1], [0], [0], [1], [0, 0, 1, 1], [], []>} : vector<8x16xbf16>, vector<16x324xbf16>, vector<8x324xf32> -> vector<8x324xf32>
    %299 = arith.addf %293, %298 : vector<8x324xf32>
    %c0_368 = arith.constant 0 : index
    %c0_369 = arith.constant 0 : index
    %c0_370 = arith.constant 0 : index
    %c19_371 = arith.constant 19 : index
    %300 = vector.load %arg5[%c0_368, %c0_369, %c0_370, %c19_371] : memref<1x1x16x362xbf16, #tpu.memory_space<vmem>>, vector<1x1x16x324xbf16>
    %301 = vector.shape_cast %300 : vector<1x1x16x324xbf16> to vector<16x324xbf16>
    %c22_372 = arith.constant 22 : index
    %c0_373 = arith.constant 0 : index
    %c0_374 = arith.constant 0 : index
    %302 = vector.load %arg8[%c22_372, %c0_373, %c0_374] : memref<27x8x16xbf16, #tpu.memory_space<vmem>>, vector<1x8x16xbf16>
    %303 = vector.shape_cast %302 : vector<1x8x16xbf16> to vector<8x16xbf16>
    %cst_375 = arith.constant dense<0.000000e+00> : vector<8x324xf32>
    %304 = tpu.matmul %303, %301, %cst_375 {dimension_numbers = #tpu.dot_dimension_numbers<[1], [0], [0], [1], [0, 0, 1, 1], [], []>} : vector<8x16xbf16>, vector<16x324xbf16>, vector<8x324xf32> -> vector<8x324xf32>
    %305 = arith.addf %299, %304 : vector<8x324xf32>
    %c0_376 = arith.constant 0 : index
    %c0_377 = arith.constant 0 : index
    %c0_378 = arith.constant 0 : index
    %c20_379 = arith.constant 20 : index
    %306 = vector.load %arg5[%c0_376, %c0_377, %c0_378, %c20_379] : memref<1x1x16x362xbf16, #tpu.memory_space<vmem>>, vector<1x1x16x324xbf16>
    %307 = vector.shape_cast %306 : vector<1x1x16x324xbf16> to vector<16x324xbf16>
    %c23_380 = arith.constant 23 : index
    %c0_381 = arith.constant 0 : index
    %c0_382 = arith.constant 0 : index
    %308 = vector.load %arg8[%c23_380, %c0_381, %c0_382] : memref<27x8x16xbf16, #tpu.memory_space<vmem>>, vector<1x8x16xbf16>
    %309 = vector.shape_cast %308 : vector<1x8x16xbf16> to vector<8x16xbf16>
    %cst_383 = arith.constant dense<0.000000e+00> : vector<8x324xf32>
    %310 = tpu.matmul %309, %307, %cst_383 {dimension_numbers = #tpu.dot_dimension_numbers<[1], [0], [0], [1], [0, 0, 1, 1], [], []>} : vector<8x16xbf16>, vector<16x324xbf16>, vector<8x324xf32> -> vector<8x324xf32>
    %311 = arith.addf %305, %310 : vector<8x324xf32>
    %c0_384 = arith.constant 0 : index
    %c0_385 = arith.constant 0 : index
    %c0_386 = arith.constant 0 : index
    %c36_387 = arith.constant 36 : index
    %312 = vector.load %arg5[%c0_384, %c0_385, %c0_386, %c36_387] : memref<1x1x16x362xbf16, #tpu.memory_space<vmem>>, vector<1x1x16x324xbf16>
    %313 = vector.shape_cast %312 : vector<1x1x16x324xbf16> to vector<16x324xbf16>
    %c24_388 = arith.constant 24 : index
    %c0_389 = arith.constant 0 : index
    %c0_390 = arith.constant 0 : index
    %314 = vector.load %arg8[%c24_388, %c0_389, %c0_390] : memref<27x8x16xbf16, #tpu.memory_space<vmem>>, vector<1x8x16xbf16>
    %315 = vector.shape_cast %314 : vector<1x8x16xbf16> to vector<8x16xbf16>
    %cst_391 = arith.constant dense<0.000000e+00> : vector<8x324xf32>
    %316 = tpu.matmul %315, %313, %cst_391 {dimension_numbers = #tpu.dot_dimension_numbers<[1], [0], [0], [1], [0, 0, 1, 1], [], []>} : vector<8x16xbf16>, vector<16x324xbf16>, vector<8x324xf32> -> vector<8x324xf32>
    %317 = arith.addf %311, %316 : vector<8x324xf32>
    %c0_392 = arith.constant 0 : index
    %c0_393 = arith.constant 0 : index
    %c0_394 = arith.constant 0 : index
    %c37_395 = arith.constant 37 : index
    %318 = vector.load %arg5[%c0_392, %c0_393, %c0_394, %c37_395] : memref<1x1x16x362xbf16, #tpu.memory_space<vmem>>, vector<1x1x16x324xbf16>
    %319 = vector.shape_cast %318 : vector<1x1x16x324xbf16> to vector<16x324xbf16>
    %c25_396 = arith.constant 25 : index
    %c0_397 = arith.constant 0 : index
    %c0_398 = arith.constant 0 : index
    %320 = vector.load %arg8[%c25_396, %c0_397, %c0_398] : memref<27x8x16xbf16, #tpu.memory_space<vmem>>, vector<1x8x16xbf16>
    %321 = vector.shape_cast %320 : vector<1x8x16xbf16> to vector<8x16xbf16>
    %cst_399 = arith.constant dense<0.000000e+00> : vector<8x324xf32>
    %322 = tpu.matmul %321, %319, %cst_399 {dimension_numbers = #tpu.dot_dimension_numbers<[1], [0], [0], [1], [0, 0, 1, 1], [], []>} : vector<8x16xbf16>, vector<16x324xbf16>, vector<8x324xf32> -> vector<8x324xf32>
    %323 = arith.addf %317, %322 : vector<8x324xf32>
    %c0_400 = arith.constant 0 : index
    %c0_401 = arith.constant 0 : index
    %c0_402 = arith.constant 0 : index
    %c38_403 = arith.constant 38 : index
    %324 = vector.load %arg5[%c0_400, %c0_401, %c0_402, %c38_403] : memref<1x1x16x362xbf16, #tpu.memory_space<vmem>>, vector<1x1x16x324xbf16>
    %325 = vector.shape_cast %324 : vector<1x1x16x324xbf16> to vector<16x324xbf16>
    %c26_404 = arith.constant 26 : index
    %c0_405 = arith.constant 0 : index
    %c0_406 = arith.constant 0 : index
    %326 = vector.load %arg8[%c26_404, %c0_405, %c0_406] : memref<27x8x16xbf16, #tpu.memory_space<vmem>>, vector<1x8x16xbf16>
    %327 = vector.shape_cast %326 : vector<1x8x16xbf16> to vector<8x16xbf16>
    %cst_407 = arith.constant dense<0.000000e+00> : vector<8x324xf32>
    %328 = tpu.matmul %327, %325, %cst_407 {dimension_numbers = #tpu.dot_dimension_numbers<[1], [0], [0], [1], [0, 0, 1, 1], [], []>} : vector<8x16xbf16>, vector<16x324xbf16>, vector<8x324xf32> -> vector<8x324xf32>
    %329 = arith.addf %323, %328 : vector<8x324xf32>
    %330 = vector.broadcast %0 : vector<8x1xf32> to vector<8x324xf32>
    %331 = arith.addf %329, %330 : vector<8x324xf32>
    %cst_408 = arith.constant 0.000000e+00 : f32
    %332 = vector.broadcast %cst_408 : f32 to vector<8x324xf32>
    %333 = arith.maximumf %331, %332 : vector<8x324xf32>
    %c0_409 = arith.constant 0 : index
    %c1_410 = arith.constant 1 : index
    %c0_411 = arith.constant 0 : index
    %c0_412 = arith.constant 0 : index
    %334 = vector.load %arg10[%c0_409, %c1_410, %c0_411, %c0_412] : memref<1x4x8x324xf32, #tpu.memory_space<vmem>>, vector<1x1x8x324xf32>
    %335 = vector.shape_cast %334 : vector<1x1x8x324xf32> to vector<8x324xf32>
    %336 = vector.shape_cast %333 : vector<8x324xf32> to vector<1x1x8x324xf32>
    tpu.vector_store %arg10[%c0_409, %c1_410, %c0_411, %c0_412], %336 {strides = array<i32>} : memref<1x4x8x324xf32, #tpu.memory_space<vmem>>, vector<1x1x8x324xf32>,
    %c0_413 = arith.constant 0 : index
    %c0_414 = arith.constant 0 : index
    %c0_415 = arith.constant 0 : index
    %c0_416 = arith.constant 0 : index
    %337 = vector.load %arg4[%c0_413, %c0_414, %c0_415, %c0_416] : memref<1x1x16x362xbf16, #tpu.memory_space<vmem>>, vector<1x1x16x324xbf16>
    %338 = vector.shape_cast %337 : vector<1x1x16x324xbf16> to vector<16x324xbf16>
    %c0_417 = arith.constant 0 : index
    %c0_418 = arith.constant 0 : index
    %c0_419 = arith.constant 0 : index
    %339 = vector.load %arg8[%c0_417, %c0_418, %c0_419] : memref<27x8x16xbf16, #tpu.memory_space<vmem>>, vector<1x8x16xbf16>
    %340 = vector.shape_cast %339 : vector<1x8x16xbf16> to vector<8x16xbf16>
    %cst_420 = arith.constant dense<0.000000e+00> : vector<8x324xf32>
    %341 = tpu.matmul %340, %338, %cst_420 {dimension_numbers = #tpu.dot_dimension_numbers<[1], [0], [0], [1], [0, 0, 1, 1], [], []>} : vector<8x16xbf16>, vector<16x324xbf16>, vector<8x324xf32> -> vector<8x324xf32>
    %c0_421 = arith.constant 0 : index
    %c0_422 = arith.constant 0 : index
    %c0_423 = arith.constant 0 : index
    %c1_424 = arith.constant 1 : index
    %342 = vector.load %arg4[%c0_421, %c0_422, %c0_423, %c1_424] : memref<1x1x16x362xbf16, #tpu.memory_space<vmem>>, vector<1x1x16x324xbf16>
    %343 = vector.shape_cast %342 : vector<1x1x16x324xbf16> to vector<16x324xbf16>
    %c1_425 = arith.constant 1 : index
    %c0_426 = arith.constant 0 : index
    %c0_427 = arith.constant 0 : index
    %344 = vector.load %arg8[%c1_425, %c0_426, %c0_427] : memref<27x8x16xbf16, #tpu.memory_space<vmem>>, vector<1x8x16xbf16>
    %345 = vector.shape_cast %344 : vector<1x8x16xbf16> to vector<8x16xbf16>
    %cst_428 = arith.constant dense<0.000000e+00> : vector<8x324xf32>
    %346 = tpu.matmul %345, %343, %cst_428 {dimension_numbers = #tpu.dot_dimension_numbers<[1], [0], [0], [1], [0, 0, 1, 1], [], []>} : vector<8x16xbf16>, vector<16x324xbf16>, vector<8x324xf32> -> vector<8x324xf32>
    %347 = arith.addf %341, %346 : vector<8x324xf32>
    %c0_429 = arith.constant 0 : index
    %c0_430 = arith.constant 0 : index
    %c0_431 = arith.constant 0 : index
    %c2_432 = arith.constant 2 : index
    %348 = vector.load %arg4[%c0_429, %c0_430, %c0_431, %c2_432] : memref<1x1x16x362xbf16, #tpu.memory_space<vmem>>, vector<1x1x16x324xbf16>
    %349 = vector.shape_cast %348 : vector<1x1x16x324xbf16> to vector<16x324xbf16>
    %c2_433 = arith.constant 2 : index
    %c0_434 = arith.constant 0 : index
    %c0_435 = arith.constant 0 : index
    %350 = vector.load %arg8[%c2_433, %c0_434, %c0_435] : memref<27x8x16xbf16, #tpu.memory_space<vmem>>, vector<1x8x16xbf16>
    %351 = vector.shape_cast %350 : vector<1x8x16xbf16> to vector<8x16xbf16>
    %cst_436 = arith.constant dense<0.000000e+00> : vector<8x324xf32>
    %352 = tpu.matmul %351, %349, %cst_436 {dimension_numbers = #tpu.dot_dimension_numbers<[1], [0], [0], [1], [0, 0, 1, 1], [], []>} : vector<8x16xbf16>, vector<16x324xbf16>, vector<8x324xf32> -> vector<8x324xf32>
    %353 = arith.addf %347, %352 : vector<8x324xf32>
    %c0_437 = arith.constant 0 : index
    %c0_438 = arith.constant 0 : index
    %c0_439 = arith.constant 0 : index
    %c18_440 = arith.constant 18 : index
    %354 = vector.load %arg4[%c0_437, %c0_438, %c0_439, %c18_440] : memref<1x1x16x362xbf16, #tpu.memory_space<vmem>>, vector<1x1x16x324xbf16>
    %355 = vector.shape_cast %354 : vector<1x1x16x324xbf16> to vector<16x324xbf16>
    %c3_441 = arith.constant 3 : index
    %c0_442 = arith.constant 0 : index
    %c0_443 = arith.constant 0 : index
    %356 = vector.load %arg8[%c3_441, %c0_442, %c0_443] : memref<27x8x16xbf16, #tpu.memory_space<vmem>>, vector<1x8x16xbf16>
    %357 = vector.shape_cast %356 : vector<1x8x16xbf16> to vector<8x16xbf16>
    %cst_444 = arith.constant dense<0.000000e+00> : vector<8x324xf32>
    %358 = tpu.matmul %357, %355, %cst_444 {dimension_numbers = #tpu.dot_dimension_numbers<[1], [0], [0], [1], [0, 0, 1, 1], [], []>} : vector<8x16xbf16>, vector<16x324xbf16>, vector<8x324xf32> -> vector<8x324xf32>
    %359 = arith.addf %353, %358 : vector<8x324xf32>
    %c0_445 = arith.constant 0 : index
    %c0_446 = arith.constant 0 : index
    %c0_447 = arith.constant 0 : index
    %c19_448 = arith.constant 19 : index
    %360 = vector.load %arg4[%c0_445, %c0_446, %c0_447, %c19_448] : memref<1x1x16x362xbf16, #tpu.memory_space<vmem>>, vector<1x1x16x324xbf16>
    %361 = vector.shape_cast %360 : vector<1x1x16x324xbf16> to vector<16x324xbf16>
    %c4_449 = arith.constant 4 : index
    %c0_450 = arith.constant 0 : index
    %c0_451 = arith.constant 0 : index
    %362 = vector.load %arg8[%c4_449, %c0_450, %c0_451] : memref<27x8x16xbf16, #tpu.memory_space<vmem>>, vector<1x8x16xbf16>
    %363 = vector.shape_cast %362 : vector<1x8x16xbf16> to vector<8x16xbf16>
    %cst_452 = arith.constant dense<0.000000e+00> : vector<8x324xf32>
    %364 = tpu.matmul %363, %361, %cst_452 {dimension_numbers = #tpu.dot_dimension_numbers<[1], [0], [0], [1], [0, 0, 1, 1], [], []>} : vector<8x16xbf16>, vector<16x324xbf16>, vector<8x324xf32> -> vector<8x324xf32>
    %365 = arith.addf %359, %364 : vector<8x324xf32>
    %c0_453 = arith.constant 0 : index
    %c0_454 = arith.constant 0 : index
    %c0_455 = arith.constant 0 : index
    %c20_456 = arith.constant 20 : index
    %366 = vector.load %arg4[%c0_453, %c0_454, %c0_455, %c20_456] : memref<1x1x16x362xbf16, #tpu.memory_space<vmem>>, vector<1x1x16x324xbf16>
    %367 = vector.shape_cast %366 : vector<1x1x16x324xbf16> to vector<16x324xbf16>
    %c5_457 = arith.constant 5 : index
    %c0_458 = arith.constant 0 : index
    %c0_459 = arith.constant 0 : index
    %368 = vector.load %arg8[%c5_457, %c0_458, %c0_459] : memref<27x8x16xbf16, #tpu.memory_space<vmem>>, vector<1x8x16xbf16>
    %369 = vector.shape_cast %368 : vector<1x8x16xbf16> to vector<8x16xbf16>
    %cst_460 = arith.constant dense<0.000000e+00> : vector<8x324xf32>
    %370 = tpu.matmul %369, %367, %cst_460 {dimension_numbers = #tpu.dot_dimension_numbers<[1], [0], [0], [1], [0, 0, 1, 1], [], []>} : vector<8x16xbf16>, vector<16x324xbf16>, vector<8x324xf32> -> vector<8x324xf32>
    %371 = arith.addf %365, %370 : vector<8x324xf32>
    %c0_461 = arith.constant 0 : index
    %c0_462 = arith.constant 0 : index
    %c0_463 = arith.constant 0 : index
    %c36_464 = arith.constant 36 : index
    %372 = vector.load %arg4[%c0_461, %c0_462, %c0_463, %c36_464] : memref<1x1x16x362xbf16, #tpu.memory_space<vmem>>, vector<1x1x16x324xbf16>
    %373 = vector.shape_cast %372 : vector<1x1x16x324xbf16> to vector<16x324xbf16>
    %c6_465 = arith.constant 6 : index
    %c0_466 = arith.constant 0 : index
    %c0_467 = arith.constant 0 : index
    %374 = vector.load %arg8[%c6_465, %c0_466, %c0_467] : memref<27x8x16xbf16, #tpu.memory_space<vmem>>, vector<1x8x16xbf16>
    %375 = vector.shape_cast %374 : vector<1x8x16xbf16> to vector<8x16xbf16>
    %cst_468 = arith.constant dense<0.000000e+00> : vector<8x324xf32>
    %376 = tpu.matmul %375, %373, %cst_468 {dimension_numbers = #tpu.dot_dimension_numbers<[1], [0], [0], [1], [0, 0, 1, 1], [], []>} : vector<8x16xbf16>, vector<16x324xbf16>, vector<8x324xf32> -> vector<8x324xf32>
    %377 = arith.addf %371, %376 : vector<8x324xf32>
    %c0_469 = arith.constant 0 : index
    %c0_470 = arith.constant 0 : index
    %c0_471 = arith.constant 0 : index
    %c37_472 = arith.constant 37 : index
    %378 = vector.load %arg4[%c0_469, %c0_470, %c0_471, %c37_472] : memref<1x1x16x362xbf16, #tpu.memory_space<vmem>>, vector<1x1x16x324xbf16>
    %379 = vector.shape_cast %378 : vector<1x1x16x324xbf16> to vector<16x324xbf16>
    %c7_473 = arith.constant 7 : index
    %c0_474 = arith.constant 0 : index
    %c0_475 = arith.constant 0 : index
    %380 = vector.load %arg8[%c7_473, %c0_474, %c0_475] : memref<27x8x16xbf16, #tpu.memory_space<vmem>>, vector<1x8x16xbf16>
    %381 = vector.shape_cast %380 : vector<1x8x16xbf16> to vector<8x16xbf16>
    %cst_476 = arith.constant dense<0.000000e+00> : vector<8x324xf32>
    %382 = tpu.matmul %381, %379, %cst_476 {dimension_numbers = #tpu.dot_dimension_numbers<[1], [0], [0], [1], [0, 0, 1, 1], [], []>} : vector<8x16xbf16>, vector<16x324xbf16>, vector<8x324xf32> -> vector<8x324xf32>
    %383 = arith.addf %377, %382 : vector<8x324xf32>
    %c0_477 = arith.constant 0 : index
    %c0_478 = arith.constant 0 : index
    %c0_479 = arith.constant 0 : index
    %c38_480 = arith.constant 38 : index
    %384 = vector.load %arg4[%c0_477, %c0_478, %c0_479, %c38_480] : memref<1x1x16x362xbf16, #tpu.memory_space<vmem>>, vector<1x1x16x324xbf16>
    %385 = vector.shape_cast %384 : vector<1x1x16x324xbf16> to vector<16x324xbf16>
    %c8_481 = arith.constant 8 : index
    %c0_482 = arith.constant 0 : index
    %c0_483 = arith.constant 0 : index
    %386 = vector.load %arg8[%c8_481, %c0_482, %c0_483] : memref<27x8x16xbf16, #tpu.memory_space<vmem>>, vector<1x8x16xbf16>
    %387 = vector.shape_cast %386 : vector<1x8x16xbf16> to vector<8x16xbf16>
    %cst_484 = arith.constant dense<0.000000e+00> : vector<8x324xf32>
    %388 = tpu.matmul %387, %385, %cst_484 {dimension_numbers = #tpu.dot_dimension_numbers<[1], [0], [0], [1], [0, 0, 1, 1], [], []>} : vector<8x16xbf16>, vector<16x324xbf16>, vector<8x324xf32> -> vector<8x324xf32>
    %389 = arith.addf %383, %388 : vector<8x324xf32>
    %c0_485 = arith.constant 0 : index
    %c0_486 = arith.constant 0 : index
    %c0_487 = arith.constant 0 : index
    %c0_488 = arith.constant 0 : index
    %390 = vector.load %arg5[%c0_485, %c0_486, %c0_487, %c0_488] : memref<1x1x16x362xbf16, #tpu.memory_space<vmem>>, vector<1x1x16x324xbf16>
    %391 = vector.shape_cast %390 : vector<1x1x16x324xbf16> to vector<16x324xbf16>
    %c9_489 = arith.constant 9 : index
    %c0_490 = arith.constant 0 : index
    %c0_491 = arith.constant 0 : index
    %392 = vector.load %arg8[%c9_489, %c0_490, %c0_491] : memref<27x8x16xbf16, #tpu.memory_space<vmem>>, vector<1x8x16xbf16>
    %393 = vector.shape_cast %392 : vector<1x8x16xbf16> to vector<8x16xbf16>
    %cst_492 = arith.constant dense<0.000000e+00> : vector<8x324xf32>
    %394 = tpu.matmul %393, %391, %cst_492 {dimension_numbers = #tpu.dot_dimension_numbers<[1], [0], [0], [1], [0, 0, 1, 1], [], []>} : vector<8x16xbf16>, vector<16x324xbf16>, vector<8x324xf32> -> vector<8x324xf32>
    %395 = arith.addf %389, %394 : vector<8x324xf32>
    %c0_493 = arith.constant 0 : index
    %c0_494 = arith.constant 0 : index
    %c0_495 = arith.constant 0 : index
    %c1_496 = arith.constant 1 : index
    %396 = vector.load %arg5[%c0_493, %c0_494, %c0_495, %c1_496] : memref<1x1x16x362xbf16, #tpu.memory_space<vmem>>, vector<1x1x16x324xbf16>
    %397 = vector.shape_cast %396 : vector<1x1x16x324xbf16> to vector<16x324xbf16>
    %c10_497 = arith.constant 10 : index
    %c0_498 = arith.constant 0 : index
    %c0_499 = arith.constant 0 : index
    %398 = vector.load %arg8[%c10_497, %c0_498, %c0_499] : memref<27x8x16xbf16, #tpu.memory_space<vmem>>, vector<1x8x16xbf16>
    %399 = vector.shape_cast %398 : vector<1x8x16xbf16> to vector<8x16xbf16>
    %cst_500 = arith.constant dense<0.000000e+00> : vector<8x324xf32>
    %400 = tpu.matmul %399, %397, %cst_500 {dimension_numbers = #tpu.dot_dimension_numbers<[1], [0], [0], [1], [0, 0, 1, 1], [], []>} : vector<8x16xbf16>, vector<16x324xbf16>, vector<8x324xf32> -> vector<8x324xf32>
    %401 = arith.addf %395, %400 : vector<8x324xf32>
    %c0_501 = arith.constant 0 : index
    %c0_502 = arith.constant 0 : index
    %c0_503 = arith.constant 0 : index
    %c2_504 = arith.constant 2 : index
    %402 = vector.load %arg5[%c0_501, %c0_502, %c0_503, %c2_504] : memref<1x1x16x362xbf16, #tpu.memory_space<vmem>>, vector<1x1x16x324xbf16>
    %403 = vector.shape_cast %402 : vector<1x1x16x324xbf16> to vector<16x324xbf16>
    %c11_505 = arith.constant 11 : index
    %c0_506 = arith.constant 0 : index
    %c0_507 = arith.constant 0 : index
    %404 = vector.load %arg8[%c11_505, %c0_506, %c0_507] : memref<27x8x16xbf16, #tpu.memory_space<vmem>>, vector<1x8x16xbf16>
    %405 = vector.shape_cast %404 : vector<1x8x16xbf16> to vector<8x16xbf16>
    %cst_508 = arith.constant dense<0.000000e+00> : vector<8x324xf32>
    %406 = tpu.matmul %405, %403, %cst_508 {dimension_numbers = #tpu.dot_dimension_numbers<[1], [0], [0], [1], [0, 0, 1, 1], [], []>} : vector<8x16xbf16>, vector<16x324xbf16>, vector<8x324xf32> -> vector<8x324xf32>
    %407 = arith.addf %401, %406 : vector<8x324xf32>
    %c0_509 = arith.constant 0 : index
    %c0_510 = arith.constant 0 : index
    %c0_511 = arith.constant 0 : index
    %c18_512 = arith.constant 18 : index
    %408 = vector.load %arg5[%c0_509, %c0_510, %c0_511, %c18_512] : memref<1x1x16x362xbf16, #tpu.memory_space<vmem>>, vector<1x1x16x324xbf16>
    %409 = vector.shape_cast %408 : vector<1x1x16x324xbf16> to vector<16x324xbf16>
    %c12_513 = arith.constant 12 : index
    %c0_514 = arith.constant 0 : index
    %c0_515 = arith.constant 0 : index
    %410 = vector.load %arg8[%c12_513, %c0_514, %c0_515] : memref<27x8x16xbf16, #tpu.memory_space<vmem>>, vector<1x8x16xbf16>
    %411 = vector.shape_cast %410 : vector<1x8x16xbf16> to vector<8x16xbf16>
    %cst_516 = arith.constant dense<0.000000e+00> : vector<8x324xf32>
    %412 = tpu.matmul %411, %409, %cst_516 {dimension_numbers = #tpu.dot_dimension_numbers<[1], [0], [0], [1], [0, 0, 1, 1], [], []>} : vector<8x16xbf16>, vector<16x324xbf16>, vector<8x324xf32> -> vector<8x324xf32>
    %413 = arith.addf %407, %412 : vector<8x324xf32>
    %c0_517 = arith.constant 0 : index
    %c0_518 = arith.constant 0 : index
    %c0_519 = arith.constant 0 : index
    %c19_520 = arith.constant 19 : index
    %414 = vector.load %arg5[%c0_517, %c0_518, %c0_519, %c19_520] : memref<1x1x16x362xbf16, #tpu.memory_space<vmem>>, vector<1x1x16x324xbf16>
    %415 = vector.shape_cast %414 : vector<1x1x16x324xbf16> to vector<16x324xbf16>
    %c13_521 = arith.constant 13 : index
    %c0_522 = arith.constant 0 : index
    %c0_523 = arith.constant 0 : index
    %416 = vector.load %arg8[%c13_521, %c0_522, %c0_523] : memref<27x8x16xbf16, #tpu.memory_space<vmem>>, vector<1x8x16xbf16>
    %417 = vector.shape_cast %416 : vector<1x8x16xbf16> to vector<8x16xbf16>
    %cst_524 = arith.constant dense<0.000000e+00> : vector<8x324xf32>
    %418 = tpu.matmul %417, %415, %cst_524 {dimension_numbers = #tpu.dot_dimension_numbers<[1], [0], [0], [1], [0, 0, 1, 1], [], []>} : vector<8x16xbf16>, vector<16x324xbf16>, vector<8x324xf32> -> vector<8x324xf32>
    %419 = arith.addf %413, %418 : vector<8x324xf32>
    %c0_525 = arith.constant 0 : index
    %c0_526 = arith.constant 0 : index
    %c0_527 = arith.constant 0 : index
    %c20_528 = arith.constant 20 : index
    %420 = vector.load %arg5[%c0_525, %c0_526, %c0_527, %c20_528] : memref<1x1x16x362xbf16, #tpu.memory_space<vmem>>, vector<1x1x16x324xbf16>
    %421 = vector.shape_cast %420 : vector<1x1x16x324xbf16> to vector<16x324xbf16>
    %c14_529 = arith.constant 14 : index
    %c0_530 = arith.constant 0 : index
    %c0_531 = arith.constant 0 : index
    %422 = vector.load %arg8[%c14_529, %c0_530, %c0_531] : memref<27x8x16xbf16, #tpu.memory_space<vmem>>, vector<1x8x16xbf16>
    %423 = vector.shape_cast %422 : vector<1x8x16xbf16> to vector<8x16xbf16>
    %cst_532 = arith.constant dense<0.000000e+00> : vector<8x324xf32>
    %424 = tpu.matmul %423, %421, %cst_532 {dimension_numbers = #tpu.dot_dimension_numbers<[1], [0], [0], [1], [0, 0, 1, 1], [], []>} : vector<8x16xbf16>, vector<16x324xbf16>, vector<8x324xf32> -> vector<8x324xf32>
    %425 = arith.addf %419, %424 : vector<8x324xf32>
    %c0_533 = arith.constant 0 : index
    %c0_534 = arith.constant 0 : index
    %c0_535 = arith.constant 0 : index
    %c36_536 = arith.constant 36 : index
    %426 = vector.load %arg5[%c0_533, %c0_534, %c0_535, %c36_536] : memref<1x1x16x362xbf16, #tpu.memory_space<vmem>>, vector<1x1x16x324xbf16>
    %427 = vector.shape_cast %426 : vector<1x1x16x324xbf16> to vector<16x324xbf16>
    %c15_537 = arith.constant 15 : index
    %c0_538 = arith.constant 0 : index
    %c0_539 = arith.constant 0 : index
    %428 = vector.load %arg8[%c15_537, %c0_538, %c0_539] : memref<27x8x16xbf16, #tpu.memory_space<vmem>>, vector<1x8x16xbf16>
    %429 = vector.shape_cast %428 : vector<1x8x16xbf16> to vector<8x16xbf16>
    %cst_540 = arith.constant dense<0.000000e+00> : vector<8x324xf32>
    %430 = tpu.matmul %429, %427, %cst_540 {dimension_numbers = #tpu.dot_dimension_numbers<[1], [0], [0], [1], [0, 0, 1, 1], [], []>} : vector<8x16xbf16>, vector<16x324xbf16>, vector<8x324xf32> -> vector<8x324xf32>
    %431 = arith.addf %425, %430 : vector<8x324xf32>
    %c0_541 = arith.constant 0 : index
    %c0_542 = arith.constant 0 : index
    %c0_543 = arith.constant 0 : index
    %c37_544 = arith.constant 37 : index
    %432 = vector.load %arg5[%c0_541, %c0_542, %c0_543, %c37_544] : memref<1x1x16x362xbf16, #tpu.memory_space<vmem>>, vector<1x1x16x324xbf16>
    %433 = vector.shape_cast %432 : vector<1x1x16x324xbf16> to vector<16x324xbf16>
    %c16_545 = arith.constant 16 : index
    %c0_546 = arith.constant 0 : index
    %c0_547 = arith.constant 0 : index
    %434 = vector.load %arg8[%c16_545, %c0_546, %c0_547] : memref<27x8x16xbf16, #tpu.memory_space<vmem>>, vector<1x8x16xbf16>
    %435 = vector.shape_cast %434 : vector<1x8x16xbf16> to vector<8x16xbf16>
    %cst_548 = arith.constant dense<0.000000e+00> : vector<8x324xf32>
    %436 = tpu.matmul %435, %433, %cst_548 {dimension_numbers = #tpu.dot_dimension_numbers<[1], [0], [0], [1], [0, 0, 1, 1], [], []>} : vector<8x16xbf16>, vector<16x324xbf16>, vector<8x324xf32> -> vector<8x324xf32>
    %437 = arith.addf %431, %436 : vector<8x324xf32>
    %c0_549 = arith.constant 0 : index
    %c0_550 = arith.constant 0 : index
    %c0_551 = arith.constant 0 : index
    %c38_552 = arith.constant 38 : index
    %438 = vector.load %arg5[%c0_549, %c0_550, %c0_551, %c38_552] : memref<1x1x16x362xbf16, #tpu.memory_space<vmem>>, vector<1x1x16x324xbf16>
    %439 = vector.shape_cast %438 : vector<1x1x16x324xbf16> to vector<16x324xbf16>
    %c17_553 = arith.constant 17 : index
    %c0_554 = arith.constant 0 : index
    %c0_555 = arith.constant 0 : index
    %440 = vector.load %arg8[%c17_553, %c0_554, %c0_555] : memref<27x8x16xbf16, #tpu.memory_space<vmem>>, vector<1x8x16xbf16>
    %441 = vector.shape_cast %440 : vector<1x8x16xbf16> to vector<8x16xbf16>
    %cst_556 = arith.constant dense<0.000000e+00> : vector<8x324xf32>
    %442 = tpu.matmul %441, %439, %cst_556 {dimension_numbers = #tpu.dot_dimension_numbers<[1], [0], [0], [1], [0, 0, 1, 1], [], []>} : vector<8x16xbf16>, vector<16x324xbf16>, vector<8x324xf32> -> vector<8x324xf32>
    %443 = arith.addf %437, %442 : vector<8x324xf32>
    %c0_557 = arith.constant 0 : index
    %c0_558 = arith.constant 0 : index
    %c0_559 = arith.constant 0 : index
    %c0_560 = arith.constant 0 : index
    %444 = vector.load %arg6[%c0_557, %c0_558, %c0_559, %c0_560] : memref<1x1x16x362xbf16, #tpu.memory_space<vmem>>, vector<1x1x16x324xbf16>
    %445 = vector.shape_cast %444 : vector<1x1x16x324xbf16> to vector<16x324xbf16>
    %c18_561 = arith.constant 18 : index
    %c0_562 = arith.constant 0 : index
    %c0_563 = arith.constant 0 : index
    %446 = vector.load %arg8[%c18_561, %c0_562, %c0_563] : memref<27x8x16xbf16, #tpu.memory_space<vmem>>, vector<1x8x16xbf16>
    %447 = vector.shape_cast %446 : vector<1x8x16xbf16> to vector<8x16xbf16>
    %cst_564 = arith.constant dense<0.000000e+00> : vector<8x324xf32>
    %448 = tpu.matmul %447, %445, %cst_564 {dimension_numbers = #tpu.dot_dimension_numbers<[1], [0], [0], [1], [0, 0, 1, 1], [], []>} : vector<8x16xbf16>, vector<16x324xbf16>, vector<8x324xf32> -> vector<8x324xf32>
    %449 = arith.addf %443, %448 : vector<8x324xf32>
    %c0_565 = arith.constant 0 : index
    %c0_566 = arith.constant 0 : index
    %c0_567 = arith.constant 0 : index
    %c1_568 = arith.constant 1 : index
    %450 = vector.load %arg6[%c0_565, %c0_566, %c0_567, %c1_568] : memref<1x1x16x362xbf16, #tpu.memory_space<vmem>>, vector<1x1x16x324xbf16>
    %451 = vector.shape_cast %450 : vector<1x1x16x324xbf16> to vector<16x324xbf16>
    %c19_569 = arith.constant 19 : index
    %c0_570 = arith.constant 0 : index
    %c0_571 = arith.constant 0 : index
    %452 = vector.load %arg8[%c19_569, %c0_570, %c0_571] : memref<27x8x16xbf16, #tpu.memory_space<vmem>>, vector<1x8x16xbf16>
    %453 = vector.shape_cast %452 : vector<1x8x16xbf16> to vector<8x16xbf16>
    %cst_572 = arith.constant dense<0.000000e+00> : vector<8x324xf32>
    %454 = tpu.matmul %453, %451, %cst_572 {dimension_numbers = #tpu.dot_dimension_numbers<[1], [0], [0], [1], [0, 0, 1, 1], [], []>} : vector<8x16xbf16>, vector<16x324xbf16>, vector<8x324xf32> -> vector<8x324xf32>
    %455 = arith.addf %449, %454 : vector<8x324xf32>
    %c0_573 = arith.constant 0 : index
    %c0_574 = arith.constant 0 : index
    %c0_575 = arith.constant 0 : index
    %c2_576 = arith.constant 2 : index
    %456 = vector.load %arg6[%c0_573, %c0_574, %c0_575, %c2_576] : memref<1x1x16x362xbf16, #tpu.memory_space<vmem>>, vector<1x1x16x324xbf16>
    %457 = vector.shape_cast %456 : vector<1x1x16x324xbf16> to vector<16x324xbf16>
    %c20_577 = arith.constant 20 : index
    %c0_578 = arith.constant 0 : index
    %c0_579 = arith.constant 0 : index
    %458 = vector.load %arg8[%c20_577, %c0_578, %c0_579] : memref<27x8x16xbf16, #tpu.memory_space<vmem>>, vector<1x8x16xbf16>
    %459 = vector.shape_cast %458 : vector<1x8x16xbf16> to vector<8x16xbf16>
    %cst_580 = arith.constant dense<0.000000e+00> : vector<8x324xf32>
    %460 = tpu.matmul %459, %457, %cst_580 {dimension_numbers = #tpu.dot_dimension_numbers<[1], [0], [0], [1], [0, 0, 1, 1], [], []>} : vector<8x16xbf16>, vector<16x324xbf16>, vector<8x324xf32> -> vector<8x324xf32>
    %461 = arith.addf %455, %460 : vector<8x324xf32>
    %c0_581 = arith.constant 0 : index
    %c0_582 = arith.constant 0 : index
    %c0_583 = arith.constant 0 : index
    %c18_584 = arith.constant 18 : index
    %462 = vector.load %arg6[%c0_581, %c0_582, %c0_583, %c18_584] : memref<1x1x16x362xbf16, #tpu.memory_space<vmem>>, vector<1x1x16x324xbf16>
    %463 = vector.shape_cast %462 : vector<1x1x16x324xbf16> to vector<16x324xbf16>
    %c21_585 = arith.constant 21 : index
    %c0_586 = arith.constant 0 : index
    %c0_587 = arith.constant 0 : index
    %464 = vector.load %arg8[%c21_585, %c0_586, %c0_587] : memref<27x8x16xbf16, #tpu.memory_space<vmem>>, vector<1x8x16xbf16>
    %465 = vector.shape_cast %464 : vector<1x8x16xbf16> to vector<8x16xbf16>
    %cst_588 = arith.constant dense<0.000000e+00> : vector<8x324xf32>
    %466 = tpu.matmul %465, %463, %cst_588 {dimension_numbers = #tpu.dot_dimension_numbers<[1], [0], [0], [1], [0, 0, 1, 1], [], []>} : vector<8x16xbf16>, vector<16x324xbf16>, vector<8x324xf32> -> vector<8x324xf32>
    %467 = arith.addf %461, %466 : vector<8x324xf32>
    %c0_589 = arith.constant 0 : index
    %c0_590 = arith.constant 0 : index
    %c0_591 = arith.constant 0 : index
    %c19_592 = arith.constant 19 : index
    %468 = vector.load %arg6[%c0_589, %c0_590, %c0_591, %c19_592] : memref<1x1x16x362xbf16, #tpu.memory_space<vmem>>, vector<1x1x16x324xbf16>
    %469 = vector.shape_cast %468 : vector<1x1x16x324xbf16> to vector<16x324xbf16>
    %c22_593 = arith.constant 22 : index
    %c0_594 = arith.constant 0 : index
    %c0_595 = arith.constant 0 : index
    %470 = vector.load %arg8[%c22_593, %c0_594, %c0_595] : memref<27x8x16xbf16, #tpu.memory_space<vmem>>, vector<1x8x16xbf16>
    %471 = vector.shape_cast %470 : vector<1x8x16xbf16> to vector<8x16xbf16>
    %cst_596 = arith.constant dense<0.000000e+00> : vector<8x324xf32>
    %472 = tpu.matmul %471, %469, %cst_596 {dimension_numbers = #tpu.dot_dimension_numbers<[1], [0], [0], [1], [0, 0, 1, 1], [], []>} : vector<8x16xbf16>, vector<16x324xbf16>, vector<8x324xf32> -> vector<8x324xf32>
    %473 = arith.addf %467, %472 : vector<8x324xf32>
    %c0_597 = arith.constant 0 : index
    %c0_598 = arith.constant 0 : index
    %c0_599 = arith.constant 0 : index
    %c20_600 = arith.constant 20 : index
    %474 = vector.load %arg6[%c0_597, %c0_598, %c0_599, %c20_600] : memref<1x1x16x362xbf16, #tpu.memory_space<vmem>>, vector<1x1x16x324xbf16>
    %475 = vector.shape_cast %474 : vector<1x1x16x324xbf16> to vector<16x324xbf16>
    %c23_601 = arith.constant 23 : index
    %c0_602 = arith.constant 0 : index
    %c0_603 = arith.constant 0 : index
    %476 = vector.load %arg8[%c23_601, %c0_602, %c0_603] : memref<27x8x16xbf16, #tpu.memory_space<vmem>>, vector<1x8x16xbf16>
    %477 = vector.shape_cast %476 : vector<1x8x16xbf16> to vector<8x16xbf16>
    %cst_604 = arith.constant dense<0.000000e+00> : vector<8x324xf32>
    %478 = tpu.matmul %477, %475, %cst_604 {dimension_numbers = #tpu.dot_dimension_numbers<[1], [0], [0], [1], [0, 0, 1, 1], [], []>} : vector<8x16xbf16>, vector<16x324xbf16>, vector<8x324xf32> -> vector<8x324xf32>
    %479 = arith.addf %473, %478 : vector<8x324xf32>
    %c0_605 = arith.constant 0 : index
    %c0_606 = arith.constant 0 : index
    %c0_607 = arith.constant 0 : index
    %c36_608 = arith.constant 36 : index
    %480 = vector.load %arg6[%c0_605, %c0_606, %c0_607, %c36_608] : memref<1x1x16x362xbf16, #tpu.memory_space<vmem>>, vector<1x1x16x324xbf16>
    %481 = vector.shape_cast %480 : vector<1x1x16x324xbf16> to vector<16x324xbf16>
    %c24_609 = arith.constant 24 : index
    %c0_610 = arith.constant 0 : index
    %c0_611 = arith.constant 0 : index
    %482 = vector.load %arg8[%c24_609, %c0_610, %c0_611] : memref<27x8x16xbf16, #tpu.memory_space<vmem>>, vector<1x8x16xbf16>
    %483 = vector.shape_cast %482 : vector<1x8x16xbf16> to vector<8x16xbf16>
    %cst_612 = arith.constant dense<0.000000e+00> : vector<8x324xf32>
    %484 = tpu.matmul %483, %481, %cst_612 {dimension_numbers = #tpu.dot_dimension_numbers<[1], [0], [0], [1], [0, 0, 1, 1], [], []>} : vector<8x16xbf16>, vector<16x324xbf16>, vector<8x324xf32> -> vector<8x324xf32>
    %485 = arith.addf %479, %484 : vector<8x324xf32>
    %c0_613 = arith.constant 0 : index
    %c0_614 = arith.constant 0 : index
    %c0_615 = arith.constant 0 : index
    %c37_616 = arith.constant 37 : index
    %486 = vector.load %arg6[%c0_613, %c0_614, %c0_615, %c37_616] : memref<1x1x16x362xbf16, #tpu.memory_space<vmem>>, vector<1x1x16x324xbf16>
    %487 = vector.shape_cast %486 : vector<1x1x16x324xbf16> to vector<16x324xbf16>
    %c25_617 = arith.constant 25 : index
    %c0_618 = arith.constant 0 : index
    %c0_619 = arith.constant 0 : index
    %488 = vector.load %arg8[%c25_617, %c0_618, %c0_619] : memref<27x8x16xbf16, #tpu.memory_space<vmem>>, vector<1x8x16xbf16>
    %489 = vector.shape_cast %488 : vector<1x8x16xbf16> to vector<8x16xbf16>
    %cst_620 = arith.constant dense<0.000000e+00> : vector<8x324xf32>
    %490 = tpu.matmul %489, %487, %cst_620 {dimension_numbers = #tpu.dot_dimension_numbers<[1], [0], [0], [1], [0, 0, 1, 1], [], []>} : vector<8x16xbf16>, vector<16x324xbf16>, vector<8x324xf32> -> vector<8x324xf32>
    %491 = arith.addf %485, %490 : vector<8x324xf32>
    %c0_621 = arith.constant 0 : index
    %c0_622 = arith.constant 0 : index
    %c0_623 = arith.constant 0 : index
    %c38_624 = arith.constant 38 : index
    %492 = vector.load %arg6[%c0_621, %c0_622, %c0_623, %c38_624] : memref<1x1x16x362xbf16, #tpu.memory_space<vmem>>, vector<1x1x16x324xbf16>
    %493 = vector.shape_cast %492 : vector<1x1x16x324xbf16> to vector<16x324xbf16>
    %c26_625 = arith.constant 26 : index
    %c0_626 = arith.constant 0 : index
    %c0_627 = arith.constant 0 : index
    %494 = vector.load %arg8[%c26_625, %c0_626, %c0_627] : memref<27x8x16xbf16, #tpu.memory_space<vmem>>, vector<1x8x16xbf16>
    %495 = vector.shape_cast %494 : vector<1x8x16xbf16> to vector<8x16xbf16>
    %cst_628 = arith.constant dense<0.000000e+00> : vector<8x324xf32>
    %496 = tpu.matmul %495, %493, %cst_628 {dimension_numbers = #tpu.dot_dimension_numbers<[1], [0], [0], [1], [0, 0, 1, 1], [], []>} : vector<8x16xbf16>, vector<16x324xbf16>, vector<8x324xf32> -> vector<8x324xf32>
    %497 = arith.addf %491, %496 : vector<8x324xf32>
    %498 = vector.broadcast %0 : vector<8x1xf32> to vector<8x324xf32>
    %499 = arith.addf %497, %498 : vector<8x324xf32>
    %cst_629 = arith.constant 0.000000e+00 : f32
    %500 = vector.broadcast %cst_629 : f32 to vector<8x324xf32>
    %501 = arith.maximumf %499, %500 : vector<8x324xf32>
    %c0_630 = arith.constant 0 : index
    %c2_631 = arith.constant 2 : index
    %c0_632 = arith.constant 0 : index
    %c0_633 = arith.constant 0 : index
    %502 = vector.load %arg10[%c0_630, %c2_631, %c0_632, %c0_633] : memref<1x4x8x324xf32, #tpu.memory_space<vmem>>, vector<1x1x8x324xf32>
    %503 = vector.shape_cast %502 : vector<1x1x8x324xf32> to vector<8x324xf32>
    %504 = vector.shape_cast %501 : vector<8x324xf32> to vector<1x1x8x324xf32>
    tpu.vector_store %arg10[%c0_630, %c2_631, %c0_632, %c0_633], %504 {strides = array<i32>} : memref<1x4x8x324xf32, #tpu.memory_space<vmem>>, vector<1x1x8x324xf32>,
    %c0_634 = arith.constant 0 : index
    %c0_635 = arith.constant 0 : index
    %c0_636 = arith.constant 0 : index
    %c0_637 = arith.constant 0 : index
    %505 = vector.load %arg5[%c0_634, %c0_635, %c0_636, %c0_637] : memref<1x1x16x362xbf16, #tpu.memory_space<vmem>>, vector<1x1x16x324xbf16>
    %506 = vector.shape_cast %505 : vector<1x1x16x324xbf16> to vector<16x324xbf16>
    %c0_638 = arith.constant 0 : index
    %c0_639 = arith.constant 0 : index
    %c0_640 = arith.constant 0 : index
    %507 = vector.load %arg8[%c0_638, %c0_639, %c0_640] : memref<27x8x16xbf16, #tpu.memory_space<vmem>>, vector<1x8x16xbf16>
    %508 = vector.shape_cast %507 : vector<1x8x16xbf16> to vector<8x16xbf16>
    %cst_641 = arith.constant dense<0.000000e+00> : vector<8x324xf32>
    %509 = tpu.matmul %508, %506, %cst_641 {dimension_numbers = #tpu.dot_dimension_numbers<[1], [0], [0], [1], [0, 0, 1, 1], [], []>} : vector<8x16xbf16>, vector<16x324xbf16>, vector<8x324xf32> -> vector<8x324xf32>
    %c0_642 = arith.constant 0 : index
    %c0_643 = arith.constant 0 : index
    %c0_644 = arith.constant 0 : index
    %c1_645 = arith.constant 1 : index
    %510 = vector.load %arg5[%c0_642, %c0_643, %c0_644, %c1_645] : memref<1x1x16x362xbf16, #tpu.memory_space<vmem>>, vector<1x1x16x324xbf16>
    %511 = vector.shape_cast %510 : vector<1x1x16x324xbf16> to vector<16x324xbf16>
    %c1_646 = arith.constant 1 : index
    %c0_647 = arith.constant 0 : index
    %c0_648 = arith.constant 0 : index
    %512 = vector.load %arg8[%c1_646, %c0_647, %c0_648] : memref<27x8x16xbf16, #tpu.memory_space<vmem>>, vector<1x8x16xbf16>
    %513 = vector.shape_cast %512 : vector<1x8x16xbf16> to vector<8x16xbf16>
    %cst_649 = arith.constant dense<0.000000e+00> : vector<8x324xf32>
    %514 = tpu.matmul %513, %511, %cst_649 {dimension_numbers = #tpu.dot_dimension_numbers<[1], [0], [0], [1], [0, 0, 1, 1], [], []>} : vector<8x16xbf16>, vector<16x324xbf16>, vector<8x324xf32> -> vector<8x324xf32>
    %515 = arith.addf %509, %514 : vector<8x324xf32>
    %c0_650 = arith.constant 0 : index
    %c0_651 = arith.constant 0 : index
    %c0_652 = arith.constant 0 : index
    %c2_653 = arith.constant 2 : index
    %516 = vector.load %arg5[%c0_650, %c0_651, %c0_652, %c2_653] : memref<1x1x16x362xbf16, #tpu.memory_space<vmem>>, vector<1x1x16x324xbf16>
    %517 = vector.shape_cast %516 : vector<1x1x16x324xbf16> to vector<16x324xbf16>
    %c2_654 = arith.constant 2 : index
    %c0_655 = arith.constant 0 : index
    %c0_656 = arith.constant 0 : index
    %518 = vector.load %arg8[%c2_654, %c0_655, %c0_656] : memref<27x8x16xbf16, #tpu.memory_space<vmem>>, vector<1x8x16xbf16>
    %519 = vector.shape_cast %518 : vector<1x8x16xbf16> to vector<8x16xbf16>
    %cst_657 = arith.constant dense<0.000000e+00> : vector<8x324xf32>
    %520 = tpu.matmul %519, %517, %cst_657 {dimension_numbers = #tpu.dot_dimension_numbers<[1], [0], [0], [1], [0, 0, 1, 1], [], []>} : vector<8x16xbf16>, vector<16x324xbf16>, vector<8x324xf32> -> vector<8x324xf32>
    %521 = arith.addf %515, %520 : vector<8x324xf32>
    %c0_658 = arith.constant 0 : index
    %c0_659 = arith.constant 0 : index
    %c0_660 = arith.constant 0 : index
    %c18_661 = arith.constant 18 : index
    %522 = vector.load %arg5[%c0_658, %c0_659, %c0_660, %c18_661] : memref<1x1x16x362xbf16, #tpu.memory_space<vmem>>, vector<1x1x16x324xbf16>
    %523 = vector.shape_cast %522 : vector<1x1x16x324xbf16> to vector<16x324xbf16>
    %c3_662 = arith.constant 3 : index
    %c0_663 = arith.constant 0 : index
    %c0_664 = arith.constant 0 : index
    %524 = vector.load %arg8[%c3_662, %c0_663, %c0_664] : memref<27x8x16xbf16, #tpu.memory_space<vmem>>, vector<1x8x16xbf16>
    %525 = vector.shape_cast %524 : vector<1x8x16xbf16> to vector<8x16xbf16>
    %cst_665 = arith.constant dense<0.000000e+00> : vector<8x324xf32>
    %526 = tpu.matmul %525, %523, %cst_665 {dimension_numbers = #tpu.dot_dimension_numbers<[1], [0], [0], [1], [0, 0, 1, 1], [], []>} : vector<8x16xbf16>, vector<16x324xbf16>, vector<8x324xf32> -> vector<8x324xf32>
    %527 = arith.addf %521, %526 : vector<8x324xf32>
    %c0_666 = arith.constant 0 : index
    %c0_667 = arith.constant 0 : index
    %c0_668 = arith.constant 0 : index
    %c19_669 = arith.constant 19 : index
    %528 = vector.load %arg5[%c0_666, %c0_667, %c0_668, %c19_669] : memref<1x1x16x362xbf16, #tpu.memory_space<vmem>>, vector<1x1x16x324xbf16>
    %529 = vector.shape_cast %528 : vector<1x1x16x324xbf16> to vector<16x324xbf16>
    %c4_670 = arith.constant 4 : index
    %c0_671 = arith.constant 0 : index
    %c0_672 = arith.constant 0 : index
    %530 = vector.load %arg8[%c4_670, %c0_671, %c0_672] : memref<27x8x16xbf16, #tpu.memory_space<vmem>>, vector<1x8x16xbf16>
    %531 = vector.shape_cast %530 : vector<1x8x16xbf16> to vector<8x16xbf16>
    %cst_673 = arith.constant dense<0.000000e+00> : vector<8x324xf32>
    %532 = tpu.matmul %531, %529, %cst_673 {dimension_numbers = #tpu.dot_dimension_numbers<[1], [0], [0], [1], [0, 0, 1, 1], [], []>} : vector<8x16xbf16>, vector<16x324xbf16>, vector<8x324xf32> -> vector<8x324xf32>
    %533 = arith.addf %527, %532 : vector<8x324xf32>
    %c0_674 = arith.constant 0 : index
    %c0_675 = arith.constant 0 : index
    %c0_676 = arith.constant 0 : index
    %c20_677 = arith.constant 20 : index
    %534 = vector.load %arg5[%c0_674, %c0_675, %c0_676, %c20_677] : memref<1x1x16x362xbf16, #tpu.memory_space<vmem>>, vector<1x1x16x324xbf16>
    %535 = vector.shape_cast %534 : vector<1x1x16x324xbf16> to vector<16x324xbf16>
    %c5_678 = arith.constant 5 : index
    %c0_679 = arith.constant 0 : index
    %c0_680 = arith.constant 0 : index
    %536 = vector.load %arg8[%c5_678, %c0_679, %c0_680] : memref<27x8x16xbf16, #tpu.memory_space<vmem>>, vector<1x8x16xbf16>
    %537 = vector.shape_cast %536 : vector<1x8x16xbf16> to vector<8x16xbf16>
    %cst_681 = arith.constant dense<0.000000e+00> : vector<8x324xf32>
    %538 = tpu.matmul %537, %535, %cst_681 {dimension_numbers = #tpu.dot_dimension_numbers<[1], [0], [0], [1], [0, 0, 1, 1], [], []>} : vector<8x16xbf16>, vector<16x324xbf16>, vector<8x324xf32> -> vector<8x324xf32>
    %539 = arith.addf %533, %538 : vector<8x324xf32>
    %c0_682 = arith.constant 0 : index
    %c0_683 = arith.constant 0 : index
    %c0_684 = arith.constant 0 : index
    %c36_685 = arith.constant 36 : index
    %540 = vector.load %arg5[%c0_682, %c0_683, %c0_684, %c36_685] : memref<1x1x16x362xbf16, #tpu.memory_space<vmem>>, vector<1x1x16x324xbf16>
    %541 = vector.shape_cast %540 : vector<1x1x16x324xbf16> to vector<16x324xbf16>
    %c6_686 = arith.constant 6 : index
    %c0_687 = arith.constant 0 : index
    %c0_688 = arith.constant 0 : index
    %542 = vector.load %arg8[%c6_686, %c0_687, %c0_688] : memref<27x8x16xbf16, #tpu.memory_space<vmem>>, vector<1x8x16xbf16>
    %543 = vector.shape_cast %542 : vector<1x8x16xbf16> to vector<8x16xbf16>
    %cst_689 = arith.constant dense<0.000000e+00> : vector<8x324xf32>
    %544 = tpu.matmul %543, %541, %cst_689 {dimension_numbers = #tpu.dot_dimension_numbers<[1], [0], [0], [1], [0, 0, 1, 1], [], []>} : vector<8x16xbf16>, vector<16x324xbf16>, vector<8x324xf32> -> vector<8x324xf32>
    %545 = arith.addf %539, %544 : vector<8x324xf32>
    %c0_690 = arith.constant 0 : index
    %c0_691 = arith.constant 0 : index
    %c0_692 = arith.constant 0 : index
    %c37_693 = arith.constant 37 : index
    %546 = vector.load %arg5[%c0_690, %c0_691, %c0_692, %c37_693] : memref<1x1x16x362xbf16, #tpu.memory_space<vmem>>, vector<1x1x16x324xbf16>
    %547 = vector.shape_cast %546 : vector<1x1x16x324xbf16> to vector<16x324xbf16>
    %c7_694 = arith.constant 7 : index
    %c0_695 = arith.constant 0 : index
    %c0_696 = arith.constant 0 : index
    %548 = vector.load %arg8[%c7_694, %c0_695, %c0_696] : memref<27x8x16xbf16, #tpu.memory_space<vmem>>, vector<1x8x16xbf16>
    %549 = vector.shape_cast %548 : vector<1x8x16xbf16> to vector<8x16xbf16>
    %cst_697 = arith.constant dense<0.000000e+00> : vector<8x324xf32>
    %550 = tpu.matmul %549, %547, %cst_697 {dimension_numbers = #tpu.dot_dimension_numbers<[1], [0], [0], [1], [0, 0, 1, 1], [], []>} : vector<8x16xbf16>, vector<16x324xbf16>, vector<8x324xf32> -> vector<8x324xf32>
    %551 = arith.addf %545, %550 : vector<8x324xf32>
    %c0_698 = arith.constant 0 : index
    %c0_699 = arith.constant 0 : index
    %c0_700 = arith.constant 0 : index
    %c38_701 = arith.constant 38 : index
    %552 = vector.load %arg5[%c0_698, %c0_699, %c0_700, %c38_701] : memref<1x1x16x362xbf16, #tpu.memory_space<vmem>>, vector<1x1x16x324xbf16>
    %553 = vector.shape_cast %552 : vector<1x1x16x324xbf16> to vector<16x324xbf16>
    %c8_702 = arith.constant 8 : index
    %c0_703 = arith.constant 0 : index
    %c0_704 = arith.constant 0 : index
    %554 = vector.load %arg8[%c8_702, %c0_703, %c0_704] : memref<27x8x16xbf16, #tpu.memory_space<vmem>>, vector<1x8x16xbf16>
    %555 = vector.shape_cast %554 : vector<1x8x16xbf16> to vector<8x16xbf16>
    %cst_705 = arith.constant dense<0.000000e+00> : vector<8x324xf32>
    %556 = tpu.matmul %555, %553, %cst_705 {dimension_numbers = #tpu.dot_dimension_numbers<[1], [0], [0], [1], [0, 0, 1, 1], [], []>} : vector<8x16xbf16>, vector<16x324xbf16>, vector<8x324xf32> -> vector<8x324xf32>
    %557 = arith.addf %551, %556 : vector<8x324xf32>
    %c0_706 = arith.constant 0 : index
    %c0_707 = arith.constant 0 : index
    %c0_708 = arith.constant 0 : index
    %c0_709 = arith.constant 0 : index
    %558 = vector.load %arg6[%c0_706, %c0_707, %c0_708, %c0_709] : memref<1x1x16x362xbf16, #tpu.memory_space<vmem>>, vector<1x1x16x324xbf16>
    %559 = vector.shape_cast %558 : vector<1x1x16x324xbf16> to vector<16x324xbf16>
    %c9_710 = arith.constant 9 : index
    %c0_711 = arith.constant 0 : index
    %c0_712 = arith.constant 0 : index
    %560 = vector.load %arg8[%c9_710, %c0_711, %c0_712] : memref<27x8x16xbf16, #tpu.memory_space<vmem>>, vector<1x8x16xbf16>
    %561 = vector.shape_cast %560 : vector<1x8x16xbf16> to vector<8x16xbf16>
    %cst_713 = arith.constant dense<0.000000e+00> : vector<8x324xf32>
    %562 = tpu.matmul %561, %559, %cst_713 {dimension_numbers = #tpu.dot_dimension_numbers<[1], [0], [0], [1], [0, 0, 1, 1], [], []>} : vector<8x16xbf16>, vector<16x324xbf16>, vector<8x324xf32> -> vector<8x324xf32>
    %563 = arith.addf %557, %562 : vector<8x324xf32>
    %c0_714 = arith.constant 0 : index
    %c0_715 = arith.constant 0 : index
    %c0_716 = arith.constant 0 : index
    %c1_717 = arith.constant 1 : index
    %564 = vector.load %arg6[%c0_714, %c0_715, %c0_716, %c1_717] : memref<1x1x16x362xbf16, #tpu.memory_space<vmem>>, vector<1x1x16x324xbf16>
    %565 = vector.shape_cast %564 : vector<1x1x16x324xbf16> to vector<16x324xbf16>
    %c10_718 = arith.constant 10 : index
    %c0_719 = arith.constant 0 : index
    %c0_720 = arith.constant 0 : index
    %566 = vector.load %arg8[%c10_718, %c0_719, %c0_720] : memref<27x8x16xbf16, #tpu.memory_space<vmem>>, vector<1x8x16xbf16>
    %567 = vector.shape_cast %566 : vector<1x8x16xbf16> to vector<8x16xbf16>
    %cst_721 = arith.constant dense<0.000000e+00> : vector<8x324xf32>
    %568 = tpu.matmul %567, %565, %cst_721 {dimension_numbers = #tpu.dot_dimension_numbers<[1], [0], [0], [1], [0, 0, 1, 1], [], []>} : vector<8x16xbf16>, vector<16x324xbf16>, vector<8x324xf32> -> vector<8x324xf32>
    %569 = arith.addf %563, %568 : vector<8x324xf32>
    %c0_722 = arith.constant 0 : index
    %c0_723 = arith.constant 0 : index
    %c0_724 = arith.constant 0 : index
    %c2_725 = arith.constant 2 : index
    %570 = vector.load %arg6[%c0_722, %c0_723, %c0_724, %c2_725] : memref<1x1x16x362xbf16, #tpu.memory_space<vmem>>, vector<1x1x16x324xbf16>
    %571 = vector.shape_cast %570 : vector<1x1x16x324xbf16> to vector<16x324xbf16>
    %c11_726 = arith.constant 11 : index
    %c0_727 = arith.constant 0 : index
    %c0_728 = arith.constant 0 : index
    %572 = vector.load %arg8[%c11_726, %c0_727, %c0_728] : memref<27x8x16xbf16, #tpu.memory_space<vmem>>, vector<1x8x16xbf16>
    %573 = vector.shape_cast %572 : vector<1x8x16xbf16> to vector<8x16xbf16>
    %cst_729 = arith.constant dense<0.000000e+00> : vector<8x324xf32>
    %574 = tpu.matmul %573, %571, %cst_729 {dimension_numbers = #tpu.dot_dimension_numbers<[1], [0], [0], [1], [0, 0, 1, 1], [], []>} : vector<8x16xbf16>, vector<16x324xbf16>, vector<8x324xf32> -> vector<8x324xf32>
    %575 = arith.addf %569, %574 : vector<8x324xf32>
    %c0_730 = arith.constant 0 : index
    %c0_731 = arith.constant 0 : index
    %c0_732 = arith.constant 0 : index
    %c18_733 = arith.constant 18 : index
    %576 = vector.load %arg6[%c0_730, %c0_731, %c0_732, %c18_733] : memref<1x1x16x362xbf16, #tpu.memory_space<vmem>>, vector<1x1x16x324xbf16>
    %577 = vector.shape_cast %576 : vector<1x1x16x324xbf16> to vector<16x324xbf16>
    %c12_734 = arith.constant 12 : index
    %c0_735 = arith.constant 0 : index
    %c0_736 = arith.constant 0 : index
    %578 = vector.load %arg8[%c12_734, %c0_735, %c0_736] : memref<27x8x16xbf16, #tpu.memory_space<vmem>>, vector<1x8x16xbf16>
    %579 = vector.shape_cast %578 : vector<1x8x16xbf16> to vector<8x16xbf16>
    %cst_737 = arith.constant dense<0.000000e+00> : vector<8x324xf32>
    %580 = tpu.matmul %579, %577, %cst_737 {dimension_numbers = #tpu.dot_dimension_numbers<[1], [0], [0], [1], [0, 0, 1, 1], [], []>} : vector<8x16xbf16>, vector<16x324xbf16>, vector<8x324xf32> -> vector<8x324xf32>
    %581 = arith.addf %575, %580 : vector<8x324xf32>
    %c0_738 = arith.constant 0 : index
    %c0_739 = arith.constant 0 : index
    %c0_740 = arith.constant 0 : index
    %c19_741 = arith.constant 19 : index
    %582 = vector.load %arg6[%c0_738, %c0_739, %c0_740, %c19_741] : memref<1x1x16x362xbf16, #tpu.memory_space<vmem>>, vector<1x1x16x324xbf16>
    %583 = vector.shape_cast %582 : vector<1x1x16x324xbf16> to vector<16x324xbf16>
    %c13_742 = arith.constant 13 : index
    %c0_743 = arith.constant 0 : index
    %c0_744 = arith.constant 0 : index
    %584 = vector.load %arg8[%c13_742, %c0_743, %c0_744] : memref<27x8x16xbf16, #tpu.memory_space<vmem>>, vector<1x8x16xbf16>
    %585 = vector.shape_cast %584 : vector<1x8x16xbf16> to vector<8x16xbf16>
    %cst_745 = arith.constant dense<0.000000e+00> : vector<8x324xf32>
    %586 = tpu.matmul %585, %583, %cst_745 {dimension_numbers = #tpu.dot_dimension_numbers<[1], [0], [0], [1], [0, 0, 1, 1], [], []>} : vector<8x16xbf16>, vector<16x324xbf16>, vector<8x324xf32> -> vector<8x324xf32>
    %587 = arith.addf %581, %586 : vector<8x324xf32>
    %c0_746 = arith.constant 0 : index
    %c0_747 = arith.constant 0 : index
    %c0_748 = arith.constant 0 : index
    %c20_749 = arith.constant 20 : index
    %588 = vector.load %arg6[%c0_746, %c0_747, %c0_748, %c20_749] : memref<1x1x16x362xbf16, #tpu.memory_space<vmem>>, vector<1x1x16x324xbf16>
    %589 = vector.shape_cast %588 : vector<1x1x16x324xbf16> to vector<16x324xbf16>
    %c14_750 = arith.constant 14 : index
    %c0_751 = arith.constant 0 : index
    %c0_752 = arith.constant 0 : index
    %590 = vector.load %arg8[%c14_750, %c0_751, %c0_752] : memref<27x8x16xbf16, #tpu.memory_space<vmem>>, vector<1x8x16xbf16>
    %591 = vector.shape_cast %590 : vector<1x8x16xbf16> to vector<8x16xbf16>
    %cst_753 = arith.constant dense<0.000000e+00> : vector<8x324xf32>
    %592 = tpu.matmul %591, %589, %cst_753 {dimension_numbers = #tpu.dot_dimension_numbers<[1], [0], [0], [1], [0, 0, 1, 1], [], []>} : vector<8x16xbf16>, vector<16x324xbf16>, vector<8x324xf32> -> vector<8x324xf32>
    %593 = arith.addf %587, %592 : vector<8x324xf32>
    %c0_754 = arith.constant 0 : index
    %c0_755 = arith.constant 0 : index
    %c0_756 = arith.constant 0 : index
    %c36_757 = arith.constant 36 : index
    %594 = vector.load %arg6[%c0_754, %c0_755, %c0_756, %c36_757] : memref<1x1x16x362xbf16, #tpu.memory_space<vmem>>, vector<1x1x16x324xbf16>
    %595 = vector.shape_cast %594 : vector<1x1x16x324xbf16> to vector<16x324xbf16>
    %c15_758 = arith.constant 15 : index
    %c0_759 = arith.constant 0 : index
    %c0_760 = arith.constant 0 : index
    %596 = vector.load %arg8[%c15_758, %c0_759, %c0_760] : memref<27x8x16xbf16, #tpu.memory_space<vmem>>, vector<1x8x16xbf16>
    %597 = vector.shape_cast %596 : vector<1x8x16xbf16> to vector<8x16xbf16>
    %cst_761 = arith.constant dense<0.000000e+00> : vector<8x324xf32>
    %598 = tpu.matmul %597, %595, %cst_761 {dimension_numbers = #tpu.dot_dimension_numbers<[1], [0], [0], [1], [0, 0, 1, 1], [], []>} : vector<8x16xbf16>, vector<16x324xbf16>, vector<8x324xf32> -> vector<8x324xf32>
    %599 = arith.addf %593, %598 : vector<8x324xf32>
    %c0_762 = arith.constant 0 : index
    %c0_763 = arith.constant 0 : index
    %c0_764 = arith.constant 0 : index
    %c37_765 = arith.constant 37 : index
    %600 = vector.load %arg6[%c0_762, %c0_763, %c0_764, %c37_765] : memref<1x1x16x362xbf16, #tpu.memory_space<vmem>>, vector<1x1x16x324xbf16>
    %601 = vector.shape_cast %600 : vector<1x1x16x324xbf16> to vector<16x324xbf16>
    %c16_766 = arith.constant 16 : index
    %c0_767 = arith.constant 0 : index
    %c0_768 = arith.constant 0 : index
    %602 = vector.load %arg8[%c16_766, %c0_767, %c0_768] : memref<27x8x16xbf16, #tpu.memory_space<vmem>>, vector<1x8x16xbf16>
    %603 = vector.shape_cast %602 : vector<1x8x16xbf16> to vector<8x16xbf16>
    %cst_769 = arith.constant dense<0.000000e+00> : vector<8x324xf32>
    %604 = tpu.matmul %603, %601, %cst_769 {dimension_numbers = #tpu.dot_dimension_numbers<[1], [0], [0], [1], [0, 0, 1, 1], [], []>} : vector<8x16xbf16>, vector<16x324xbf16>, vector<8x324xf32> -> vector<8x324xf32>
    %605 = arith.addf %599, %604 : vector<8x324xf32>
    %c0_770 = arith.constant 0 : index
    %c0_771 = arith.constant 0 : index
    %c0_772 = arith.constant 0 : index
    %c38_773 = arith.constant 38 : index
    %606 = vector.load %arg6[%c0_770, %c0_771, %c0_772, %c38_773] : memref<1x1x16x362xbf16, #tpu.memory_space<vmem>>, vector<1x1x16x324xbf16>
    %607 = vector.shape_cast %606 : vector<1x1x16x324xbf16> to vector<16x324xbf16>
    %c17_774 = arith.constant 17 : index
    %c0_775 = arith.constant 0 : index
    %c0_776 = arith.constant 0 : index
    %608 = vector.load %arg8[%c17_774, %c0_775, %c0_776] : memref<27x8x16xbf16, #tpu.memory_space<vmem>>, vector<1x8x16xbf16>
    %609 = vector.shape_cast %608 : vector<1x8x16xbf16> to vector<8x16xbf16>
    %cst_777 = arith.constant dense<0.000000e+00> : vector<8x324xf32>
    %610 = tpu.matmul %609, %607, %cst_777 {dimension_numbers = #tpu.dot_dimension_numbers<[1], [0], [0], [1], [0, 0, 1, 1], [], []>} : vector<8x16xbf16>, vector<16x324xbf16>, vector<8x324xf32> -> vector<8x324xf32>
    %611 = arith.addf %605, %610 : vector<8x324xf32>
    %c0_778 = arith.constant 0 : index
    %c0_779 = arith.constant 0 : index
    %c0_780 = arith.constant 0 : index
    %c0_781 = arith.constant 0 : index
    %612 = vector.load %arg7[%c0_778, %c0_779, %c0_780, %c0_781] : memref<1x1x16x362xbf16, #tpu.memory_space<vmem>>, vector<1x1x16x324xbf16>
    %613 = vector.shape_cast %612 : vector<1x1x16x324xbf16> to vector<16x324xbf16>
    %c18_782 = arith.constant 18 : index
    %c0_783 = arith.constant 0 : index
    %c0_784 = arith.constant 0 : index
    %614 = vector.load %arg8[%c18_782, %c0_783, %c0_784] : memref<27x8x16xbf16, #tpu.memory_space<vmem>>, vector<1x8x16xbf16>
    %615 = vector.shape_cast %614 : vector<1x8x16xbf16> to vector<8x16xbf16>
    %cst_785 = arith.constant dense<0.000000e+00> : vector<8x324xf32>
    %616 = tpu.matmul %615, %613, %cst_785 {dimension_numbers = #tpu.dot_dimension_numbers<[1], [0], [0], [1], [0, 0, 1, 1], [], []>} : vector<8x16xbf16>, vector<16x324xbf16>, vector<8x324xf32> -> vector<8x324xf32>
    %617 = arith.addf %611, %616 : vector<8x324xf32>
    %c0_786 = arith.constant 0 : index
    %c0_787 = arith.constant 0 : index
    %c0_788 = arith.constant 0 : index
    %c1_789 = arith.constant 1 : index
    %618 = vector.load %arg7[%c0_786, %c0_787, %c0_788, %c1_789] : memref<1x1x16x362xbf16, #tpu.memory_space<vmem>>, vector<1x1x16x324xbf16>
    %619 = vector.shape_cast %618 : vector<1x1x16x324xbf16> to vector<16x324xbf16>
    %c19_790 = arith.constant 19 : index
    %c0_791 = arith.constant 0 : index
    %c0_792 = arith.constant 0 : index
    %620 = vector.load %arg8[%c19_790, %c0_791, %c0_792] : memref<27x8x16xbf16, #tpu.memory_space<vmem>>, vector<1x8x16xbf16>
    %621 = vector.shape_cast %620 : vector<1x8x16xbf16> to vector<8x16xbf16>
    %cst_793 = arith.constant dense<0.000000e+00> : vector<8x324xf32>
    %622 = tpu.matmul %621, %619, %cst_793 {dimension_numbers = #tpu.dot_dimension_numbers<[1], [0], [0], [1], [0, 0, 1, 1], [], []>} : vector<8x16xbf16>, vector<16x324xbf16>, vector<8x324xf32> -> vector<8x324xf32>
    %623 = arith.addf %617, %622 : vector<8x324xf32>
    %c0_794 = arith.constant 0 : index
    %c0_795 = arith.constant 0 : index
    %c0_796 = arith.constant 0 : index
    %c2_797 = arith.constant 2 : index
    %624 = vector.load %arg7[%c0_794, %c0_795, %c0_796, %c2_797] : memref<1x1x16x362xbf16, #tpu.memory_space<vmem>>, vector<1x1x16x324xbf16>
    %625 = vector.shape_cast %624 : vector<1x1x16x324xbf16> to vector<16x324xbf16>
    %c20_798 = arith.constant 20 : index
    %c0_799 = arith.constant 0 : index
    %c0_800 = arith.constant 0 : index
    %626 = vector.load %arg8[%c20_798, %c0_799, %c0_800] : memref<27x8x16xbf16, #tpu.memory_space<vmem>>, vector<1x8x16xbf16>
    %627 = vector.shape_cast %626 : vector<1x8x16xbf16> to vector<8x16xbf16>
    %cst_801 = arith.constant dense<0.000000e+00> : vector<8x324xf32>
    %628 = tpu.matmul %627, %625, %cst_801 {dimension_numbers = #tpu.dot_dimension_numbers<[1], [0], [0], [1], [0, 0, 1, 1], [], []>} : vector<8x16xbf16>, vector<16x324xbf16>, vector<8x324xf32> -> vector<8x324xf32>
    %629 = arith.addf %623, %628 : vector<8x324xf32>
    %c0_802 = arith.constant 0 : index
    %c0_803 = arith.constant 0 : index
    %c0_804 = arith.constant 0 : index
    %c18_805 = arith.constant 18 : index
    %630 = vector.load %arg7[%c0_802, %c0_803, %c0_804, %c18_805] : memref<1x1x16x362xbf16, #tpu.memory_space<vmem>>, vector<1x1x16x324xbf16>
    %631 = vector.shape_cast %630 : vector<1x1x16x324xbf16> to vector<16x324xbf16>
    %c21_806 = arith.constant 21 : index
    %c0_807 = arith.constant 0 : index
    %c0_808 = arith.constant 0 : index
    %632 = vector.load %arg8[%c21_806, %c0_807, %c0_808] : memref<27x8x16xbf16, #tpu.memory_space<vmem>>, vector<1x8x16xbf16>
    %633 = vector.shape_cast %632 : vector<1x8x16xbf16> to vector<8x16xbf16>
    %cst_809 = arith.constant dense<0.000000e+00> : vector<8x324xf32>
    %634 = tpu.matmul %633, %631, %cst_809 {dimension_numbers = #tpu.dot_dimension_numbers<[1], [0], [0], [1], [0, 0, 1, 1], [], []>} : vector<8x16xbf16>, vector<16x324xbf16>, vector<8x324xf32> -> vector<8x324xf32>
    %635 = arith.addf %629, %634 : vector<8x324xf32>
    %c0_810 = arith.constant 0 : index
    %c0_811 = arith.constant 0 : index
    %c0_812 = arith.constant 0 : index
    %c19_813 = arith.constant 19 : index
    %636 = vector.load %arg7[%c0_810, %c0_811, %c0_812, %c19_813] : memref<1x1x16x362xbf16, #tpu.memory_space<vmem>>, vector<1x1x16x324xbf16>
    %637 = vector.shape_cast %636 : vector<1x1x16x324xbf16> to vector<16x324xbf16>
    %c22_814 = arith.constant 22 : index
    %c0_815 = arith.constant 0 : index
    %c0_816 = arith.constant 0 : index
    %638 = vector.load %arg8[%c22_814, %c0_815, %c0_816] : memref<27x8x16xbf16, #tpu.memory_space<vmem>>, vector<1x8x16xbf16>
    %639 = vector.shape_cast %638 : vector<1x8x16xbf16> to vector<8x16xbf16>
    %cst_817 = arith.constant dense<0.000000e+00> : vector<8x324xf32>
    %640 = tpu.matmul %639, %637, %cst_817 {dimension_numbers = #tpu.dot_dimension_numbers<[1], [0], [0], [1], [0, 0, 1, 1], [], []>} : vector<8x16xbf16>, vector<16x324xbf16>, vector<8x324xf32> -> vector<8x324xf32>
    %641 = arith.addf %635, %640 : vector<8x324xf32>
    %c0_818 = arith.constant 0 : index
    %c0_819 = arith.constant 0 : index
    %c0_820 = arith.constant 0 : index
    %c20_821 = arith.constant 20 : index
    %642 = vector.load %arg7[%c0_818, %c0_819, %c0_820, %c20_821] : memref<1x1x16x362xbf16, #tpu.memory_space<vmem>>, vector<1x1x16x324xbf16>
    %643 = vector.shape_cast %642 : vector<1x1x16x324xbf16> to vector<16x324xbf16>
    %c23_822 = arith.constant 23 : index
    %c0_823 = arith.constant 0 : index
    %c0_824 = arith.constant 0 : index
    %644 = vector.load %arg8[%c23_822, %c0_823, %c0_824] : memref<27x8x16xbf16, #tpu.memory_space<vmem>>, vector<1x8x16xbf16>
    %645 = vector.shape_cast %644 : vector<1x8x16xbf16> to vector<8x16xbf16>
    %cst_825 = arith.constant dense<0.000000e+00> : vector<8x324xf32>
    %646 = tpu.matmul %645, %643, %cst_825 {dimension_numbers = #tpu.dot_dimension_numbers<[1], [0], [0], [1], [0, 0, 1, 1], [], []>} : vector<8x16xbf16>, vector<16x324xbf16>, vector<8x324xf32> -> vector<8x324xf32>
    %647 = arith.addf %641, %646 : vector<8x324xf32>
    %c0_826 = arith.constant 0 : index
    %c0_827 = arith.constant 0 : index
    %c0_828 = arith.constant 0 : index
    %c36_829 = arith.constant 36 : index
    %648 = vector.load %arg7[%c0_826, %c0_827, %c0_828, %c36_829] : memref<1x1x16x362xbf16, #tpu.memory_space<vmem>>, vector<1x1x16x324xbf16>
    %649 = vector.shape_cast %648 : vector<1x1x16x324xbf16> to vector<16x324xbf16>
    %c24_830 = arith.constant 24 : index
    %c0_831 = arith.constant 0 : index
    %c0_832 = arith.constant 0 : index
    %650 = vector.load %arg8[%c24_830, %c0_831, %c0_832] : memref<27x8x16xbf16, #tpu.memory_space<vmem>>, vector<1x8x16xbf16>
    %651 = vector.shape_cast %650 : vector<1x8x16xbf16> to vector<8x16xbf16>
    %cst_833 = arith.constant dense<0.000000e+00> : vector<8x324xf32>
    %652 = tpu.matmul %651, %649, %cst_833 {dimension_numbers = #tpu.dot_dimension_numbers<[1], [0], [0], [1], [0, 0, 1, 1], [], []>} : vector<8x16xbf16>, vector<16x324xbf16>, vector<8x324xf32> -> vector<8x324xf32>
    %653 = arith.addf %647, %652 : vector<8x324xf32>
    %c0_834 = arith.constant 0 : index
    %c0_835 = arith.constant 0 : index
    %c0_836 = arith.constant 0 : index
    %c37_837 = arith.constant 37 : index
    %654 = vector.load %arg7[%c0_834, %c0_835, %c0_836, %c37_837] : memref<1x1x16x362xbf16, #tpu.memory_space<vmem>>, vector<1x1x16x324xbf16>
    %655 = vector.shape_cast %654 : vector<1x1x16x324xbf16> to vector<16x324xbf16>
    %c25_838 = arith.constant 25 : index
    %c0_839 = arith.constant 0 : index
    %c0_840 = arith.constant 0 : index
    %656 = vector.load %arg8[%c25_838, %c0_839, %c0_840] : memref<27x8x16xbf16, #tpu.memory_space<vmem>>, vector<1x8x16xbf16>
    %657 = vector.shape_cast %656 : vector<1x8x16xbf16> to vector<8x16xbf16>
    %cst_841 = arith.constant dense<0.000000e+00> : vector<8x324xf32>
    %658 = tpu.matmul %657, %655, %cst_841 {dimension_numbers = #tpu.dot_dimension_numbers<[1], [0], [0], [1], [0, 0, 1, 1], [], []>} : vector<8x16xbf16>, vector<16x324xbf16>, vector<8x324xf32> -> vector<8x324xf32>
    %659 = arith.addf %653, %658 : vector<8x324xf32>
    %c0_842 = arith.constant 0 : index
    %c0_843 = arith.constant 0 : index
    %c0_844 = arith.constant 0 : index
    %c38_845 = arith.constant 38 : index
    %660 = vector.load %arg7[%c0_842, %c0_843, %c0_844, %c38_845] : memref<1x1x16x362xbf16, #tpu.memory_space<vmem>>, vector<1x1x16x324xbf16>
    %661 = vector.shape_cast %660 : vector<1x1x16x324xbf16> to vector<16x324xbf16>
    %c26_846 = arith.constant 26 : index
    %c0_847 = arith.constant 0 : index
    %c0_848 = arith.constant 0 : index
    %662 = vector.load %arg8[%c26_846, %c0_847, %c0_848] : memref<27x8x16xbf16, #tpu.memory_space<vmem>>, vector<1x8x16xbf16>
    %663 = vector.shape_cast %662 : vector<1x8x16xbf16> to vector<8x16xbf16>
    %cst_849 = arith.constant dense<0.000000e+00> : vector<8x324xf32>
    %664 = tpu.matmul %663, %661, %cst_849 {dimension_numbers = #tpu.dot_dimension_numbers<[1], [0], [0], [1], [0, 0, 1, 1], [], []>} : vector<8x16xbf16>, vector<16x324xbf16>, vector<8x324xf32> -> vector<8x324xf32>
    %665 = arith.addf %659, %664 : vector<8x324xf32>
    %666 = vector.broadcast %0 : vector<8x1xf32> to vector<8x324xf32>
    %667 = arith.addf %665, %666 : vector<8x324xf32>
    %cst_850 = arith.constant 0.000000e+00 : f32
    %668 = vector.broadcast %cst_850 : f32 to vector<8x324xf32>
    %669 = arith.maximumf %667, %668 : vector<8x324xf32>
    %c0_851 = arith.constant 0 : index
    %c3_852 = arith.constant 3 : index
    %c0_853 = arith.constant 0 : index
    %c0_854 = arith.constant 0 : index
    %670 = vector.load %arg10[%c0_851, %c3_852, %c0_853, %c0_854] : memref<1x4x8x324xf32, #tpu.memory_space<vmem>>, vector<1x1x8x324xf32>
    %671 = vector.shape_cast %670 : vector<1x1x8x324xf32> to vector<8x324xf32>
    %672 = vector.shape_cast %669 : vector<8x324xf32> to vector<1x1x8x324xf32>
    tpu.vector_store %arg10[%c0_851, %c3_852, %c0_853, %c0_854], %672 {strides = array<i32>} : memref<1x4x8x324xf32, #tpu.memory_space<vmem>>, vector<1x1x8x324xf32>,
    return
  }
  func.func @transform_0(%arg0: i32, %arg1: i32) -> (i32, i32, i32, i32) {
    %c4_i32 = arith.constant 4 : i32
    %0 = arith.muli %arg1, %c4_i32 : i32
    %c0_i32 = arith.constant 0 : i32
    %1 = arith.addi %0, %c0_i32 : i32
    %c0_i32_0 = arith.constant 0 : i32
    %c0_i32_1 = arith.constant 0 : i32
    %c0_i32_2 = arith.constant 0 : i32
    return %arg0, %1, %c0_i32_0, %c0_i32_1 : i32, i32, i32, i32
  }
  func.func @transform_1(%arg0: i32, %arg1: i32) -> (i32, i32, i32, i32) {
    %c4_i32 = arith.constant 4 : i32
    %0 = arith.muli %arg1, %c4_i32 : i32
    %c1_i32 = arith.constant 1 : i32
    %1 = arith.addi %0, %c1_i32 : i32
    %c0_i32 = arith.constant 0 : i32
    %c0_i32_0 = arith.constant 0 : i32
    %c0_i32_1 = arith.constant 0 : i32
    return %arg0, %1, %c0_i32, %c0_i32_0 : i32, i32, i32, i32
  }
  func.func @transform_2(%arg0: i32, %arg1: i32) -> (i32, i32, i32, i32) {
    %c4_i32 = arith.constant 4 : i32
    %0 = arith.muli %arg1, %c4_i32 : i32
    %c2_i32 = arith.constant 2 : i32
    %1 = arith.addi %0, %c2_i32 : i32
    %c0_i32 = arith.constant 0 : i32
    %c0_i32_0 = arith.constant 0 : i32
    %c0_i32_1 = arith.constant 0 : i32
    return %arg0, %1, %c0_i32, %c0_i32_0 : i32, i32, i32, i32
  }
  func.func @transform_3(%arg0: i32, %arg1: i32) -> (i32, i32, i32, i32) {
    %c4_i32 = arith.constant 4 : i32
    %0 = arith.muli %arg1, %c4_i32 : i32
    %c3_i32 = arith.constant 3 : i32
    %1 = arith.addi %0, %c3_i32 : i32
    %c0_i32 = arith.constant 0 : i32
    %c0_i32_0 = arith.constant 0 : i32
    %c0_i32_1 = arith.constant 0 : i32
    return %arg0, %1, %c0_i32, %c0_i32_0 : i32, i32, i32, i32
  }
  func.func @transform_4(%arg0: i32, %arg1: i32) -> (i32, i32, i32, i32) {
    %c4_i32 = arith.constant 4 : i32
    %0 = arith.muli %arg1, %c4_i32 : i32
    %c4_i32_0 = arith.constant 4 : i32
    %1 = arith.addi %0, %c4_i32_0 : i32
    %c0_i32 = arith.constant 0 : i32
    %c0_i32_1 = arith.constant 0 : i32
    %c0_i32_2 = arith.constant 0 : i32
    return %arg0, %1, %c0_i32, %c0_i32_1 : i32, i32, i32, i32
  }
  func.func @transform_5(%arg0: i32, %arg1: i32) -> (i32, i32, i32, i32) {
    %c4_i32 = arith.constant 4 : i32
    %0 = arith.muli %arg1, %c4_i32 : i32
    %c5_i32 = arith.constant 5 : i32
    %1 = arith.addi %0, %c5_i32 : i32
    %c0_i32 = arith.constant 0 : i32
    %c0_i32_0 = arith.constant 0 : i32
    %c0_i32_1 = arith.constant 0 : i32
    return %arg0, %1, %c0_i32, %c0_i32_0 : i32, i32, i32, i32
  }
  func.func @transform_6(%arg0: i32, %arg1: i32) -> (i32, i32, i32) {
    %c0_i32 = arith.constant 0 : i32
    %c0_i32_0 = arith.constant 0 : i32
    %c0_i32_1 = arith.constant 0 : i32
    %c0_i32_2 = arith.constant 0 : i32
    return %c0_i32, %c0_i32_0, %c0_i32_1 : i32, i32, i32
  }
  func.func @transform_7(%arg0: i32, %arg1: i32) -> (i32, i32) {
    %c0_i32 = arith.constant 0 : i32
    %c0_i32_0 = arith.constant 0 : i32
    %c0_i32_1 = arith.constant 0 : i32
    return %c0_i32, %c0_i32_0 : i32, i32
  }
  func.func @transform_8(%arg0: i32, %arg1: i32) -> (i32, i32, i32, i32) {
    %c0_i32 = arith.constant 0 : i32
    %c0_i32_0 = arith.constant 0 : i32
    %c0_i32_1 = arith.constant 0 : i32
    return %arg0, %arg1, %c0_i32, %c0_i32_0 : i32, i32, i32, i32
  }
}

</mosaic_0001>

<bundles_post_ra>
// kernel: upsampling_function_forward.1
= control target key start
LH: loop header
LB: loop body
LE: loop exit
PB: predicated region body
PF: predicated region fallthrough
CT: control target
= control target key end

     0   :  { %s13136_s27 = smov 0   ;;  %s13138_s28 = smov 0   ;;  %s15675_s0 = inlined_call_operand.vmem [shape: bf16[2,18,16,362], index: 0, kind: input, shape index: {}, may-alias: {0,1,2,3,4,5}]   ;;  %s15676_s1 = inlined_call_operand.vmem [shape: bf16[2,18,16,362], index: 1, kind: input, shape index: {}, may-alias: {0,1,2,3,4,5}]   ;;  %s15677_s2 = inlined_call_operand.vmem [shape: bf16[2,18,16,362], index: 2, kind: input, shape index: {}, may-alias: {0,1,2,3,4,5}]   ;;  %s15678_s3 = inlined_call_operand.vmem [shape: bf16[2,18,16,362], index: 3, kind: input, shape index: {}, may-alias: {0,1,2,3,4,5}]   ;;  %s15679_s4 = inlined_call_operand.vmem [shape: bf16[2,18,16,362], index: 4, kind: input, shape index: {}, may-alias: {0,1,2,3,4,5}]   ;;  %s15680_s5 = inlined_call_operand.vmem [shape: bf16[2,18,16,362], index: 5, kind: input, shape index: {}, may-alias: {0,1,2,3,4,5}]   ;;  %s15681_s6 = inlined_call_operand.vmem [shape: bf16[27,8,16], index: 6, kind: input, shape index: {}]   ;;  %s15682_s7 = inlined_call_operand.vmem [shape: f32[8,1], index: 7, kind: input, shape index: {}]   ;;  %s15683_s8 = inlined_call_operand.vmem [shape: f32[2,16,8,324], index: 8, kind: output, shape index: {}]  }
   0x1   :  { %15710 = sst [smem:[#allocation14_spill]] %s15675_s0  ;;  %s13140_s29 = smov 0  }
   0x2   :  { %15711 = sst [smem:[#allocation15_spill]] %s15676_s1  ;;  %s13142_s30 = smov 0  }
   0x3   :  { %15712 = sst [smem:[#allocation16_spill]] %s15677_s2  ;;  %s13144_s9 = smov 0  }
   0x4 LB: > { %s27_s10 = sadd.s32 1, %s13070_s29  ;;  %s30_s11 = sadd.s32 1, %s13074_s30  ;;  %s13078_s9 = sphi %s13144_s9, %s18_s9   ;;  %s13074_s30 = sphi %s13142_s30, %s15753_s30   ;;  %s13070_s29 = sphi %s13140_s29, %s15752_s29   ;;  %s13066_s28 = sphi %s13138_s28, %s15751_s28   ;;  %s13062_s27 = sphi %s13136_s27, %s15750_s27  }
   0x5   : > { %p28_p0 = scmp.ge.s32.totalorder %s27_s10, 4  ;;  %p11670_p1 = scmp.ge.s32.totalorder %s13078_s9, 1 }
   0x6   : > { %p406_p2 = scmp.lt.s32.totalorder %s13078_s9, 9 }
   0x7   : > { %s15755_s10 = smov (%p28_p0, %s27_s10), 0  ;;  %s15757_s11 = smov (!%p28_p0, %s30_s11), %s13074_s30 }
   0x8   : > { %p407_p3 = pnand %p11670_p1, %p406_p2  ;;  %p32_p4 = scmp.ge.s32.totalorder %s15757_s11, 2 }
   0xa   : > { %s15759_s11 = smov (%p32_p4, %s15757_s11), 0  ;;  %410 = sbr.rel (%p407_p3) target bundleno = 1228 (0x4cc), region = 52 }
  0x11   : > { %s13166_s12 = sshll.u32 %s13062_s27, 2  ;;  %p506_p5 = scmp.lt.s32.totalorder %s13066_s28, 1  ;;  %v15702_v0 = vmov 0.0   ;;  %vm13081_vm0 = vmmov 0   ;;  %v15700_v1 = vmov 0   ;;  %vm620_vm1 = vcmask 1039360  }
  0x12   : > { %p508_p6 = scmp.lt.s32.totalorder %s13166_s12, 17  ;;  %12268 = vmatprep.subr.bf16.mxu1 %v15702_v0  ;;  %12270 = vmatprep.mubr.msk.bf16.mxu1 %vm13081_vm0, %v15702_v0  ;;  %s15713_s0 = sld [smem:[#allocation14_spill]]  ;;  %v11685_v15 = vld [vmem:[%s15681_s6 + $0x4] sm:$0xf]  ;;  %vm626_vm2 = vcmask 130048   ;;  %vm806_vm3 = vcmask 1031168  }
  0x13   : > { %s15761_s28 = smov (!%p506_p5, %s13066_s28), 1  ;;  %662 = vmatprep.mubr.bf16.mxu0 %v15700_v1  ;;  %12976 = vset.pattern.permute.xlu0 %v15700_v1  ;;  %s517_s21 = sadd.s32 1, %s13166_s12  ;;  %v598_v22 = vld [vmem:[%s15681_s6] sm:$0xf]  ;;  %vm907_vm4 = vcmask 900096   ;;  %vm1008_vm5 = vcmask 891904  }
  0x14   : > { %s509_s13 = scalar_select %p508_p6, %s13166_s12, 17  ;;  %v11693_v29 = vld [vmem:[%s15681_s6 + $0x8] sm:$0xf]  ;;  %v11696_v35 = vld [vmem:[%s15681_s6 + $0xc] sm:$0xf]  ;;  %vm1109_vm6 = vcmask 883712  }
  0x15   : > { %s13174_s14 = smul.u32 108, %s15761_s28  ;;  %s530_s22 = sadd.s32 2, %s13166_s12  ;;  %v11699_v43 = vld [vmem:[%s15681_s6 + $0x10] sm:$0xf]  ;;  %vm1210_vm7 = vcmask 752640   ;;  %vm1311_vm8 = vcmask 744448  }
  0x16   : > { %s12916_s15 = smul.u32 6, %s509_s13  ;;  %s15684_s23 = smov 127   ;;  %v11702_v49 = vld [vmem:[%s15681_s6 + $0x14] sm:$0xf]  ;;  %v11705_v55 = vld [vmem:[%s15681_s6 + $0x18] sm:$0xf] }
  0x17   : > { %p520_p7 = scmp.lt.s32.totalorder %s517_s21, 17  ;;  %p533_p8 = scmp.lt.s32.totalorder %s530_s22, 17  ;;  %vm1412_vm9 = vcmask 736256   ;;  %v11708_v62 = vld [vmem:[%s15681_s6 + $0x1c] sm:$0xf]  ;;  %vm3336_vm10 = vcmask 556032  }
  0x18   : > { %s512_s16 = sadd.s32 %s13174_s14, %s12916_s15  ;;  %s15694_s25 = smov 126  }
  0x19   : > { %s11672_s17 = sshll.u32 %s512_s16, 2  ;;  %s15763_s21 = smov (!%p520_p7, %s517_s21), 17 }
  0x1a   : > { %s514_s20 = scalar_lea.vmem %s15713_s0, %s11672_s17  ;;  %s15765_s22 = smov (!%p533_p8, %s530_s22), 17 }
  0x1b   : > { %v13184_v2 = vld [vmem:[%s514_s20 + $0x4] ss:$12 sps:$4 sm:$0xff]   ;;  %v13188_v3 = vld [vmem:[%s514_s20] ss:$12 sps:$4 sm:$0xff]   ;;  %v13192_v4 = vld [vmem:[%s514_s20 + $0x8] ss:$12 sps:$4 sm:$0xff]  }
  0x1c   : > { %616 = vrot.lane.b32.xlu0 %v13184_v2, %s15684_s23  ;;  %614 = vrot.lane.b32.xlu1 %v13188_v3, %s15684_s23  ;;  %s12918_s24 = smul.u32 6, %s15763_s21  ;;  %s15714_s1 = sld [smem:[#allocation15_spill]] }
  0x1d   : > { %s12919_s26 = smul.u32 6, %s15765_s22  ;;  %s15715_s2 = sld [smem:[#allocation16_spill]] }
  0x1e   : > { %s524_s27 = sadd.s32 %s12918_s24, %s13174_s14  ;;  %s15698_s22 = smov 110  }
  0x1f   : > { %s11674_s13 = sshll.u32 %s524_s27, 2  ;;  %s537_s15 = sadd.s32 %s12919_s26, %s13174_s14 }
  0x20   : > { %618 = vrot.lane.b32.xlu0 %v13192_v4, %s15684_s23  ;;  %802 = vrot.lane.b32.xlu1 %v13184_v2, %s15694_s25  ;;  %s11676_s19 = sshll.u32 %s537_s15, 2  ;;  %s15696_s24 = smov 109  }
  0x21   : > { %s15692_s26 = smov 108   ;;  %s15690_s27 = smov 92  }
  0x22   : > { %s13207_s18 = scalar_lea.vmem %s15714_s1, %s11674_s13  ;;  %s15688_s13 = smov 91  }
  0x23   : > { %s13214_s23 = scalar_lea.vmem %s15715_s2, %s11676_s19  ;;  %s15686_s15 = smov 90   ;;  %v13251_v5 = vld [vmem:[%s13207_s18 + $0x4] ss:$12 sps:$4 sm:$0xff]   ;;  %v13256_v6 = vld [vmem:[%s13207_s18 + $0x8] ss:$12 sps:$4 sm:$0xff]  }
  0x24   : > { %804 = vrot.lane.b32.xlu0 %v13192_v4, %s15694_s25  ;;  %800 = vrot.lane.b32.xlu1 %v13188_v3, %s15694_s25  ;;  %s15716_s16 = smov 127   ;;  %v13261_v7 = vld [vmem:[%s13207_s18] ss:$12 sps:$4 sm:$0xff]   ;;  %v13308_v8 = vld [vmem:[%s13214_s23 + $0x4] ss:$12 sps:$4 sm:$0xff]   ;;  %s543_s17 = sadd.s32 3, %s13166_s12 }
  0x25   : > { %v13313_v9 = vld [vmem:[%s13214_s23 + $0x8] ss:$12 sps:$4 sm:$0xff]   ;;  %v13318_v10 = vld [vmem:[%s13214_s23] ss:$12 sps:$4 sm:$0xff]   ;;  %p546_p9 = scmp.lt.s32.totalorder %s543_s17, 17  ;;  %s15721_s0 = smov 109  }
  0x26   : > { %v13419_v40 = vld [vmem:[%s13207_s18 + $0x8] ss:$12 sps:$4 sm:$0xff]   ;;  %p584_p12 = scmp.lt.s32.totalorder %s13166_s12, 15 }
  0x27   : > { %s15767_s17 = smov (!%p546_p9, %s543_s17), 17 }
  0x28   : > { %903 = vrot.lane.b32.xlu0 %v13184_v2, %s15698_s22  ;;  %905 = vrot.lane.b32.xlu1 %v13192_v4, %s15698_s22  ;;  %s12920_s19 = smul.u32 6, %s15767_s17  ;;  %s15719_s17 = smov 90  }
  0x2a   : > { %s550_s20 = sadd.s32 %s12920_s19, %s13174_s14 }
  0x2b   : > { %s11678_s21 = sshll.u32 %s550_s20, 2  ;;  %s15717_s20 = smov 92  }
  0x2c   : > { %901 = vrot.lane.b32.xlu0 %v13188_v3, %s15698_s22  ;;  %1004 = vrot.lane.b32.xlu1 %v13184_v2, %s15696_s24 }
  0x30   : > { %1006 = vrot.lane.b32.xlu0 %v13192_v4, %s15696_s24  ;;  %1002 = vrot.lane.b32.xlu1 %v13188_v3, %s15696_s24 }
  0x34   : > { %1105 = vrot.lane.b32.xlu0 %v13184_v2, %s15692_s26  ;;  %1107 = vrot.lane.b32.xlu1 %v13192_v4, %s15692_s26 }
  0x38   : > { %1103 = vrot.lane.b32.xlu0 %v13188_v3, %s15692_s26  ;;  %1206 = vrot.lane.b32.xlu1 %v13184_v2, %s15690_s27 }
  0x3c   : > { %1208 = vrot.lane.b32.xlu0 %v13192_v4, %s15690_s27  ;;  %1204 = vrot.lane.b32.xlu1 %v13188_v3, %s15690_s27 }
  0x40   : > { %1307 = vrot.lane.b32.xlu0 %v13184_v2, %s15688_s13  ;;  %1309 = vrot.lane.b32.xlu1 %v13192_v4, %s15688_s13 }
  0x44   : > { %1305 = vrot.lane.b32.xlu0 %v13188_v3, %s15688_s13  ;;  %1408 = vrot.lane.b32.xlu1 %v13184_v2, %s15686_s15 }
  0x48   : > { %1410 = vrot.lane.b32.xlu0 %v13192_v4, %s15686_s15  ;;  %1406 = vrot.lane.b32.xlu1 %v13188_v3, %s15686_s15 }
  0x4c   : > { %1618 = vrot.lane.b32.xlu0 %v13251_v5, %s15716_s16  ;;  %1620 = vrot.lane.b32.xlu1 %v13256_v6, %s15716_s16 }
  0x50   : > { %1616 = vrot.lane.b32.xlu0 %v13261_v7, %s15716_s16  ;;  %1718 = vrot.lane.b32.xlu1 %v13251_v5, %s15694_s25 }
  0x54   : > { %1720 = vrot.lane.b32.xlu0 %v13256_v6, %s15694_s25  ;;  %1716 = vrot.lane.b32.xlu1 %v13261_v7, %s15694_s25 }
  0x58   : > { %1818 = vrot.lane.b32.xlu0 %v13251_v5, %s15698_s22  ;;  %1820 = vrot.lane.b32.xlu1 %v13256_v6, %s15698_s22 }
  0x5c   : > { %1816 = vrot.lane.b32.xlu0 %v13261_v7, %s15698_s22  ;;  %1918 = vrot.lane.b32.xlu1 %v13251_v5, %s15696_s24 }
  0x60   : > { %1920 = vrot.lane.b32.xlu0 %v13256_v6, %s15696_s24  ;;  %1916 = vrot.lane.b32.xlu1 %v13261_v7, %s15696_s24 }
  0x64   : > { %2018 = vrot.lane.b32.xlu0 %v13251_v5, %s15692_s26  ;;  %2020 = vrot.lane.b32.xlu1 %v13256_v6, %s15692_s26 }
  0x68   : > { %2016 = vrot.lane.b32.xlu0 %v13261_v7, %s15692_s26  ;;  %2118 = vrot.lane.b32.xlu1 %v13251_v5, %s15690_s27 }
  0x6c   : > { %2120 = vrot.lane.b32.xlu0 %v13256_v6, %s15690_s27  ;;  %2116 = vrot.lane.b32.xlu1 %v13261_v7, %s15690_s27  ;;  %s13339_s27 = scalar_lea.vmem %s15678_s3, %s11678_s21  ;;  %s15718_s21 = smov 91  }
  0x70   : > { %2218 = vrot.lane.b32.xlu0 %v13251_v5, %s15688_s13  ;;  %2220 = vrot.lane.b32.xlu1 %v13256_v6, %s15688_s13 }
  0x74   : > { %2216 = vrot.lane.b32.xlu0 %v13261_v7, %s15688_s13  ;;  %2318 = vrot.lane.b32.xlu1 %v13251_v5, %s15686_s15 }
  0x78   : > { %2320 = vrot.lane.b32.xlu0 %v13256_v6, %s15686_s15  ;;  %2316 = vrot.lane.b32.xlu1 %v13261_v7, %s15686_s15  ;;  %s556_s15 = sadd.s32 4, %s13166_s12 }
  0x79   : > { %p559_p10 = scmp.lt.s32.totalorder %s556_s15, 17 }
  0x7b   : > { %s15769_s15 = smov (!%p559_p10, %s556_s15), 17 }
  0x7c   : > { %2527 = vrot.lane.b32.xlu0 %v13308_v8, %s15716_s16  ;;  %2529 = vrot.lane.b32.xlu1 %v13313_v9, %s15716_s16 }
  0x80   : > { %2525 = vrot.lane.b32.xlu0 %v13318_v10, %s15716_s16  ;;  %2627 = vrot.lane.b32.xlu1 %v13308_v8, %s15694_s25 }
  0x84   : > { %2629 = vrot.lane.b32.xlu0 %v13313_v9, %s15694_s25  ;;  %2625 = vrot.lane.b32.xlu1 %v13318_v10, %s15694_s25 }
  0x88   : > { %2727 = vrot.lane.b32.xlu0 %v13308_v8, %s15698_s22  ;;  %2729 = vrot.lane.b32.xlu1 %v13313_v9, %s15698_s22 }
  0x8c   : > { %2725 = vrot.lane.b32.xlu0 %v13318_v10, %s15698_s22  ;;  %2827 = vrot.lane.b32.xlu1 %v13308_v8, %s15696_s24 }
  0x8e   : > { %v617_v11 = vpop.permute.xlu0 %616  ;;  %v615_v12 = vpop.permute.xlu1 %614 }
  0x8f   : > { %v621_v17 = vsel %vm620_vm1, %v615_v12, %v617_v11 }
  0x90   : > { %2829 = vrot.lane.b32.xlu0 %v13313_v9, %s15696_s24  ;;  %2825 = vrot.lane.b32.xlu1 %v13318_v10, %s15696_s24 }
  0x92   : > { %v619_v13 = vpop.permute.xlu0 %618  ;;  %v803_v16 = vpop.permute.xlu1 %802 }
  0x93   : > { %12269 = vmatpush3.bf16.msra.mxu1 %v619_v13  ;;  %v622_v14 = vsel %vm620_vm1, %v617_v11, %v619_v13 }
  0x94   : > { %630 = vmatprep.subr.bf16.mxu0 %v622_v14  ;;  %2927 = vrot.lane.b32.xlu0 %v13308_v8, %s15692_s26 }
  0x95   : > { %631 = vmatpush1.bf16.msra.mxu0 %v621_v17  ;;  %12274 = vmatprep.subr.bf16.mxu1 %v15702_v0 }
  0x96   : > { %12271 = vmatmul.mubr.msk.bf16.vlgmr.msra.gmra.mrb[0].mxu1 %vm626_vm2, %v11685_v15  ;;  %717 = vmatprep.subr.bf16.mxu0 %v13184_v2  ;;  %v805_v18 = vpop.permute.xlu0 %804  ;;  %v801_v20 = vpop.permute.xlu1 %800 }
  0x97   : > { %12275 = vmatpush3.bf16.msra.mxu1 %v13192_v4  ;;  %12276 = vmatprep.mubr.msk.bf16.mxu1 %vm13081_vm0, %v15702_v0  ;;  %v808_v19 = vsel %vm806_vm3, %v803_v16, %v805_v18  ;;  %v807_v24 = vsel %vm806_vm3, %v801_v20, %v803_v16  ;;  %v11711_v4 = vld [vmem:[%s15681_s6 + $0x20] sm:$0xf]  ;;  %v13544_v20 = vld [vmem:[%s13214_s23 + $0x8] ss:$12 sps:$4 sm:$0xff]  }
  0x98   : > { %2925 = vrot.lane.b32.xlu0 %v13318_v10, %s15692_s26  ;;  %11689 = vmatmul.mubr.msk.bf16.vlgmr.msra.gmra.mrb[0].mxu0 %vm626_vm2, %v11685_v15  ;;  %v11714_v15 = vld [vmem:[%s15681_s6 + $0x24] sm:$0xf] }
  0x99   : > { %718 = vmatpush1.bf16.msra.mxu0 %v13188_v3  ;;  %12280 = vmatprep.subr.bf16.mxu1 %v15702_v0 }
  0x9a   : > { %815 = vmatprep.subr.bf16.mxu0 %v808_v19  ;;  %v904_v21 = vpop.permute.xlu0 %903  ;;  %749 = vmatprep.mubr.bf16.mxu0 %v15700_v1  ;;  %v906_v23 = vpop.permute.xlu1 %905 }
  0x9b   : > { %2929 = vrot.lane.b32.xlu1 %v13313_v9, %s15692_s26  ;;  %v909_v26 = vsel %vm907_vm4, %v904_v21, %v906_v23 }
  0x9c   : > { %3029 = vrot.lane.b32.xlu0 %v13313_v9, %s15717_s20 }
  0x9e   : > { %12277 = vmatmul.mubr.msk.bf16.vlgmr.msra.gmra.mrb[4].mxu1 %vm626_vm2, %v598_v22  ;;  %v902_v25 = vpop.permute.xlu0 %901  ;;  %v1005_v27 = vpop.permute.xlu1 %1004 }
  0x9f   : > { %12281 = vmatpush3.bf16.msra.mxu1 %v805_v18  ;;  %12282 = vmatprep.mubr.msk.bf16.mxu1 %vm13081_vm0, %v15702_v0  ;;  %v908_v30 = vsel %vm907_vm4, %v902_v25, %v904_v21 }
  0xa0   : > { %3127 = vrot.lane.b32.xlu0 %v13308_v8, %s15718_s21  ;;  %11691 = vmatmul.mubr.msk.bf16.vlgmr.msra.gmra.mrb[4].mxu0 %vm626_vm2, %v598_v22  ;;  %v11720_v22 = vld [vmem:[%s15681_s6 + $0x28] sm:$0xf] }
  0xa1   : > { %816 = vmatpush1.bf16.msra.mxu0 %v807_v24  ;;  %12286 = vmatprep.subr.bf16.mxu1 %v15702_v0 }
  0xa2   : > { %916 = vmatprep.subr.bf16.mxu0 %v909_v26  ;;  %847 = vmatprep.mubr.bf16.mxu0 %v15700_v1  ;;  %v1007_v28 = vpop.permute.xlu0 %1006  ;;  %v1003_v33 = vpop.permute.xlu1 %1002 }
  0xa3   : > { %3027 = vrot.lane.b32.xlu1 %v13308_v8, %s15717_s20  ;;  %v1010_v32 = vsel %vm1008_vm5, %v1005_v27, %v1007_v28  ;;  %v1009_v37 = vsel %vm1008_vm5, %v1003_v33, %v1005_v27 }
  0xa4   : > { %3125 = vrot.lane.b32.xlu0 %v13318_v10, %s15718_s21 }
  0xa6   : > { %12283 = vmatmul.mubr.msk.bf16.vlgmr.msra.gmra.mrb[8].mxu1 %vm626_vm2, %v11693_v29  ;;  %v1106_v31 = vpop.permute.xlu0 %1105  ;;  %v1108_v36 = vpop.permute.xlu1 %1107 }
  0xa7   : > { %12287 = vmatpush3.bf16.msra.mxu1 %v906_v23  ;;  %12288 = vmatprep.mubr.msk.bf16.mxu1 %vm13081_vm0, %v15702_v0  ;;  %v1111_v39 = vsel %vm1109_vm6, %v1106_v31, %v1108_v36 }
  0xa8   : > { %3229 = vrot.lane.b32.xlu0 %v13313_v9, %s15719_s17  ;;  %11694 = vmatmul.mubr.msk.bf16.vlgmr.msra.gmra.mrb[8].mxu0 %vm626_vm2, %v11693_v29  ;;  %v11723_v29 = vld [vmem:[%s15681_s6 + $0x2c] sm:$0xf] }
  0xa9   : > { %917 = vmatpush1.bf16.msra.mxu0 %v908_v30  ;;  %12292 = vmatprep.subr.bf16.mxu1 %v15702_v0 }
  0xaa   : > { %1017 = vmatprep.subr.bf16.mxu0 %v1010_v32  ;;  %948 = vmatprep.mubr.bf16.mxu0 %v15700_v1  ;;  %v1104_v34 = vpop.permute.xlu0 %1103  ;;  %v1207_v41 = vpop.permute.xlu1 %1206 }
  0xab   : > { %3025 = vrot.lane.b32.xlu1 %v13318_v10, %s15717_s20  ;;  %v1110_v44 = vsel %vm1109_vm6, %v1104_v34, %v1106_v31 }
  0xac   : > { %3359 = vrot.lane.b32.xlu0 %v13251_v5, %s15716_s16 }
  0xae   : > { %12289 = vmatmul.mubr.msk.bf16.vlgmr.msra.gmra.mrb[12].mxu1 %vm626_vm2, %v11696_v35  ;;  %v1209_v38 = vpop.permute.xlu0 %1208  ;;  %v1205_v47 = vpop.permute.xlu1 %1204 }
  0xaf   : > { %12293 = vmatpush3.bf16.msra.mxu1 %v1007_v28  ;;  %12294 = vmatprep.mubr.msk.bf16.mxu1 %vm13081_vm0, %v15702_v0  ;;  %v1212_v46 = vsel %vm1210_vm7, %v1207_v41, %v1209_v38  ;;  %v1211_v51 = vsel %vm1210_vm7, %v1205_v47, %v1207_v41 }
  0xb0   : > { %3357 = vrot.lane.b32.xlu0 %v13261_v7, %s15716_s16  ;;  %11697 = vmatmul.mubr.msk.bf16.vlgmr.msra.gmra.mrb[12].mxu0 %vm626_vm2, %v11696_v35  ;;  %v11726_v35 = vld [vmem:[%s15681_s6 + $0x30] sm:$0xf] }
  0xb1   : > { %1018 = vmatpush1.bf16.msra.mxu0 %v1009_v37  ;;  %12298 = vmatprep.subr.bf16.mxu1 %v15702_v0 }
  0xb2   : > { %1118 = vmatprep.subr.bf16.mxu0 %v1111_v39  ;;  %1049 = vmatprep.mubr.bf16.mxu0 %v15700_v1  ;;  %v1308_v42 = vpop.permute.xlu0 %1307  ;;  %v1310_v50 = vpop.permute.xlu1 %1309 }
  0xb3   : > { %3129 = vrot.lane.b32.xlu1 %v13313_v9, %s15718_s21  ;;  %v1313_v53 = vsel %vm1311_vm8, %v1308_v42, %v1310_v50 }
  0xb4   : > { %3544 = vrot.lane.b32.xlu0 %v13419_v40, %s15694_s25 }
  0xb6   : > { %12295 = vmatmul.mubr.msk.bf16.vlgmr.msra.gmra.mrb[16].mxu1 %vm626_vm2, %v11699_v43  ;;  %v1306_v45 = vpop.permute.xlu0 %1305  ;;  %v1409_v56 = vpop.permute.xlu1 %1408 }
  0xb7   : > { %12299 = vmatpush3.bf16.msra.mxu1 %v1108_v36  ;;  %12300 = vmatprep.mubr.msk.bf16.mxu1 %vm13081_vm0, %v15702_v0  ;;  %v1312_v57 = vsel %vm1311_vm8, %v1306_v45, %v1308_v42 }
  0xb8   : > { %3641 = vrot.lane.b32.xlu0 %v13251_v5, %s15698_s22  ;;  %11700 = vmatmul.mubr.msk.bf16.vlgmr.msra.gmra.mrb[16].mxu0 %vm626_vm2, %v11699_v43  ;;  %v11729_v43 = vld [vmem:[%s15681_s6 + $0x34] sm:$0xf] }
  0xb9   : > { %1119 = vmatpush1.bf16.msra.mxu0 %v1110_v44  ;;  %12304 = vmatprep.subr.bf16.mxu1 %v15702_v0 }
  0xba   : > { %1219 = vmatprep.subr.bf16.mxu0 %v1212_v46  ;;  %1150 = vmatprep.mubr.bf16.mxu0 %v15700_v1  ;;  %v1411_v48 = vpop.permute.xlu0 %1410  ;;  %v1407_v61 = vpop.permute.xlu1 %1406 }
  0xbb   : > { %3227 = vrot.lane.b32.xlu1 %v13308_v8, %s15719_s17  ;;  %v1414_v59 = vsel %vm1412_vm9, %v1409_v56, %v1411_v48  ;;  %v1413_v63 = vsel %vm1412_vm9, %v1407_v61, %v1409_v56  ;;  %v11735_v56 = vld [vmem:[%s15681_s6 + $0x3c] sm:$0xf] }
  0xbc   : > { %3639 = vrot.lane.b32.xlu0 %v13261_v7, %s15698_s22 }
  0xbe   : > { %12301 = vmatmul.mubr.msk.bf16.vlgmr.msra.gmra.mrb[20].mxu1 %vm626_vm2, %v11702_v49  ;;  %v13449_v52 = vpop.permute.xlu0 %1618  ;;  %v1621_v11 = vpop.permute.xlu1 %1620 }
  0xbf   : > { %12305 = vmatpush3.bf16.msra.mxu1 %v1209_v38  ;;  %12306 = vmatprep.mubr.msk.bf16.mxu1 %vm13081_vm0, %v15702_v0  ;;  %v1623_v13 = vsel %vm620_vm1, %v13449_v52, %v1621_v11 }
  0xc0   : > { %3742 = vrot.lane.b32.xlu0 %v13419_v40, %s15696_s24  ;;  %11703 = vmatmul.mubr.msk.bf16.vlgmr.msra.gmra.mrb[20].mxu0 %vm626_vm2, %v11702_v49  ;;  %v11732_v49 = vld [vmem:[%s15681_s6 + $0x38] sm:$0xf] }
  0xc1   : > { %1220 = vmatpush1.bf16.msra.mxu0 %v1211_v51  ;;  %12310 = vmatprep.subr.bf16.mxu1 %v15702_v0 }
  0xc2   : > { %1320 = vmatprep.subr.bf16.mxu0 %v1313_v53  ;;  %1251 = vmatprep.mubr.bf16.mxu0 %v15700_v1  ;;  %v1617_v54 = vpop.permute.xlu0 %1616 }
  0xc3   : > { %3225 = vrot.lane.b32.xlu1 %v13318_v10, %s15719_s17  ;;  %v1622_v16 = vsel %vm620_vm1, %v1617_v54, %v13449_v52  ;;  %v13664_v54 = vld [vmem:[%s13339_s27 + $0x4] ss:$12 sps:$4 sm:$0xff]  }
  0xc4   : > { %3839 = vrot.lane.b32.xlu0 %v13251_v5, %s15692_s26 }
  0xc6   : > { %12307 = vmatmul.mubr.msk.bf16.vlgmr.msra.gmra.mrb[24].mxu1 %vm626_vm2, %v11705_v55  ;;  %v13468_v58 = vpop.permute.xlu0 %1720 }
  0xc7   : > { %12311 = vmatpush3.bf16.msra.mxu1 %v1310_v50  ;;  %12312 = vmatprep.mubr.msk.bf16.mxu1 %vm13081_vm0, %v15702_v0 }
  0xc8   : > { %3837 = vrot.lane.b32.xlu0 %v13261_v7, %s15692_s26  ;;  %11706 = vmatmul.mubr.msk.bf16.vlgmr.msra.gmra.mrb[24].mxu0 %vm626_vm2, %v11705_v55 }
  0xc9   : > { %1321 = vmatpush1.bf16.msra.mxu0 %v1312_v57  ;;  %12316 = vmatprep.subr.bf16.mxu1 %v15702_v0  ;;  %v13678_v57 = vld [vmem:[%s13339_s27] ss:$12 sps:$4 sm:$0xff]  }
  0xca   : > { %1421 = vmatprep.subr.bf16.mxu0 %v1414_v59  ;;  %1352 = vmatprep.mubr.bf16.mxu0 %v15700_v1  ;;  %v13478_v60 = vpop.permute.xlu0 %1818 }
  0xcb   : > { %3361 = vrot.lane.b32.xlu1 %v13419_v40, %s15716_s16 }
  0xcc   : > { %3940 = vrot.lane.b32.xlu0 %v13419_v40, %s15717_s20 }
  0xce   : > { %12313 = vmatmul.mubr.msk.bf16.vlgmr.msra.gmra.mrb[28].mxu1 %vm626_vm2, %v11708_v62  ;;  %v13489_v2 = vpop.permute.xlu0 %1816 }
  0xcf   : > { %12317 = vmatpush3.bf16.msra.mxu1 %v1411_v48  ;;  %12318 = vmatprep.mubr.msk.bf16.mxu1 %vm13081_vm0, %v15702_v0  ;;  %v1822_v30 = vsel %vm907_vm4, %v13489_v2, %v13478_v60 }
  0xd0   : > { %4037 = vrot.lane.b32.xlu0 %v13251_v5, %s15718_s21  ;;  %11709 = vmatmul.mubr.msk.bf16.vlgmr.msra.gmra.mrb[28].mxu0 %vm626_vm2, %v11708_v62  ;;  %v13694_v62 = vld [vmem:[%s13339_s27 + $0x8] ss:$12 sps:$4 sm:$0xff]  }
  0xd1   : > { %1422 = vmatpush1.bf16.msra.mxu0 %v1413_v63  ;;  %1453 = vmatprep.mubr.bf16.mxu0 %v15700_v1 }
  0xd2   : > { %1530 = vmatprep.subr.bf16.mxu0 %v13251_v5  ;;  %12322 = vmatprep.subr.bf16.mxu1 %v15702_v0  ;;  %v13499_v3 = vpop.permute.xlu0 %1920 }
  0xd3   : > { %3542 = vrot.lane.b32.xlu1 %v13251_v5, %s15694_s25 }
  0xd4   : > { %4035 = vrot.lane.b32.xlu0 %v13261_v7, %s15718_s21 }
  0xd6   : > { %12319 = vmatmul.mubr.msk.bf16.vlgmr.msra.gmra.mrb[32].mxu1 %vm626_vm2, %v11711_v4  ;;  %v13509_v12 = vpop.permute.xlu0 %2018 }
  0xd7   : > { %12323 = vmatpush3.bf16.msra.mxu1 %v13256_v6  ;;  %12324 = vmatprep.mubr.msk.bf16.mxu1 %vm13081_vm0, %v15702_v0  ;;  %v1719_v6 = vpop.permute.xlu1 %1718 }
  0xd8   : > { %4138 = vrot.lane.b32.xlu0 %v13419_v40, %s15719_s17  ;;  %11712 = vmatmul.mubr.msk.bf16.vlgmr.msra.gmra.mrb[32].mxu0 %vm626_vm2, %v11711_v4  ;;  %v1723_v18 = vsel %vm806_vm3, %v1719_v6, %v13468_v58 }
  0xd9   : > { %1531 = vmatpush1.bf16.msra.mxu0 %v13261_v7  ;;  %12328 = vmatprep.subr.bf16.mxu1 %v15702_v0 }
  0xda   : > { %1630 = vmatprep.subr.bf16.mxu0 %v1623_v13  ;;  %1562 = vmatprep.mubr.bf16.mxu0 %v15700_v1  ;;  %v13522_v14 = vpop.permute.xlu0 %2016  ;;  %v11741_v13 = vld [vmem:[%s15681_s6 + $0x44] sm:$0xf] }
  0xdb   : > { %3540 = vrot.lane.b32.xlu1 %v13261_v7, %s15694_s25  ;;  %v1717_v19 = vpop.permute.xlu1 %1716  ;;  %v2022_v44 = vsel %vm1109_vm6, %v13522_v14, %v13509_v12 }
  0xdc   : > { %4343 = vrot.lane.b32.xlu0 %v13308_v8, %s15716_s16  ;;  %v1722_v24 = vsel %vm806_vm3, %v1717_v19, %v1719_v6 }
  0xde   : > { %12325 = vmatmul.mubr.msk.bf16.vlgmr.msra.gmra.mrb[36].mxu1 %vm626_vm2, %v11714_v15  ;;  %v13534_v17 = vpop.permute.xlu0 %2120 }
  0xdf   : > { %12329 = vmatpush3.bf16.msra.mxu1 %v1621_v11  ;;  %12330 = vmatprep.mubr.msk.bf16.mxu1 %vm13081_vm0, %v15702_v0  ;;  %v1821_v23 = vpop.permute.xlu1 %1820 }
  0xe0   : > { %4341 = vrot.lane.b32.xlu0 %v13318_v10, %s15716_s16  ;;  %11718 = vmatmul.mubr.msk.bf16.vlgmr.msra.gmra.mrb[36].mxu0 %vm626_vm2, %v11714_v15  ;;  %v1823_v26 = vsel %vm907_vm4, %v13478_v60, %v1821_v23 }
  0xe1   : > { %1631 = vmatpush1.bf16.msra.mxu0 %v1622_v16  ;;  %12334 = vmatprep.subr.bf16.mxu1 %v15702_v0  ;;  %v11744_v16 = vld [vmem:[%s15681_s6 + $0x48] sm:$0xf] }
  0xe2   : > { %1730 = vmatprep.subr.bf16.mxu0 %v1723_v18  ;;  %1662 = vmatprep.mubr.bf16.mxu0 %v15700_v1  ;;  %v13548_v21 = vpop.permute.xlu0 %2218 }
  0xe3   : > { %3643 = vrot.lane.b32.xlu1 %v13419_v40, %s15698_s22  ;;  %v1919_v27 = vpop.permute.xlu1 %1918 }
  0xe4   : > { %4444 = vrot.lane.b32.xlu0 %v13544_v20, %s15694_s25  ;;  %v1923_v32 = vsel %vm1008_vm5, %v1919_v27, %v13499_v3 }
  0xe6   : > { %12331 = vmatmul.mubr.msk.bf16.vlgmr.msra.gmra.mrb[40].mxu1 %vm626_vm2, %v11720_v22  ;;  %v13559_v25 = vpop.permute.xlu0 %2216 }
  0xe7   : > { %12335 = vmatpush3.bf16.msra.mxu1 %v13468_v58  ;;  %12336 = vmatprep.mubr.msk.bf16.mxu1 %vm13081_vm0, %v15702_v0  ;;  %v1917_v33 = vpop.permute.xlu1 %1916  ;;  %v2222_v59 = vsel %vm1311_vm8, %v13559_v25, %v13548_v21 }
  0xe8   : > { %4541 = vrot.lane.b32.xlu0 %v13308_v8, %s15698_s22  ;;  %11721 = vmatmul.mubr.msk.bf16.vlgmr.msra.gmra.mrb[40].mxu0 %vm626_vm2, %v11720_v22  ;;  %v1922_v37 = vsel %vm1008_vm5, %v1917_v33, %v1919_v27  ;;  %v11750_v22 = vld [vmem:[%s15681_s6 + $0x4c] sm:$0xf] }
  0xe9   : > { %1731 = vmatpush1.bf16.msra.mxu0 %v1722_v24  ;;  %12340 = vmatprep.subr.bf16.mxu1 %v15702_v0 }
  0xea   : > { %1830 = vmatprep.subr.bf16.mxu0 %v1823_v26  ;;  %1762 = vmatprep.mubr.bf16.mxu0 %v15700_v1  ;;  %v13571_v28 = vpop.permute.xlu0 %2320 }
  0xeb   : > { %3740 = vrot.lane.b32.xlu1 %v13251_v5, %s15696_s24  ;;  %v2021_v36 = vpop.permute.xlu1 %2020 }
  0xec   : > { %4539 = vrot.lane.b32.xlu0 %v13318_v10, %s15698_s22  ;;  %v2023_v39 = vsel %vm1109_vm6, %v13509_v12, %v2021_v36 }
  0xee   : > { %12337 = vmatmul.mubr.msk.bf16.vlgmr.msra.gmra.mrb[44].mxu1 %vm626_vm2, %v11723_v29  ;;  %v13584_v31 = vpop.permute.xlu0 %2527 }
  0xef   : > { %12341 = vmatpush3.bf16.msra.mxu1 %v1821_v23  ;;  %12342 = vmatprep.mubr.msk.bf16.mxu1 %vm13081_vm0, %v15702_v0  ;;  %v2119_v41 = vpop.permute.xlu1 %2118 }
  0xf0   : > { %4642 = vrot.lane.b32.xlu0 %v13544_v20, %s15696_s24  ;;  %11724 = vmatmul.mubr.msk.bf16.vlgmr.msra.gmra.mrb[44].mxu0 %vm626_vm2, %v11723_v29  ;;  %v2123_v46 = vsel %vm1210_vm7, %v2119_v41, %v13534_v17  ;;  %v11753_v29 = vld [vmem:[%s15681_s6 + $0x50] sm:$0xf] }
  0xf1   : > { %1831 = vmatpush1.bf16.msra.mxu0 %v1822_v30  ;;  %12346 = vmatprep.subr.bf16.mxu1 %v15702_v0 }
  0xf2   : > { %1930 = vmatprep.subr.bf16.mxu0 %v1923_v32  ;;  %1862 = vmatprep.mubr.bf16.mxu0 %v15700_v1  ;;  %v13595_v34 = vpop.permute.xlu0 %2525 }
  0xf3   : > { %3738 = vrot.lane.b32.xlu1 %v13261_v7, %s15696_s24  ;;  %v2117_v47 = vpop.permute.xlu1 %2116 }
  0xf4   : > { %4739 = vrot.lane.b32.xlu0 %v13308_v8, %s15692_s26  ;;  %v2122_v51 = vsel %vm1210_vm7, %v2117_v47, %v2119_v41  ;;  %v13843_v41 = vld [vmem:[%s13214_s23 + $0x8] ss:$12 sps:$4 sm:$0xff]  }
  0xf6   : > { %12343 = vmatmul.mubr.msk.bf16.vlgmr.msra.gmra.mrb[48].mxu1 %vm626_vm2, %v11726_v35  ;;  %v13606_v38 = vpop.permute.xlu0 %2629 }
  0xf7   : > { %12347 = vmatpush3.bf16.msra.mxu1 %v13499_v3  ;;  %12348 = vmatprep.mubr.msk.bf16.mxu1 %vm13081_vm0, %v15702_v0  ;;  %v2221_v50 = vpop.permute.xlu1 %2220  ;;  %v11738_v3 = vld [vmem:[%s15681_s6 + $0x40] sm:$0xf] }
  0xf8   : > { %4737 = vrot.lane.b32.xlu0 %v13318_v10, %s15692_s26  ;;  %11727 = vmatmul.mubr.msk.bf16.vlgmr.msra.gmra.mrb[48].mxu0 %vm626_vm2, %v11726_v35  ;;  %v2223_v53 = vsel %vm1311_vm8, %v13548_v21, %v2221_v50  ;;  %v11756_v35 = vld [vmem:[%s15681_s6 + $0x54] sm:$0xf] }
  0xf9   : > { %1931 = vmatpush1.bf16.msra.mxu0 %v1922_v37  ;;  %12352 = vmatprep.subr.bf16.mxu1 %v15702_v0 }
  0xfa   : > { %2030 = vmatprep.subr.bf16.mxu0 %v2023_v39  ;;  %1962 = vmatprep.mubr.bf16.mxu0 %v15700_v1  ;;  %v13618_v42 = vpop.permute.xlu0 %2727 }
  0xfb   : > { %3841 = vrot.lane.b32.xlu1 %v13419_v40, %s15692_s26  ;;  %v2319_v58 = vpop.permute.xlu1 %2318  ;;  %s12921_s26 = smul.u32 6, %s15769_s15 }
  0xfc   : > { %4840 = vrot.lane.b32.xlu0 %v13544_v20, %s15717_s20  ;;  %v2323_v61 = vsel %vm1412_vm9, %v2319_v58, %v13571_v28 }
  0xfd   : > { %s563_s19 = sadd.s32 %s12921_s26, %s13174_s14  ;;  %s15720_s26 = smov 110  }
  0xfe   : > { %12349 = vmatmul.mubr.msk.bf16.vlgmr.msra.gmra.mrb[52].mxu1 %vm626_vm2, %v11729_v43  ;;  %v13631_v45 = vpop.permute.xlu0 %2725  ;;  %s11680_s13 = sshll.u32 %s563_s19, 2  ;;  %s15722_s19 = smov 108  }
  0xff   : > { %12353 = vmatpush3.bf16.msra.mxu1 %v2021_v36  ;;  %12354 = vmatprep.mubr.msk.bf16.mxu1 %vm13081_vm0, %v15702_v0  ;;  %v2317_v2 = vpop.permute.xlu1 %2316  ;;  %s13727_s24 = scalar_lea.vmem %s15679_s4, %s11680_s13  ;;  %s15723_s13 = smov 126   ;;  %v2731_v30 = vsel %vm907_vm4, %v13631_v45, %v13618_v42 }
 0x100   : > { %4937 = vrot.lane.b32.xlu0 %v13308_v8, %s15718_s21  ;;  %11730 = vmatmul.mubr.msk.bf16.vlgmr.msra.gmra.mrb[52].mxu0 %vm626_vm2, %v11729_v43  ;;  %v2322_v4 = vsel %vm1412_vm9, %v2317_v2, %v2319_v58 }
 0x101   : > { %2031 = vmatpush1.bf16.msra.mxu0 %v2022_v44  ;;  %12358 = vmatprep.subr.bf16.mxu1 %v15702_v0  ;;  %v11759_v44 = vld [vmem:[%s15681_s6 + $0x58] sm:$0xf] }
 0x102   : > { %2130 = vmatprep.subr.bf16.mxu0 %v2123_v46  ;;  %2062 = vmatprep.mubr.bf16.mxu0 %v15700_v1  ;;  %v13642_v48 = vpop.permute.xlu0 %2829 }
 0x103   : > { %3938 = vrot.lane.b32.xlu1 %v13251_v5, %s15717_s20  ;;  %v2530_v6 = vpop.permute.xlu1 %2529 }
 0x104   : > { %4935 = vrot.lane.b32.xlu0 %v13318_v10, %s15718_s21  ;;  %v2532_v15 = vsel %vm620_vm1, %v13584_v31, %v2530_v6 }
 0x106   : > { %12355 = vmatmul.mubr.msk.bf16.vlgmr.msra.gmra.mrb[56].mxu1 %vm626_vm2, %v11732_v49  ;;  %v13653_v52 = vpop.permute.xlu0 %2927 }
 0x107   : > { %12359 = vmatpush3.bf16.msra.mxu1 %v13534_v17  ;;  %12360 = vmatprep.mubr.msk.bf16.mxu1 %vm13081_vm0, %v15702_v0  ;;  %v2531_v17 = vsel %vm620_vm1, %v13595_v34, %v13584_v31 }
 0x108   : > { %5038 = vrot.lane.b32.xlu0 %v13544_v20, %s15719_s17  ;;  %11733 = vmatmul.mubr.msk.bf16.vlgmr.msra.gmra.mrb[56].mxu0 %vm626_vm2, %v11732_v49 }
 0x109   : > { %2131 = vmatpush1.bf16.msra.mxu0 %v2122_v51  ;;  %12364 = vmatprep.subr.bf16.mxu1 %v15702_v0 }
 0x10a   : > { %2230 = vmatprep.subr.bf16.mxu0 %v2223_v53  ;;  %2162 = vmatprep.mubr.bf16.mxu0 %v15700_v1  ;;  %v13668_v55 = vpop.permute.xlu0 %2925 }
 0x10b   : > { %3936 = vrot.lane.b32.xlu1 %v13261_v7, %s15717_s20  ;;  %v2931_v45 = vsel %vm1109_vm6, %v13668_v55, %v13653_v52 }
 0x10c   : > { %5243 = vrot.lane.b32.xlu0 %v13664_v54, %s15716_s16 }
 0x10e   : > { %12361 = vmatmul.mubr.msk.bf16.vlgmr.msra.gmra.mrb[60].mxu1 %vm626_vm2, %v11735_v56  ;;  %v13684_v60 = vpop.permute.xlu0 %3029 }
 0x10f   : > { %12365 = vmatpush3.bf16.msra.mxu1 %v2221_v50  ;;  %12366 = vmatprep.mubr.msk.bf16.mxu1 %vm13081_vm0, %v15702_v0  ;;  %v11762_v50 = vld [vmem:[%s15681_s6 + $0x5c] sm:$0xf] }
 0x110   : > { %5241 = vrot.lane.b32.xlu0 %v13678_v57, %s15716_s16  ;;  %11736 = vmatmul.mubr.msk.bf16.vlgmr.msra.gmra.mrb[60].mxu0 %vm626_vm2, %v11735_v56 }
 0x111   : > { %2231 = vmatpush1.bf16.msra.mxu0 %v2222_v59  ;;  %12370 = vmatprep.subr.bf16.mxu1 %v15702_v0  ;;  %v11765_v59 = vld [vmem:[%s15681_s6 + $0x60] sm:$0xf] }
 0x112   : > { %2330 = vmatprep.subr.bf16.mxu0 %v2323_v61  ;;  %2262 = vmatprep.mubr.bf16.mxu0 %v15700_v1  ;;  %v13699_v63 = vpop.permute.xlu0 %3127 }
 0x113   : > { %4039 = vrot.lane.b32.xlu1 %v13419_v40, %s15718_s21 }
 0x114   : > { %5344 = vrot.lane.b32.xlu0 %v13694_v62, %s15694_s25 }
 0x116   : > { %12367 = vmatmul.mubr.msk.bf16.vlgmr.msra.gmra.mrb[64].mxu1 %vm626_vm2, %v11738_v3  ;;  %v13710_v11 = vpop.permute.xlu0 %3125 }
 0x117   : > { %12371 = vmatpush3.bf16.msra.mxu1 %v13571_v28  ;;  %12372 = vmatprep.mubr.msk.bf16.mxu1 %vm13081_vm0, %v15702_v0 }
 0x118   : > { %5441 = vrot.lane.b32.xlu0 %v13664_v54, %s15698_s22  ;;  %11739 = vmatmul.mubr.msk.bf16.vlgmr.msra.gmra.mrb[64].mxu0 %vm626_vm2, %v11738_v3  ;;  %s569_s22 = sadd.s32 5, %s13166_s12  ;;  %s15773_s12 = smov (!%p584_p12, %s13166_s12), 15 }
 0x119   : > { %2331 = vmatpush1.bf16.msra.mxu0 %v2322_v4  ;;  %2362 = vmatprep.mubr.bf16.mxu0 %v15700_v1  ;;  %v11768_v4 = vld [vmem:[%s15681_s6 + $0x64] sm:$0xf]  ;;  %p572_p11 = scmp.lt.s32.totalorder %s569_s22, 17  ;;  %s12923_s1 = smul.u32 3, %s15773_s12 }
 0x11a   : > { %2439 = vmatprep.subr.bf16.mxu0 %v13308_v8  ;;  %12376 = vmatprep.subr.bf16.mxu1 %v15702_v0  ;;  %v13722_v12 = vpop.permute.xlu0 %3229 }
 0x11b   : > { %4136 = vrot.lane.b32.xlu1 %v13251_v5, %s15719_s17  ;;  %v2628_v5 = vpop.permute.xlu1 %2627  ;;  %s15771_s22 = smov (!%p572_p11, %s569_s22), 17 }
 0x11c   : > { %5439 = vrot.lane.b32.xlu0 %v13678_v57, %s15720_s26  ;;  %v2632_v19 = vsel %vm806_vm3, %v2628_v5, %v13606_v38  ;;  %s12922_s25 = smul.u32 6, %s15771_s22 }
 0x11d   : > { %s12924_s22 = smul.u32 48, %s15761_s28 }
 0x11e   : > { %12373 = vmatmul.mubr.msk.bf16.vlgmr.msra.gmra.mrb[68].mxu1 %vm626_vm2, %v11741_v13  ;;  %v13737_v14 = vpop.permute.xlu0 %3359  ;;  %s576_s15 = sadd.s32 %s12922_s25, %s13174_s14 }
 0x11f   : > { %12377 = vmatpush3.bf16.msra.mxu1 %v13313_v9  ;;  %12378 = vmatprep.mubr.msk.bf16.mxu1 %vm13081_vm0, %v15702_v0  ;;  %s588_s28 = sadd.s32 %s12924_s22, %s12923_s1 }
 0x120   : > { %5542 = vrot.lane.b32.xlu0 %v13694_v62, %s15721_s0  ;;  %11742 = vmatmul.mubr.msk.bf16.vlgmr.msra.gmra.mrb[68].mxu0 %vm626_vm2, %v11741_v13  ;;  %s11684_s12 = sshll.u32 %s588_s28, 3 }
 0x121   : > { %2440 = vmatpush1.bf16.msra.mxu0 %v13318_v10  ;;  %12382 = vmatprep.subr.bf16.mxu1 %v15702_v0  ;;  %s15141_s22 = scalar_lea.vmem %s15683_s8, %s11684_s12 }
 0x122   : > { %2539 = vmatprep.subr.bf16.mxu0 %v2532_v15  ;;  %2471 = vmatprep.mubr.bf16.mxu0 %v15700_v1  ;;  %v13750_v9 = vpop.permute.xlu0 %3357 }
 0x123   : > { %4134 = vrot.lane.b32.xlu1 %v13261_v7, %s15719_s17  ;;  %v2626_v7 = vpop.permute.xlu1 %2625 }
 0x124   : > { %5639 = vrot.lane.b32.xlu0 %v13664_v54, %s15722_s19  ;;  %v2631_v24 = vsel %vm806_vm3, %v2626_v7, %v2628_v5  ;;  %v13949_v5 = vld [vmem:[%s13214_s23] ss:$12 sps:$4 sm:$0xff]  }
 0x126   : > { %12379 = vmatmul.mubr.msk.bf16.vlgmr.msra.gmra.mrb[72].mxu1 %vm626_vm2, %v11744_v16  ;;  %v13763_v18 = vpop.permute.xlu0 %3544 }
 0x127   : > { %12383 = vmatpush3.bf16.msra.mxu1 %v2530_v6  ;;  %12384 = vmatprep.mubr.msk.bf16.mxu1 %vm13081_vm0, %v15702_v0  ;;  %v2730_v23 = vpop.permute.xlu1 %2729 }
 0x128   : > { %5637 = vrot.lane.b32.xlu0 %v13678_v57, %s15722_s19  ;;  %11748 = vmatmul.mubr.msk.bf16.vlgmr.msra.gmra.mrb[72].mxu0 %vm626_vm2, %v11744_v16  ;;  %v2732_v26 = vsel %vm907_vm4, %v13618_v42, %v2730_v23 }
 0x129   : > { %2540 = vmatpush1.bf16.msra.mxu0 %v2531_v17  ;;  %12388 = vmatprep.subr.bf16.mxu1 %v15702_v0 }
 0x12a   : > { %2639 = vmatprep.subr.bf16.mxu0 %v2632_v19  ;;  %2571 = vmatprep.mubr.bf16.mxu0 %v15700_v1  ;;  %v13774_v21 = vpop.permute.xlu0 %3641 }
 0x12b   : > { %4345 = vrot.lane.b32.xlu1 %v13544_v20, %s15716_s16  ;;  %v2828_v27 = vpop.permute.xlu1 %2827 }
 0x12c   : > { %5740 = vrot.lane.b32.xlu0 %v13694_v62, %s15717_s20  ;;  %v2832_v32 = vsel %vm1008_vm5, %v2828_v27, %v13642_v48 }
 0x12e   : > { %12385 = vmatmul.mubr.msk.bf16.vlgmr.msra.gmra.mrb[76].mxu1 %vm626_vm2, %v11750_v22  ;;  %v13785_v25 = vpop.permute.xlu0 %3639 }
 0x12f   : > { %12389 = vmatpush3.bf16.msra.mxu1 %v13606_v38  ;;  %12390 = vmatprep.mubr.msk.bf16.mxu1 %vm13081_vm0, %v15702_v0  ;;  %v2826_v33 = vpop.permute.xlu1 %2825 }
 0x130   : > { %5837 = vrot.lane.b32.xlu0 %v13664_v54, %s15718_s21  ;;  %11751 = vmatmul.mubr.msk.bf16.vlgmr.msra.gmra.mrb[76].mxu0 %vm626_vm2, %v11750_v22  ;;  %v2831_v37 = vsel %vm1008_vm5, %v2826_v33, %v2828_v27 }
 0x131   : > { %2640 = vmatpush1.bf16.msra.mxu0 %v2631_v24  ;;  %12394 = vmatprep.subr.bf16.mxu1 %v15702_v0  ;;  %v11774_v24 = vld [vmem:[%s15681_s6 + $0x4] sm:$0xf] }
 0x132   : > { %2739 = vmatprep.subr.bf16.mxu0 %v2732_v26  ;;  %2671 = vmatprep.mubr.bf16.mxu0 %v15700_v1  ;;  %v13797_v28 = vpop.permute.xlu0 %3742 }
 0x133   : > { %4442 = vrot.lane.b32.xlu1 %v13308_v8, %s15723_s13  ;;  %v2930_v36 = vpop.permute.xlu1 %2929 }
 0x134   : > { %5835 = vrot.lane.b32.xlu0 %v13678_v57, %s15718_s21  ;;  %v2932_v39 = vsel %vm1109_vm6, %v13653_v52, %v2930_v36 }
 0x136   : > { %12391 = vmatmul.mubr.msk.bf16.vlgmr.msra.gmra.mrb[80].mxu1 %vm626_vm2, %v11753_v29  ;;  %v13810_v31 = vpop.permute.xlu0 %3839 }
 0x137   : > { %12395 = vmatpush3.bf16.msra.mxu1 %v2730_v23  ;;  %12396 = vmatprep.mubr.msk.bf16.mxu1 %vm13081_vm0, %v15702_v0  ;;  %v3028_v42 = vpop.permute.xlu1 %3027 }
 0x138   : > { %5938 = vrot.lane.b32.xlu0 %v13694_v62, %s15719_s17  ;;  %11754 = vmatmul.mubr.msk.bf16.vlgmr.msra.gmra.mrb[80].mxu0 %vm626_vm2, %v11753_v29  ;;  %v3032_v47 = vsel %vm1210_vm7, %v3028_v42, %v13684_v60 }
 0x139   : > { %2740 = vmatpush1.bf16.msra.mxu0 %v2731_v30  ;;  %12400 = vmatprep.subr.bf16.mxu1 %v15702_v0 }
 0x13a   : > { %2839 = vmatprep.subr.bf16.mxu0 %v2832_v32  ;;  %2771 = vmatprep.mubr.bf16.mxu0 %v15700_v1  ;;  %v13821_v34 = vpop.permute.xlu0 %3837  ;;  %v13980_v32 = vld [vmem:[%s13214_s23 + $0x4] ss:$12 sps:$4 sm:$0xff]  }
 0x13b   : > { %4440 = vrot.lane.b32.xlu1 %v13318_v10, %s15723_s13 }
 0x13c   : > { %6063 = vrot.lane.b32.xlu0 %v13308_v8, %s15716_s16 }
 0x13e   : > { %12397 = vmatmul.mubr.msk.bf16.vlgmr.msra.gmra.mrb[84].mxu1 %vm626_vm2, %v11756_v35  ;;  %v13832_v38 = vpop.permute.xlu0 %3940 }
 0x13f   : > { %12401 = vmatpush3.bf16.msra.mxu1 %v13642_v48  ;;  %12402 = vmatprep.mubr.msk.bf16.mxu1 %vm13081_vm0, %v15702_v0  ;;  %v3026_v48 = vpop.permute.xlu1 %3025 }
 0x140   : > { %6061 = vrot.lane.b32.xlu0 %v13318_v10, %s15716_s16  ;;  %11757 = vmatmul.mubr.msk.bf16.vlgmr.msra.gmra.mrb[84].mxu0 %vm626_vm2, %v11756_v35  ;;  %v3031_v52 = vsel %vm1210_vm7, %v3026_v48, %v3028_v42 }
 0x141   : > { %2840 = vmatpush1.bf16.msra.mxu0 %v2831_v37  ;;  %12406 = vmatprep.subr.bf16.mxu1 %v15702_v0 }
 0x142   : > { %2939 = vmatprep.subr.bf16.mxu0 %v2932_v39  ;;  %2871 = vmatprep.mubr.bf16.mxu0 %v15700_v1  ;;  %v13847_v43 = vpop.permute.xlu0 %4037  ;;  %v13013_v39 = vld [vmem:[%s13207_s18] ss:$12 sps:$4 sm:$0xff]  }
 0x143   : > { %4543 = vrot.lane.b32.xlu1 %v13544_v20, %s15720_s26  ;;  %v3130_v51 = vpop.permute.xlu1 %3129 }
 0x144   : > { %6248 = vrot.lane.b32.xlu0 %v13843_v41, %s15723_s13  ;;  %v3132_v55 = vsel %vm1311_vm8, %v13699_v63, %v3130_v51 }
 0x146   : > { %12403 = vmatmul.mubr.msk.bf16.vlgmr.msra.gmra.mrb[88].mxu1 %vm626_vm2, %v11759_v44  ;;  %v13860_v46 = vpop.permute.xlu0 %4035 }
 0x147   : > { %12407 = vmatpush3.bf16.msra.mxu1 %v2930_v36  ;;  %12408 = vmatprep.mubr.msk.bf16.mxu1 %vm13081_vm0, %v15702_v0  ;;  %v3228_v56 = vpop.permute.xlu1 %3227  ;;  %v13995_v36 = vld [vmem:[%s13339_s27 + $0x8] ss:$12 sps:$4 sm:$0xff]  }
 0x148   : > { %6345 = vrot.lane.b32.xlu0 %v13308_v8, %s15720_s26  ;;  %11760 = vmatmul.mubr.msk.bf16.vlgmr.msra.gmra.mrb[88].mxu0 %vm626_vm2, %v11759_v44  ;;  %v3232_v2 = vsel %vm1412_vm9, %v3228_v56, %v13722_v12 }
 0x149   : > { %2940 = vmatpush1.bf16.msra.mxu0 %v2931_v45  ;;  %12412 = vmatprep.subr.bf16.mxu1 %v15702_v0 }
 0x14a   : > { %3039 = vmatprep.subr.bf16.mxu0 %v3032_v47  ;;  %2971 = vmatprep.mubr.bf16.mxu0 %v15700_v1  ;;  %v13871_v49 = vpop.permute.xlu0 %4138 }
 0x14b   : > { %4640 = vrot.lane.b32.xlu1 %v13308_v8, %s15721_s0  ;;  %v3226_v3 = vpop.permute.xlu1 %3225 }
 0x14c   : > { %6343 = vrot.lane.b32.xlu0 %v13318_v10, %s15720_s26 }
 0x14e   : > { %12409 = vmatmul.mubr.msk.bf16.vlgmr.msra.gmra.mrb[92].mxu1 %vm626_vm2, %v11762_v50  ;;  %v13882_v53 = vpop.permute.xlu0 %4343 }
 0x14f   : > { %12413 = vmatpush3.bf16.msra.mxu1 %v13684_v60  ;;  %12414 = vmatprep.mubr.msk.bf16.mxu1 %vm13081_vm0, %v15702_v0  ;;  %v3131_v60 = vsel %vm1311_vm8, %v13710_v11, %v13699_v63  ;;  %v3231_v11 = vsel %vm1412_vm9, %v3226_v3, %v3228_v56 }
 0x150   : > { %6446 = vrot.lane.b32.xlu0 %v13843_v41, %s15721_s0  ;;  %11763 = vmatmul.mubr.msk.bf16.vlgmr.msra.gmra.mrb[92].mxu0 %vm626_vm2, %v11762_v50  ;;  %v3342_v50 = vld [vmem:[%s15681_s6] sm:$0xf] }
 0x151   : > { %3040 = vmatpush1.bf16.msra.mxu0 %v3031_v52  ;;  %12418 = vmatprep.subr.bf16.mxu1 %v15702_v0 }
 0x152   : > { %3139 = vmatprep.subr.bf16.mxu0 %v3132_v55  ;;  %3071 = vmatprep.mubr.bf16.mxu0 %v15700_v1  ;;  %v13894_v58 = vpop.permute.xlu0 %4341 }
 0x153   : > { %4638 = vrot.lane.b32.xlu1 %v13318_v10, %s15721_s0 }
 0x154   : > { %6543 = vrot.lane.b32.xlu0 %v13308_v8, %s15722_s19 }
 0x156   : > { %12415 = vmatmul.mubr.msk.bf16.vlgmr.msra.gmra.mrb[96].mxu1 %vm626_vm2, %v11765_v59  ;;  %v13907_v61 = vpop.permute.xlu0 %4444 }
 0x157   : > { %12419 = vmatpush3.bf16.msra.mxu1 %v3130_v51  ;;  %12420 = vmatprep.mubr.msk.bf16.mxu1 %vm13081_vm0, %v15702_v0 }
 0x158   : > { %6541 = vrot.lane.b32.xlu0 %v13318_v10, %s15722_s19  ;;  %11766 = vmatmul.mubr.msk.bf16.vlgmr.msra.gmra.mrb[96].mxu0 %vm626_vm2, %v11765_v59  ;;  %v3362_v10 = vpop.permute.xlu1 %3361 }
 0x159   : > { %3140 = vmatpush1.bf16.msra.mxu0 %v3131_v60  ;;  %12424 = vmatprep.subr.bf16.mxu1 %v15702_v0  ;;  %v3364_v6 = vsel %vm620_vm1, %v13737_v14, %v3362_v10 }
 0x15a   : > { %3239 = vmatprep.subr.bf16.mxu0 %v3232_v2  ;;  %3171 = vmatprep.mubr.bf16.mxu0 %v15700_v1  ;;  %v13918_v63 = vpop.permute.xlu0 %4541 }
 0x15b   : > { %4741 = vrot.lane.b32.xlu1 %v13544_v20, %s15722_s19 }
 0x15c   : > { %6644 = vrot.lane.b32.xlu0 %v13843_v41, %s15717_s20  ;;  %v3543_v17 = vpop.permute.xlu1 %3542 }
 0x15d   : > { %v3547_v35 = vsel %vm806_vm3, %v3543_v17, %v13763_v18 }
 0x15e   : > { %12421 = vmatmul.mubr.msk.bf16.vlgmr.msra.gmra.mrb[100].mxu1 %vm626_vm2, %v11768_v4  ;;  %v13929_v13 = vpop.permute.xlu0 %4539 }
 0x15f   : > { %12425 = vmatpush3.bf16.msra.mxu1 %v13722_v12  ;;  %4838 = vrot.lane.b32.xlu1 %v13308_v8, %s15717_s20  ;;  %v11771_v12 = vld [vmem:[%s15681_s6 + $0x68] sm:$0xf] }
 0x160   : > { %6741 = vrot.lane.b32.xlu0 %v13308_v8, %s15718_s21  ;;  %11769 = vmatmul.mubr.msk.bf16.vlgmr.msra.gmra.mrb[100].mxu0 %vm626_vm2, %v11768_v4  ;;  %v3363_v8 = vsel %vm620_vm1, %v13750_v9, %v13737_v14  ;;  %v13011_v14 = vld [vmem:[%s13207_s18 + $0x4] ss:$12 sps:$4 sm:$0xff]   ;;  %v3541_v30 = vpop.permute.xlu1 %3540  ;;  %s11682_s18 = sshll.u32 %s576_s15, 2 }
 0x161   : > { %3240 = vmatpush1.bf16.msra.mxu0 %v3231_v11  ;;  %12426 = vmatprep.mubr.msk.bf16.mxu1 %vm13081_vm0, %v15702_v0  ;;  %v3546_v60 = vsel %vm806_vm3, %v3541_v30, %v3543_v17  ;;  %s14182_s14 = scalar_lea.vmem %s15680_s5, %s11682_s18 }
 0x162   : > { %3371 = vmatprep.subr.bf16.mxu0 %v3364_v6  ;;  %12430 = vmatprep.subr.bf16.mxu1 %v15702_v0  ;;  %v13942_v15 = vpop.permute.xlu0 %4642 }
 0x163   : > { %3271 = vmatprep.mubr.bf16.mxu0 %v15700_v1  ;;  %4836 = vrot.lane.b32.xlu1 %v13949_v5, %s15717_s20 }
 0x164   : > { %6739 = vrot.lane.b32.xlu0 %v13949_v5, %s15718_s21  ;;  %v3644_v42 = vpop.permute.xlu1 %3643 }
 0x165   : > { %v3646_v4 = vsel %vm907_vm4, %v13774_v21, %v3644_v42 }
 0x166   : > { %12427 = vmatmul.mubr.msk.bf16.vlgmr.msra.gmra.mrb[104].mxu1 %vm626_vm2, %v11771_v12  ;;  %v13959_v16 = vpop.permute.xlu0 %4739 }
 0x167   : > { %12431 = vmatpush3.bf16.msra.mxu1 %v3362_v10  ;;  %12432 = vmatprep.mubr.msk.bf16.mxu1 %vm13081_vm0, %v15702_v0 }
 0x168   : > { %6842 = vrot.lane.b32.xlu0 %v13843_v41, %s15719_s17  ;;  %11772 = vmatmul.mubr.msk.bf16.vlgmr.msra.gmra.mrb[104].mxu0 %vm626_vm2, %v11771_v12  ;;  %v3741_v10 = vpop.permute.xlu1 %3740 }
 0x169   : > { %3372 = vmatpush1.bf16.msra.mxu0 %v3363_v8  ;;  %v705_v19 = vpop.f32.mrb[0].mxu1  ;;  %3403 = vmatprep.mubr.bf16.mxu0 %v15700_v1 }
 0x16a   : > { %v12272_v7 = vpop.f32.mrb[1].mxu1  ;;  %3458 = vmatprep.subr.bf16.mxu0 %v13011_v14  ;;  %4939 = vrot.lane.b32.xlu1 %v13544_v20, %s15718_s21  ;;  %v13970_v9 = vpop.permute.xlu0 %4737 }
 0x16b   : > { %v664_v22 = vpop.f32.mrb[0].mxu0  ;;  %v708_v23 = vpop.f32.mrb[2].mxu1  ;;  %12436 = vmatprep.subr.bf16.mxu1 %v15702_v0 }
 0x16c   : > { %7047 = vrot.lane.b32.xlu0 %v13664_v54, %s15716_s16  ;;  %v666_v26 = vpop.f32.mrb[1].mxu0  ;;  %v12273_v27 = vpop.f32.mrb[3].mxu1 }
 0x16d   : > { %v668_v29 = vpop.f32.mrb[2].mxu0  ;;  %v3645_v27 = vsel %vm907_vm4, %v13785_v25, %v13774_v21 }
 0x16e   : > { %v669_v20 = vpop.f32.mrb[3].mxu0  ;;  %12433 = vmatmul.mubr.msk.bf16.vlgmr.msra.gmra.mrb[108].mxu1 %vm626_vm2, %v11774_v24  ;;  %5036 = vrot.lane.b32.xlu1 %v13980_v32, %s15719_s17  ;;  %v13984_v33 = vpop.permute.xlu0 %4840 }
 0x16f   : > { %12437 = vmatpush3.bf16.msra.mxu1 %v13419_v40  ;;  %12438 = vmatprep.mubr.msk.bf16.mxu1 %vm13081_vm0, %v15702_v0  ;;  %v3745_v20 = vsel %vm1008_vm5, %v3741_v10, %v13797_v28 }
 0x170   : > { %7045 = vrot.lane.b32.xlu0 %v13678_v57, %s15716_s16  ;;  %11778 = vmatmul.mubr.msk.bf16.vlgmr.msra.gmra.mrb[108].mxu0 %vm626_vm2, %v11774_v24 }
 0x171   : > { %v792_v37 = vpop.f32.mrb[4].mxu1  ;;  %3459 = vmatpush1.bf16.msra.mxu0 %v13013_v39  ;;  %12442 = vmatprep.subr.bf16.mxu1 %v15702_v0 }
 0x172   : > { %v793_v40 = vadd.f32 %v792_v37, %v705_v19  ;;  %v12278_v44 = vpop.f32.mrb[5].mxu1  ;;  %3554 = vmatprep.subr.bf16.mxu0 %v3547_v35  ;;  %3490 = vmatprep.mubr.bf16.mxu0 %v15700_v1  ;;  %v14000_v45 = vpop.permute.xlu0 %4937  ;;  %v11782_v19 = vld [vmem:[%s15681_s6 + $0x8] sm:$0xf] }
 0x173   : > { %v751_v47 = vpop.f32.mrb[4].mxu0  ;;  %v795_v48 = vpop.f32.mrb[6].mxu1  ;;  %5034 = vrot.lane.b32.xlu1 %v13949_v5, %s15719_s17  ;;  %v11785_v44 = vld [vmem:[%s15681_s6 + $0xc] sm:$0xf] }
 0x174   : > { %v752_v51 = vadd.f32 %v751_v47, %v664_v22  ;;  %7148 = vrot.lane.b32.xlu0 %v13995_v36, %s15723_s13  ;;  %v753_v52 = vpop.f32.mrb[5].mxu0  ;;  %v12279_v55 = vpop.f32.mrb[7].mxu1 }
 0x175   : > { %v754_v56 = vadd.f32 %v753_v52, %v666_v26  ;;  %v755_v59 = vpop.f32.mrb[6].mxu0  ;;  %v3739_v26 = vpop.permute.xlu1 %3738 }
 0x176   : > { %v756_v2 = vpop.f32.mrb[7].mxu0  ;;  %12439 = vmatmul.mubr.msk.bf16.vlgmr.msra.gmra.mrb[112].mxu1 %vm626_vm2, %v3342_v50  ;;  %v14011_v3 = vpop.permute.xlu0 %4935  ;;  %v3744_v55 = vsel %vm1008_vm5, %v3739_v26, %v3741_v10 }
 0x177   : > { %12443 = vmatpush3.bf16.msra.mxu1 %v13763_v18  ;;  %12444 = vmatprep.mubr.msk.bf16.mxu1 %vm13081_vm0, %v15702_v0 }
 0x178   : > { %7245 = vrot.lane.b32.xlu0 %v13664_v54, %s15720_s26  ;;  %11780 = vmatmul.mubr.msk.bf16.vlgmr.msra.gmra.mrb[112].mxu0 %vm626_vm2, %v3342_v50 }
 0x179   : > { %3555 = vmatpush1.bf16.msra.mxu0 %v3546_v60  ;;  %v890_v11 = vpop.f32.mrb[8].mxu1  ;;  %12448 = vmatprep.subr.bf16.mxu1 %v15702_v0  ;;  %v3842_v21 = vpop.permute.xlu1 %3841 }
 0x17a   : > { %v898_v6 = vadd.f32 %v890_v11, %v793_v40  ;;  %v12284_v12 = vpop.f32.mrb[9].mxu1  ;;  %3653 = vmatprep.subr.bf16.mxu0 %v3646_v4  ;;  %3586 = vmatprep.mubr.bf16.mxu0 %v15700_v1  ;;  %v14023_v18 = vpop.permute.xlu0 %5038  ;;  %v3844_v60 = vsel %vm1109_vm6, %v13810_v31, %v3842_v21 }
 0x17b   : > { %v849_v8 = vpop.f32.mrb[8].mxu0  ;;  %v893_v17 = vpop.f32.mrb[10].mxu1  ;;  %5245 = vrot.lane.b32.xlu1 %v13694_v62, %s15716_s16 }
 0x17c   : > { %v896_v7 = vadd.f32 %v849_v8, %v752_v51  ;;  %7243 = vrot.lane.b32.xlu0 %v13678_v57, %s15720_s26  ;;  %v851_v14 = vpop.f32.mrb[9].mxu0  ;;  %v12285_v22 = vpop.f32.mrb[11].mxu1  ;;  %v11788_v8 = vld [vmem:[%s15681_s6 + $0x10] sm:$0xf] }
 0x17d   : > { %v897_v23 = vadd.f32 %v851_v14, %v754_v56  ;;  %v853_v24 = vpop.f32.mrb[10].mxu0  ;;  %v3939_v2 = vpop.permute.xlu1 %3938 }
 0x17e   : > { %v854_v29 = vpop.f32.mrb[11].mxu0  ;;  %12445 = vmatmul.mubr.msk.bf16.vlgmr.msra.gmra.mrb[116].mxu1 %vm626_vm2, %v11782_v19  ;;  %v14036_v30 = vpop.permute.xlu0 %5243  ;;  %v3843_v24 = vsel %vm1109_vm6, %v13821_v34, %v13810_v31 }
 0x17f   : > { %12449 = vmatpush3.bf16.msra.mxu1 %v3644_v42  ;;  %12450 = vmatprep.mubr.msk.bf16.mxu1 %vm13081_vm0, %v15702_v0  ;;  %v3943_v29 = vsel %vm1210_vm7, %v3939_v2, %v13832_v38 }
 0x180   : > { %7346 = vrot.lane.b32.xlu0 %v13995_v36, %s15721_s0  ;;  %11783 = vmatmul.mubr.msk.bf16.vlgmr.msra.gmra.mrb[116].mxu0 %vm626_vm2, %v11782_v19 }
 0x181   : > { %3654 = vmatpush1.bf16.msra.mxu0 %v3645_v27  ;;  %v991_v35 = vpop.f32.mrb[12].mxu1  ;;  %12454 = vmatprep.subr.bf16.mxu1 %v15702_v0 }
 0x182   : > { %v999_v25 = vadd.f32 %v991_v35, %v898_v6  ;;  %v12290_v37 = vpop.f32.mrb[13].mxu1  ;;  %3752 = vmatprep.subr.bf16.mxu0 %v3745_v20  ;;  %3685 = vmatprep.mubr.bf16.mxu0 %v15700_v1  ;;  %v14047_v39 = vpop.permute.xlu0 %5241 }
 0x183   : > { %v950_v42 = vpop.f32.mrb[12].mxu0  ;;  %v994_v40 = vpop.f32.mrb[14].mxu1  ;;  %5342 = vrot.lane.b32.xlu1 %v13664_v54, %s15723_s13 }
 0x184   : > { %v997_v47 = vadd.f32 %v950_v42, %v896_v7  ;;  %7443 = vrot.lane.b32.xlu0 %v13664_v54, %s15722_s19  ;;  %v952_v48 = vpop.f32.mrb[13].mxu0  ;;  %v12291_v50 = vpop.f32.mrb[15].mxu1  ;;  %v11791_v42 = vld [vmem:[%s15681_s6 + $0x14] sm:$0xf] }
 0x185   : > { %v998_v51 = vadd.f32 %v952_v48, %v897_v23  ;;  %v954_v52 = vpop.f32.mrb[14].mxu0  ;;  %v3937_v23 = vpop.permute.xlu1 %3936 }
 0x186   : > { %v955_v56 = vpop.f32.mrb[15].mxu0  ;;  %12451 = vmatmul.mubr.msk.bf16.vlgmr.msra.gmra.mrb[120].mxu1 %vm626_vm2, %v11785_v44  ;;  %v14058_v59 = vpop.permute.xlu0 %5344 }
 0x187   : > { %12455 = vmatpush3.bf16.msra.mxu1 %v13797_v28  ;;  %12456 = vmatprep.mubr.msk.bf16.mxu1 %vm13081_vm0, %v15702_v0 }
 0x188   : > { %7441 = vrot.lane.b32.xlu0 %v13678_v57, %s15722_s19  ;;  %11786 = vmatmul.mubr.msk.bf16.vlgmr.msra.gmra.mrb[120].mxu0 %vm626_vm2, %v11785_v44 }
 0x189   : > { %3753 = vmatpush1.bf16.msra.mxu0 %v3744_v55  ;;  %v1092_v4 = vpop.f32.mrb[16].mxu1  ;;  %12460 = vmatprep.subr.bf16.mxu1 %v15702_v0  ;;  %v4040_v31 = vpop.permute.xlu1 %4039 }
 0x18a   : > { %v1100_v10 = vadd.f32 %v1092_v4, %v999_v25  ;;  %v12296_v11 = vpop.f32.mrb[17].mxu1  ;;  %3851 = vmatprep.subr.bf16.mxu0 %v3844_v60  ;;  %3784 = vmatprep.mubr.bf16.mxu0 %v15700_v1  ;;  %v14070_v28 = vpop.permute.xlu0 %5441  ;;  %v4042_v56 = vsel %vm1311_vm8, %v13847_v43, %v4040_v31  ;;  %v14116_v60 = vld [vmem:[%s13727_s24 + $0x4] ss:$12 sps:$4 sm:$0xff]  }
 0x18b   : > { %v1051_v6 = vpop.f32.mrb[16].mxu0  ;;  %v1095_v12 = vpop.f32.mrb[18].mxu1  ;;  %5340 = vrot.lane.b32.xlu1 %v13678_v57, %s15723_s13 }
 0x18c   : > { %v1098_v17 = vadd.f32 %v1051_v6, %v997_v47  ;;  %7544 = vrot.lane.b32.xlu0 %v13995_v36, %s15717_s20  ;;  %v1053_v19 = vpop.f32.mrb[17].mxu0  ;;  %v12297_v7 = vpop.f32.mrb[19].mxu1  ;;  %v11794_v12 = vld [vmem:[%s15681_s6 + $0x18] sm:$0xf] }
 0x18d   : > { %v1099_v14 = vadd.f32 %v1053_v19, %v998_v51  ;;  %v1055_v22 = vpop.f32.mrb[18].mxu0  ;;  %v3942_v51 = vsel %vm1210_vm7, %v3937_v23, %v3939_v2  ;;  %v14132_v7 = vld [vmem:[%s13727_s24] ss:$12 sps:$4 sm:$0xff]   ;;  %v4041_v23 = vsel %vm1311_vm8, %v13860_v46, %v13847_v43 }
 0x18e   : > { %v1056_v26 = vpop.f32.mrb[19].mxu0  ;;  %12457 = vmatmul.mubr.msk.bf16.vlgmr.msra.gmra.mrb[124].mxu1 %vm626_vm2, %v11788_v8  ;;  %v14083_v27 = vpop.permute.xlu0 %5439 }
 0x18f   : > { %12461 = vmatpush3.bf16.msra.mxu1 %v3842_v21  ;;  %12462 = vmatprep.mubr.msk.bf16.mxu1 %vm13081_vm0, %v15702_v0 }
 0x190   : > { %7641 = vrot.lane.b32.xlu0 %v13664_v54, %s15718_s21  ;;  %11789 = vmatmul.mubr.msk.bf16.vlgmr.msra.gmra.mrb[124].mxu0 %vm626_vm2, %v11788_v8 }
 0x191   : > { %3852 = vmatpush1.bf16.msra.mxu0 %v3843_v24  ;;  %v1193_v20 = vpop.f32.mrb[20].mxu1  ;;  %12466 = vmatprep.subr.bf16.mxu1 %v15702_v0 }
 0x192   : > { %v1201_v34 = vadd.f32 %v1193_v20, %v1100_v10  ;;  %v12302_v35 = vpop.f32.mrb[21].mxu1  ;;  %3950 = vmatprep.subr.bf16.mxu0 %v3943_v29  ;;  %3883 = vmatprep.mubr.bf16.mxu0 %v15700_v1  ;;  %v14094_v21 = vpop.permute.xlu0 %5542  ;;  %v14148_v20 = vld [vmem:[%s13727_s24 + $0x8] ss:$12 sps:$4 sm:$0xff]  }
 0x193   : > { %v1152_v25 = vpop.f32.mrb[20].mxu0  ;;  %v1196_v37 = vpop.f32.mrb[22].mxu1  ;;  %5443 = vrot.lane.b32.xlu1 %v13694_v62, %s15720_s26 }
 0x194   : > { %v1199_v40 = vadd.f32 %v1152_v25, %v1098_v17  ;;  %7639 = vrot.lane.b32.xlu0 %v13678_v57, %s15718_s21  ;;  %v1154_v44 = vpop.f32.mrb[21].mxu0  ;;  %v12303_v47 = vpop.f32.mrb[23].mxu1 }
 0x195   : > { %v1200_v48 = vadd.f32 %v1154_v44, %v1099_v14  ;;  %v1156_v50 = vpop.f32.mrb[22].mxu0 }
 0x196   : > { %v1157_v52 = vpop.f32.mrb[23].mxu0  ;;  %12463 = vmatmul.mubr.msk.bf16.vlgmr.msra.gmra.mrb[128].mxu1 %vm626_vm2, %v11791_v42  ;;  %v14105_v55 = vpop.permute.xlu0 %5639 }
 0x197   : > { %12467 = vmatpush3.bf16.msra.mxu1 %v13832_v38  ;;  %5540 = vrot.lane.b32.xlu1 %v13664_v54, %s15721_s0  ;;  %v4137_v38 = vpop.permute.xlu1 %4136 }
 0x198   : > { %7742 = vrot.lane.b32.xlu0 %v13995_v36, %s15719_s17  ;;  %11792 = vmatmul.mubr.msk.bf16.vlgmr.msra.gmra.mrb[128].mxu0 %vm626_vm2, %v11791_v42  ;;  %v4141_v29 = vsel %vm1412_vm9, %v4137_v38, %v13871_v49  ;;  %v11797_v42 = vld [vmem:[%s15681_s6 + $0x1c] sm:$0xf] }
 0x199   : > { %3951 = vmatpush1.bf16.msra.mxu0 %v3942_v51  ;;  %v1294_v2 = vpop.f32.mrb[24].mxu1  ;;  %12468 = vmatprep.mubr.msk.bf16.mxu1 %vm13081_vm0, %v15702_v0 }
 0x19a   : > { %v1302_v4 = vadd.f32 %v1294_v2, %v1201_v34  ;;  %v12308_v10 = vpop.f32.mrb[25].mxu1  ;;  %4049 = vmatprep.subr.bf16.mxu0 %v4042_v56  ;;  %12472 = vmatprep.subr.bf16.mxu1 %v15702_v0  ;;  %v14121_v11 = vpop.permute.xlu0 %5637 }
 0x19b   : > { %v1253_v6 = vpop.f32.mrb[24].mxu0  ;;  %v1297_v36 = vpop.f32.mrb[26].mxu1  ;;  %3982 = vmatprep.mubr.bf16.mxu0 %v15700_v1  ;;  %5538 = vrot.lane.b32.xlu1 %v13678_v57, %s15721_s0 }
 0x19c   : > { %v1300_v8 = vadd.f32 %v1253_v6, %v1199_v40  ;;  %7947 = vrot.lane.b32.xlu0 %v14116_v60, %s15716_s16  ;;  %v1255_v17 = vpop.f32.mrb[25].mxu0  ;;  %v12309_v19 = vpop.f32.mrb[27].mxu1  ;;  %v11800_v36 = vld [vmem:[%s15681_s6 + $0x20] sm:$0xf] }
 0x19d   : > { %v1301_v14 = vadd.f32 %v1255_v17, %v1200_v48  ;;  %v1257_v22 = vpop.f32.mrb[26].mxu0  ;;  %v4135_v46 = vpop.permute.xlu1 %4134 }
 0x19e   : > { %v1258_v24 = vpop.f32.mrb[27].mxu0  ;;  %12469 = vmatmul.mubr.msk.bf16.vlgmr.msra.gmra.mrb[132].mxu1 %vm626_vm2, %v11794_v12  ;;  %v14138_v26 = vpop.permute.xlu0 %5740  ;;  %v4140_v51 = vsel %vm1412_vm9, %v4135_v46, %v4137_v38 }
 0x19f   : > { %12473 = vmatpush3.bf16.msra.mxu1 %v4040_v31  ;;  %12474 = vmatprep.mubr.msk.bf16.mxu1 %vm13081_vm0, %v15702_v0  ;;  %v13014_v24 = vld [vmem:[%s13214_s23 + $0x8] ss:$12 sps:$4 sm:$0xff]  }
 0x1a0   : > { %7945 = vrot.lane.b32.xlu0 %v14132_v7, %s15716_s16  ;;  %11795 = vmatmul.mubr.msk.bf16.vlgmr.msra.gmra.mrb[132].mxu0 %vm626_vm2, %v11794_v12 }
 0x1a1   : > { %4050 = vmatpush1.bf16.msra.mxu0 %v4041_v23  ;;  %v1395_v43 = vpop.f32.mrb[28].mxu1  ;;  %12478 = vmatprep.subr.bf16.mxu1 %v15702_v0  ;;  %v4346_v38 = vpop.permute.xlu1 %4345 }
 0x1a2   : > { %v1403_v31 = vadd.f32 %v1395_v43, %v1302_v4  ;;  %v12314_v34 = vpop.f32.mrb[29].mxu1  ;;  %4148 = vmatprep.subr.bf16.mxu0 %v4141_v29  ;;  %4081 = vmatprep.mubr.bf16.mxu0 %v15700_v1  ;;  %v14153_v35 = vpop.permute.xlu0 %5837 }
 0x1a3   : > { %v1354_v25 = vpop.f32.mrb[28].mxu0  ;;  %v1398_v37 = vpop.f32.mrb[30].mxu1  ;;  %5641 = vrot.lane.b32.xlu1 %v13694_v62, %s15722_s19 }
 0x1a4   : > { %v1401_v40 = vadd.f32 %v1354_v25, %v1300_v8  ;;  %8048 = vrot.lane.b32.xlu0 %v14148_v20, %s15723_s13  ;;  %v1356_v44 = vpop.f32.mrb[29].mxu0  ;;  %v12315_v47 = vpop.f32.mrb[31].mxu1 }
 0x1a5   : > { %v1402_v48 = vadd.f32 %v1356_v44, %v1301_v14  ;;  %v1358_v50 = vpop.f32.mrb[30].mxu0  ;;  %v4443_v29 = vpop.permute.xlu1 %4442 }
 0x1a6   : > { %v1359_v52 = vpop.f32.mrb[31].mxu0  ;;  %12475 = vmatmul.mubr.msk.bf16.vlgmr.msra.gmra.mrb[136].mxu1 %vm626_vm2, %v11797_v42  ;;  %v14164_v56 = vpop.permute.xlu0 %5835 }
 0x1a7   : > { %12479 = vmatpush3.bf16.msra.mxu1 %v13871_v49  ;;  %5738 = vrot.lane.b32.xlu1 %v13664_v54, %s15717_s20  ;;  %v4347_v52 = vsel %vm620_vm1, %v13894_v58, %v13882_v53 }
 0x1a8   : > { %8145 = vrot.lane.b32.xlu0 %v14116_v60, %s15720_s26  ;;  %11798 = vmatmul.mubr.msk.bf16.vlgmr.msra.gmra.mrb[136].mxu0 %vm626_vm2, %v11797_v42  ;;  %v11803_v42 = vld [vmem:[%s15681_s6 + $0x24] sm:$0xf] }
 0x1a9   : > { %4149 = vmatpush1.bf16.msra.mxu0 %v4140_v51  ;;  %v1496_v2 = vpop.f32.mrb[32].mxu1  ;;  %12480 = vmatprep.mubr.msk.bf16.mxu1 %vm13081_vm0, %v15702_v0 }
 0x1aa   : > { %v1504_v4 = vadd.f32 %v1496_v2, %v1403_v31  ;;  %v12320_v10 = vpop.f32.mrb[33].mxu1  ;;  %4180 = vmatprep.mubr.bf16.mxu0 %v15700_v1  ;;  %4256 = vmatprep.subr.bf16.mxu0 %v13980_v32  ;;  %v14177_v54 = vpop.permute.xlu0 %5938 }
 0x1ab   : > { %v1455_v49 = vpop.f32.mrb[32].mxu0  ;;  %v1499_v6 = vpop.f32.mrb[34].mxu1  ;;  %5736 = vrot.lane.b32.xlu1 %v13678_v57, %s15717_s20  ;;  %12484 = vmatprep.subr.bf16.mxu1 %v15702_v0  ;;  %v4348_v57 = vsel %vm620_vm1, %v13882_v53, %v4346_v38  ;;  %v4447_v10 = vsel %vm806_vm3, %v4443_v29, %v13907_v61 }
 0x1ac   : > { %v1502_v12 = vadd.f32 %v1455_v49, %v1401_v40  ;;  %8143 = vrot.lane.b32.xlu0 %v14132_v7, %s15720_s26  ;;  %v1457_v8 = vpop.f32.mrb[33].mxu0  ;;  %v12321_v17 = vpop.f32.mrb[35].mxu1 }
 0x1ad   : > { %v1503_v19 = vadd.f32 %v1457_v8, %v1402_v48  ;;  %v1459_v14 = vpop.f32.mrb[34].mxu0  ;;  %v4441_v51 = vpop.permute.xlu1 %4440  ;;  %v11809_v8 = vld [vmem:[%s15681_s6 + $0x28] sm:$0xf]  ;;  %v14241_v17 = vld [vmem:[%s13339_s27] ss:$12 sps:$4 sm:$0xff]  }
 0x1ae   : > { %v1460_v22 = vpop.f32.mrb[35].mxu0  ;;  %12481 = vmatmul.mubr.msk.bf16.vlgmr.msra.gmra.mrb[140].mxu1 %vm626_vm2, %v11800_v36  ;;  %v14193_v23 = vpop.permute.xlu0 %6063 }
 0x1af   : > { %12485 = vmatpush3.bf16.msra.mxu1 %v13014_v24  ;;  %12486 = vmatprep.mubr.msk.bf16.mxu1 %vm13081_vm0, %v15702_v0 }
 0x1b0   : > { %8246 = vrot.lane.b32.xlu0 %v14148_v20, %s15721_s0  ;;  %11801 = vmatmul.mubr.msk.bf16.vlgmr.msra.gmra.mrb[140].mxu0 %vm626_vm2, %v11800_v36 }
 0x1b1   : > { %v1605_v43 = vpop.f32.mrb[36].mxu1  ;;  %4257 = vmatpush1.bf16.msra.mxu0 %v13949_v5  ;;  %12490 = vmatprep.subr.bf16.mxu1 %v15702_v0 }
 0x1b2   : > { %v1613_v46 = vadd.f32 %v1605_v43, %v1504_v4  ;;  %v12326_v31 = vpop.f32.mrb[37].mxu1  ;;  %4355 = vmatprep.subr.bf16.mxu0 %v4348_v57  ;;  %4288 = vmatprep.mubr.bf16.mxu0 %v15700_v1  ;;  %v14206_v34 = vpop.permute.xlu0 %6061  ;;  %v4446_v43 = vsel %vm806_vm3, %v4441_v51, %v4443_v29 }
 0x1b3   : > { %v1564_v25 = vpop.f32.mrb[36].mxu0  ;;  %v1608_v37 = vpop.f32.mrb[38].mxu1  ;;  %5839 = vrot.lane.b32.xlu1 %v13694_v62, %s15718_s21  ;;  %v14222_v62 = vld [vmem:[%s13339_s27 + $0x4] ss:$12 sps:$4 sm:$0xff]  }
 0x1b4   : > { %v1611_v40 = vadd.f32 %v1564_v25, %v1502_v12  ;;  %8343 = vrot.lane.b32.xlu0 %v14116_v60, %s15722_s19  ;;  %v1566_v44 = vpop.f32.mrb[37].mxu0  ;;  %v12327_v47 = vpop.f32.mrb[39].mxu1 }
 0x1b5   : > { %v1612_v48 = vadd.f32 %v1566_v44, %v1503_v19  ;;  %v1568_v50 = vpop.f32.mrb[38].mxu0  ;;  %v4544_v58 = vpop.permute.xlu1 %4543 }
 0x1b6   : > { %v1569_v2 = vpop.f32.mrb[39].mxu0  ;;  %12487 = vmatmul.mubr.msk.bf16.vlgmr.msra.gmra.mrb[144].mxu1 %vm626_vm2, %v11803_v42  ;;  %v14219_v4 = vpop.permute.xlu0 %6248  ;;  %v4546_v25 = vsel %vm907_vm4, %v13918_v63, %v4544_v58 }
 0x1b7   : > { %12491 = vmatpush3.bf16.msra.mxu1 %v4346_v38  ;;  %5936 = vrot.lane.b32.xlu1 %v14222_v62, %s15719_s17 }
 0x1b8   : > { %8341 = vrot.lane.b32.xlu0 %v14132_v7, %s15722_s19  ;;  %11807 = vmatmul.mubr.msk.bf16.vlgmr.msra.gmra.mrb[144].mxu0 %vm626_vm2, %v11803_v42 }
 0x1b9   : > { %4356 = vmatpush1.bf16.msra.mxu0 %v4347_v52  ;;  %v1705_v53 = vpop.f32.mrb[40].mxu1  ;;  %12492 = vmatprep.mubr.msk.bf16.mxu1 %vm13081_vm0, %v15702_v0 }
 0x1ba   : > { %v1713_v38 = vadd.f32 %v1705_v53, %v1613_v46  ;;  %v12332_v49 = vpop.f32.mrb[41].mxu1  ;;  %4454 = vmatprep.subr.bf16.mxu0 %v4447_v10  ;;  %12496 = vmatprep.subr.bf16.mxu1 %v15702_v0  ;;  %v14234_v6 = vpop.permute.xlu0 %6345  ;;  %v4545_v53 = vsel %vm907_vm4, %v13929_v13, %v13918_v63 }
 0x1bb   : > { %v1664_v36 = vpop.f32.mrb[40].mxu0  ;;  %v1708_v12 = vpop.f32.mrb[42].mxu1  ;;  %4387 = vmatprep.mubr.bf16.mxu0 %v15700_v1  ;;  %5934 = vrot.lane.b32.xlu1 %v14241_v17, %s15719_s17 }
 0x1bc   : > { %v1711_v19 = vadd.f32 %v1664_v36, %v1611_v40  ;;  %8444 = vrot.lane.b32.xlu0 %v14148_v20, %s15717_s20  ;;  %v1666_v14 = vpop.f32.mrb[41].mxu0  ;;  %v12333_v22 = vpop.f32.mrb[43].mxu1  ;;  %v14284_v36 = vld [vmem:[%s13339_s27 + $0x4] ss:$12 sps:$4 sm:$0xff]  }
 0x1bd   : > { %v1712_v24 = vadd.f32 %v1666_v14, %v1612_v48  ;;  %v1668_v57 = vpop.f32.mrb[42].mxu0  ;;  %v4641_v37 = vpop.permute.xlu1 %4640  ;;  %v11812_v48 = vld [vmem:[%s15681_s6 + $0x2c] sm:$0xf] }
 0x1be   : > { %v1669_v46 = vpop.f32.mrb[43].mxu0  ;;  %12493 = vmatmul.mubr.msk.bf16.vlgmr.msra.gmra.mrb[148].mxu1 %vm626_vm2, %v11809_v8  ;;  %v14249_v31 = vpop.permute.xlu0 %6343 }
 0x1bf   : > { %12497 = vmatpush3.bf16.msra.mxu1 %v13907_v61  ;;  %12498 = vmatprep.mubr.msk.bf16.mxu1 %vm13081_vm0, %v15702_v0 }
 0x1c0   : > { %8541 = vrot.lane.b32.xlu0 %v14116_v60, %s15718_s21  ;;  %11810 = vmatmul.mubr.msk.bf16.vlgmr.msra.gmra.mrb[148].mxu0 %vm626_vm2, %v11809_v8 }
 0x1c1   : > { %4455 = vmatpush1.bf16.msra.mxu0 %v4446_v43  ;;  %v1805_v29 = vpop.f32.mrb[44].mxu1  ;;  %12502 = vmatprep.subr.bf16.mxu1 %v15702_v0  ;;  %v14298_v43 = vld [vmem:[%s13339_s27] ss:$12 sps:$4 sm:$0xff]  }
 0x1c2   : > { %v1813_v42 = vadd.f32 %v1805_v29, %v1713_v38  ;;  %v12338_v40 = vpop.f32.mrb[45].mxu1  ;;  %4553 = vmatprep.subr.bf16.mxu0 %v4546_v25  ;;  %4486 = vmatprep.mubr.bf16.mxu0 %v15700_v1  ;;  %v14261_v61 = vpop.permute.xlu0 %6446 }
 0x1c3   : > { %v1764_v44 = vpop.f32.mrb[44].mxu0  ;;  %v1808_v47 = vpop.f32.mrb[46].mxu1  ;;  %6065 = vrot.lane.b32.xlu1 %v13843_v41, %s15716_s16  ;;  %v4645_v41 = vsel %vm1008_vm5, %v4641_v37, %v13942_v15 }
 0x1c4   : > { %v1811_v50 = vadd.f32 %v1764_v44, %v1711_v19  ;;  %8539 = vrot.lane.b32.xlu0 %v14132_v7, %s15718_s21  ;;  %v1766_v51 = vpop.f32.mrb[45].mxu0  ;;  %v12339_v52 = vpop.f32.mrb[47].mxu1 }
 0x1c5   : > { %v1812_v2 = vadd.f32 %v1766_v51, %v1712_v24  ;;  %v1768_v10 = vpop.f32.mrb[46].mxu0  ;;  %v4639_v13 = vpop.permute.xlu1 %4638 }
 0x1c6   : > { %v1769_v38 = vpop.f32.mrb[47].mxu0  ;;  %12499 = vmatmul.mubr.msk.bf16.vlgmr.msra.gmra.mrb[152].mxu1 %vm626_vm2, %v11812_v48  ;;  %v14274_v49 = vpop.permute.xlu0 %6543 }
 0x1c7   : > { %12503 = vmatpush3.bf16.msra.mxu1 %v4544_v58  ;;  %12504 = vmatprep.mubr.msk.bf16.mxu1 %vm13081_vm0, %v15702_v0 }
 0x1c8   : > { %8642 = vrot.lane.b32.xlu0 %v14148_v20, %s15719_s17  ;;  %11813 = vmatmul.mubr.msk.bf16.vlgmr.msra.gmra.mrb[152].mxu0 %vm626_vm2, %v11812_v48  ;;  %v11815_v20 = vld [vmem:[%s15681_s6 + $0x30] sm:$0xf]  ;;  %v14313_v48 = vld [vmem:[%s13339_s27 + $0x8] ss:$12 sps:$4 sm:$0xff]  }
 0x1c9   : > { %4554 = vmatpush1.bf16.msra.mxu0 %v4545_v53  ;;  %v1905_v63 = vpop.f32.mrb[48].mxu1  ;;  %12508 = vmatprep.subr.bf16.mxu1 %v15702_v0  ;;  %v11818_v53 = vld [vmem:[%s15681_s6 + $0x34] sm:$0xf] }
 0x1ca   : > { %v1913_v58 = vadd.f32 %v1905_v63, %v1813_v42  ;;  %v12344_v12 = vpop.f32.mrb[49].mxu1  ;;  %4652 = vmatprep.subr.bf16.mxu0 %v4645_v41  ;;  %4585 = vmatprep.mubr.bf16.mxu0 %v15700_v1  ;;  %v14288_v8 = vpop.permute.xlu0 %6541  ;;  %v4644_v42 = vsel %vm1008_vm5, %v4639_v13, %v4641_v37 }
 0x1cb   : > { %v1864_v19 = vpop.f32.mrb[48].mxu0  ;;  %v1908_v14 = vpop.f32.mrb[50].mxu1  ;;  %6246 = vrot.lane.b32.xlu1 %v13980_v32, %s15723_s13  ;;  %v4743_v12 = vsel %vm1109_vm6, %v13970_v9, %v13959_v16 }
 0x1cc   : > { %v1911_v22 = vadd.f32 %v1864_v19, %v1811_v50  ;;  %8767 = vrot.lane.b32.xlu0 %v14284_v36, %s15716_s16  ;;  %v1866_v24 = vpop.f32.mrb[49].mxu0  ;;  %v12345_v57 = vpop.f32.mrb[51].mxu1 }
 0x1cd   : > { %v1912_v46 = vadd.f32 %v1866_v24, %v1812_v2  ;;  %v1868_v25 = vpop.f32.mrb[50].mxu0  ;;  %v4742_v29 = vpop.permute.xlu1 %4741 }
 0x1ce   : > { %v1869_v40 = vpop.f32.mrb[51].mxu0  ;;  %12505 = vmatmul.mubr.msk.bf16.vlgmr.msra.gmra.mrb[156].mxu1 %vm626_vm2, %v11815_v20  ;;  %v14302_v44 = vpop.permute.xlu0 %6644  ;;  %v4744_v47 = vsel %vm1109_vm6, %v13959_v16, %v4742_v29 }
 0x1cf   : > { %12509 = vmatpush3.bf16.msra.mxu1 %v13942_v15  ;;  %12510 = vmatprep.mubr.msk.bf16.mxu1 %vm13081_vm0, %v15702_v0 }
 0x1d0   : > { %8765 = vrot.lane.b32.xlu0 %v14298_v43, %s15716_s16  ;;  %11816 = vmatmul.mubr.msk.bf16.vlgmr.msra.gmra.mrb[156].mxu0 %vm626_vm2, %v11815_v20 }
 0x1d1   : > { %4653 = vmatpush1.bf16.msra.mxu0 %v4644_v42  ;;  %v2005_v37 = vpop.f32.mrb[52].mxu1  ;;  %12514 = vmatprep.subr.bf16.mxu1 %v15702_v0  ;;  %v4839_v50 = vpop.permute.xlu1 %4838  ;;  %v14347_v42 = vld [vmem:[%s13214_s23 + $0x8] ss:$12 sps:$4 sm:$0xff]  }
 0x1d2   : > { %v2013_v51 = vadd.f32 %v2005_v37, %v1913_v58  ;;  %v12350_v15 = vpop.f32.mrb[53].mxu1  ;;  %4751 = vmatprep.subr.bf16.mxu0 %v4744_v47  ;;  %4684 = vmatprep.mubr.bf16.mxu0 %v15700_v1  ;;  %v14317_v52 = vpop.permute.xlu0 %6741  ;;  %v4843_v20 = vsel %vm1210_vm7, %v4839_v50, %v13984_v33 }
 0x1d3   : > { %v1964_v2 = vpop.f32.mrb[52].mxu0  ;;  %v2008_v10 = vpop.f32.mrb[54].mxu1  ;;  %6244 = vrot.lane.b32.xlu1 %v13949_v5, %s15723_s13 }
 0x1d4   : > { %v2011_v38 = vadd.f32 %v1964_v2, %v1911_v22  ;;  %8952 = vrot.lane.b32.xlu0 %v14313_v48, %s15723_s13  ;;  %v1966_v41 = vpop.f32.mrb[53].mxu0  ;;  %v12351_v63 = vpop.f32.mrb[55].mxu1 }
 0x1d5   : > { %v2012_v13 = vadd.f32 %v1966_v41, %v1912_v46  ;;  %v1968_v58 = vpop.f32.mrb[54].mxu0  ;;  %v4837_v9 = vpop.permute.xlu1 %4836 }
 0x1d6   : > { %v1969_v19 = vpop.f32.mrb[55].mxu0  ;;  %12511 = vmatmul.mubr.msk.bf16.vlgmr.msra.gmra.mrb[160].mxu1 %vm626_vm2, %v11818_v53  ;;  %v14330_v14 = vpop.permute.xlu0 %6739  ;;  %v4842_v10 = vsel %vm1210_vm7, %v4837_v9, %v4839_v50 }
 0x1d7   : > { %12515 = vmatpush3.bf16.msra.mxu1 %v4742_v29  ;;  %12516 = vmatprep.mubr.msk.bf16.mxu1 %vm13081_vm0, %v15702_v0  ;;  %v11821_v29 = vld [vmem:[%s15681_s6 + $0x38] sm:$0xf] }
 0x1d8   : > { %9049 = vrot.lane.b32.xlu0 %v14284_v36, %s15720_s26  ;;  %11819 = vmatmul.mubr.msk.bf16.vlgmr.msra.gmra.mrb[160].mxu0 %vm626_vm2, %v11818_v53 }
 0x1d9   : > { %4752 = vmatpush1.bf16.msra.mxu0 %v4743_v12  ;;  %v2105_v16 = vpop.f32.mrb[56].mxu1  ;;  %12520 = vmatprep.subr.bf16.mxu1 %v15702_v0 }
 0x1da   : > { %v2113_v22 = vadd.f32 %v2105_v16, %v2013_v51  ;;  %v12356_v24 = vpop.f32.mrb[57].mxu1  ;;  %4850 = vmatprep.subr.bf16.mxu0 %v4843_v20  ;;  %4783 = vmatprep.mubr.bf16.mxu0 %v15700_v1  ;;  %v14341_v57 = vpop.permute.xlu0 %6842  ;;  %v11824_v20 = vld [vmem:[%s15681_s6 + $0x3c] sm:$0xf] }
 0x1db   : > { %v2064_v46 = vpop.f32.mrb[56].mxu0  ;;  %v2108_v25 = vpop.f32.mrb[58].mxu1  ;;  %6347 = vrot.lane.b32.xlu1 %v14347_v42, %s15720_s26 }
 0x1dc   : > { %v2111_v40 = vadd.f32 %v2064_v46, %v2011_v38  ;;  %9047 = vrot.lane.b32.xlu0 %v14298_v43, %s15720_s26  ;;  %v2066_v47 = vpop.f32.mrb[57].mxu0  ;;  %v12357_v37 = vpop.f32.mrb[59].mxu1  ;;  %v4941_v25 = vsel %vm1311_vm8, %v14011_v3, %v14000_v45 }
 0x1dd   : > { %v2112_v51 = vadd.f32 %v2066_v47, %v2012_v13  ;;  %v2068_v15 = vpop.f32.mrb[58].mxu0  ;;  %v4940_v2 = vpop.permute.xlu1 %4939 }
 0x1de   : > { %v2069_v53 = vpop.f32.mrb[59].mxu0  ;;  %12517 = vmatmul.mubr.msk.bf16.vlgmr.msra.gmra.mrb[164].mxu1 %vm626_vm2, %v11821_v29  ;;  %v14355_v41 = vpop.permute.xlu0 %7047  ;;  %v4942_v38 = vsel %vm1311_vm8, %v14000_v45, %v4940_v2 }
 0x1df   : > { %12521 = vmatpush3.bf16.msra.mxu1 %v13984_v33  ;;  %6444 = vrot.lane.b32.xlu1 %v13980_v32, %s15721_s0 }
 0x1e0   : > { %9150 = vrot.lane.b32.xlu0 %v14313_v48, %s15721_s0  ;;  %11822 = vmatmul.mubr.msk.bf16.vlgmr.msra.gmra.mrb[164].mxu0 %vm626_vm2, %v11821_v29 }
 0x1e1   : > { %4851 = vmatpush1.bf16.msra.mxu0 %v4842_v10  ;;  %v2205_v50 = vpop.f32.mrb[60].mxu1  ;;  %12522 = vmatprep.mubr.msk.bf16.mxu1 %vm13081_vm0, %v15702_v0  ;;  %v5037_v63 = vpop.permute.xlu1 %5036  ;;  %v11827_v10 = vld [vmem:[%s15681_s6 + $0x40] sm:$0xf] }
 0x1e2   : > { %v2213_v13 = vadd.f32 %v2205_v50, %v2113_v22  ;;  %v12362_v58 = vpop.f32.mrb[61].mxu1  ;;  %4949 = vmatprep.subr.bf16.mxu0 %v4942_v38  ;;  %12526 = vmatprep.subr.bf16.mxu1 %v15702_v0  ;;  %v14368_v33 = vpop.permute.xlu0 %7045 }
 0x1e3   : > { %v2164_v12 = vpop.f32.mrb[60].mxu0  ;;  %v2208_v19 = vpop.f32.mrb[62].mxu1  ;;  %4882 = vmatprep.mubr.bf16.mxu0 %v15700_v1  ;;  %6442 = vrot.lane.b32.xlu1 %v13949_v5, %s15721_s0  ;;  %v5041_v5 = vsel %vm1412_vm9, %v5037_v63, %v14023_v18 }
 0x1e4   : > { %v2211_v16 = vadd.f32 %v2164_v12, %v2111_v40  ;;  %9247 = vrot.lane.b32.xlu0 %v14284_v36, %s15722_s19  ;;  %v2166_v9 = vpop.f32.mrb[61].mxu0  ;;  %v12363_v22 = vpop.f32.mrb[63].mxu1 }
 0x1e5   : > { %v2212_v24 = vadd.f32 %v2166_v9, %v2112_v51  ;;  %v2168_v46 = vpop.f32.mrb[62].mxu0  ;;  %v5035_v45 = vpop.permute.xlu1 %5034 }
 0x1e6   : > { %v2169_v29 = vpop.f32.mrb[63].mxu0  ;;  %12523 = vmatmul.mubr.msk.bf16.vlgmr.msra.gmra.mrb[168].mxu1 %vm626_vm2, %v11824_v20  ;;  %v14382_v47 = vpop.permute.xlu0 %7148  ;;  %v5040_v12 = vsel %vm1412_vm9, %v5035_v45, %v5037_v63  ;;  %v14422_v46 = vld [vmem:[%s13214_s23] ss:$12 sps:$4 sm:$0xff]  }
 0x1e7   : > { %12527 = vmatpush3.bf16.msra.mxu1 %v4940_v2  ;;  %12528 = vmatprep.mubr.msk.bf16.mxu1 %vm13081_vm0, %v15702_v0 }
 0x1e8   : > { %9245 = vrot.lane.b32.xlu0 %v14298_v43, %s15722_s19  ;;  %11825 = vmatmul.mubr.msk.bf16.vlgmr.msra.gmra.mrb[168].mxu0 %vm626_vm2, %v11824_v20 }
 0x1e9   : > { %4950 = vmatpush1.bf16.msra.mxu0 %v4941_v25  ;;  %v2305_v40 = vpop.f32.mrb[64].mxu1  ;;  %12532 = vmatprep.subr.bf16.mxu1 %v15702_v0 }
 0x1ea   : > { %v2313_v3 = vadd.f32 %v2305_v40, %v2213_v13  ;;  %v12368_v37 = vpop.f32.mrb[65].mxu1  ;;  %5048 = vmatprep.subr.bf16.mxu0 %v5041_v5  ;;  %4981 = vmatprep.mubr.bf16.mxu0 %v15700_v1  ;;  %v14393_v51 = vpop.permute.xlu0 %7245 }
 0x1eb   : > { %v2264_v15 = vpop.f32.mrb[64].mxu0  ;;  %v2308_v2 = vpop.f32.mrb[66].mxu1  ;;  %6545 = vrot.lane.b32.xlu1 %v14347_v42, %s15722_s19 }
 0x1ec   : > { %v2311_v53 = vadd.f32 %v2264_v15, %v2211_v16  ;;  %9348 = vrot.lane.b32.xlu0 %v14313_v48, %s15717_s20  ;;  %v2266_v38 = vpop.f32.mrb[65].mxu0  ;;  %v12369_v50 = vpop.f32.mrb[67].mxu1  ;;  %v13019_v15 = vld [vmem:[%s13339_s27 + $0x8] ss:$12 sps:$4 sm:$0xff]  }
 0x1ed   : > { %v2312_v13 = vadd.f32 %v2266_v38, %v2212_v24  ;;  %v2268_v58 = vpop.f32.mrb[66].mxu0  ;;  %v5246_v63 = vpop.permute.xlu1 %5245 }
 0x1ee   : > { %v2269_v19 = vpop.f32.mrb[67].mxu0  ;;  %12529 = vmatmul.mubr.msk.bf16.vlgmr.msra.gmra.mrb[172].mxu1 %vm626_vm2, %v11827_v10  ;;  %v14404_v20 = vpop.permute.xlu0 %7243  ;;  %v5248_v2 = vsel %vm620_vm1, %v14036_v30, %v5246_v63 }
 0x1ef   : > { %12533 = vmatpush3.bf16.msra.mxu1 %v14023_v18  ;;  %6642 = vrot.lane.b32.xlu1 %v13980_v32, %s15717_s20 }
 0x1f0   : > { %9445 = vrot.lane.b32.xlu0 %v14284_v36, %s15718_s21  ;;  %11828 = vmatmul.mubr.msk.bf16.vlgmr.msra.gmra.mrb[172].mxu0 %vm626_vm2, %v11827_v10  ;;  %v11830_v36 = vld [vmem:[%s15681_s6 + $0x44] sm:$0xf] }
 0x1f1   : > { %5049 = vmatpush1.bf16.msra.mxu0 %v5040_v12  ;;  %v2405_v16 = vpop.f32.mrb[68].mxu1  ;;  %12534 = vmatprep.mubr.msk.bf16.mxu1 %vm13081_vm0, %v15702_v0 }
 0x1f2   : > { %v2413_v9 = vadd.f32 %v2405_v16, %v2313_v3  ;;  %v12374_v22 = vpop.f32.mrb[69].mxu1  ;;  %5080 = vmatprep.mubr.bf16.mxu0 %v15700_v1  ;;  %5156 = vmatprep.subr.bf16.mxu0 %v14222_v62  ;;  %v14416_v18 = vpop.permute.xlu0 %7346 }
 0x1f3   : > { %v2364_v32 = vpop.f32.mrb[68].mxu0  ;;  %v2408_v24 = vpop.f32.mrb[70].mxu1  ;;  %6640 = vrot.lane.b32.xlu1 %v14422_v46, %s15717_s20  ;;  %12538 = vmatprep.subr.bf16.mxu1 %v15702_v0 }
 0x1f4   : > { %v2411_v25 = vadd.f32 %v2364_v32, %v2311_v53  ;;  %9443 = vrot.lane.b32.xlu0 %v14298_v43, %s15718_s21  ;;  %v2366_v29 = vpop.f32.mrb[69].mxu0  ;;  %v12375_v5 = vpop.f32.mrb[71].mxu1  ;;  %v5247_v32 = vsel %vm620_vm1, %v14047_v39, %v14036_v30  ;;  %v14469_v30 = vld [vmem:[%s13727_s24 + $0x8] ss:$12 sps:$4 sm:$0xff]  }
 0x1f5   : > { %v2412_v40 = vadd.f32 %v2366_v29, %v2312_v13  ;;  %v2368_v45 = vpop.f32.mrb[70].mxu0  ;;  %v5343_v10 = vpop.permute.xlu1 %5342  ;;  %v14459_v29 = vld [vmem:[%s13214_s23 + $0x4] ss:$12 sps:$4 sm:$0xff]  }
 0x1f6   : > { %v2369_v3 = vpop.f32.mrb[71].mxu0  ;;  %12535 = vmatmul.mubr.msk.bf16.vlgmr.msra.gmra.mrb[176].mxu1 %vm626_vm2, %v11830_v36  ;;  %v14430_v37 = vpop.permute.xlu0 %7443 }
 0x1f7   : > { %12539 = vmatpush3.bf16.msra.mxu1 %v13019_v15  ;;  %12540 = vmatprep.mubr.msk.bf16.mxu1 %vm13081_vm0, %v15702_v0 }
 0x1f8   : > { %9546 = vrot.lane.b32.xlu0 %v14313_v48, %s15719_s17  ;;  %11831 = vmatmul.mubr.msk.bf16.vlgmr.msra.gmra.mrb[176].mxu0 %vm626_vm2, %v11830_v36  ;;  %v11833_v48 = vld [vmem:[%s15681_s6 + $0x48] sm:$0xf] }
 0x1f9   : > { %v2514_v43 = vpop.f32.mrb[72].mxu1  ;;  %5157 = vmatpush1.bf16.msra.mxu0 %v14241_v17  ;;  %12544 = vmatprep.subr.bf16.mxu1 %v15702_v0 }
 0x1fa   : > { %v2522_v53 = vadd.f32 %v2514_v43, %v2413_v9  ;;  %v12380_v38 = vpop.f32.mrb[73].mxu1  ;;  %5255 = vmatprep.subr.bf16.mxu0 %v5248_v2  ;;  %5188 = vmatprep.mubr.bf16.mxu0 %v15700_v1  ;;  %v14443_v50 = vpop.permute.xlu0 %7441  ;;  %v11839_v2 = vld [vmem:[%s15681_s6 + $0x4c] sm:$0xf] }
 0x1fb   : > { %v2473_v13 = vpop.f32.mrb[72].mxu0  ;;  %v2517_v58 = vpop.f32.mrb[74].mxu1  ;;  %6743 = vrot.lane.b32.xlu1 %v14347_v42, %s15718_s21 }
 0x1fc   : > { %v2520_v12 = vadd.f32 %v2473_v13, %v2411_v25  ;;  %9751 = vrot.lane.b32.xlu0 %v14116_v60, %s15716_s16  ;;  %v2475_v19 = vpop.f32.mrb[73].mxu0  ;;  %v12381_v16 = vpop.f32.mrb[75].mxu1  ;;  %v5347_v25 = vsel %vm806_vm3, %v5343_v10, %v14058_v59 }
 0x1fd   : > { %v2521_v9 = vadd.f32 %v2475_v19, %v2412_v40  ;;  %v2477_v22 = vpop.f32.mrb[74].mxu0  ;;  %v5341_v5 = vpop.permute.xlu1 %5340 }
 0x1fe   : > { %v2478_v24 = vpop.f32.mrb[75].mxu0  ;;  %12541 = vmatmul.mubr.msk.bf16.vlgmr.msra.gmra.mrb[180].mxu1 %vm626_vm2, %v11833_v48  ;;  %v14456_v36 = vpop.permute.xlu0 %7544  ;;  %v5346_v19 = vsel %vm806_vm3, %v5341_v5, %v5343_v10  ;;  %v11842_v5 = vld [vmem:[%s15681_s6 + $0x50] sm:$0xf] }
 0x1ff   : > { %12545 = vmatpush3.bf16.msra.mxu1 %v5246_v63  ;;  %6840 = vrot.lane.b32.xlu1 %v14459_v29, %s15719_s17 }
 0x200   : > { %9749 = vrot.lane.b32.xlu0 %v14132_v7, %s15716_s16  ;;  %11837 = vmatmul.mubr.msk.bf16.vlgmr.msra.gmra.mrb[180].mxu0 %vm626_vm2, %v11833_v48 }
 0x201   : > { %5256 = vmatpush1.bf16.msra.mxu0 %v5247_v32  ;;  %v2614_v39 = vpop.f32.mrb[76].mxu1  ;;  %12546 = vmatprep.mubr.msk.bf16.mxu1 %vm13081_vm0, %v15702_v0 }
 0x202   : > { %v2622_v63 = vadd.f32 %v2614_v39, %v2522_v53  ;;  %v12386_v40 = vpop.f32.mrb[77].mxu1  ;;  %5354 = vmatprep.subr.bf16.mxu0 %v5347_v25  ;;  %12550 = vmatprep.subr.bf16.mxu1 %v15702_v0  ;;  %v14474_v45 = vpop.permute.xlu0 %7641 }
 0x203   : > { %v2573_v3 = vpop.f32.mrb[76].mxu0  ;;  %v2617_v15 = vpop.f32.mrb[78].mxu1  ;;  %5287 = vmatprep.mubr.bf16.mxu0 %v15700_v1  ;;  %6838 = vrot.lane.b32.xlu1 %v14422_v46, %s15719_s17  ;;  %v14504_v40 = vld [vmem:[%s13339_s27 + $0x8] ss:$12 sps:$4 sm:$0xff]  }
 0x204   : > { %v2620_v43 = vadd.f32 %v2573_v3, %v2520_v12  ;;  %9852 = vrot.lane.b32.xlu0 %v14469_v30, %s15723_s13  ;;  %v2575_v53 = vpop.f32.mrb[77].mxu0  ;;  %v12387_v38 = vpop.f32.mrb[79].mxu1 }
 0x205   : > { %v2621_v13 = vadd.f32 %v2575_v53, %v2521_v9  ;;  %v2577_v58 = vpop.f32.mrb[78].mxu0  ;;  %v5444_v48 = vpop.permute.xlu1 %5443  ;;  %v5445_v38 = vsel %vm907_vm4, %v14083_v27, %v14070_v28 }
 0x206   : > { %v2578_v16 = vpop.f32.mrb[79].mxu0  ;;  %12547 = vmatmul.mubr.msk.bf16.vlgmr.msra.gmra.mrb[184].mxu1 %vm626_vm2, %v11839_v2  ;;  %v14486_v22 = vpop.permute.xlu0 %7639  ;;  %v5446_v12 = vsel %vm907_vm4, %v14070_v28, %v5444_v48 }
 0x207   : > { %12551 = vmatpush3.bf16.msra.mxu1 %v14058_v59  ;;  %12552 = vmatprep.mubr.msk.bf16.mxu1 %vm13081_vm0, %v15702_v0 }
 0x208   : > { %9949 = vrot.lane.b32.xlu0 %v14116_v60, %s15720_s26  ;;  %11840 = vmatmul.mubr.msk.bf16.vlgmr.msra.gmra.mrb[184].mxu0 %vm626_vm2, %v11839_v2 }
 0x209   : > { %5355 = vmatpush1.bf16.msra.mxu0 %v5346_v19  ;;  %v2714_v10 = vpop.f32.mrb[80].mxu1  ;;  %12556 = vmatprep.subr.bf16.mxu1 %v15702_v0  ;;  %v5541_v9 = vpop.permute.xlu1 %5540 }
 0x20a   : > { %v2722_v32 = vadd.f32 %v2714_v10, %v2622_v63  ;;  %v12392_v24 = vpop.f32.mrb[81].mxu1  ;;  %5453 = vmatprep.subr.bf16.mxu0 %v5446_v12  ;;  %5386 = vmatprep.mubr.bf16.mxu0 %v15700_v1  ;;  %v14498_v59 = vpop.permute.xlu0 %7742 }
 0x20b   : > { %v2673_v25 = vpop.f32.mrb[80].mxu0  ;;  %v2717_v39 = vpop.f32.mrb[82].mxu1  ;;  %7049 = vrot.lane.b32.xlu1 %v14504_v40, %s15716_s16  ;;  %v11845_v24 = vld [vmem:[%s15681_s6 + $0x54] sm:$0xf] }
 0x20c   : > { %v2720_v3 = vadd.f32 %v2673_v25, %v2620_v43  ;;  %9947 = vrot.lane.b32.xlu0 %v14132_v7, %s15720_s26  ;;  %v2675_v63 = vpop.f32.mrb[81].mxu0  ;;  %v12393_v15 = vpop.f32.mrb[83].mxu1  ;;  %v5545_v43 = vsel %vm1008_vm5, %v5541_v9, %v14094_v21 }
 0x20d   : > { %v2721_v2 = vadd.f32 %v2675_v63, %v2621_v13  ;;  %v2677_v53 = vpop.f32.mrb[82].mxu0  ;;  %v5539_v28 = vpop.permute.xlu1 %5538 }
 0x20e   : > { %v2678_v58 = vpop.f32.mrb[83].mxu0  ;;  %12553 = vmatmul.mubr.msk.bf16.vlgmr.msra.gmra.mrb[188].mxu1 %vm626_vm2, %v11842_v5  ;;  %v14514_v19 = vpop.permute.xlu0 %7947  ;;  %v5544_v53 = vsel %vm1008_vm5, %v5539_v28, %v5541_v9 }
 0x20f   : > { %12557 = vmatpush3.bf16.msra.mxu1 %v5444_v48  ;;  %12558 = vmatprep.mubr.msk.bf16.mxu1 %vm13081_vm0, %v15702_v0 }
 0x210   : > { %10050 = vrot.lane.b32.xlu0 %v14469_v30, %s15721_s0  ;;  %11843 = vmatmul.mubr.msk.bf16.vlgmr.msra.gmra.mrb[188].mxu0 %vm626_vm2, %v11842_v5 }
 0x211   : > { %5454 = vmatpush1.bf16.msra.mxu0 %v5445_v38  ;;  %v2814_v13 = vpop.f32.mrb[84].mxu1  ;;  %12562 = vmatprep.subr.bf16.mxu1 %v15702_v0 }
 0x212   : > { %v2822_v27 = vadd.f32 %v2814_v13, %v2722_v32  ;;  %v12398_v16 = vpop.f32.mrb[85].mxu1  ;;  %5552 = vmatprep.subr.bf16.mxu0 %v5545_v43  ;;  %5485 = vmatprep.mubr.bf16.mxu0 %v15700_v1  ;;  %v14525_v48 = vpop.permute.xlu0 %7945 }
 0x213   : > { %v2773_v12 = vpop.f32.mrb[84].mxu0  ;;  %v2817_v10 = vpop.f32.mrb[86].mxu1  ;;  %7146 = vrot.lane.b32.xlu1 %v14222_v62, %s15723_s13 }
 0x214   : > { %v2820_v25 = vadd.f32 %v2773_v12, %v2720_v3  ;;  %10147 = vrot.lane.b32.xlu0 %v14116_v60, %s15722_s19  ;;  %v2775_v32 = vpop.f32.mrb[85].mxu0  ;;  %v12399_v39 = vpop.f32.mrb[87].mxu1  ;;  %v11848_v12 = vld [vmem:[%s15681_s6 + $0x58] sm:$0xf] }
 0x215   : > { %v2821_v5 = vadd.f32 %v2775_v32, %v2721_v2  ;;  %v2777_v63 = vpop.f32.mrb[86].mxu0  ;;  %v5642_v15 = vpop.permute.xlu1 %5641 }
 0x216   : > { %v2778_v38 = vpop.f32.mrb[87].mxu0  ;;  %12559 = vmatmul.mubr.msk.bf16.vlgmr.msra.gmra.mrb[192].mxu1 %vm626_vm2, %v11845_v24  ;;  %v14536_v58 = vpop.permute.xlu0 %8048  ;;  %v5644_v3 = vsel %vm1109_vm6, %v14105_v55, %v5642_v15  ;;  %v5643_v63 = vsel %vm1109_vm6, %v14121_v11, %v14105_v55 }
 0x217   : > { %12563 = vmatpush3.bf16.msra.mxu1 %v14094_v21  ;;  %12564 = vmatprep.mubr.msk.bf16.mxu1 %vm13081_vm0, %v15702_v0 }
 0x218   : > { %10145 = vrot.lane.b32.xlu0 %v14132_v7, %s15722_s19  ;;  %11846 = vmatmul.mubr.msk.bf16.vlgmr.msra.gmra.mrb[192].mxu0 %vm626_vm2, %v11845_v24 }
 0x219   : > { %5553 = vmatpush1.bf16.msra.mxu0 %v5544_v53  ;;  %v2914_v9 = vpop.f32.mrb[88].mxu1  ;;  %12568 = vmatprep.subr.bf16.mxu1 %v15702_v0  ;;  %v5739_v2 = vpop.permute.xlu1 %5738 }
 0x21a   : > { %v2922_v43 = vadd.f32 %v2914_v9, %v2822_v27  ;;  %v12404_v13 = vpop.f32.mrb[89].mxu1  ;;  %5651 = vmatprep.subr.bf16.mxu0 %v5644_v3  ;;  %5584 = vmatprep.mubr.bf16.mxu0 %v15700_v1  ;;  %v14548_v21 = vpop.permute.xlu0 %8145 }
 0x21b   : > { %v2873_v28 = vpop.f32.mrb[88].mxu0  ;;  %v2917_v16 = vpop.f32.mrb[90].mxu1  ;;  %7144 = vrot.lane.b32.xlu1 %v14241_v17, %s15723_s13 }
 0x21c   : > { %v2920_v10 = vadd.f32 %v2873_v28, %v2820_v25  ;;  %10248 = vrot.lane.b32.xlu0 %v14469_v30, %s15717_s20  ;;  %v2875_v27 = vpop.f32.mrb[89].mxu0  ;;  %v12405_v24 = vpop.f32.mrb[91].mxu1  ;;  %v5743_v25 = vsel %vm1210_vm7, %v5739_v2, %v14138_v26 }
 0x21d   : > { %v2921_v32 = vadd.f32 %v2875_v27, %v2821_v5  ;;  %v2877_v39 = vpop.f32.mrb[90].mxu0  ;;  %v5737_v55 = vpop.permute.xlu1 %5736 }
 0x21e   : > { %v2878_v53 = vpop.f32.mrb[91].mxu0  ;;  %12565 = vmatmul.mubr.msk.bf16.vlgmr.msra.gmra.mrb[196].mxu1 %vm626_vm2, %v11848_v12  ;;  %v14561_v38 = vpop.permute.xlu0 %8143  ;;  %v5742_v39 = vsel %vm1210_vm7, %v5737_v55, %v5739_v2 }
 0x21f   : > { %12569 = vmatpush3.bf16.msra.mxu1 %v5642_v15  ;;  %12570 = vmatprep.mubr.msk.bf16.mxu1 %vm13081_vm0, %v15702_v0 }
 0x220   : > { %10345 = vrot.lane.b32.xlu0 %v14116_v60, %s15718_s21  ;;  %11849 = vmatmul.mubr.msk.bf16.vlgmr.msra.gmra.mrb[196].mxu0 %vm626_vm2, %v11848_v12  ;;  %v11851_v60 = vld [vmem:[%s15681_s6 + $0x5c] sm:$0xf] }
 0x221   : > { %5652 = vmatpush1.bf16.msra.mxu0 %v5643_v63  ;;  %v3014_v5 = vpop.f32.mrb[92].mxu1  ;;  %12574 = vmatprep.subr.bf16.mxu1 %v15702_v0 }
 0x222   : > { %v3022_v11 = vadd.f32 %v3014_v5, %v2922_v43  ;;  %v12410_v3 = vpop.f32.mrb[93].mxu1  ;;  %5750 = vmatprep.subr.bf16.mxu0 %v5743_v25  ;;  %5683 = vmatprep.mubr.bf16.mxu0 %v15700_v1  ;;  %v14572_v15 = vpop.permute.xlu0 %8246 }
 0x223   : > { %v2973_v9 = vpop.f32.mrb[92].mxu0  ;;  %v3017_v13 = vpop.f32.mrb[94].mxu1  ;;  %7247 = vrot.lane.b32.xlu1 %v14504_v40, %s15720_s26  ;;  %v11854_v3 = vld [vmem:[%s15681_s6 + $0x60] sm:$0xf] }
 0x224   : > { %v3020_v28 = vadd.f32 %v2973_v9, %v2920_v10  ;;  %10343 = vrot.lane.b32.xlu0 %v14132_v7, %s15718_s21  ;;  %v2975_v43 = vpop.f32.mrb[93].mxu0  ;;  %v12411_v16 = vpop.f32.mrb[95].mxu1  ;;  %v14594_v10 = vld [vmem:[%s14182_s14 + $0x4] ss:$12 sps:$4 sm:$0xff]  }
 0x225   : > { %v3021_v12 = vadd.f32 %v2975_v43, %v2921_v32  ;;  %v2977_v27 = vpop.f32.mrb[94].mxu0  ;;  %v5840_v24 = vpop.permute.xlu1 %5839 }
 0x226   : > { %v2978_v63 = vpop.f32.mrb[95].mxu0  ;;  %12571 = vmatmul.mubr.msk.bf16.vlgmr.msra.gmra.mrb[200].mxu1 %vm626_vm2, %v11851_v60  ;;  %v14583_v53 = vpop.permute.xlu0 %8343  ;;  %v5842_v7 = vsel %vm1311_vm8, %v14153_v35, %v5840_v24  ;;  %v5841_v27 = vsel %vm1311_vm8, %v14164_v56, %v14153_v35 }
 0x227   : > { %12575 = vmatpush3.bf16.msra.mxu1 %v14138_v26  ;;  %7344 = vrot.lane.b32.xlu1 %v14222_v62, %s15721_s0 }
 0x228   : > { %10446 = vrot.lane.b32.xlu0 %v14469_v30, %s15719_s17  ;;  %11852 = vmatmul.mubr.msk.bf16.vlgmr.msra.gmra.mrb[200].mxu0 %vm626_vm2, %v11851_v60  ;;  %v14610_v60 = vld [vmem:[%s14182_s14] ss:$12 sps:$4 sm:$0xff]  }
 0x229   : > { %5751 = vmatpush1.bf16.msra.mxu0 %v5742_v39  ;;  %v3114_v2 = vpop.f32.mrb[96].mxu1  ;;  %12576 = vmatprep.mubr.msk.bf16.mxu1 %vm13081_vm0, %v15702_v0  ;;  %v5937_v26 = vpop.permute.xlu1 %5936 }
 0x22a   : > { %v3122_v32 = vadd.f32 %v3114_v2, %v3022_v11  ;;  %v12416_v25 = vpop.f32.mrb[97].mxu1  ;;  %5849 = vmatprep.subr.bf16.mxu0 %v5842_v7  ;;  %12580 = vmatprep.subr.bf16.mxu1 %v15702_v0  ;;  %v14599_v5 = vpop.permute.xlu0 %8341 }
 0x22b   : > { %v3073_v55 = vpop.f32.mrb[96].mxu0  ;;  %v3117_v30 = vpop.f32.mrb[98].mxu1  ;;  %5782 = vmatprep.mubr.bf16.mxu0 %v15700_v1  ;;  %7342 = vrot.lane.b32.xlu1 %v14241_v17, %s15721_s0 }
 0x22c   : > { %v3120_v9 = vadd.f32 %v3073_v55, %v3020_v28  ;;  %10651 = vrot.lane.b32.xlu0 %v14594_v10, %s15716_s16  ;;  %v3075_v11 = vpop.f32.mrb[97].mxu0  ;;  %v12417_v13 = vpop.f32.mrb[99].mxu1  ;;  %v5941_v28 = vsel %vm1412_vm9, %v5937_v26, %v14177_v54  ;;  %v11857_v30 = vld [vmem:[%s15681_s6 + $0x64] sm:$0xf] }
 0x22d   : > { %v3121_v43 = vadd.f32 %v3075_v11, %v3021_v12  ;;  %v3077_v16 = vpop.f32.mrb[98].mxu0  ;;  %v14626_v12 = vld [vmem:[%s14182_s14 + $0x8] ss:$12 sps:$4 sm:$0xff]   ;;  %v5935_v56 = vpop.permute.xlu1 %5934 }
 0x22e   : > { %v3078_v39 = vpop.f32.mrb[99].mxu0  ;;  %12577 = vmatmul.mubr.msk.bf16.vlgmr.msra.gmra.mrb[204].mxu1 %vm626_vm2, %v11854_v3  ;;  %v14616_v63 = vpop.permute.xlu0 %8444 }
 0x22f   : > { %12581 = vmatpush3.bf16.msra.mxu1 %v5840_v24  ;;  %12582 = vmatprep.mubr.msk.bf16.mxu1 %vm13081_vm0, %v15702_v0  ;;  %v5940_v39 = vsel %vm1412_vm9, %v5935_v56, %v5937_v26 }
 0x230   : > { %10649 = vrot.lane.b32.xlu0 %v14610_v60, %s15716_s16  ;;  %11855 = vmatmul.mubr.msk.bf16.vlgmr.msra.gmra.mrb[204].mxu0 %vm626_vm2, %v11854_v3 }
 0x231   : > { %5850 = vmatpush1.bf16.msra.mxu0 %v5841_v27  ;;  %v3214_v35 = vpop.f32.mrb[100].mxu1  ;;  %12586 = vmatprep.subr.bf16.mxu1 %v15702_v0 }
 0x232   : > { %v3222_v7 = vadd.f32 %v3214_v35, %v3122_v32  ;;  %v12422_v24 = vpop.f32.mrb[101].mxu1  ;;  %5948 = vmatprep.subr.bf16.mxu0 %v5941_v28  ;;  %5881 = vmatprep.mubr.bf16.mxu0 %v15700_v1  ;;  %v14630_v2 = vpop.permute.xlu0 %8541 }
 0x233   : > { %v3173_v25 = vpop.f32.mrb[100].mxu0  ;;  %v3217_v55 = vpop.f32.mrb[102].mxu1  ;;  %7445 = vrot.lane.b32.xlu1 %v14504_v40, %s15722_s19 }
 0x234   : > { %v3220_v3 = vadd.f32 %v3173_v25, %v3120_v9  ;;  %10752 = vrot.lane.b32.xlu0 %v14626_v12, %s15723_s13  ;;  %v3175_v32 = vpop.f32.mrb[101].mxu0  ;;  %v12423_v11 = vpop.f32.mrb[103].mxu1  ;;  %v11860_v25 = vld [vmem:[%s15681_s6 + $0x68] sm:$0xf] }
 0x235   : > { %v3221_v13 = vadd.f32 %v3175_v32, %v3121_v43  ;;  %v3177_v16 = vpop.f32.mrb[102].mxu0  ;;  %v6066_v27 = vpop.permute.xlu1 %6065 }
 0x236   : > { %v3178_v28 = vpop.f32.mrb[103].mxu0  ;;  %12583 = vmatmul.mubr.msk.bf16.vlgmr.msra.gmra.mrb[208].mxu1 %vm626_vm2, %v11857_v30  ;;  %v14641_v35 = vpop.permute.xlu0 %8539  ;;  %v6068_v9 = vsel %vm620_vm1, %v14193_v23, %v6066_v27  ;;  %v6067_v16 = vsel %vm620_vm1, %v14206_v34, %v14193_v23 }
 0x237   : > { %12587 = vmatpush3.bf16.msra.mxu1 %v14177_v54  ;;  %7542 = vrot.lane.b32.xlu1 %v14222_v62, %s15717_s20 }
 0x238   : > { %10849 = vrot.lane.b32.xlu0 %v14594_v10, %s15720_s26  ;;  %11858 = vmatmul.mubr.msk.bf16.vlgmr.msra.gmra.mrb[208].mxu0 %vm626_vm2, %v11857_v30 }
 0x239   : > { %5949 = vmatpush1.bf16.msra.mxu0 %v5940_v39  ;;  %v3314_v26 = vpop.f32.mrb[104].mxu1  ;;  %12588 = vmatprep.mubr.msk.bf16.mxu1 %vm13081_vm0, %v15702_v0 }
 0x23a   : > { %v14653_v43 = vadd.f32 %v3314_v26, %v3222_v7  ;;  %v12428_v56 = vpop.f32.mrb[105].mxu1  ;;  %6075 = vmatprep.subr.bf16.mxu0 %v6068_v9  ;;  %12592 = vmatprep.subr.bf16.mxu1 %v15702_v0  ;;  %v14656_v54 = vpop.permute.xlu0 %8642  ;;  %v11866_v9 = vld [vmem:[%s15681_s6 + $0x4] sm:$0xf] }
 0x23b   : > { %v3273_v62 = vpop.f32.mrb[104].mxu0  ;;  %v3317_v24 = vpop.f32.mrb[106].mxu1  ;;  %5980 = vmatprep.mubr.bf16.mxu0 %v15700_v1  ;;  %7540 = vrot.lane.b32.xlu1 %v14241_v17, %s15717_s20 }
 0x23c   : > { %v14664_v55 = vadd.f32 %v3273_v62, %v3220_v3  ;;  %10847 = vrot.lane.b32.xlu0 %v14610_v60, %s15720_s26  ;;  %v3275_v7 = vpop.f32.mrb[105].mxu0  ;;  %v12429_v30 = vpop.f32.mrb[107].mxu1  ;;  %v14695_v24 = vld [vmem:[%s13339_s27 + $0x4] ss:$12 sps:$4 sm:$0xff]  }
 0x23d   : > { %v14668_v32 = vadd.f32 %v3275_v7, %v3221_v13  ;;  %v3277_v11 = vpop.f32.mrb[106].mxu0  ;;  %v6247_v23 = vpop.permute.xlu1 %6246 }
 0x23e   : > { %v3278_v39 = vpop.f32.mrb[107].mxu0  ;;  %12589 = vmatmul.mubr.msk.bf16.vlgmr.msra.gmra.mrb[212].mxu1 %vm626_vm2, %v11860_v25  ;;  %v14674_v28 = vpop.permute.xlu0 %8767  ;;  %v6251_v7 = vsel %vm806_vm3, %v6247_v23, %v14219_v4 }
 0x23f   : > { %12593 = vmatpush3.bf16.msra.mxu1 %v6066_v27  ;;  %12594 = vmatprep.mubr.msk.bf16.mxu1 %vm13081_vm0, %v15702_v0 }
 0x240   : > { %10950 = vrot.lane.b32.xlu0 %v14626_v12, %s15721_s0  ;;  %11861 = vmatmul.mubr.msk.bf16.vlgmr.msra.gmra.mrb[212].mxu0 %vm626_vm2, %v11860_v25 }
 0x241   : > { %6076 = vmatpush1.bf16.msra.mxu0 %v6067_v16  ;;  %v3446_v17 = vpop.f32.mrb[108].mxu1  ;;  %6107 = vmatprep.mubr.bf16.mxu0 %v15700_v1 }
 0x242   : > { %v12434_v34 = vpop.f32.mrb[109].mxu1  ;;  %6162 = vmatprep.subr.bf16.mxu0 %v14459_v29  ;;  %7643 = vrot.lane.b32.xlu1 %v14504_v40, %s15718_s21  ;;  %v14685_v3 = vpop.permute.xlu0 %8765 }
 0x243   : > { %v3405_v13 = vpop.f32.mrb[108].mxu0  ;;  %v3449_v27 = vpop.f32.mrb[110].mxu1  ;;  %12598 = vmatprep.subr.bf16.mxu1 %v15702_v0 }
 0x244   : > { %11047 = vrot.lane.b32.xlu0 %v14594_v10, %s15722_s19  ;;  %v3407_v26 = vpop.f32.mrb[109].mxu0  ;;  %v12435_v56 = vpop.f32.mrb[111].mxu1 }
 0x245   : > { %v3409_v62 = vpop.f32.mrb[110].mxu0  ;;  %v6245_v11 = vpop.permute.xlu1 %6244  ;;  %v6046_v56 = vld [vmem:[%s15681_s6] sm:$0xf] }
 0x246   : > { %v3410_v29 = vpop.f32.mrb[111].mxu0  ;;  %12595 = vmatmul.mubr.msk.bf16.vlgmr.msra.gmra.mrb[216].mxu1 %vm626_vm2, %v11866_v9  ;;  %7740 = vrot.lane.b32.xlu1 %v14695_v24, %s15719_s17  ;;  %v14699_v25 = vpop.permute.xlu0 %8952 }
 0x247   : > { %12599 = vmatpush3.bf16.msra.mxu1 %v14347_v42  ;;  %12600 = vmatprep.mubr.msk.bf16.mxu1 %vm13081_vm0, %v15702_v0 }
 0x248   : > { %11045 = vrot.lane.b32.xlu0 %v14610_v60, %s15722_s19  ;;  %11870 = vmatmul.mubr.msk.bf16.vlgmr.msra.gmra.mrb[216].mxu0 %vm626_vm2, %v11866_v9  ;;  %v14718_v9 = vld [vmem:[%s13339_s27] ss:$12 sps:$4 sm:$0xff]  }
 0x249   : > { %v3533_v30 = vpop.f32.mrb[112].mxu1  ;;  %6163 = vmatpush1.bf16.msra.mxu0 %v14422_v46  ;;  %12604 = vmatprep.subr.bf16.mxu1 %v15702_v0 }
 0x24a   : > { %v3534_v16 = vadd.f32 %v3533_v30, %v3446_v17  ;;  %v12440_v42 = vpop.f32.mrb[113].mxu1  ;;  %6258 = vmatprep.subr.bf16.mxu0 %v6251_v7  ;;  %6194 = vmatprep.mubr.bf16.mxu0 %v15700_v1  ;;  %v14712_v39 = vpop.permute.xlu0 %9049 }
 0x24b   : > { %v3492_v34 = vpop.f32.mrb[112].mxu0  ;;  %v3536_v27 = vpop.f32.mrb[114].mxu1  ;;  %7738 = vrot.lane.b32.xlu1 %v14718_v9, %s15719_s17  ;;  %v6250_v42 = vsel %vm806_vm3, %v6245_v11, %v6247_v23 }
 0x24c   : > { %v3493_v46 = vadd.f32 %v3492_v34, %v3405_v13  ;;  %11148 = vrot.lane.b32.xlu0 %v14626_v12, %s15717_s20  ;;  %v3494_v17 = vpop.f32.mrb[113].mxu0  ;;  %v12441_v62 = vpop.f32.mrb[115].mxu1 }
 0x24d   : > { %v3495_v29 = vadd.f32 %v3494_v17, %v3407_v26  ;;  %v3496_v7 = vpop.f32.mrb[114].mxu0  ;;  %v6348_v30 = vpop.permute.xlu1 %6347 }
 0x24e   : > { %v3497_v27 = vpop.f32.mrb[115].mxu0  ;;  %12601 = vmatmul.mubr.msk.bf16.vlgmr.msra.gmra.mrb[220].mxu1 %vm626_vm2, %v6046_v56  ;;  %v14726_v1 = vpop.permute.xlu0 %9047  ;;  %v6350_v13 = vsel %vm907_vm4, %v14234_v6, %v6348_v30 }
 0x24f   : > { %12605 = vmatpush3.bf16.msra.mxu1 %v14219_v4  ;;  %12606 = vmatprep.mubr.msk.bf16.mxu1 %vm13081_vm0, %v15702_v0  ;;  %v15724_v4 = vmov 0   ;;  %v14744_v27 = vld [vmem:[%s13727_s24 + $0x8] ss:$12 sps:$4 sm:$0xff]  }
 0x250   : > { %11245 = vrot.lane.b32.xlu0 %v14594_v10, %s15718_s21  ;;  %11872 = vmatmul.mubr.msk.bf16.vlgmr.msra.gmra.mrb[220].mxu0 %vm626_vm2, %v6046_v56  ;;  %v11874_v10 = vld [vmem:[%s15681_s6 + $0x8] sm:$0xf] }
 0x251   : > { %6259 = vmatpush1.bf16.msra.mxu0 %v6250_v42  ;;  %v3629_v23 = vpop.f32.mrb[116].mxu1  ;;  %12610 = vmatprep.subr.bf16.mxu1 %v15702_v0  ;;  %v6445_v26 = vpop.permute.xlu1 %6444 }
 0x252   : > { %v3637_v11 = vadd.f32 %v3629_v23, %v3534_v16  ;;  %v12446_v34 = vpop.f32.mrb[117].mxu1  ;;  %6357 = vmatprep.subr.bf16.mxu0 %v6350_v13  ;;  %6290 = vmatprep.mubr.bf16.mxu0 %v15724_v4  ;;  %v14738_v17 = vpop.permute.xlu0 %9150 }
 0x253   : > { %15725 = vst [vmem:[#allocation2_spill] sm:$0xff] %v14738_v17  ;;  %v3588_v62 = vpop.f32.mrb[116].mxu0  ;;  %v3632_v7 = vpop.f32.mrb[118].mxu1  ;;  %7949 = vrot.lane.b32.xlu1 %v14744_v27, %s15716_s16  ;;  %v6349_v34 = vsel %vm907_vm4, %v14249_v31, %v14234_v6  ;;  %v15726_v17 = vmov 0.0  }
 0x254   : > { %v3635_v56 = vadd.f32 %v3588_v62, %v3493_v46  ;;  %11243 = vrot.lane.b32.xlu0 %v14610_v60, %s15718_s21  ;;  %v3590_v16 = vpop.f32.mrb[117].mxu0  ;;  %v12447_v42 = vpop.f32.mrb[119].mxu1  ;;  %v6449_v60 = vsel %vm1008_vm5, %v6445_v26, %v14261_v61  ;;  %v593_v46 = vld [vmem:[%s15682_s7] sm:$0xff] }
 0x255   : > { %v3636_v13 = vadd.f32 %v3590_v16, %v3495_v29  ;;  %v3592_v23 = vpop.f32.mrb[118].mxu0  ;;  %v6443_v31 = vpop.permute.xlu1 %6442  ;;  %v14774_v42 = vld [vmem:[%s13727_s24 + $0x4] ss:$12 sps:$4 sm:$0xff]  }
 0x256   : > { %v3593_v7 = vpop.f32.mrb[119].mxu0  ;;  %12607 = vmatmul.mubr.msk.bf16.vlgmr.msra.gmra.mrb[224].mxu1 %vm626_vm2, %v11874_v10  ;;  %v14754_v0 = vpop.permute.xlu0 %9247 }
 0x257   : > { %12611 = vmatpush3.bf16.msra.mxu1 %v6348_v30  ;;  %12612 = vmatprep.mubr.msk.bf16.mxu1 %vm13081_vm0, %v15726_v17 }
 0x258   : > { %11346 = vrot.lane.b32.xlu0 %v14626_v12, %s15719_s17  ;;  %11875 = vmatmul.mubr.msk.bf16.vlgmr.msra.gmra.mrb[224].mxu0 %vm626_vm2, %v11874_v10  ;;  %v11877_v10 = vld [vmem:[%s15681_s6 + $0xc] sm:$0xf] }
 0x259   : > { %6358 = vmatpush1.bf16.msra.mxu0 %v6349_v34  ;;  %v3728_v6 = vpop.f32.mrb[120].mxu1  ;;  %12616 = vmatprep.subr.bf16.mxu1 %v15726_v17 }
 0x25a   : > { %v3736_v29 = vadd.f32 %v3728_v6, %v3637_v11  ;;  %v12452_v30 = vpop.f32.mrb[121].mxu1  ;;  %6456 = vmatprep.subr.bf16.mxu0 %v6449_v60  ;;  %6389 = vmatprep.mubr.bf16.mxu0 %v15724_v4  ;;  %v14768_v62 = vpop.permute.xlu0 %9245 }
 0x25b   : > { %15727 = vst [vmem:[#allocation3_spill] sm:$0xff] %v14768_v62  ;;  %v3687_v16 = vpop.f32.mrb[120].mxu0  ;;  %v3731_v12 = vpop.f32.mrb[122].mxu1  ;;  %8046 = vrot.lane.b32.xlu1 %v14774_v42, %s15723_s13  ;;  %v6448_v30 = vsel %vm1008_vm5, %v6443_v31, %v6445_v26 }
 0x25c   : > { %v3734_v23 = vadd.f32 %v3687_v16, %v3635_v56  ;;  %3325 = vperm.xlu0 %12976, %v593_v46   ;;  %v3689_v11 = vpop.f32.mrb[121].mxu0  ;;  %v12453_v34 = vpop.f32.mrb[123].mxu1  ;;  %v14791_v16 = vld [vmem:[%s13727_s24] ss:$12 sps:$4 sm:$0xff]  }
 0x25d   : > { %v3735_v7 = vadd.f32 %v3689_v11, %v3636_v13  ;;  %v3691_v60 = vpop.f32.mrb[122].mxu0  ;;  %v6546_v6 = vpop.permute.xlu1 %6545 }
 0x25e   : > { %v3692_v12 = vpop.f32.mrb[123].mxu0  ;;  %12613 = vmatmul.mubr.msk.bf16.vlgmr.msra.gmra.mrb[228].mxu1 %vm626_vm2, %v11877_v10  ;;  %v14780_v62 = vpop.permute.xlu0 %9348  ;;  %v6548_v56 = vsel %vm1109_vm6, %v14274_v49, %v6546_v6 }
 0x25f   : > { %15728 = vst [vmem:[#allocation4_spill] sm:$0xff] %v14780_v62  ;;  %12617 = vmatpush3.bf16.msra.mxu1 %v14261_v61  ;;  %12618 = vmatprep.mubr.msk.bf16.mxu1 %vm13081_vm0, %v15726_v17 }
 0x260   : > { %11878 = vmatmul.mubr.msk.bf16.vlgmr.msra.gmra.mrb[228].mxu0 %vm626_vm2, %v11877_v10  ;;  %12622 = vmatprep.subr.bf16.mxu1 %v15726_v17  ;;  %v11880_v10 = vld [vmem:[%s15681_s6 + $0x10] sm:$0xf] }
 0x261   : > { %6457 = vmatpush1.bf16.msra.mxu0 %v6448_v30  ;;  %v3827_v26 = vpop.f32.mrb[124].mxu1  ;;  %6488 = vmatprep.mubr.bf16.mxu0 %v15724_v4  ;;  %v6643_v13 = vpop.permute.xlu1 %6642 }
 0x262   : > { %v3835_v31 = vadd.f32 %v3827_v26, %v3736_v29  ;;  %v12458_v46 = vpop.f32.mrb[125].mxu1  ;;  %6555 = vmatprep.subr.bf16.mxu0 %v6548_v56  ;;  %8044 = vrot.lane.b32.xlu1 %v14791_v16, %s15723_s13  ;;  %v14795_v61 = vpop.permute.xlu0 %9445  ;;  %v6547_v56 = vsel %vm1109_vm6, %v14288_v8, %v14274_v49 }
 0x263   : > { %15729 = vst [vmem:[#allocation5_spill] sm:$0xff] %v14795_v61  ;;  %v3786_v11 = vpop.f32.mrb[124].mxu0  ;;  %v3830_v34 = vpop.f32.mrb[126].mxu1 }
 0x264   : > { %v3833_v60 = vadd.f32 %v3786_v11, %v3734_v23  ;;  %v3788_v30 = vpop.f32.mrb[125].mxu0  ;;  %v12459_v12 = vpop.f32.mrb[127].mxu1  ;;  %v6647_v23 = vsel %vm1210_vm7, %v6643_v13, %v14302_v44 }
 0x265   : > { %v3834_v62 = vadd.f32 %v3788_v30, %v3735_v7  ;;  %v3790_v29 = vpop.f32.mrb[126].mxu0  ;;  %v6641_v8 = vpop.permute.xlu1 %6640 }
 0x266   : > { %v3791_v26 = vpop.f32.mrb[127].mxu0  ;;  %12619 = vmatmul.mubr.msk.bf16.vlgmr.msra.gmra.mrb[232].mxu1 %vm626_vm2, %v11880_v10  ;;  %8147 = vrot.lane.b32.xlu1 %v14744_v27, %s15720_s26  ;;  %v14806_v46 = vpop.permute.xlu0 %9443 }
 0x267   : > { %15730 = vst [vmem:[#allocation6_spill] sm:$0xff] %v14806_v46  ;;  %12623 = vmatpush3.bf16.msra.mxu1 %v6546_v6  ;;  %12624 = vmatprep.mubr.msk.bf16.mxu1 %vm13081_vm0, %v15726_v17 }
 0x268   : > { %11881 = vmatmul.mubr.msk.bf16.vlgmr.msra.gmra.mrb[232].mxu0 %vm626_vm2, %v11880_v10  ;;  %12628 = vmatprep.subr.bf16.mxu1 %v15726_v17  ;;  %v11883_v10 = vld [vmem:[%s15681_s6 + $0x14] sm:$0xf] }
 0x269   : > { %6556 = vmatpush1.bf16.msra.mxu0 %v6547_v56  ;;  %v3926_v49 = vpop.f32.mrb[128].mxu1  ;;  %6587 = vmatprep.mubr.bf16.mxu0 %v15724_v4 }
 0x26a   : > { %v3934_v7 = vadd.f32 %v3926_v49, %v3835_v31  ;;  %v12464_v11 = vpop.f32.mrb[129].mxu1  ;;  %6654 = vmatprep.subr.bf16.mxu0 %v6647_v23  ;;  %8244 = vrot.lane.b32.xlu1 %v14774_v42, %s15721_s0  ;;  %v14817_v6 = vpop.permute.xlu0 %9546  ;;  %v6646_v31 = vsel %vm1210_vm7, %v6641_v8, %v6643_v13 }
 0x26b   : > { %v3885_v34 = vpop.f32.mrb[128].mxu0  ;;  %v3929_v30 = vpop.f32.mrb[130].mxu1 }
 0x26c   : > { %v3932_v12 = vadd.f32 %v3885_v34, %v3833_v60  ;;  %v3887_v29 = vpop.f32.mrb[129].mxu0  ;;  %v12465_v56 = vpop.f32.mrb[131].mxu1  ;;  %v11886_v30 = vld [vmem:[%s15681_s6 + $0x18] sm:$0xf] }
 0x26d   : > { %v3933_v26 = vadd.f32 %v3887_v29, %v3834_v62  ;;  %v3889_v46 = vpop.f32.mrb[130].mxu0  ;;  %v6744_v61 = vpop.permute.xlu1 %6743 }
 0x26e   : > { %v3890_v23 = vpop.f32.mrb[131].mxu0  ;;  %12625 = vmatmul.mubr.msk.bf16.vlgmr.msra.gmra.mrb[236].mxu1 %vm626_vm2, %v11883_v10  ;;  %8242 = vrot.lane.b32.xlu1 %v14791_v16, %s15721_s0  ;;  %v14826_v49 = vpop.permute.xlu0 %9751  ;;  %v6746_v62 = vsel %vm1311_vm8, %v14317_v52, %v6744_v61 }
 0x26f   : > { %12629 = vmatpush3.bf16.msra.mxu1 %v14302_v44  ;;  %12630 = vmatprep.mubr.msk.bf16.mxu1 %vm13081_vm0, %v15726_v17 }
 0x270   : > { %11884 = vmatmul.mubr.msk.bf16.vlgmr.msra.gmra.mrb[236].mxu0 %vm626_vm2, %v11883_v10  ;;  %12634 = vmatprep.subr.bf16.mxu1 %v15726_v17 }
 0x271   : > { %6655 = vmatpush1.bf16.msra.mxu0 %v6646_v31  ;;  %v4025_v13 = vpop.f32.mrb[132].mxu1  ;;  %6686 = vmatprep.mubr.bf16.mxu0 %v15724_v4  ;;  %v6841_v60 = vpop.permute.xlu1 %6840 }
 0x272   : > { %v4033_v46 = vadd.f32 %v4025_v13, %v3934_v7  ;;  %v12470_v8 = vpop.f32.mrb[133].mxu1  ;;  %6753 = vmatprep.subr.bf16.mxu0 %v6746_v62  ;;  %v14836_v11 = vpop.permute.xlu0 %9749  ;;  %8345 = vrot.lane.b32.xlu1 %v14744_v27, %s15722_s19  ;;  %v6745_v7 = vsel %vm1311_vm8, %v14330_v14, %v14317_v52 }
 0x273   : > { %v3984_v44 = vpop.f32.mrb[132].mxu0  ;;  %v4028_v34 = vpop.f32.mrb[134].mxu1 }
 0x274   : > { %v4031_v10 = vadd.f32 %v3984_v44, %v3932_v12  ;;  %v3986_v29 = vpop.f32.mrb[133].mxu0  ;;  %v12471_v56 = vpop.f32.mrb[135].mxu1  ;;  %v6845_v12 = vsel %vm1412_vm9, %v6841_v60, %v14341_v57 }
 0x275   : > { %v4032_v31 = vadd.f32 %v3986_v29, %v3933_v26  ;;  %v3988_v23 = vpop.f32.mrb[134].mxu0  ;;  %v6839_v14 = vpop.permute.xlu1 %6838 }
 0x276   : > { %v3989_v62 = vpop.f32.mrb[135].mxu0  ;;  %12631 = vmatmul.mubr.msk.bf16.vlgmr.msra.gmra.mrb[240].mxu1 %vm626_vm2, %v11886_v30  ;;  %v14847_v13 = vpop.permute.xlu0 %9852  ;;  %8442 = vrot.lane.b32.xlu1 %v14774_v42, %s15717_s20 }
 0x277   : > { %12635 = vmatpush3.bf16.msra.mxu1 %v6744_v61  ;;  %12636 = vmatprep.mubr.msk.bf16.mxu1 %vm13081_vm0, %v15726_v17 }
 0x278   : > { %11887 = vmatmul.mubr.msk.bf16.vlgmr.msra.gmra.mrb[240].mxu0 %vm626_vm2, %v11886_v30  ;;  %12640 = vmatprep.subr.bf16.mxu1 %v15726_v17  ;;  %v11889_v30 = vld [vmem:[%s15681_s6 + $0x1c] sm:$0xf] }
 0x279   : > { %6754 = vmatpush1.bf16.msra.mxu0 %v6745_v7  ;;  %v4124_v52 = vpop.f32.mrb[136].mxu1  ;;  %6785 = vmatprep.mubr.bf16.mxu0 %v15724_v4 }
 0x27a   : > { %v4132_v26 = vadd.f32 %v4124_v52, %v4033_v46  ;;  %v12476_v8 = vpop.f32.mrb[137].mxu1  ;;  %6852 = vmatprep.subr.bf16.mxu0 %v6845_v12  ;;  %v14858_v44 = vpop.permute.xlu0 %9949  ;;  %8440 = vrot.lane.b32.xlu1 %v14791_v16, %s15717_s20  ;;  %v6844_v46 = vsel %vm1412_vm9, %v6839_v14, %v6841_v60 }
 0x27b   : > { %v4083_v61 = vpop.f32.mrb[136].mxu0  ;;  %v4127_v34 = vpop.f32.mrb[138].mxu1 }
 0x27c   : > { %v4130_v29 = vadd.f32 %v4083_v61, %v4031_v10  ;;  %v4085_v56 = vpop.f32.mrb[137].mxu0  ;;  %v12477_v23 = vpop.f32.mrb[139].mxu1  ;;  %v11892_v34 = vld [vmem:[%s15681_s6 + $0x20] sm:$0xf] }
 0x27d   : > { %v4131_v7 = vadd.f32 %v4085_v56, %v4032_v31  ;;  %v4087_v62 = vpop.f32.mrb[138].mxu0  ;;  %v7050_v60 = vpop.permute.xlu1 %7049 }
 0x27e   : > { %v4088_v52 = vpop.f32.mrb[139].mxu0  ;;  %12637 = vmatmul.mubr.msk.bf16.vlgmr.msra.gmra.mrb[244].mxu1 %vm626_vm2, %v11889_v30  ;;  %v14867_v12 = vpop.permute.xlu0 %9947  ;;  %8543 = vrot.lane.b32.xlu1 %v14744_v27, %s15718_s21 }
 0x27f   : > { %12641 = vmatpush3.bf16.msra.mxu1 %v14341_v57  ;;  %12642 = vmatprep.mubr.msk.bf16.mxu1 %vm13081_vm0, %v15726_v17 }
 0x280   : > { %11890 = vmatmul.mubr.msk.bf16.vlgmr.msra.gmra.mrb[244].mxu0 %vm626_vm2, %v11889_v30  ;;  %12646 = vmatprep.subr.bf16.mxu1 %v15726_v17 }
 0x281   : > { %6853 = vmatpush1.bf16.msra.mxu0 %v6844_v46  ;;  %v4223_v10 = vpop.f32.mrb[140].mxu1  ;;  %6884 = vmatprep.mubr.bf16.mxu0 %v15724_v4 }
 0x282   : > { %v4231_v31 = vadd.f32 %v4223_v10, %v4132_v26  ;;  %v12482_v14 = vpop.f32.mrb[141].mxu1  ;;  %6960 = vmatprep.subr.bf16.mxu0 %v14695_v24  ;;  %v14878_v8 = vpop.permute.xlu0 %10050  ;;  %8640 = vrot.lane.b32.xlu1 %v14774_v42, %s15719_s17 }
 0x283   : > { %v4182_v57 = vpop.f32.mrb[140].mxu0  ;;  %v4226_v61 = vpop.f32.mrb[142].mxu1 }
 0x284   : > { %v4229_v30 = vadd.f32 %v4182_v57, %v4130_v29  ;;  %v4184_v56 = vpop.f32.mrb[141].mxu0  ;;  %v12483_v23 = vpop.f32.mrb[143].mxu1  ;;  %v7052_v29 = vsel %vm620_vm1, %v14355_v41, %v7050_v60  ;;  %v14902_v57 = vld [vmem:[%s13339_s27 + $0x8] ss:$12 sps:$4 sm:$0xff]  }
 0x285   : > { %v4230_v62 = vadd.f32 %v4184_v56, %v4131_v7  ;;  %v4186_v46 = vpop.f32.mrb[142].mxu0  ;;  %v7147_v52 = vpop.permute.xlu1 %7146 }
 0x286   : > { %v4187_v26 = vpop.f32.mrb[143].mxu0  ;;  %12643 = vmatmul.mubr.msk.bf16.vlgmr.msra.gmra.mrb[248].mxu1 %vm626_vm2, %v11892_v34  ;;  %v14886_v24 = vpop.permute.xlu0 %10147  ;;  %8638 = vrot.lane.b32.xlu1 %v14791_v16, %s15719_s17 }
 0x287   : > { %12647 = vmatpush3.bf16.msra.mxu1 %v14504_v40  ;;  %12648 = vmatprep.mubr.msk.bf16.mxu1 %vm13081_vm0, %v15726_v17 }
 0x288   : > { %11893 = vmatmul.mubr.msk.bf16.vlgmr.msra.gmra.mrb[248].mxu0 %vm626_vm2, %v11892_v34  ;;  %12652 = vmatprep.subr.bf16.mxu1 %v15726_v17 }
 0x289   : > { %v4331_v7 = vpop.f32.mrb[144].mxu1  ;;  %6961 = vmatpush1.bf16.msra.mxu0 %v14718_v9  ;;  %6992 = vmatprep.mubr.bf16.mxu0 %v15724_v4  ;;  %v11895_v9 = vld [vmem:[%s15681_s6 + $0x24] sm:$0xf] }
 0x28a   : > { %v4339_v10 = vadd.f32 %v4331_v7, %v4231_v31  ;;  %v12488_v14 = vpop.f32.mrb[145].mxu1  ;;  %7059 = vmatprep.subr.bf16.mxu0 %v7052_v29  ;;  %v14899_v40 = vpop.permute.xlu0 %10145  ;;  %8769 = vrot.lane.b32.xlu1 %v14902_v57, %s15716_s16  ;;  %v7051_v29 = vsel %vm620_vm1, %v14368_v33, %v14355_v41 }
 0x28b   : > { %15731 = vst [vmem:[#allocation7_spill] sm:$0xff] %v14899_v40  ;;  %v4290_v61 = vpop.f32.mrb[144].mxu0  ;;  %v4334_v34 = vpop.f32.mrb[146].mxu1 }
 0x28c   : > { %v4337_v56 = vadd.f32 %v4290_v61, %v4229_v30  ;;  %v4292_v23 = vpop.f32.mrb[145].mxu0  ;;  %v12489_v46 = vpop.f32.mrb[147].mxu1  ;;  %v14916_v34 = vld [vmem:[%s13339_s27 + $0x4] ss:$12 sps:$4 sm:$0xff]   ;;  %v7151_v30 = vsel %vm806_vm3, %v7147_v52, %v14382_v47 }
 0x28d   : > { %v4338_v31 = vadd.f32 %v4292_v23, %v4230_v62  ;;  %v4294_v26 = vpop.f32.mrb[146].mxu0  ;;  %v7145_v33 = vpop.permute.xlu1 %7144 }
 0x28e   : > { %v4295_v7 = vpop.f32.mrb[147].mxu0  ;;  %12649 = vmatmul.mubr.msk.bf16.vlgmr.msra.gmra.mrb[252].mxu1 %vm626_vm2, %v11895_v9  ;;  %v14913_v14 = vpop.permute.xlu0 %10248  ;;  %8950 = vrot.lane.b32.xlu1 %v14916_v34, %s15723_s13 }
 0x28f   : > { %15732 = vst [vmem:[#allocation8_spill] sm:$0xff] %v14913_v14  ;;  %12653 = vmatpush3.bf16.msra.mxu1 %v7050_v60  ;;  %12654 = vmatprep.mubr.msk.bf16.mxu1 %vm13081_vm0, %v15726_v17  ;;  %v14930_v60 = vld [vmem:[%s13339_s27] ss:$12 sps:$4 sm:$0xff]  }
 0x290   : > { %11899 = vmatmul.mubr.msk.bf16.vlgmr.msra.gmra.mrb[252].mxu0 %vm626_vm2, %v11895_v9  ;;  %12658 = vmatprep.subr.bf16.mxu1 %v15726_v17  ;;  %v11901_v9 = vld [vmem:[%s15681_s6 + $0x28] sm:$0xf] }
 0x291   : > { %7060 = vmatpush1.bf16.msra.mxu0 %v7051_v29  ;;  %v4430_v41 = vpop.f32.mrb[148].mxu1  ;;  %7091 = vmatprep.mubr.bf16.mxu0 %v15724_v4 }
 0x292   : > { %v4438_v62 = vadd.f32 %v4430_v41, %v4339_v10  ;;  %v12494_v61 = vpop.f32.mrb[149].mxu1  ;;  %7158 = vmatprep.subr.bf16.mxu0 %v7151_v30  ;;  %v14927_v23 = vpop.permute.xlu0 %10345  ;;  %8948 = vrot.lane.b32.xlu1 %v14930_v60, %s15723_s13  ;;  %v7150_v30 = vsel %vm806_vm3, %v7145_v33, %v7147_v52 }
 0x293   : > { %15733 = vst [vmem:[#allocation9_spill] sm:$0xff] %v14927_v23  ;;  %v4389_v46 = vpop.f32.mrb[148].mxu0  ;;  %v4433_v26 = vpop.f32.mrb[150].mxu1 }
 0x294   : > { %v4436_v29 = vadd.f32 %v4389_v46, %v4337_v56  ;;  %v4391_v7 = vpop.f32.mrb[149].mxu0  ;;  %v12495_v14 = vpop.f32.mrb[151].mxu1 }
 0x295   : > { %v4437_v40 = vadd.f32 %v4391_v7, %v4338_v31  ;;  %v4393_v10 = vpop.f32.mrb[150].mxu0  ;;  %v7248_v41 = vpop.permute.xlu1 %7247 }
 0x296   : > { %v4394_v61 = vpop.f32.mrb[151].mxu0  ;;  %12655 = vmatmul.mubr.msk.bf16.vlgmr.msra.gmra.mrb[0].mxu1 %vm626_vm2, %v11901_v9  ;;  %v14939_v23 = vpop.permute.xlu0 %10343  ;;  %9051 = vrot.lane.b32.xlu1 %v14902_v57, %s15720_s26  ;;  %v7250_v56 = vsel %vm907_vm4, %v14393_v51, %v7248_v41 }
 0x297   : > { %15734 = vst [vmem:[#allocation10_spill] sm:$0xff] %v14939_v23  ;;  %12659 = vmatpush3.bf16.msra.mxu1 %v14382_v47  ;;  %12660 = vmatprep.mubr.msk.bf16.mxu1 %vm13081_vm0, %v15726_v17 }
 0x298   : > { %11902 = vmatmul.mubr.msk.bf16.vlgmr.msra.gmra.mrb[0].mxu0 %vm626_vm2, %v11901_v9  ;;  %12664 = vmatprep.subr.bf16.mxu1 %v15726_v17  ;;  %v11904_v9 = vld [vmem:[%s15681_s6 + $0x2c] sm:$0xf] }
 0x299   : > { %7159 = vmatpush1.bf16.msra.mxu0 %v7150_v30  ;;  %v4529_v52 = vpop.f32.mrb[152].mxu1  ;;  %7190 = vmatprep.mubr.bf16.mxu0 %v15724_v4  ;;  %v7345_v31 = vpop.permute.xlu1 %7344 }
 0x29a   : > { %v4537_v14 = vadd.f32 %v4529_v52, %v4438_v62  ;;  %v12500_v33 = vpop.f32.mrb[153].mxu1  ;;  %7257 = vmatprep.subr.bf16.mxu0 %v7250_v56  ;;  %v14951_v46 = vpop.permute.xlu0 %10446  ;;  %9148 = vrot.lane.b32.xlu1 %v14916_v34, %s15721_s0  ;;  %v7249_v62 = vsel %vm907_vm4, %v14404_v20, %v14393_v51 }
 0x29b   : > { %v4488_v47 = vpop.f32.mrb[152].mxu0  ;;  %v4532_v26 = vpop.f32.mrb[154].mxu1 }
 0x29c   : > { %v4535_v7 = vadd.f32 %v4488_v47, %v4436_v29  ;;  %v4490_v10 = vpop.f32.mrb[153].mxu0  ;;  %v12501_v30 = vpop.f32.mrb[155].mxu1  ;;  %v11907_v26 = vld [vmem:[%s15681_s6 + $0x30] sm:$0xf] }
 0x29d   : > { %v4536_v61 = vadd.f32 %v4490_v10, %v4437_v40  ;;  %v4492_v23 = vpop.f32.mrb[154].mxu0  ;;  %v7349_v40 = vsel %vm1008_vm5, %v7345_v31, %v14416_v18  ;;  %v7343_v20 = vpop.permute.xlu1 %7342 }
 0x29e   : > { %v4493_v56 = vpop.f32.mrb[155].mxu0  ;;  %12661 = vmatmul.mubr.msk.bf16.vlgmr.msra.gmra.mrb[4].mxu1 %vm626_vm2, %v11904_v9  ;;  %v14962_v52 = vpop.permute.xlu0 %10651  ;;  %9146 = vrot.lane.b32.xlu1 %v14930_v60, %s15721_s0 }
 0x29f   : > { %15735 = vst [vmem:[#allocation11_spill] sm:$0xff] %v14962_v52  ;;  %12665 = vmatpush3.bf16.msra.mxu1 %v7248_v41  ;;  %12666 = vmatprep.mubr.msk.bf16.mxu1 %vm13081_vm0, %v15726_v17 }
 0x2a0   : > { %11905 = vmatmul.mubr.msk.bf16.vlgmr.msra.gmra.mrb[4].mxu0 %vm626_vm2, %v11904_v9  ;;  %12670 = vmatprep.subr.bf16.mxu1 %v15726_v17 }
 0x2a1   : > { %7258 = vmatpush1.bf16.msra.mxu0 %v7249_v62  ;;  %v4628_v51 = vpop.f32.mrb[156].mxu1  ;;  %7289 = vmatprep.mubr.bf16.mxu0 %v15724_v4 }
 0x2a2   : > { %v4636_v23 = vadd.f32 %v4628_v51, %v4537_v14  ;;  %v12506_v29 = vpop.f32.mrb[157].mxu1  ;;  %7356 = vmatprep.subr.bf16.mxu0 %v7349_v40  ;;  %v14973_v33 = vpop.permute.xlu0 %10649  ;;  %9249 = vrot.lane.b32.xlu1 %v14902_v57, %s15722_s19  ;;  %v7348_v14 = vsel %vm1008_vm5, %v7343_v20, %v7345_v31 }
 0x2a3   : > { %v4587_v41 = vpop.f32.mrb[156].mxu0  ;;  %v4631_v47 = vpop.f32.mrb[158].mxu1 }
 0x2a4   : > { %v4634_v9 = vadd.f32 %v4587_v41, %v4535_v7  ;;  %v4589_v10 = vpop.f32.mrb[157].mxu0  ;;  %v12507_v30 = vpop.f32.mrb[159].mxu1 }
 0x2a5   : > { %v4635_v62 = vadd.f32 %v4589_v10, %v4536_v61  ;;  %v4591_v56 = vpop.f32.mrb[158].mxu0  ;;  %v7446_v52 = vpop.permute.xlu1 %7445 }
 0x2a6   : > { %v4592_v40 = vpop.f32.mrb[159].mxu0  ;;  %12667 = vmatmul.mubr.msk.bf16.vlgmr.msra.gmra.mrb[8].mxu1 %vm626_vm2, %v11907_v26  ;;  %v14982_v51 = vpop.permute.xlu0 %10752  ;;  %9346 = vrot.lane.b32.xlu1 %v14916_v34, %s15717_s20  ;;  %v7448_v7 = vsel %vm1109_vm6, %v14430_v37, %v7446_v52 }
 0x2a7   : > { %12671 = vmatpush3.bf16.msra.mxu1 %v14416_v18  ;;  %12672 = vmatprep.mubr.msk.bf16.mxu1 %vm13081_vm0, %v15726_v17 }
 0x2a8   : > { %11908 = vmatmul.mubr.msk.bf16.vlgmr.msra.gmra.mrb[8].mxu0 %vm626_vm2, %v11907_v26  ;;  %12676 = vmatprep.subr.bf16.mxu1 %v15726_v17  ;;  %v11910_v26 = vld [vmem:[%s15681_s6 + $0x34] sm:$0xf] }
 0x2a9   : > { %7357 = vmatpush1.bf16.msra.mxu0 %v7348_v14  ;;  %v4727_v31 = vpop.f32.mrb[160].mxu1  ;;  %7388 = vmatprep.mubr.bf16.mxu0 %v15724_v4  ;;  %v7543_v61 = vpop.permute.xlu1 %7542 }
 0x2aa   : > { %v4735_v20 = vadd.f32 %v4727_v31, %v4636_v23  ;;  %v12512_v29 = vpop.f32.mrb[161].mxu1  ;;  %7455 = vmatprep.subr.bf16.mxu0 %v7448_v7  ;;  %v14994_v41 = vpop.permute.xlu0 %10849  ;;  %9344 = vrot.lane.b32.xlu1 %v14930_v60, %s15717_s20  ;;  %v7447_v23 = vsel %vm1109_vm6, %v14443_v50, %v14430_v37 }
 0x2ab   : > { %v4686_v18 = vpop.f32.mrb[160].mxu0  ;;  %v4730_v47 = vpop.f32.mrb[162].mxu1 }
 0x2ac   : > { %v4733_v10 = vadd.f32 %v4686_v18, %v4634_v9  ;;  %v4688_v30 = vpop.f32.mrb[161].mxu0  ;;  %v12513_v56 = vpop.f32.mrb[163].mxu1  ;;  %v7547_v9 = vsel %vm1210_vm7, %v7543_v61, %v14456_v36 }
 0x2ad   : > { %v4734_v14 = vadd.f32 %v4688_v30, %v4635_v62  ;;  %v4690_v40 = vpop.f32.mrb[162].mxu0  ;;  %v7541_v50 = vpop.permute.xlu1 %7540 }
 0x2ae   : > { %v4691_v7 = vpop.f32.mrb[163].mxu0  ;;  %12673 = vmatmul.mubr.msk.bf16.vlgmr.msra.gmra.mrb[12].mxu1 %vm626_vm2, %v11910_v26  ;;  %v15005_v31 = vpop.permute.xlu0 %10847  ;;  %9447 = vrot.lane.b32.xlu1 %v14902_v57, %s15718_s21 }
 0x2af   : > { %15736 = vst [vmem:[#allocation12_spill] sm:$0xff] %v15005_v31  ;;  %12677 = vmatpush3.bf16.msra.mxu1 %v7446_v52  ;;  %12678 = vmatprep.mubr.msk.bf16.mxu1 %vm13081_vm0, %v15726_v17 }
 0x2b0   : > { %11911 = vmatmul.mubr.msk.bf16.vlgmr.msra.gmra.mrb[12].mxu0 %vm626_vm2, %v11910_v26  ;;  %12682 = vmatprep.subr.bf16.mxu1 %v15726_v17  ;;  %v11913_v26 = vld [vmem:[%s15681_s6 + $0x38] sm:$0xf] }
 0x2b1   : > { %7456 = vmatpush1.bf16.msra.mxu0 %v7447_v23  ;;  %v4826_v37 = vpop.f32.mrb[164].mxu1  ;;  %7487 = vmatprep.mubr.bf16.mxu0 %v15724_v4 }
 0x2b2   : > { %v4834_v62 = vadd.f32 %v4826_v37, %v4735_v20  ;;  %v12518_v29 = vpop.f32.mrb[165].mxu1  ;;  %7554 = vmatprep.subr.bf16.mxu0 %v7547_v9  ;;  %v15016_v18 = vpop.permute.xlu0 %10950  ;;  %9544 = vrot.lane.b32.xlu1 %v14916_v34, %s15719_s17  ;;  %v7546_v20 = vsel %vm1210_vm7, %v7541_v50, %v7543_v61 }
 0x2b3   : > { %v4785_v52 = vpop.f32.mrb[164].mxu0  ;;  %v4829_v47 = vpop.f32.mrb[166].mxu1 }
 0x2b4   : > { %v4832_v30 = vadd.f32 %v4785_v52, %v4733_v10  ;;  %v4787_v56 = vpop.f32.mrb[165].mxu0  ;;  %v12519_v40 = vpop.f32.mrb[167].mxu1 }
 0x2b5   : > { %v4833_v23 = vadd.f32 %v4787_v56, %v4734_v14  ;;  %v4789_v7 = vpop.f32.mrb[166].mxu0  ;;  %v7644_v31 = vpop.permute.xlu1 %7643 }
 0x2b6   : > { %v4790_v9 = vpop.f32.mrb[167].mxu0  ;;  %12679 = vmatmul.mubr.msk.bf16.vlgmr.msra.gmra.mrb[16].mxu1 %vm626_vm2, %v11913_v26  ;;  %v15025_v37 = vpop.permute.xlu0 %11047  ;;  %9542 = vrot.lane.b32.xlu1 %v14930_v60, %s15719_s17  ;;  %v7646_v10 = vsel %vm1311_vm8, %v14474_v45, %v7644_v31 }
 0x2b7   : > { %12683 = vmatpush3.bf16.msra.mxu1 %v14456_v36  ;;  %12684 = vmatprep.mubr.msk.bf16.mxu1 %vm13081_vm0, %v15726_v17  ;;  %v15040_v36 = vld [vmem:[%s13727_s24 + $0x8] ss:$12 sps:$4 sm:$0xff]  }
 0x2b8   : > { %11914 = vmatmul.mubr.msk.bf16.vlgmr.msra.gmra.mrb[16].mxu0 %vm626_vm2, %v11913_v26  ;;  %12688 = vmatprep.subr.bf16.mxu1 %v15726_v17  ;;  %v11916_v26 = vld [vmem:[%s15681_s6 + $0x3c] sm:$0xf] }
 0x2b9   : > { %7555 = vmatpush1.bf16.msra.mxu0 %v7546_v20  ;;  %v4925_v61 = vpop.f32.mrb[168].mxu1  ;;  %7586 = vmatprep.mubr.bf16.mxu0 %v15724_v4  ;;  %v7741_v14 = vpop.permute.xlu1 %7740 }
 0x2ba   : > { %v4933_v50 = vadd.f32 %v4925_v61, %v4834_v62  ;;  %v12524_v29 = vpop.f32.mrb[169].mxu1  ;;  %7653 = vmatprep.subr.bf16.mxu0 %v7646_v10  ;;  %v15037_v52 = vpop.permute.xlu0 %11045  ;;  %9753 = vrot.lane.b32.xlu1 %v15040_v36, %s15716_s16  ;;  %v7645_v10 = vsel %vm1311_vm8, %v14486_v22, %v14474_v45 }
 0x2bb   : > { %v4884_v47 = vpop.f32.mrb[168].mxu0  ;;  %v4928_v56 = vpop.f32.mrb[170].mxu1 }
 0x2bc   : > { %v4931_v40 = vadd.f32 %v4884_v47, %v4832_v30  ;;  %v4886_v7 = vpop.f32.mrb[169].mxu0  ;;  %v12525_v20 = vpop.f32.mrb[171].mxu1  ;;  %v7745_v30 = vsel %vm1412_vm9, %v7741_v14, %v14498_v59 }
 0x2bd   : > { %v4932_v9 = vadd.f32 %v4886_v7, %v4833_v23  ;;  %v4888_v62 = vpop.f32.mrb[170].mxu0  ;;  %v7739_v45 = vpop.permute.xlu1 %7738 }
 0x2be   : > { %v4889_v61 = vpop.f32.mrb[171].mxu0  ;;  %12685 = vmatmul.mubr.msk.bf16.vlgmr.msra.gmra.mrb[20].mxu1 %vm626_vm2, %v11916_v26  ;;  %9850 = vrot.lane.b32.xlu1 %v14774_v42, %s15723_s13  ;;  %v15060_v47 = vpop.permute.xlu0 %11148 }
 0x2bf   : > { %12689 = vmatpush3.bf16.msra.mxu1 %v7644_v31  ;;  %12690 = vmatprep.mubr.msk.bf16.mxu1 %vm13081_vm0, %v15726_v17 }
 0x2c0   : > { %11917 = vmatmul.mubr.msk.bf16.vlgmr.msra.gmra.mrb[20].mxu0 %vm626_vm2, %v11916_v26  ;;  %12694 = vmatprep.subr.bf16.mxu1 %v15726_v17  ;;  %v11919_v26 = vld [vmem:[%s15681_s6 + $0x40] sm:$0xf] }
 0x2c1   : > { %7654 = vmatpush1.bf16.msra.mxu0 %v7645_v10  ;;  %v5024_v23 = vpop.f32.mrb[172].mxu1  ;;  %7685 = vmatprep.mubr.bf16.mxu0 %v15724_v4 }
 0x2c2   : > { %v12530_v22 = vpop.f32.mrb[173].mxu1  ;;  %7752 = vmatprep.subr.bf16.mxu0 %v7745_v30  ;;  %v5032_v29 = vadd.f32 %v5024_v23, %v4933_v50  ;;  %9848 = vrot.lane.b32.xlu1 %v14791_v16, %s15723_s13 }
 0x2c3   : > { %v4983_v31 = vpop.f32.mrb[172].mxu0  ;;  %v5027_v56 = vpop.f32.mrb[174].mxu1  ;;  %v7744_v22 = vsel %vm1412_vm9, %v7739_v45, %v7741_v14 }
 0x2c4   : > { %v4985_v7 = vpop.f32.mrb[173].mxu0  ;;  %v12531_v20 = vpop.f32.mrb[175].mxu1  ;;  %v5030_v62 = vadd.f32 %v4983_v31, %v4931_v40  ;;  %v11922_v31 = vld [vmem:[%s15681_s6 + $0x44] sm:$0xf] }
 0x2c5   : > { %v4987_v10 = vpop.f32.mrb[174].mxu0  ;;  %v5031_v61 = vadd.f32 %v4985_v7, %v4932_v9  ;;  %v15076_v40 = vpop.permute.xlu0 %11245 }
 0x2c6   : > { %v4988_v30 = vpop.f32.mrb[175].mxu0  ;;  %12691 = vmatmul.mubr.msk.bf16.vlgmr.msra.gmra.mrb[24].mxu1 %vm626_vm2, %v11919_v26  ;;  %9951 = vrot.lane.b32.xlu1 %v15040_v36, %s15720_s26  ;;  %v7950_v23 = vpop.permute.xlu1 %7949 }
 0x2c7   : > { %12695 = vmatpush3.bf16.msra.mxu1 %v14498_v59  ;;  %12696 = vmatprep.mubr.msk.bf16.mxu1 %vm13081_vm0, %v15726_v17 }
 0x2c8   : > { %11920 = vmatmul.mubr.msk.bf16.vlgmr.msra.gmra.mrb[24].mxu0 %vm626_vm2, %v11919_v26  ;;  %12700 = vmatprep.subr.bf16.mxu1 %v15726_v17 }
 0x2c9   : > { %7753 = vmatpush1.bf16.msra.mxu0 %v7744_v22  ;;  %v5123_v50 = vpop.f32.mrb[176].mxu1  ;;  %7784 = vmatprep.mubr.bf16.mxu0 %v15724_v4  ;;  %v15090_v22 = vpop.permute.xlu0 %11243 }
 0x2ca   : > { %v5131_v14 = vadd.f32 %v5123_v50, %v5032_v29  ;;  %v12536_v9 = vpop.f32.mrb[177].mxu1  ;;  %7860 = vmatprep.subr.bf16.mxu0 %v14774_v42  ;;  %10048 = vrot.lane.b32.xlu1 %v14774_v42, %s15721_s0  ;;  %15737 = vst [vmem:[#allocation13_spill] sm:$0xff] %v15090_v22 }
 0x2cb   : > { %v5082_v59 = vpop.f32.mrb[176].mxu0  ;;  %v5126_v45 = vpop.f32.mrb[178].mxu1 }
 0x2cc   : > { %v5129_v56 = vadd.f32 %v5082_v59, %v5030_v62  ;;  %v5084_v26 = vpop.f32.mrb[177].mxu0  ;;  %v12537_v7 = vpop.f32.mrb[179].mxu1  ;;  %v7952_v62 = vsel %vm620_vm1, %v14514_v19, %v7950_v23  ;;  %v11925_v45 = vld [vmem:[%s15681_s6 + $0x48] sm:$0xf] }
 0x2cd   : > { %v5130_v20 = vadd.f32 %v5084_v26, %v5031_v61  ;;  %v5086_v29 = vpop.f32.mrb[178].mxu0  ;;  %v8047_v61 = vpop.permute.xlu1 %8046 }
 0x2ce   : > { %v5087_v10 = vpop.f32.mrb[179].mxu0  ;;  %12697 = vmatmul.mubr.msk.bf16.vlgmr.msra.gmra.mrb[28].mxu1 %vm626_vm2, %v11922_v31  ;;  %10046 = vrot.lane.b32.xlu1 %v14791_v16, %s15721_s0  ;;  %v15110_v22 = vpop.permute.xlu0 %11346 }
 0x2cf   : > { %12701 = vmatpush3.bf16.msra.mxu1 %v14744_v27  ;;  %12702 = vmatprep.mubr.msk.bf16.mxu1 %vm13081_vm0, %v15726_v17 }
 0x2d0   : > { %11923 = vmatmul.mubr.msk.bf16.vlgmr.msra.gmra.mrb[28].mxu0 %vm626_vm2, %v11922_v31  ;;  %12706 = vmatprep.subr.bf16.mxu1 %v15726_v17 }
 0x2d1   : > { %v5231_v30 = vpop.f32.mrb[180].mxu1  ;;  %7861 = vmatpush1.bf16.msra.mxu0 %v14791_v16  ;;  %7892 = vmatprep.mubr.bf16.mxu0 %v15724_v4 }
 0x2d2   : > { %v5239_v27 = vadd.f32 %v5231_v30, %v5131_v14  ;;  %v12542_v50 = vpop.f32.mrb[181].mxu1  ;;  %7959 = vmatprep.subr.bf16.mxu0 %v7952_v62  ;;  %10149 = vrot.lane.b32.xlu1 %v15040_v36, %s15722_s19  ;;  %v7951_v14 = vsel %vm620_vm1, %v14525_v48, %v14514_v19 }
 0x2d3   : > { %v5190_v9 = vpop.f32.mrb[180].mxu0  ;;  %v5234_v59 = vpop.f32.mrb[182].mxu1 }
 0x2d4   : > { %v5237_v31 = vadd.f32 %v5190_v9, %v5129_v56  ;;  %v5192_v26 = vpop.f32.mrb[181].mxu0  ;;  %v12543_v7 = vpop.f32.mrb[183].mxu1  ;;  %v8051_v56 = vsel %vm806_vm3, %v8047_v61, %v14536_v58  ;;  %v11931_v59 = vld [vmem:[%s15681_s6 + $0x4c] sm:$0xf] }
 0x2d5   : > { %v5238_v29 = vadd.f32 %v5192_v26, %v5130_v20  ;;  %v5194_v10 = vpop.f32.mrb[182].mxu0  ;;  %v8045_v30 = vpop.permute.xlu1 %8044 }
 0x2d6   : > { %v5195_v62 = vpop.f32.mrb[183].mxu0  ;;  %12703 = vmatmul.mubr.msk.bf16.vlgmr.msra.gmra.mrb[32].mxu1 %vm626_vm2, %v11925_v45  ;;  %10246 = vrot.lane.b32.xlu1 %v14774_v42, %s15717_s20 }
 0x2d7   : > { %12707 = vmatpush3.bf16.msra.mxu1 %v7950_v23  ;;  %12708 = vmatprep.mubr.msk.bf16.mxu1 %vm13081_vm0, %v15726_v17 }
 0x2d8   : > { %11929 = vmatmul.mubr.msk.bf16.vlgmr.msra.gmra.mrb[32].mxu0 %vm626_vm2, %v11925_v45  ;;  %12712 = vmatprep.subr.bf16.mxu1 %v15726_v17 }
 0x2d9   : > { %7960 = vmatpush1.bf16.msra.mxu0 %v7951_v14  ;;  %v5330_v19 = vpop.f32.mrb[184].mxu1  ;;  %7991 = vmatprep.mubr.bf16.mxu0 %v15724_v4  ;;  %v8148_v23 = vpop.permute.xlu1 %8147 }
 0x2da   : > { %v5338_v48 = vadd.f32 %v5330_v19, %v5239_v27  ;;  %v12548_v20 = vpop.f32.mrb[185].mxu1  ;;  %8058 = vmatprep.subr.bf16.mxu0 %v8051_v56  ;;  %10244 = vrot.lane.b32.xlu1 %v14791_v16, %s15717_s20 }
 0x2db   : > { %v15127_v50 = vpop.permute.xlu0 %3325  ;;  %v5289_v9 = vpop.f32.mrb[184].mxu0 }
 0x2dc   : > { %v3328_v45 = vadd.f32 %v15127_v50, %v14664_v55  ;;  %v3329_v27 = vadd.f32 %v15127_v50, %v14668_v32  ;;  %v5336_v26 = vadd.f32 %v5289_v9, %v5237_v31  ;;  %v5291_v7 = vpop.f32.mrb[185].mxu0  ;;  %v5333_v10 = vpop.f32.mrb[186].mxu1  ;;  %v3330_v14 = vadd.f32 %v15127_v50, %v14653_v43 }
 0x2dd   : > { %v5337_v62 = vadd.f32 %v5291_v7, %v5238_v29  ;;  %v5293_v56 = vpop.f32.mrb[186].mxu0  ;;  %v12549_v19 = vpop.f32.mrb[187].mxu1  ;;  %v8050_v31 = vsel %vm806_vm3, %v8045_v30, %v8047_v61  ;;  %v8150_v29 = vsel %vm907_vm4, %v14548_v21, %v8148_v23 }
 0x2de   : > { %v3331_v55 = vmax.f32 %v3328_v45, 0.0  ;;  %v3332_v32 = vmax.f32 %v3329_v27, 0.0  ;;  %v5294_v20 = vpop.f32.mrb[187].mxu0  ;;  %12709 = vmatmul.mubr.msk.bf16.vlgmr.msra.gmra.mrb[36].mxu1 %vm626_vm2, %v11931_v59  ;;  %v3333_v43 = vmax.f32 %v3330_v14, 0.0  ;;  %10347 = vrot.lane.b32.xlu1 %v15040_v36, %s15718_s21  ;;  %v8245_v61 = vpop.permute.xlu1 %8244 }
 0x2df   : > { %12713 = vmatpush3.bf16.msra.mxu1 %v14536_v58  ;;  %12714 = vmatprep.mubr.msk.bf16.mxu1 %vm13081_vm0, %v15726_v17 }
 0x2e0   : > { %3334 = vst [vmem:[%s15141_s22] sm:$0xff] %v3331_v55  ;;  %3335 = vst [vmem:[%s15141_s22 + $0x8] sm:$0xff] %v3332_v32  ;;  %11932 = vmatmul.mubr.msk.bf16.vlgmr.msra.gmra.mrb[36].mxu0 %vm626_vm2, %v11931_v59  ;;  %12718 = vmatprep.subr.bf16.mxu1 %v15726_v17  ;;  %v11934_v59 = vld [vmem:[%s15681_s6 + $0x50] sm:$0xf] }
 0x2e1   : > { %3337 = vst.msk [vmem:[%s15141_s22 + $0x10] sm:$0xff] %vm3336_vm10, %v3333_v43  ;;  %8059 = vmatpush1.bf16.msra.mxu0 %v8050_v31  ;;  %v5429_v30 = vpop.f32.mrb[188].mxu1  ;;  %8090 = vmatprep.mubr.bf16.mxu0 %v15724_v4  ;;  %v11937_v31 = vld [vmem:[%s15681_s6 + $0x54] sm:$0xf] }
 0x2e2   : > { %v5437_v58 = vadd.f32 %v5429_v30, %v5338_v48  ;;  %v12554_v36 = vpop.f32.mrb[189].mxu1  ;;  %8157 = vmatprep.subr.bf16.mxu0 %v8150_v29  ;;  %10444 = vrot.lane.b32.xlu1 %v14774_v42, %s15719_s17  ;;  %v8149_v48 = vsel %vm907_vm4, %v14561_v38, %v14548_v21  ;;  %v8243_v42 = vpop.permute.xlu1 %8242 }
 0x2e3   : > { %v5388_v9 = vpop.f32.mrb[188].mxu0  ;;  %v5432_v45 = vpop.f32.mrb[190].mxu1  ;;  %v8248_v36 = vsel %vm1008_vm5, %v8243_v42, %v8245_v61 }
 0x2e4   : > { %v5435_v27 = vadd.f32 %v5388_v9, %v5336_v26  ;;  %v5390_v7 = vpop.f32.mrb[189].mxu0  ;;  %v12555_v10 = vpop.f32.mrb[191].mxu1  ;;  %v8249_v26 = vsel %vm1008_vm5, %v8245_v61, %v14572_v15  ;;  %v15188_v45 = vld [vmem:[%s14182_s14 + $0x4] ss:$12 sps:$4 sm:$0xff]  }
 0x2e5   : > { %v5436_v14 = vadd.f32 %v5390_v7, %v5337_v62  ;;  %v5392_v56 = vpop.f32.mrb[190].mxu0 }
 0x2e6   : > { %v5393_v19 = vpop.f32.mrb[191].mxu0  ;;  %12715 = vmatmul.mubr.msk.bf16.vlgmr.msra.gmra.mrb[40].mxu1 %vm626_vm2, %v11934_v59  ;;  %10442 = vrot.lane.b32.xlu1 %v14791_v16, %s15719_s17  ;;  %v8346_v16 = vpop.permute.xlu1 %8345 }
 0x2e7   : > { %12719 = vmatpush3.bf16.msra.mxu1 %v8148_v23  ;;  %12720 = vmatprep.mubr.msk.bf16.mxu1 %vm13081_vm0, %v15726_v17  ;;  %v15178_v23 = vld [vmem:[%s14182_s14 + $0x8] ss:$12 sps:$4 sm:$0xff]  }
 0x2e8   : > { %11935 = vmatmul.mubr.msk.bf16.vlgmr.msra.gmra.mrb[40].mxu0 %vm626_vm2, %v11934_v59  ;;  %12724 = vmatprep.subr.bf16.mxu1 %v15726_v17  ;;  %v8348_v59 = vsel %vm1109_vm6, %v14583_v53, %v8346_v16 }
 0x2e9   : > { %8158 = vmatpush1.bf16.msra.mxu0 %v8149_v48  ;;  %v5528_v21 = vpop.f32.mrb[192].mxu1  ;;  %8189 = vmatprep.mubr.bf16.mxu0 %v15724_v4  ;;  %v11940_v48 = vld [vmem:[%s15681_s6 + $0x58] sm:$0xf] }
 0x2ea   : > { %v5536_v38 = vadd.f32 %v5528_v21, %v5437_v58  ;;  %v12560_v62 = vpop.f32.mrb[193].mxu1  ;;  %8256 = vmatprep.subr.bf16.mxu0 %v8249_v26  ;;  %10653 = vrot.lane.b32.xlu1 %v15178_v23, %s15716_s16  ;;  %v8443_v61 = vpop.permute.xlu1 %8442 }
 0x2eb   : > { %v5487_v55 = vpop.f32.mrb[192].mxu0  ;;  %v5531_v32 = vpop.f32.mrb[194].mxu1 }
 0x2ec   : > { %v5534_v20 = vadd.f32 %v5487_v55, %v5435_v27  ;;  %v5489_v43 = vpop.f32.mrb[193].mxu0  ;;  %v12561_v29 = vpop.f32.mrb[195].mxu1 }
 0x2ed   : > { %v5535_v30 = vadd.f32 %v5489_v43, %v5436_v14  ;;  %v5491_v58 = vpop.f32.mrb[194].mxu0  ;;  %v15201_v14 = vld [vmem:[%s14182_s14] ss:$12 sps:$4 sm:$0xff]  }
 0x2ee   : > { %v5492_v9 = vpop.f32.mrb[195].mxu0  ;;  %12721 = vmatmul.mubr.msk.bf16.vlgmr.msra.gmra.mrb[44].mxu1 %vm626_vm2, %v11937_v31  ;;  %10750 = vrot.lane.b32.xlu1 %v15188_v45, %s15723_s13  ;;  %v8441_v32 = vpop.permute.xlu1 %8440 }
 0x2ef   : > { %12725 = vmatpush3.bf16.msra.mxu1 %v14572_v15  ;;  %12726 = vmatprep.mubr.msk.bf16.mxu1 %vm13081_vm0, %v15726_v17 }
 0x2f0   : > { %11938 = vmatmul.mubr.msk.bf16.vlgmr.msra.gmra.mrb[44].mxu0 %vm626_vm2, %v11937_v31  ;;  %12730 = vmatprep.subr.bf16.mxu1 %v15726_v17  ;;  %v8447_v31 = vsel %vm1210_vm7, %v8443_v61, %v14616_v63 }
 0x2f1   : > { %8257 = vmatpush1.bf16.msra.mxu0 %v8248_v36  ;;  %v5627_v27 = vpop.f32.mrb[196].mxu1  ;;  %8288 = vmatprep.mubr.bf16.mxu0 %v15724_v4 }
 0x2f2   : > { %v5635_v7 = vadd.f32 %v5627_v27, %v5536_v38  ;;  %v12566_v10 = vpop.f32.mrb[197].mxu1  ;;  %8355 = vmatprep.subr.bf16.mxu0 %v8348_v59  ;;  %10748 = vrot.lane.b32.xlu1 %v15201_v14, %s15723_s13  ;;  %v8347_v38 = vsel %vm1109_vm6, %v14599_v5, %v14583_v53  ;;  %v8544_v43 = vpop.permute.xlu1 %8543 }
 0x2f3   : > { %v5586_v15 = vpop.f32.mrb[196].mxu0  ;;  %v5630_v56 = vpop.f32.mrb[198].mxu1  ;;  %v8446_v10 = vsel %vm1210_vm7, %v8441_v32, %v8443_v61 }
 0x2f4   : > { %v5633_v19 = vadd.f32 %v5586_v15, %v5534_v20  ;;  %v5588_v42 = vpop.f32.mrb[197].mxu0  ;;  %v12567_v26 = vpop.f32.mrb[199].mxu1  ;;  %v8546_v15 = vsel %vm1311_vm8, %v14630_v2, %v8544_v43 }
 0x2f5   : > { %v5634_v21 = vadd.f32 %v5588_v42, %v5535_v30  ;;  %v5590_v62 = vpop.f32.mrb[198].mxu0  ;;  %v11943_v30 = vld [vmem:[%s15681_s6 + $0x5c] sm:$0xf]  ;;  %v11946_v26 = vld [vmem:[%s15681_s6 + $0x60] sm:$0xf] }
 0x2f6   : > { %v5591_v55 = vpop.f32.mrb[199].mxu0  ;;  %12727 = vmatmul.mubr.msk.bf16.vlgmr.msra.gmra.mrb[48].mxu1 %vm626_vm2, %v11940_v48  ;;  %10851 = vrot.lane.b32.xlu1 %v15178_v23, %s15720_s26  ;;  %v8641_v56 = vpop.permute.xlu1 %8640 }
 0x2f7   : > { %12731 = vmatpush3.bf16.msra.mxu1 %v8346_v16  ;;  %12732 = vmatprep.mubr.msk.bf16.mxu1 %vm13081_vm0, %v15726_v17 }
 0x2f8   : > { %11941 = vmatmul.mubr.msk.bf16.vlgmr.msra.gmra.mrb[48].mxu0 %vm626_vm2, %v11940_v48  ;;  %12736 = vmatprep.subr.bf16.mxu1 %v15726_v17 }
 0x2f9   : > { %8356 = vmatpush1.bf16.msra.mxu0 %v8347_v38  ;;  %v5726_v53 = vpop.f32.mrb[200].mxu1  ;;  %8387 = vmatprep.mubr.bf16.mxu0 %v15724_v4 }
 0x2fa   : > { %v5734_v5 = vadd.f32 %v5726_v53, %v5635_v7  ;;  %v12572_v20 = vpop.f32.mrb[201].mxu1  ;;  %8454 = vmatprep.subr.bf16.mxu0 %v8447_v31  ;;  %10948 = vrot.lane.b32.xlu1 %v15188_v45, %s15721_s0  ;;  %v8545_v31 = vsel %vm1311_vm8, %v14641_v35, %v14630_v2 }
 0x2fb   : > { %v5685_v16 = vpop.f32.mrb[200].mxu0  ;;  %v5729_v29 = vpop.f32.mrb[202].mxu1  ;;  %v8645_v20 = vsel %vm1412_vm9, %v8641_v56, %v14656_v54 }
 0x2fc   : > { %v5732_v58 = vadd.f32 %v5685_v16, %v5633_v19  ;;  %v5687_v36 = vpop.f32.mrb[201].mxu0  ;;  %v12573_v9 = vpop.f32.mrb[203].mxu1 }
 0x2fd   : > { %v5733_v59 = vadd.f32 %v5687_v36, %v5634_v21  ;;  %v5689_v27 = vpop.f32.mrb[202].mxu0 }
 0x2fe   : > { %v5690_v7 = vpop.f32.mrb[203].mxu0  ;;  %12733 = vmatmul.mubr.msk.bf16.vlgmr.msra.gmra.mrb[52].mxu1 %vm626_vm2, %v11943_v30  ;;  %10946 = vrot.lane.b32.xlu1 %v15201_v14, %s15721_s0 }
 0x2ff   : > { %12737 = vmatpush3.bf16.msra.mxu1 %v14616_v63  ;;  %12738 = vmatprep.mubr.msk.bf16.mxu1 %vm13081_vm0, %v15726_v17 }
 0x300   : > { %11944 = vmatmul.mubr.msk.bf16.vlgmr.msra.gmra.mrb[52].mxu0 %vm626_vm2, %v11943_v30  ;;  %12742 = vmatprep.subr.bf16.mxu1 %v15726_v17 }
 0x301   : > { %8455 = vmatpush1.bf16.msra.mxu0 %v8446_v10  ;;  %v5825_v61 = vpop.f32.mrb[204].mxu1  ;;  %8486 = vmatprep.mubr.bf16.mxu0 %v15724_v4 }
 0x302   : > { %v5833_v48 = vadd.f32 %v5825_v61, %v5734_v5  ;;  %v12578_v19 = vpop.f32.mrb[205].mxu1  ;;  %8553 = vmatprep.subr.bf16.mxu0 %v8546_v15  ;;  %11049 = vrot.lane.b32.xlu1 %v15178_v23, %s15722_s19  ;;  %v8639_v5 = vpop.permute.xlu1 %8638 }
 0x303   : > { %v5784_v63 = vpop.f32.mrb[204].mxu0  ;;  %v5828_v42 = vpop.f32.mrb[206].mxu1  ;;  %v8644_v7 = vsel %vm1412_vm9, %v8639_v5, %v8641_v56 }
 0x304   : > { %v5831_v21 = vadd.f32 %v5784_v63, %v5732_v58  ;;  %v5786_v62 = vpop.f32.mrb[205].mxu0  ;;  %v12579_v38 = vpop.f32.mrb[207].mxu1  ;;  %v11949_v58 = vld [vmem:[%s15681_s6 + $0x64] sm:$0xf]  ;;  %v11952_v63 = vld [vmem:[%s15681_s6 + $0x68] sm:$0xf] }
 0x305   : > { %v5832_v55 = vadd.f32 %v5786_v62, %v5733_v59  ;;  %v5788_v32 = vpop.f32.mrb[206].mxu0 }
 0x306   : > { %v5789_v53 = vpop.f32.mrb[207].mxu0  ;;  %12739 = vmatmul.mubr.msk.bf16.vlgmr.msra.gmra.mrb[56].mxu1 %vm626_vm2, %v11946_v26  ;;  %11146 = vrot.lane.b32.xlu1 %v15188_v45, %s15717_s20  ;;  %v8770_v29 = vpop.permute.xlu1 %8769  ;;  %v8771_v32 = vsel %vm620_vm1, %v14685_v3, %v14674_v28 }
 0x307   : > { %12743 = vmatpush3.bf16.msra.mxu1 %v8544_v43  ;;  %12744 = vmatprep.mubr.msk.bf16.mxu1 %vm13081_vm0, %v15726_v17  ;;  %v8772_v61 = vsel %vm620_vm1, %v14674_v28, %v8770_v29 }
 0x308   : > { %11947 = vmatmul.mubr.msk.bf16.vlgmr.msra.gmra.mrb[56].mxu0 %vm626_vm2, %v11946_v26  ;;  %12748 = vmatprep.subr.bf16.mxu1 %v15726_v17 }
 0x309   : > { %8554 = vmatpush1.bf16.msra.mxu0 %v8545_v31  ;;  %v5924_v2 = vpop.f32.mrb[208].mxu1  ;;  %8585 = vmatprep.mubr.bf16.mxu0 %v15724_v4 }
 0x30a   : > { %v5932_v35 = vadd.f32 %v5924_v2, %v5833_v48  ;;  %v12584_v16 = vpop.f32.mrb[209].mxu1  ;;  %8652 = vmatprep.subr.bf16.mxu0 %v8645_v20  ;;  %11144 = vrot.lane.b32.xlu1 %v15201_v14, %s15717_s20  ;;  %v8951_v3 = vpop.permute.xlu1 %8950 }
 0x30b   : > { %v5883_v43 = vpop.f32.mrb[208].mxu0  ;;  %v5927_v30 = vpop.f32.mrb[210].mxu1 }
 0x30c   : > { %v5930_v36 = vadd.f32 %v5883_v43, %v5831_v21  ;;  %v5885_v9 = vpop.f32.mrb[209].mxu0  ;;  %v12585_v59 = vpop.f32.mrb[211].mxu1 }
 0x30d   : > { %v5931_v27 = vadd.f32 %v5885_v9, %v5832_v55  ;;  %v5887_v10 = vpop.f32.mrb[210].mxu0 }
 0x30e   : > { %v5888_v15 = vpop.f32.mrb[211].mxu0  ;;  %12745 = vmatmul.mubr.msk.bf16.vlgmr.msra.gmra.mrb[60].mxu1 %vm626_vm2, %v11949_v58  ;;  %11247 = vrot.lane.b32.xlu1 %v15178_v23, %s15718_s21  ;;  %v8949_v9 = vpop.permute.xlu1 %8948 }
 0x30f   : > { %12749 = vmatpush3.bf16.msra.mxu1 %v14656_v54  ;;  %12750 = vmatprep.mubr.msk.bf16.mxu1 %vm13081_vm0, %v15726_v17 }
 0x310   : > { %11950 = vmatmul.mubr.msk.bf16.vlgmr.msra.gmra.mrb[60].mxu0 %vm626_vm2, %v11949_v58  ;;  %12754 = vmatprep.subr.bf16.mxu1 %v15726_v17 }
 0x311   : > { %8653 = vmatpush1.bf16.msra.mxu0 %v8644_v7  ;;  %v6023_v56 = vpop.f32.mrb[212].mxu1  ;;  %8684 = vmatprep.mubr.bf16.mxu0 %v15724_v4 }
 0x312   : > { %v6031_v48 = vadd.f32 %v6023_v56, %v5932_v35  ;;  %v12590_v19 = vpop.f32.mrb[213].mxu1  ;;  %8779 = vmatprep.subr.bf16.mxu0 %v8772_v61  ;;  %11344 = vrot.lane.b32.xlu1 %v15188_v45, %s15719_s17  ;;  %v9052_v7 = vpop.permute.xlu1 %9051  ;;  %v8750_v61 = vld [vmem:[%s15681_s6] sm:$0xf] }
 0x313   : > { %v5982_v54 = vpop.f32.mrb[212].mxu0  ;;  %v6026_v23 = vpop.f32.mrb[214].mxu1 }
 0x314   : > { %v6034_v42 = vadd.f32 %v6031_v48, %v15127_v50  ;;  %v6029_v26 = vadd.f32 %v5982_v54, %v5930_v36  ;;  %v5984_v21 = vpop.f32.mrb[213].mxu0  ;;  %v12591_v62 = vpop.f32.mrb[215].mxu1 }
 0x315   : > { %v6030_v38 = vadd.f32 %v5984_v21, %v5931_v27  ;;  %v5986_v55 = vpop.f32.mrb[214].mxu0 }
 0x316   : > { %v6037_v31 = vmax.f32 %v6034_v42, 0.0  ;;  %v6032_v45 = vadd.f32 %v6029_v26, %v15127_v50  ;;  %v5987_v53 = vpop.f32.mrb[215].mxu0  ;;  %12751 = vmatmul.mubr.msk.bf16.vlgmr.msra.gmra.mrb[64].mxu1 %vm626_vm2, %v11952_v63  ;;  %11342 = vrot.lane.b32.xlu1 %v15201_v14, %s15719_s17  ;;  %v9054_v42 = vsel %vm907_vm4, %v14712_v39, %v9052_v7  ;;  %v9149_v26 = vpop.permute.xlu1 %9148 }
 0x317   : > { %v6033_v5 = vadd.f32 %v6030_v38, %v15127_v50  ;;  %12755 = vmatpush3.bf16.msra.mxu1 %v8770_v29  ;;  %12756 = vmatprep.mubr.msk.bf16.mxu1 %vm13081_vm0, %v15726_v17  ;;  %v11958_v29 = vld [vmem:[%s15681_s6 + $0x4] sm:$0xf] }
 0x318   : > { %11865 = vst.msk [vmem:[%s15141_s22 + $0x28] sm:$0xff] %vm3336_vm10, %v6037_v31  ;;  %v6035_v28 = vmax.f32 %v6032_v45, 0.0  ;;  %11953 = vmatmul.mubr.msk.bf16.vlgmr.msra.gmra.mrb[64].mxu0 %vm626_vm2, %v11952_v63  ;;  %12760 = vmatprep.subr.bf16.mxu1 %v15726_v17  ;;  %v8954_v63 = vsel %vm806_vm3, %v8949_v9, %v8951_v3 }
 0x319   : > { %v6036_v20 = vmax.f32 %v6033_v5, 0.0  ;;  %8780 = vmatpush1.bf16.msra.mxu0 %v8771_v32  ;;  %v6150_v2 = vpop.f32.mrb[216].mxu1  ;;  %8811 = vmatprep.mubr.bf16.mxu0 %v15724_v4  ;;  %v11966_v32 = vld [vmem:[%s15681_s6 + $0x8] sm:$0xf] }
 0x31a   : > { %11863 = vst [vmem:[%s15141_s22 + $0x18] sm:$0xff] %v6035_v28  ;;  %v12596_v14 = vpop.f32.mrb[217].mxu1  ;;  %8866 = vmatprep.subr.bf16.mxu0 %v14916_v34  ;;  %v8955_v34 = vsel %vm806_vm3, %v8951_v3, %v14699_v25  ;;  %v9053_v3 = vsel %vm907_vm4, %v14726_v1, %v14712_v39 }
 0x31b   : > { %11864 = vst [vmem:[%s15141_s22 + $0x20] sm:$0xff] %v6036_v20  ;;  %v6109_v35 = vpop.f32.mrb[216].mxu0  ;;  %v6153_v16 = vpop.f32.mrb[218].mxu1  ;;  %v15738_v14 = vld [vmem:[#allocation2_spill] sm:$0xff] }
 0x31c   : > { %v6111_v43 = vpop.f32.mrb[217].mxu0  ;;  %v12597_v30 = vpop.f32.mrb[219].mxu1 }
 0x31d   : > { %v6113_v58 = vpop.f32.mrb[218].mxu0 }
 0x31e   : > { %v6114_v36 = vpop.f32.mrb[219].mxu0  ;;  %12757 = vmatmul.mubr.msk.bf16.vlgmr.msra.gmra.mrb[68].mxu1 %vm626_vm2, %v11958_v29  ;;  %v11969_v58 = vld [vmem:[%s15681_s6 + $0xc] sm:$0xf] }
 0x31f   : > { %12761 = vmatpush3.bf16.msra.mxu1 %v14902_v57  ;;  %12762 = vmatprep.mubr.msk.bf16.mxu1 %vm13081_vm0, %v15726_v17 }
 0x320   : > { %11962 = vmatmul.mubr.msk.bf16.vlgmr.msra.gmra.mrb[68].mxu0 %vm626_vm2, %v11958_v29  ;;  %12766 = vmatprep.subr.bf16.mxu1 %v15726_v17 }
 0x321   : > { %v6237_v59 = vpop.f32.mrb[220].mxu1  ;;  %8867 = vmatpush1.bf16.msra.mxu0 %v14930_v60  ;;  %8898 = vmatprep.mubr.bf16.mxu0 %v15724_v4 }
 0x322   : > { %v6238_v27 = vadd.f32 %v6237_v59, %v6150_v2  ;;  %v12602_v10 = vpop.f32.mrb[221].mxu1  ;;  %8962 = vmatprep.subr.bf16.mxu0 %v8955_v34  ;;  %v9147_v2 = vpop.permute.xlu1 %9146 }
 0x323   : > { %v6196_v57 = vpop.f32.mrb[220].mxu0  ;;  %v6240_v15 = vpop.f32.mrb[222].mxu1  ;;  %v9152_v10 = vsel %vm1008_vm5, %v9147_v2, %v9149_v26 }
 0x324   : > { %v6197_v56 = vadd.f32 %v6196_v57, %v6109_v35  ;;  %v6198_v48 = vpop.f32.mrb[221].mxu0  ;;  %v12603_v19 = vpop.f32.mrb[223].mxu1  ;;  %v9153_v35 = vsel %vm1008_vm5, %v9149_v26, %v15738_v14 }
 0x325   : > { %v6199_v54 = vadd.f32 %v6198_v48, %v6111_v43  ;;  %v6200_v23 = vpop.f32.mrb[222].mxu0 }
 0x326   : > { %v6201_v60 = vpop.f32.mrb[223].mxu0  ;;  %12763 = vmatmul.mubr.msk.bf16.vlgmr.msra.gmra.mrb[72].mxu1 %vm626_vm2, %v8750_v61  ;;  %v9250_v29 = vpop.permute.xlu1 %9249  ;;  %v11972_v23 = vld [vmem:[%s15681_s6 + $0x10] sm:$0xf] }
 0x327   : > { %12767 = vmatpush3.bf16.msra.mxu1 %v14699_v25  ;;  %12768 = vmatprep.mubr.msk.bf16.mxu1 %vm13081_vm0, %v15726_v17  ;;  %v9252_v57 = vsel %vm1109_vm6, %v14754_v0, %v9250_v29 }
 0x328   : > { %11964 = vmatmul.mubr.msk.bf16.vlgmr.msra.gmra.mrb[72].mxu0 %vm626_vm2, %v8750_v61  ;;  %12772 = vmatprep.subr.bf16.mxu1 %v15726_v17 }
 0x329   : > { %8963 = vmatpush1.bf16.msra.mxu0 %v8954_v63  ;;  %v6333_v21 = vpop.f32.mrb[224].mxu1  ;;  %8994 = vmatprep.mubr.bf16.mxu0 %v15724_v4 }
 0x32a   : > { %v6341_v62 = vadd.f32 %v6333_v21, %v6238_v27  ;;  %v12608_v38 = vpop.f32.mrb[225].mxu1  ;;  %9061 = vmatprep.subr.bf16.mxu0 %v9054_v42  ;;  %v9347_v15 = vpop.permute.xlu1 %9346 }
 0x32b   : > { %v6292_v55 = vpop.f32.mrb[224].mxu0  ;;  %v6336_v25 = vpop.f32.mrb[226].mxu1 }
 0x32c   : > { %v6339_v31 = vadd.f32 %v6292_v55, %v6197_v56  ;;  %v6294_v45 = vpop.f32.mrb[225].mxu0  ;;  %v12609_v53 = vpop.f32.mrb[227].mxu1 }
 0x32d   : > { %v6340_v5 = vadd.f32 %v6294_v45, %v6199_v54  ;;  %v6296_v28 = vpop.f32.mrb[226].mxu0 }
 0x32e   : > { %v6297_v20 = vpop.f32.mrb[227].mxu0  ;;  %12769 = vmatmul.mubr.msk.bf16.vlgmr.msra.gmra.mrb[76].mxu1 %vm626_vm2, %v11966_v32  ;;  %v9345_v25 = vpop.permute.xlu1 %9344 }
 0x32f   : > { %12773 = vmatpush3.bf16.msra.mxu1 %v9052_v7  ;;  %12774 = vmatprep.mubr.msk.bf16.mxu1 %vm13081_vm0, %v15726_v17  ;;  %v11975_v20 = vld [vmem:[%s15681_s6 + $0x14] sm:$0xf] }
 0x330   : > { %11967 = vmatmul.mubr.msk.bf16.vlgmr.msra.gmra.mrb[76].mxu0 %vm626_vm2, %v11966_v32  ;;  %12778 = vmatprep.subr.bf16.mxu1 %v15726_v17  ;;  %v15740_v32 = vld [vmem:[#allocation4_spill] sm:$0xff] }
 0x331   : > { %9062 = vmatpush1.bf16.msra.mxu0 %v9053_v3  ;;  %v6432_v16 = vpop.f32.mrb[228].mxu1  ;;  %9093 = vmatprep.mubr.bf16.mxu0 %v15724_v4 }
 0x332   : > { %v6440_v1 = vadd.f32 %v6432_v16, %v6341_v62  ;;  %v12614_v39 = vpop.f32.mrb[229].mxu1  ;;  %9160 = vmatprep.subr.bf16.mxu0 %v9153_v35  ;;  %v15739_v62 = vld [vmem:[#allocation3_spill] sm:$0xff] }
 0x333   : > { %v6391_v43 = vpop.f32.mrb[228].mxu0  ;;  %v6435_v30 = vpop.f32.mrb[230].mxu1  ;;  %v9251_v38 = vsel %vm1109_vm6, %v15739_v62, %v14754_v0  ;;  %v9350_v39 = vsel %vm1210_vm7, %v9345_v25, %v9347_v15 }
 0x334   : > { %v6438_v36 = vadd.f32 %v6391_v43, %v6339_v31  ;;  %v6393_v9 = vpop.f32.mrb[229].mxu0  ;;  %v12615_v34 = vpop.f32.mrb[231].mxu1  ;;  %v9351_v31 = vsel %vm1210_vm7, %v9347_v15, %v15740_v32  ;;  %v15741_v43 = vld [vmem:[#allocation5_spill] sm:$0xff] }
 0x335   : > { %v6439_v59 = vadd.f32 %v6393_v9, %v6340_v5  ;;  %v6395_v27 = vpop.f32.mrb[230].mxu0  ;;  %v9448_v5 = vpop.permute.xlu1 %9447 }
 0x336   : > { %v6396_v7 = vpop.f32.mrb[231].mxu0  ;;  %12775 = vmatmul.mubr.msk.bf16.vlgmr.msra.gmra.mrb[80].mxu1 %vm626_vm2, %v11969_v58  ;;  %v9450_v30 = vsel %vm1311_vm8, %v15741_v43, %v9448_v5 }
 0x337   : > { %12779 = vmatpush3.bf16.msra.mxu1 %v15738_v14  ;;  %12780 = vmatprep.mubr.msk.bf16.mxu1 %vm13081_vm0, %v15726_v17 }
 0x338   : > { %11970 = vmatmul.mubr.msk.bf16.vlgmr.msra.gmra.mrb[80].mxu0 %vm626_vm2, %v11969_v58  ;;  %12784 = vmatprep.subr.bf16.mxu1 %v15726_v17 }
 0x339   : > { %9161 = vmatpush1.bf16.msra.mxu0 %v9152_v10  ;;  %v6531_v61 = vpop.f32.mrb[232].mxu1  ;;  %9192 = vmatprep.mubr.bf16.mxu0 %v15724_v4  ;;  %v9545_v34 = vpop.permute.xlu1 %9544  ;;  %v11978_v10 = vld [vmem:[%s15681_s6 + $0x18] sm:$0xf] }
 0x33a   : > { %v6539_v56 = vadd.f32 %v6531_v61, %v6440_v1  ;;  %v12620_v48 = vpop.f32.mrb[233].mxu1  ;;  %9259 = vmatprep.subr.bf16.mxu0 %v9252_v57 }
 0x33b   : > { %v6490_v19 = vpop.f32.mrb[232].mxu0  ;;  %v6534_v54 = vpop.f32.mrb[234].mxu1  ;;  %v15742_v48 = vld [vmem:[#allocation6_spill] sm:$0xff] }
 0x33c   : > { %v6537_v63 = vadd.f32 %v6490_v19, %v6438_v36  ;;  %v6492_v60 = vpop.f32.mrb[233].mxu0  ;;  %v12621_v42 = vpop.f32.mrb[235].mxu1  ;;  %v9449_v19 = vsel %vm1311_vm8, %v15742_v48, %v15741_v43 }
 0x33d   : > { %v6538_v26 = vadd.f32 %v6492_v60, %v6439_v59  ;;  %v6494_v21 = vpop.f32.mrb[234].mxu0 }
 0x33e   : > { %v6495_v55 = vpop.f32.mrb[235].mxu0  ;;  %12781 = vmatmul.mubr.msk.bf16.vlgmr.msra.gmra.mrb[84].mxu1 %vm626_vm2, %v11972_v23 }
 0x33f   : > { %12785 = vmatpush3.bf16.msra.mxu1 %v9250_v29  ;;  %12786 = vmatprep.mubr.msk.bf16.mxu1 %vm13081_vm0, %v15726_v17 }
 0x340   : > { %11973 = vmatmul.mubr.msk.bf16.vlgmr.msra.gmra.mrb[84].mxu0 %vm626_vm2, %v11972_v23  ;;  %12790 = vmatprep.subr.bf16.mxu1 %v15726_v17  ;;  %v9549_v23 = vsel %vm1412_vm9, %v9545_v34, %v14817_v6 }
 0x341   : > { %9260 = vmatpush1.bf16.msra.mxu0 %v9251_v38  ;;  %v6630_v45 = vpop.f32.mrb[236].mxu1  ;;  %9291 = vmatprep.mubr.bf16.mxu0 %v15724_v4  ;;  %v11981_v38 = vld [vmem:[%s15681_s6 + $0x1c] sm:$0xf] }
 0x342   : > { %v6638_v0 = vadd.f32 %v6630_v45, %v6539_v56  ;;  %v12626_v53 = vpop.f32.mrb[237].mxu1  ;;  %9358 = vmatprep.subr.bf16.mxu0 %v9351_v31 }
 0x343   : > { %v6589_v28 = vpop.f32.mrb[236].mxu0  ;;  %v6633_v3 = vpop.f32.mrb[238].mxu1 }
 0x344   : > { %v6636_v2 = vadd.f32 %v6589_v28, %v6537_v63  ;;  %v6591_v14 = vpop.f32.mrb[237].mxu0  ;;  %v12627_v35 = vpop.f32.mrb[239].mxu1 }
 0x345   : > { %v6637_v16 = vadd.f32 %v6591_v14, %v6538_v26  ;;  %v6593_v1 = vpop.f32.mrb[238].mxu0  ;;  %v9543_v26 = vpop.permute.xlu1 %9542 }
 0x346   : > { %v6594_v29 = vpop.f32.mrb[239].mxu0  ;;  %12787 = vmatmul.mubr.msk.bf16.vlgmr.msra.gmra.mrb[88].mxu1 %vm626_vm2, %v11975_v20 }
 0x347   : > { %12791 = vmatpush3.bf16.msra.mxu1 %v15740_v32  ;;  %12792 = vmatprep.mubr.msk.bf16.mxu1 %vm13081_vm0, %v15726_v17 }
 0x348   : > { %11976 = vmatmul.mubr.msk.bf16.vlgmr.msra.gmra.mrb[88].mxu0 %vm626_vm2, %v11975_v20  ;;  %12796 = vmatprep.subr.bf16.mxu1 %v15726_v17  ;;  %v13034_v20 = vld [vmem:[%s13727_s24 + $0x4] ss:$12 sps:$4 sm:$0xff]  }
 0x349   : > { %9359 = vmatpush1.bf16.msra.mxu0 %v9350_v39  ;;  %v6729_v58 = vpop.f32.mrb[240].mxu1  ;;  %9390 = vmatprep.mubr.bf16.mxu0 %v15724_v4 }
 0x34a   : > { %v6737_v36 = vadd.f32 %v6729_v58, %v6638_v0  ;;  %v12632_v9 = vpop.f32.mrb[241].mxu1  ;;  %9457 = vmatprep.subr.bf16.mxu0 %v9450_v30  ;;  %v9548_v0 = vsel %vm1412_vm9, %v9543_v26, %v9545_v34  ;;  %v13035_v58 = vld [vmem:[%s13727_s24 + $0x8] ss:$12 sps:$4 sm:$0xff]  }
 0x34b   : > { %v6688_v59 = vpop.f32.mrb[240].mxu0  ;;  %v6732_v27 = vpop.f32.mrb[242].mxu1 }
 0x34c   : > { %v6735_v7 = vadd.f32 %v6688_v59, %v6636_v2  ;;  %v6690_v57 = vpop.f32.mrb[241].mxu0  ;;  %v12633_v15 = vpop.f32.mrb[243].mxu1  ;;  %v13036_v59 = vld [vmem:[%s13727_s24] ss:$12 sps:$4 sm:$0xff]  }
 0x34d   : > { %v6736_v61 = vadd.f32 %v6690_v57, %v6637_v16  ;;  %v6692_v56 = vpop.f32.mrb[242].mxu0  ;;  %v9754_v2 = vpop.permute.xlu1 %9753  ;;  %v11987_v15 = vld [vmem:[%s15681_s6 + $0x24] sm:$0xf] }
 0x34e   : > { %v6693_v54 = vpop.f32.mrb[243].mxu0  ;;  %12793 = vmatmul.mubr.msk.bf16.vlgmr.msra.gmra.mrb[92].mxu1 %vm626_vm2, %v11978_v10 }
 0x34f   : > { %12797 = vmatpush3.bf16.msra.mxu1 %v9448_v5  ;;  %12798 = vmatprep.mubr.msk.bf16.mxu1 %vm13081_vm0, %v15726_v17 }
 0x350   : > { %11979 = vmatmul.mubr.msk.bf16.vlgmr.msra.gmra.mrb[92].mxu0 %vm626_vm2, %v11978_v10  ;;  %12802 = vmatprep.subr.bf16.mxu1 %v15726_v17 }
 0x351   : > { %9458 = vmatpush1.bf16.msra.mxu0 %v9449_v19  ;;  %v6828_v63 = vpop.f32.mrb[244].mxu1  ;;  %9489 = vmatprep.mubr.bf16.mxu0 %v15724_v4  ;;  %v9851_v9 = vpop.permute.xlu1 %9850 }
 0x352   : > { %v6836_v60 = vadd.f32 %v6828_v63, %v6737_v36  ;;  %v12638_v42 = vpop.f32.mrb[245].mxu1  ;;  %9556 = vmatprep.subr.bf16.mxu0 %v9549_v23  ;;  %v9756_v36 = vsel %vm620_vm1, %v14826_v49, %v9754_v2  ;;  %v9755_v23 = vsel %vm620_vm1, %v14836_v11, %v14826_v49 }
 0x353   : > { %v6787_v21 = vpop.f32.mrb[244].mxu0  ;;  %v6831_v62 = vpop.f32.mrb[246].mxu1  ;;  %v9855_v42 = vsel %vm806_vm3, %v9851_v9, %v14847_v13 }
 0x354   : > { %v6834_v55 = vadd.f32 %v6787_v21, %v6735_v7  ;;  %v6789_v25 = vpop.f32.mrb[245].mxu0  ;;  %v12639_v32 = vpop.f32.mrb[247].mxu1 }
 0x355   : > { %v6835_v31 = vadd.f32 %v6789_v25, %v6736_v61  ;;  %v6791_v45 = vpop.f32.mrb[246].mxu0 }
 0x356   : > { %v6792_v53 = vpop.f32.mrb[247].mxu0  ;;  %12799 = vmatmul.mubr.msk.bf16.vlgmr.msra.gmra.mrb[96].mxu1 %vm626_vm2, %v11981_v38 }
 0x357   : > { %12803 = vmatpush3.bf16.msra.mxu1 %v14817_v6  ;;  %12804 = vmatprep.mubr.msk.bf16.mxu1 %vm13081_vm0, %v15726_v17  ;;  %v11984_v6 = vld [vmem:[%s15681_s6 + $0x20] sm:$0xf] }
 0x358   : > { %11982 = vmatmul.mubr.msk.bf16.vlgmr.msra.gmra.mrb[96].mxu0 %vm626_vm2, %v11981_v38  ;;  %12808 = vmatprep.subr.bf16.mxu1 %v15726_v17 }
 0x359   : > { %9557 = vmatpush1.bf16.msra.mxu0 %v9548_v0  ;;  %v6927_v5 = vpop.f32.mrb[248].mxu1  ;;  %9588 = vmatprep.mubr.bf16.mxu0 %v15724_v4 }
 0x35a   : > { %v6935_v28 = vadd.f32 %v6927_v5, %v6836_v60  ;;  %v12644_v3 = vpop.f32.mrb[249].mxu1  ;;  %9664 = vmatprep.subr.bf16.mxu0 %v13034_v20  ;;  %v9849_v60 = vpop.permute.xlu1 %9848 }
 0x35b   : > { %v6886_v14 = vpop.f32.mrb[248].mxu0  ;;  %v6930_v35 = vpop.f32.mrb[250].mxu1  ;;  %v9854_v53 = vsel %vm806_vm3, %v9849_v60, %v9851_v9 }
 0x35c   : > { %v6933_v16 = vadd.f32 %v6886_v14, %v6834_v55  ;;  %v6888_v1 = vpop.f32.mrb[249].mxu0  ;;  %v12645_v39 = vpop.f32.mrb[251].mxu1  ;;  %v11993_v55 = vld [vmem:[%s15681_s6 + $0x28] sm:$0xf] }
 0x35d   : > { %v6934_v29 = vadd.f32 %v6888_v1, %v6835_v31  ;;  %v6890_v43 = vpop.f32.mrb[250].mxu0 }
 0x35e   : > { %v6891_v30 = vpop.f32.mrb[251].mxu0  ;;  %12805 = vmatmul.mubr.msk.bf16.vlgmr.msra.gmra.mrb[100].mxu1 %vm626_vm2, %v11984_v6  ;;  %v9952_v21 = vpop.permute.xlu1 %9951 }
 0x35f   : > { %12809 = vmatpush3.bf16.msra.mxu1 %v13035_v58  ;;  %12810 = vmatprep.mubr.msk.bf16.mxu1 %vm13081_vm0, %v15726_v17  ;;  %v9953_v30 = vsel %vm907_vm4, %v14867_v12, %v14858_v44 }
 0x360   : > { %11985 = vmatmul.mubr.msk.bf16.vlgmr.msra.gmra.mrb[100].mxu0 %vm626_vm2, %v11984_v6  ;;  %12814 = vmatprep.subr.bf16.mxu1 %v15726_v17  ;;  %v11996_v6 = vld [vmem:[%s15681_s6 + $0x2c] sm:$0xf] }
 0x361   : > { %v7035_v34 = vpop.f32.mrb[252].mxu1  ;;  %9665 = vmatpush1.bf16.msra.mxu0 %v13036_v59  ;;  %9696 = vmatprep.mubr.bf16.mxu0 %v15724_v4 }
 0x362   : > { %v7043_v27 = vadd.f32 %v7035_v34, %v6935_v28  ;;  %v12650_v10 = vpop.f32.mrb[253].mxu1  ;;  %9763 = vmatprep.subr.bf16.mxu0 %v9756_v36  ;;  %v9954_v28 = vsel %vm907_vm4, %v14858_v44, %v9952_v21  ;;  %v10049_v3 = vpop.permute.xlu1 %10048 }
 0x363   : > { %v6994_v7 = vpop.f32.mrb[252].mxu0  ;;  %v7038_v57 = vpop.f32.mrb[254].mxu1  ;;  %v10053_v9 = vsel %vm1008_vm5, %v10049_v3, %v14878_v8 }
 0x364   : > { %v7041_v61 = vadd.f32 %v6994_v7, %v6933_v16  ;;  %v6996_v56 = vpop.f32.mrb[253].mxu0  ;;  %v12651_v48 = vpop.f32.mrb[255].mxu1  ;;  %v11999_v7 = vld [vmem:[%s15681_s6 + $0x30] sm:$0xf] }
 0x365   : > { %v7042_v19 = vadd.f32 %v6996_v56, %v6934_v29  ;;  %v6998_v54 = vpop.f32.mrb[254].mxu0 }
 0x366   : > { %v6999_v63 = vpop.f32.mrb[255].mxu0  ;;  %12811 = vmatmul.mubr.msk.bf16.vlgmr.msra.gmra.mrb[104].mxu1 %vm626_vm2, %v11987_v15  ;;  %v10047_v36 = vpop.permute.xlu1 %10046 }
 0x367   : > { %12815 = vmatpush3.bf16.msra.mxu1 %v9754_v2  ;;  %12816 = vmatprep.mubr.msk.bf16.mxu1 %vm13081_vm0, %v15726_v17 }
 0x368   : > { %11991 = vmatmul.mubr.msk.bf16.vlgmr.msra.gmra.mrb[104].mxu0 %vm626_vm2, %v11987_v15  ;;  %12820 = vmatprep.subr.bf16.mxu1 %v15726_v17 }
 0x369   : > { %9764 = vmatpush1.bf16.msra.mxu0 %v9755_v23  ;;  %v7134_v26 = vpop.f32.mrb[0].mxu1  ;;  %9795 = vmatprep.mubr.bf16.mxu0 %v15724_v4 }
 0x36a   : > { %v7142_v49 = vadd.f32 %v7134_v26, %v7043_v27  ;;  %v12656_v11 = vpop.f32.mrb[1].mxu1  ;;  %9862 = vmatprep.subr.bf16.mxu0 %v9855_v42  ;;  %v10150_v59 = vpop.permute.xlu1 %10149 }
 0x36b   : > { %v7093_v62 = vpop.f32.mrb[0].mxu0  ;;  %v7137_v38 = vpop.f32.mrb[2].mxu1  ;;  %v10152_v23 = vsel %vm1109_vm6, %v14886_v24, %v10150_v59  ;;  %v12002_v11 = vld [vmem:[%s15681_s6 + $0x34] sm:$0xf] }
 0x36c   : > { %v7140_v25 = vadd.f32 %v7093_v62, %v7041_v61  ;;  %v7095_v32 = vpop.f32.mrb[1].mxu0  ;;  %v12657_v31 = vpop.f32.mrb[3].mxu1 }
 0x36d   : > { %v7141_v45 = vadd.f32 %v7095_v32, %v7042_v19  ;;  %v7097_v0 = vpop.f32.mrb[2].mxu0  ;;  %v10052_v19 = vsel %vm1008_vm5, %v10047_v36, %v10049_v3  ;;  %v15743_v32 = vld [vmem:[#allocation7_spill] sm:$0xff] }
 0x36e   : > { %v7098_v5 = vpop.f32.mrb[3].mxu0  ;;  %12817 = vmatmul.mubr.msk.bf16.vlgmr.msra.gmra.mrb[108].mxu1 %vm626_vm2, %v11993_v55  ;;  %v10247_v63 = vpop.permute.xlu1 %10246  ;;  %v10151_v31 = vsel %vm1109_vm6, %v15743_v32, %v14886_v24 }
 0x36f   : > { %12821 = vmatpush3.bf16.msra.mxu1 %v14847_v13  ;;  %12822 = vmatprep.mubr.msk.bf16.mxu1 %vm13081_vm0, %v15726_v17 }
 0x370   : > { %11994 = vmatmul.mubr.msk.bf16.vlgmr.msra.gmra.mrb[108].mxu0 %vm626_vm2, %v11993_v55  ;;  %12826 = vmatprep.subr.bf16.mxu1 %v15726_v17 }
 0x371   : > { %9863 = vmatpush1.bf16.msra.mxu0 %v9854_v53  ;;  %v7233_v20 = vpop.f32.mrb[4].mxu1  ;;  %9894 = vmatprep.mubr.bf16.mxu0 %v15724_v4  ;;  %v15744_v53 = vld [vmem:[#allocation8_spill] sm:$0xff] }
 0x372   : > { %v7241_v2 = vadd.f32 %v7233_v20, %v7142_v49  ;;  %v12662_v14 = vpop.f32.mrb[5].mxu1  ;;  %9961 = vmatprep.subr.bf16.mxu0 %v9954_v28  ;;  %v10245_v0 = vpop.permute.xlu1 %10244  ;;  %v10251_v5 = vsel %vm1210_vm7, %v10247_v63, %v15744_v53 }
 0x373   : > { %v7192_v35 = vpop.f32.mrb[4].mxu0  ;;  %v7236_v13 = vpop.f32.mrb[6].mxu1 }
 0x374   : > { %v7239_v16 = vadd.f32 %v7192_v35, %v7140_v25  ;;  %v7194_v1 = vpop.f32.mrb[5].mxu0  ;;  %v12663_v39 = vpop.f32.mrb[7].mxu1  ;;  %v12005_v35 = vld [vmem:[%s15681_s6 + $0x38] sm:$0xf] }
 0x375   : > { %v7240_v29 = vadd.f32 %v7194_v1, %v7141_v45  ;;  %v7196_v43 = vpop.f32.mrb[6].mxu0 }
 0x376   : > { %v7197_v58 = vpop.f32.mrb[7].mxu0  ;;  %12823 = vmatmul.mubr.msk.bf16.vlgmr.msra.gmra.mrb[112].mxu1 %vm626_vm2, %v11996_v6  ;;  %v10348_v20 = vpop.permute.xlu1 %10347 }
 0x377   : > { %12827 = vmatpush3.bf16.msra.mxu1 %v9952_v21  ;;  %12828 = vmatprep.mubr.msk.bf16.mxu1 %vm13081_vm0, %v15726_v17 }
 0x378   : > { %11997 = vmatmul.mubr.msk.bf16.vlgmr.msra.gmra.mrb[112].mxu0 %vm626_vm2, %v11996_v6  ;;  %12832 = vmatprep.subr.bf16.mxu1 %v15726_v17 }
 0x379   : > { %9962 = vmatpush1.bf16.msra.mxu0 %v9953_v30  ;;  %v7332_v34 = vpop.f32.mrb[8].mxu1  ;;  %9993 = vmatprep.mubr.bf16.mxu0 %v15724_v4  ;;  %v15745_v30 = vld [vmem:[#allocation9_spill] sm:$0xff] }
 0x37a   : > { %v7340_v44 = vadd.f32 %v7332_v34, %v7241_v2  ;;  %v12668_v12 = vpop.f32.mrb[9].mxu1  ;;  %10060 = vmatprep.subr.bf16.mxu0 %v10053_v9  ;;  %v10350_v58 = vsel %vm1311_vm8, %v15745_v30, %v10348_v20 }
 0x37b   : > { %v7291_v27 = vpop.f32.mrb[8].mxu0  ;;  %v7335_v10 = vpop.f32.mrb[10].mxu1 }
 0x37c   : > { %v7338_v57 = vadd.f32 %v7291_v27, %v7239_v16  ;;  %v7293_v15 = vpop.f32.mrb[9].mxu0  ;;  %v12669_v61 = vpop.f32.mrb[11].mxu1  ;;  %v12008_v27 = vld [vmem:[%s15681_s6 + $0x3c] sm:$0xf] }
 0x37d   : > { %v7339_v56 = vadd.f32 %v7293_v15, %v7240_v29  ;;  %v7295_v48 = vpop.f32.mrb[10].mxu0  ;;  %v10250_v29 = vsel %vm1210_vm7, %v10245_v0, %v10247_v63 }
 0x37e   : > { %v7296_v54 = vpop.f32.mrb[11].mxu0  ;;  %12829 = vmatmul.mubr.msk.bf16.vlgmr.msra.gmra.mrb[116].mxu1 %vm626_vm2, %v11999_v7 }
 0x37f   : > { %12833 = vmatpush3.bf16.msra.mxu1 %v14878_v8  ;;  %12834 = vmatprep.mubr.msk.bf16.mxu1 %vm13081_vm0, %v15726_v17 }
 0x380   : > { %12000 = vmatmul.mubr.msk.bf16.vlgmr.msra.gmra.mrb[116].mxu0 %vm626_vm2, %v11999_v7  ;;  %12838 = vmatprep.subr.bf16.mxu1 %v15726_v17 }
 0x381   : > { %10061 = vmatpush1.bf16.msra.mxu0 %v10052_v19  ;;  %v7431_v60 = vpop.f32.mrb[12].mxu1  ;;  %10092 = vmatprep.mubr.bf16.mxu0 %v15724_v4 }
 0x382   : > { %v7439_v42 = vadd.f32 %v7431_v60, %v7340_v44  ;;  %v12674_v26 = vpop.f32.mrb[13].mxu1  ;;  %10159 = vmatprep.subr.bf16.mxu0 %v10152_v23  ;;  %v10445_v44 = vpop.permute.xlu1 %10444 }
 0x383   : > { %v7390_v49 = vpop.f32.mrb[12].mxu0  ;;  %v7434_v8 = vpop.f32.mrb[14].mxu1  ;;  %v10449_v54 = vsel %vm1412_vm9, %v10445_v44, %v14951_v46 }
 0x384   : > { %v7437_v21 = vadd.f32 %v7390_v49, %v7338_v57  ;;  %v7392_v62 = vpop.f32.mrb[13].mxu0  ;;  %v12675_v38 = vpop.f32.mrb[15].mxu1  ;;  %v12011_v8 = vld [vmem:[%s15681_s6 + $0x40] sm:$0xf] }
 0x385   : > { %v7438_v55 = vadd.f32 %v7392_v62, %v7339_v56  ;;  %v7394_v25 = vpop.f32.mrb[14].mxu0  ;;  %v15746_v56 = vld [vmem:[#allocation10_spill] sm:$0xff] }
 0x386   : > { %v7395_v45 = vpop.f32.mrb[15].mxu0  ;;  %12835 = vmatmul.mubr.msk.bf16.vlgmr.msra.gmra.mrb[120].mxu1 %vm626_vm2, %v12002_v11  ;;  %v10349_v48 = vsel %vm1311_vm8, %v15746_v56, %v15745_v30 }
 0x387   : > { %12839 = vmatpush3.bf16.msra.mxu1 %v10150_v59  ;;  %12840 = vmatprep.mubr.msk.bf16.mxu1 %vm13081_vm0, %v15726_v17 }
 0x388   : > { %12003 = vmatmul.mubr.msk.bf16.vlgmr.msra.gmra.mrb[120].mxu0 %vm626_vm2, %v12002_v11  ;;  %12844 = vmatprep.subr.bf16.mxu1 %v15726_v17 }
 0x389   : > { %10160 = vmatpush1.bf16.msra.mxu0 %v10151_v31  ;;  %v7530_v28 = vpop.f32.mrb[16].mxu1  ;;  %10191 = vmatprep.mubr.bf16.mxu0 %v15724_v4 }
 0x38a   : > { %v7538_v24 = vadd.f32 %v7530_v28, %v7439_v42  ;;  %v12680_v3 = vpop.f32.mrb[17].mxu1  ;;  %10258 = vmatprep.subr.bf16.mxu0 %v10251_v5  ;;  %v10443_v42 = vpop.permute.xlu1 %10442 }
 0x38b   : > { %v7489_v2 = vpop.f32.mrb[16].mxu0  ;;  %v7533_v14 = vpop.f32.mrb[18].mxu1  ;;  %v10448_v25 = vsel %vm1412_vm9, %v10443_v42, %v10445_v44 }
 0x38c   : > { %v7536_v13 = vadd.f32 %v7489_v2, %v7437_v21  ;;  %v7491_v6 = vpop.f32.mrb[17].mxu0  ;;  %v12681_v16 = vpop.f32.mrb[19].mxu1 }
 0x38d   : > { %v7537_v1 = vadd.f32 %v7491_v6, %v7438_v55  ;;  %v7493_v39 = vpop.f32.mrb[18].mxu0  ;;  %v13038_v6 = vld [vmem:[%s14182_s14 + $0x8] ss:$12 sps:$4 sm:$0xff]  }
 0x38e   : > { %v7494_v43 = vpop.f32.mrb[19].mxu0  ;;  %12841 = vmatmul.mubr.msk.bf16.vlgmr.msra.gmra.mrb[124].mxu1 %vm626_vm2, %v12005_v35  ;;  %v10654_v5 = vpop.permute.xlu1 %10653  ;;  %v15747_v16 = vld [vmem:[#allocation11_spill] sm:$0xff] }
 0x38f   : > { %12845 = vmatpush3.bf16.msra.mxu1 %v15744_v53  ;;  %12846 = vmatprep.mubr.msk.bf16.mxu1 %vm13081_vm0, %v15726_v17  ;;  %v13037_v53 = vld [vmem:[%s14182_s14 + $0x4] ss:$12 sps:$4 sm:$0xff]   ;;  %v13039_v43 = vld [vmem:[%s14182_s14] ss:$12 sps:$4 sm:$0xff]  }
 0x390   : > { %12006 = vmatmul.mubr.msk.bf16.vlgmr.msra.gmra.mrb[124].mxu0 %vm626_vm2, %v12005_v35  ;;  %12850 = vmatprep.subr.bf16.mxu1 %v15726_v17 }
 0x391   : > { %10259 = vmatpush1.bf16.msra.mxu0 %v10250_v29  ;;  %v7629_v36 = vpop.f32.mrb[20].mxu1  ;;  %10290 = vmatprep.mubr.bf16.mxu0 %v15724_v4 }
 0x392   : > { %v7637_v9 = vadd.f32 %v7629_v36, %v7538_v24  ;;  %v12686_v34 = vpop.f32.mrb[21].mxu1  ;;  %10357 = vmatprep.subr.bf16.mxu0 %v10350_v58  ;;  %v10751_v39 = vpop.permute.xlu1 %10750 }
 0x393   : > { %v7588_v12 = vpop.f32.mrb[20].mxu0  ;;  %v7632_v59 = vpop.f32.mrb[22].mxu1  ;;  %v12017_v34 = vld [vmem:[%s15681_s6 + $0x48] sm:$0xf] }
 0x394   : > { %v7635_v10 = vadd.f32 %v7588_v12, %v7536_v13  ;;  %v7590_v7 = vpop.f32.mrb[21].mxu0  ;;  %v12687_v57 = vpop.f32.mrb[23].mxu1 }
 0x395   : > { %v7636_v15 = vadd.f32 %v7590_v7, %v7537_v1  ;;  %v7592_v61 = vpop.f32.mrb[22].mxu0  ;;  %v10656_v1 = vsel %vm620_vm1, %v15747_v16, %v10654_v5  ;;  %v10655_v7 = vsel %vm620_vm1, %v14973_v33, %v15747_v16 }
 0x396   : > { %v7593_v19 = vpop.f32.mrb[23].mxu0  ;;  %12847 = vmatmul.mubr.msk.bf16.vlgmr.msra.gmra.mrb[128].mxu1 %vm626_vm2, %v12008_v27  ;;  %v10755_v61 = vsel %vm806_vm3, %v10751_v39, %v14982_v51 }
 0x397   : > { %12851 = vmatpush3.bf16.msra.mxu1 %v10348_v20  ;;  %12852 = vmatprep.mubr.msk.bf16.mxu1 %vm13081_vm0, %v15726_v17 }
 0x398   : > { %12009 = vmatmul.mubr.msk.bf16.vlgmr.msra.gmra.mrb[128].mxu0 %vm626_vm2, %v12008_v27  ;;  %12856 = vmatprep.subr.bf16.mxu1 %v15726_v17 }
 0x399   : > { %10358 = vmatpush1.bf16.msra.mxu0 %v10349_v48  ;;  %v7728_v23 = vpop.f32.mrb[24].mxu1  ;;  %10389 = vmatprep.mubr.bf16.mxu0 %v15724_v4 }
 0x39a   : > { %v7736_v63 = vadd.f32 %v7728_v23, %v7637_v9  ;;  %v12692_v60 = vpop.f32.mrb[25].mxu1  ;;  %10456 = vmatprep.subr.bf16.mxu0 %v10449_v54 }
 0x39b   : > { %v7687_v26 = vpop.f32.mrb[24].mxu0  ;;  %v7731_v49 = vpop.f32.mrb[26].mxu1 }
 0x39c   : > { %v7734_v11 = vadd.f32 %v7687_v26, %v7635_v10  ;;  %v7689_v21 = vpop.f32.mrb[25].mxu0  ;;  %v12693_v62 = vpop.f32.mrb[27].mxu1 }
 0x39d   : > { %v7735_v38 = vadd.f32 %v7689_v21, %v7636_v15  ;;  %v7691_v55 = vpop.f32.mrb[26].mxu0  ;;  %v10749_v15 = vpop.permute.xlu1 %10748 }
 0x39e   : > { %v7692_v32 = vpop.f32.mrb[27].mxu0  ;;  %12853 = vmatmul.mubr.msk.bf16.vlgmr.msra.gmra.mrb[132].mxu1 %vm626_vm2, %v12011_v8 }
 0x39f   : > { %12857 = vmatpush3.bf16.msra.mxu1 %v14951_v46  ;;  %12858 = vmatprep.mubr.msk.bf16.mxu1 %vm13081_vm0, %v15726_v17  ;;  %v12014_v46 = vld [vmem:[%s15681_s6 + $0x44] sm:$0xf] }
 0x3a0   : > { %12012 = vmatmul.mubr.msk.bf16.vlgmr.msra.gmra.mrb[132].mxu0 %vm626_vm2, %v12011_v8  ;;  %12862 = vmatprep.subr.bf16.mxu1 %v15726_v17 }
 0x3a1   : > { %10457 = vmatpush1.bf16.msra.mxu0 %v10448_v25  ;;  %v7827_v31 = vpop.f32.mrb[28].mxu1  ;;  %10488 = vmatprep.mubr.bf16.mxu0 %v15724_v4  ;;  %v10852_v19 = vpop.permute.xlu1 %10851 }
 0x3a2   : > { %v7835_v45 = vadd.f32 %v7827_v31, %v7736_v63  ;;  %v12698_v0 = vpop.f32.mrb[29].mxu1  ;;  %10564 = vmatprep.subr.bf16.mxu0 %v13037_v53  ;;  %v12023_v63 = vld [vmem:[%s15681_s6 + $0x4c] sm:$0xf]  ;;  %v10854_v62 = vsel %vm907_vm4, %v14994_v41, %v10852_v19 }
 0x3a3   : > { %v7786_v28 = vpop.f32.mrb[28].mxu0  ;;  %v7830_v24 = vpop.f32.mrb[30].mxu1 }
 0x3a4   : > { %v7833_v3 = vadd.f32 %v7786_v28, %v7734_v11  ;;  %v7788_v20 = vpop.f32.mrb[29].mxu0  ;;  %v12699_v2 = vpop.f32.mrb[31].mxu1  ;;  %v10754_v11 = vsel %vm806_vm3, %v10749_v15, %v10751_v39  ;;  %v12029_v39 = vld [vmem:[%s15681_s6 + $0x54] sm:$0xf] }
 0x3a5   : > { %v7834_v14 = vadd.f32 %v7788_v20, %v7735_v38  ;;  %v7790_v35 = vpop.f32.mrb[30].mxu0  ;;  %v10949_v38 = vpop.permute.xlu1 %10948 }
 0x3a6   : > { %v7791_v13 = vpop.f32.mrb[31].mxu0  ;;  %12859 = vmatmul.mubr.msk.bf16.vlgmr.msra.gmra.mrb[136].mxu1 %vm626_vm2, %v12014_v46 }
 0x3a7   : > { %12863 = vmatpush3.bf16.msra.mxu1 %v13038_v6  ;;  %12864 = vmatprep.mubr.msk.bf16.mxu1 %vm13081_vm0, %v15726_v17 }
 0x3a8   : > { %12015 = vmatmul.mubr.msk.bf16.vlgmr.msra.gmra.mrb[136].mxu0 %vm626_vm2, %v12014_v46  ;;  %12868 = vmatprep.subr.bf16.mxu1 %v15726_v17  ;;  %v15748_v46 = vld [vmem:[#allocation12_spill] sm:$0xff] }
 0x3a9   : > { %v7935_v29 = vpop.f32.mrb[32].mxu1  ;;  %10565 = vmatpush1.bf16.msra.mxu0 %v13039_v43  ;;  %10596 = vmatprep.mubr.bf16.mxu0 %v15724_v4  ;;  %v10947_v2 = vpop.permute.xlu1 %10946 }
 0x3aa   : > { %v7943_v30 = vadd.f32 %v7935_v29, %v7835_v45  ;;  %v12704_v58 = vpop.f32.mrb[33].mxu1  ;;  %10663 = vmatprep.subr.bf16.mxu0 %v10656_v1  ;;  %v12026_v45 = vld [vmem:[%s15681_s6 + $0x50] sm:$0xf] }
 0x3ab   : > { %v7894_v36 = vpop.f32.mrb[32].mxu0  ;;  %v7938_v9 = vpop.f32.mrb[34].mxu1 }
 0x3ac   : > { %v7941_v44 = vadd.f32 %v7894_v36, %v7833_v3  ;;  %v7896_v12 = vpop.f32.mrb[33].mxu0  ;;  %v12705_v59 = vpop.f32.mrb[35].mxu1  ;;  %v10853_v3 = vsel %vm907_vm4, %v15748_v46, %v14994_v41  ;;  %v10952_v9 = vsel %vm1008_vm5, %v10947_v2, %v10949_v38 }
 0x3ad   : > { %v7942_v27 = vadd.f32 %v7896_v12, %v7834_v14  ;;  %v7898_v10 = vpop.f32.mrb[34].mxu0  ;;  %v10953_v14 = vsel %vm1008_vm5, %v10949_v38, %v15016_v18  ;;  %v11050_v6 = vpop.permute.xlu1 %11049 }
 0x3ae   : > { %v7899_v57 = vpop.f32.mrb[35].mxu0  ;;  %12865 = vmatmul.mubr.msk.bf16.vlgmr.msra.gmra.mrb[140].mxu1 %vm626_vm2, %v12017_v34 }
 0x3af   : > { %12869 = vmatpush3.bf16.msra.mxu1 %v10654_v5  ;;  %12870 = vmatprep.mubr.msk.bf16.mxu1 %vm13081_vm0, %v15726_v17  ;;  %v12032_v57 = vld [vmem:[%s15681_s6 + $0x58] sm:$0xf] }
 0x3b0   : > { %12021 = vmatmul.mubr.msk.bf16.vlgmr.msra.gmra.mrb[140].mxu0 %vm626_vm2, %v12017_v34  ;;  %12874 = vmatprep.subr.bf16.mxu1 %v15726_v17 }
 0x3b1   : > { %10664 = vmatpush1.bf16.msra.mxu0 %v10655_v7  ;;  %v8034_v56 = vpop.f32.mrb[36].mxu1  ;;  %10695 = vmatprep.mubr.bf16.mxu0 %v15724_v4  ;;  %v11147_v12 = vpop.permute.xlu1 %11146 }
 0x3b2   : > { %v8042_v33 = vadd.f32 %v8034_v56, %v7943_v30  ;;  %v12710_v48 = vpop.f32.mrb[37].mxu1  ;;  %10762 = vmatprep.subr.bf16.mxu0 %v10755_v61 }
 0x3b3   : > { %v7993_v54 = vpop.f32.mrb[36].mxu0  ;;  %v8037_v23 = vpop.f32.mrb[38].mxu1 }
 0x3b4   : > { %v8040_v60 = vadd.f32 %v7993_v54, %v7941_v44  ;;  %v7995_v42 = vpop.f32.mrb[37].mxu0  ;;  %v12711_v26 = vpop.f32.mrb[39].mxu1  ;;  %v11052_v44 = vsel %vm1109_vm6, %v15025_v37, %v11050_v6 }
 0x3b5   : > { %v8041_v49 = vadd.f32 %v7995_v42, %v7942_v27  ;;  %v7997_v8 = vpop.f32.mrb[38].mxu0  ;;  %v11145_v23 = vpop.permute.xlu1 %11144 }
 0x3b6   : > { %v7998_v21 = vpop.f32.mrb[39].mxu0  ;;  %12871 = vmatmul.mubr.msk.bf16.vlgmr.msra.gmra.mrb[144].mxu1 %vm626_vm2, %v12023_v63  ;;  %v12035_v8 = vld [vmem:[%s15681_s6 + $0x5c] sm:$0xf] }
 0x3b7   : > { %12875 = vmatpush3.bf16.msra.mxu1 %v14982_v51  ;;  %12876 = vmatprep.mubr.msk.bf16.mxu1 %vm13081_vm0, %v15726_v17 }
 0x3b8   : > { %12024 = vmatmul.mubr.msk.bf16.vlgmr.msra.gmra.mrb[144].mxu0 %vm626_vm2, %v12023_v63  ;;  %12880 = vmatprep.subr.bf16.mxu1 %v15726_v17  ;;  %v11151_v63 = vsel %vm1210_vm7, %v11147_v12, %v15060_v47 }
 0x3b9   : > { %10763 = vmatpush1.bf16.msra.mxu0 %v10754_v11  ;;  %v8133_v55 = vpop.f32.mrb[40].mxu1  ;;  %10794 = vmatprep.mubr.bf16.mxu0 %v15724_v4  ;;  %v11248_v42 = vpop.permute.xlu1 %11247 }
 0x3ba   : > { %v8141_v25 = vadd.f32 %v8133_v55, %v8042_v33  ;;  %v12716_v32 = vpop.f32.mrb[41].mxu1  ;;  %10861 = vmatprep.subr.bf16.mxu0 %v10854_v62 }
 0x3bb   : > { %v8092_v31 = vpop.f32.mrb[40].mxu0  ;;  %v8136_v51 = vpop.f32.mrb[42].mxu1 }
 0x3bc   : > { %v8139_v0 = vadd.f32 %v8092_v31, %v8040_v60  ;;  %v8094_v53 = vpop.f32.mrb[41].mxu0  ;;  %v12717_v5 = vpop.f32.mrb[43].mxu1  ;;  %v11250_v31 = vsel %vm1311_vm8, %v15076_v40, %v11248_v42 }
 0x3bd   : > { %v8140_v28 = vadd.f32 %v8094_v53, %v8041_v49  ;;  %v8096_v24 = vpop.f32.mrb[42].mxu0  ;;  %v11345_v53 = vpop.permute.xlu1 %11344 }
 0x3be   : > { %v8097_v20 = vpop.f32.mrb[43].mxu0  ;;  %12877 = vmatmul.mubr.msk.bf16.vlgmr.msra.gmra.mrb[148].mxu1 %vm626_vm2, %v12026_v45 }
 0x3bf   : > { %12881 = vmatpush3.bf16.msra.mxu1 %v10852_v19  ;;  %12882 = vmatprep.mubr.msk.bf16.mxu1 %vm13081_vm0, %v15726_v17  ;;  %v11051_v19 = vsel %vm1109_vm6, %v15037_v52, %v15025_v37 }
 0x3c0   : > { %12027 = vmatmul.mubr.msk.bf16.vlgmr.msra.gmra.mrb[148].mxu0 %vm626_vm2, %v12026_v45  ;;  %12886 = vmatprep.subr.bf16.mxu1 %v15726_v17 }
 0x3c1   : > { %10862 = vmatpush1.bf16.msra.mxu0 %v10853_v3  ;;  %v8232_v35 = vpop.f32.mrb[44].mxu1  ;;  %10893 = vmatprep.mubr.bf16.mxu0 %v15724_v4 }
 0x3c2   : > { %v8240_v41 = vadd.f32 %v8232_v35, %v8141_v25  ;;  %v12722_v13 = vpop.f32.mrb[45].mxu1  ;;  %10960 = vmatprep.subr.bf16.mxu0 %v10953_v14  ;;  %v11150_v25 = vsel %vm1210_vm7, %v11145_v23, %v11147_v12  ;;  %v15749_v14 = vld [vmem:[#allocation13_spill] sm:$0xff] }
 0x3c3   : > { %v8191_v16 = vpop.f32.mrb[44].mxu0  ;;  %v8235_v1 = vpop.f32.mrb[46].mxu1  ;;  %v11249_v35 = vsel %vm1311_vm8, %v15749_v14, %v15076_v40  ;;  %v11349_v13 = vsel %vm1412_vm9, %v11345_v53, %v15110_v22 }
 0x3c4   : > { %v8238_v29 = vadd.f32 %v8191_v16, %v8139_v0  ;;  %v8193_v43 = vpop.f32.mrb[45].mxu0  ;;  %v12723_v30 = vpop.f32.mrb[47].mxu1 }
 0x3c5   : > { %v8239_v58 = vadd.f32 %v8193_v43, %v8140_v28  ;;  %v8195_v36 = vpop.f32.mrb[46].mxu0  ;;  %v12038_v28 = vld [vmem:[%s15681_s6 + $0x60] sm:$0xf]  ;;  %v11343_v1 = vpop.permute.xlu1 %11342  ;;  %v12041_v43 = vld [vmem:[%s15681_s6 + $0x64] sm:$0xf] }
 0x3c6   : > { %v8196_v34 = vpop.f32.mrb[47].mxu0  ;;  %12883 = vmatmul.mubr.msk.bf16.vlgmr.msra.gmra.mrb[152].mxu1 %vm626_vm2, %v12029_v39 }
 0x3c7   : > { %12887 = vmatpush3.bf16.msra.mxu1 %v15016_v18  ;;  %12888 = vmatprep.mubr.msk.bf16.mxu1 %vm13081_vm0, %v15726_v17 }
 0x3c8   : > { %12030 = vmatmul.mubr.msk.bf16.vlgmr.msra.gmra.mrb[152].mxu0 %vm626_vm2, %v12029_v39  ;;  %12892 = vmatprep.subr.bf16.mxu1 %v15726_v17 }
 0x3c9   : > { %10961 = vmatpush1.bf16.msra.mxu0 %v10952_v9  ;;  %v8331_v59 = vpop.f32.mrb[48].mxu1  ;;  %10992 = vmatprep.mubr.bf16.mxu0 %v15724_v4 }
 0x3ca   : > { %v8339_v27 = vadd.f32 %v8331_v59, %v8240_v41  ;;  %v12728_v10 = vpop.f32.mrb[49].mxu1  ;;  %11059 = vmatprep.subr.bf16.mxu0 %v11052_v44  ;;  %v11348_v44 = vsel %vm1412_vm9, %v11343_v1, %v11345_v53 }
 0x3cb   : > { %v8290_v7 = vpop.f32.mrb[48].mxu0  ;;  %v8334_v18 = vpop.f32.mrb[50].mxu1 }
 0x3cc   : > { %v8337_v15 = vadd.f32 %v8290_v7, %v8238_v29  ;;  %v8292_v61 = vpop.f32.mrb[49].mxu0  ;;  %v12729_v56 = vpop.f32.mrb[51].mxu1 }
 0x3cd   : > { %v8338_v33 = vadd.f32 %v8292_v61, %v8239_v58  ;;  %v8294_v48 = vpop.f32.mrb[50].mxu0 }
 0x3ce   : > { %v8295_v54 = vpop.f32.mrb[51].mxu0  ;;  %12889 = vmatmul.mubr.msk.bf16.vlgmr.msra.gmra.mrb[156].mxu1 %vm626_vm2, %v12032_v57 }
 0x3cf   : > { %12893 = vmatpush3.bf16.msra.mxu1 %v11050_v6  ;;  %12894 = vmatprep.mubr.msk.bf16.mxu1 %vm13081_vm0, %v15726_v17 }
 0x3d0   : > { %12033 = vmatmul.mubr.msk.bf16.vlgmr.msra.gmra.mrb[156].mxu0 %vm626_vm2, %v12032_v57  ;;  %12898 = vmatprep.subr.bf16.mxu1 %v15726_v17  ;;  %v12044_v57 = vld [vmem:[%s15681_s6 + $0x68] sm:$0xf] }
 0x3d1   : > { %11060 = vmatpush1.bf16.msra.mxu0 %v11051_v19  ;;  %v8430_v60 = vpop.f32.mrb[52].mxu1  ;;  %11091 = vmatprep.mubr.bf16.mxu0 %v15724_v4 }
 0x3d2   : > { %v8438_v37 = vadd.f32 %v8430_v60, %v8339_v27  ;;  %v12734_v52 = vpop.f32.mrb[53].mxu1  ;;  %11158 = vmatprep.subr.bf16.mxu0 %v11151_v63 }
 0x3d3   : > { %v8389_v26 = vpop.f32.mrb[52].mxu0  ;;  %v8433_v49 = vpop.f32.mrb[54].mxu1 }
 0x3d4   : > { %v8436_v11 = vadd.f32 %v8389_v26, %v8337_v15  ;;  %v8391_v21 = vpop.f32.mrb[53].mxu0  ;;  %v12735_v62 = vpop.f32.mrb[55].mxu1 }
 0x3d5   : > { %v8437_v38 = vadd.f32 %v8391_v21, %v8338_v33  ;;  %v8393_v55 = vpop.f32.mrb[54].mxu0 }
 0x3d6   : > { %v8394_v32 = vpop.f32.mrb[55].mxu0  ;;  %12895 = vmatmul.mubr.msk.bf16.vlgmr.msra.gmra.mrb[160].mxu1 %vm626_vm2, %v12035_v8 }
 0x3d7   : > { %12899 = vmatpush3.bf16.msra.mxu1 %v15060_v47  ;;  %12900 = vmatprep.mubr.msk.bf16.mxu1 %vm13081_vm0, %v15726_v17 }
 0x3d8   : > { %12036 = vmatmul.mubr.msk.bf16.vlgmr.msra.gmra.mrb[160].mxu0 %vm626_vm2, %v12035_v8  ;;  %12904 = vmatprep.subr.bf16.mxu1 %v15726_v17 }
 0x3d9   : > { %11159 = vmatpush1.bf16.msra.mxu0 %v11150_v25  ;;  %v8529_v51 = vpop.f32.mrb[56].mxu1  ;;  %11190 = vmatprep.mubr.bf16.mxu0 %v15724_v4 }
 0x3da   : > { %v8537_v45 = vadd.f32 %v8529_v51, %v8438_v37  ;;  %v12740_v0 = vpop.f32.mrb[57].mxu1  ;;  %11257 = vmatprep.subr.bf16.mxu0 %v11250_v31 }
 0x3db   : > { %v8488_v5 = vpop.f32.mrb[56].mxu0  ;;  %v8532_v47 = vpop.f32.mrb[58].mxu1 }
 0x3dc   : > { %v8535_v24 = vadd.f32 %v8488_v5, %v8436_v11  ;;  %v8490_v46 = vpop.f32.mrb[57].mxu0  ;;  %v12741_v3 = vpop.f32.mrb[59].mxu1 }
 0x3dd   : > { %v8536_v20 = vadd.f32 %v8490_v46, %v8437_v38  ;;  %v8492_v2 = vpop.f32.mrb[58].mxu0 }
 0x3de   : > { %v8493_v41 = vpop.f32.mrb[59].mxu0  ;;  %12901 = vmatmul.mubr.msk.bf16.vlgmr.msra.gmra.mrb[164].mxu1 %vm626_vm2, %v12038_v28 }
 0x3df   : > { %12905 = vmatpush3.bf16.msra.mxu1 %v11248_v42  ;;  %12906 = vmatprep.mubr.msk.bf16.mxu1 %vm13081_vm0, %v15726_v17 }
 0x3e0   : > { %12039 = vmatmul.mubr.msk.bf16.vlgmr.msra.gmra.mrb[164].mxu0 %vm626_vm2, %v12038_v28  ;;  %12910 = vmatprep.subr.bf16.mxu1 %v15726_v17 }
 0x3e1   : > { %11258 = vmatpush1.bf16.msra.mxu0 %v11249_v35  ;;  %v8628_v6 = vpop.f32.mrb[60].mxu1  ;;  %11289 = vmatprep.mubr.bf16.mxu0 %v15724_v4 }
 0x3e2   : > { %v8636_v16 = vadd.f32 %v8628_v6, %v8537_v45  ;;  %v12746_v40 = vpop.f32.mrb[61].mxu1  ;;  %11356 = vmatprep.subr.bf16.mxu0 %v11349_v13 }
 0x3e3   : > { %v8587_v39 = vpop.f32.mrb[60].mxu0  ;;  %v8631_v29 = vpop.f32.mrb[62].mxu1 }
 0x3e4   : > { %v8634_v30 = vadd.f32 %v8587_v39, %v8535_v24  ;;  %v8589_v58 = vpop.f32.mrb[61].mxu0  ;;  %v12747_v36 = vpop.f32.mrb[63].mxu1 }
 0x3e5   : > { %v8635_v9 = vadd.f32 %v8589_v58, %v8536_v20  ;;  %v8591_v34 = vpop.f32.mrb[62].mxu0 }
 0x3e6   : > { %v8592_v12 = vpop.f32.mrb[63].mxu0  ;;  %12907 = vmatmul.mubr.msk.bf16.vlgmr.msra.gmra.mrb[168].mxu1 %vm626_vm2, %v12041_v43 }
 0x3e7   : > { %12911 = vmatpush3.bf16.msra.mxu1 %v15110_v22  ;;  %12912 = vmatprep.mubr.msk.bf16.mxu1 %vm13081_vm0, %v15726_v17 }
 0x3e8   : > { %12042 = vmatmul.mubr.msk.bf16.vlgmr.msra.gmra.mrb[168].mxu0 %vm626_vm2, %v12041_v43 }
 0x3e9   : > { %11357 = vmatpush1.bf16.msra.mxu0 %v11348_v44  ;;  %v8727_v59 = vpop.f32.mrb[64].mxu1  ;;  %11388 = vmatprep.mubr.bf16.mxu0 %v15724_v4 }
 0x3ea   : > { %v8735_v27 = vadd.f32 %v8727_v59, %v8636_v16  ;;  %v12752_v10 = vpop.f32.mrb[65].mxu1 }
 0x3eb   : > { %v8686_v7 = vpop.f32.mrb[64].mxu0  ;;  %v8730_v18 = vpop.f32.mrb[66].mxu1 }
 0x3ec   : > { %v8738_v22 = vadd.f32 %v8735_v27, %v15127_v50  ;;  %v8733_v15 = vadd.f32 %v8686_v7, %v8634_v30  ;;  %v8688_v17 = vpop.f32.mrb[65].mxu0  ;;  %v12753_v61 = vpop.f32.mrb[67].mxu1 }
 0x3ed   : > { %v8734_v56 = vadd.f32 %v8688_v17, %v8635_v9  ;;  %v8690_v33 = vpop.f32.mrb[66].mxu0 }
 0x3ee   : > { %v8741_v48 = vmax.f32 %v8738_v22, 0.0  ;;  %v8736_v4 = vadd.f32 %v8733_v15, %v15127_v50  ;;  %v8691_v19 = vpop.f32.mrb[67].mxu0  ;;  %12913 = vmatmul.mubr.msk.bf16.vlgmr.msra.gmra.mrb[172].mxu1 %vm626_vm2, %v12044_v57 }
 0x3ef   : > { %v8737_v54 = vadd.f32 %v8734_v56, %v15127_v50 }
 0x3f0   : > { %11957 = vst.msk [vmem:[%s15141_s22 + $0x40] sm:$0xff] %vm3336_vm10, %v8741_v48  ;;  %v8739_v23 = vmax.f32 %v8736_v4, 0.0  ;;  %12045 = vmatmul.mubr.msk.bf16.vlgmr.msra.gmra.mrb[172].mxu0 %vm626_vm2, %v12044_v57 }
 0x3f1   : > { %v8740_v63 = vmax.f32 %v8737_v54, 0.0  ;;  %v8854_v60 = vpop.f32.mrb[68].mxu1 }
 0x3f2   : > { %11955 = vst [vmem:[%s15141_s22 + $0x30] sm:$0xff] %v8739_v23  ;;  %v12758_v37 = vpop.f32.mrb[69].mxu1 }
 0x3f3   : > { %11956 = vst [vmem:[%s15141_s22 + $0x38] sm:$0xff] %v8740_v63  ;;  %v8813_v52 = vpop.f32.mrb[68].mxu0  ;;  %v8857_v42 = vpop.f32.mrb[70].mxu1 }
 0x3f4   : > { %v8815_v26 = vpop.f32.mrb[69].mxu0  ;;  %v12759_v49 = vpop.f32.mrb[71].mxu1 }
 0x3f5   : > { %v8817_v8 = vpop.f32.mrb[70].mxu0 }
 0x3f6   : > { %v8818_v11 = vpop.f32.mrb[71].mxu0 }
 0x3f9   : > { %v8941_v21 = vpop.f32.mrb[72].mxu1 }
 0x3fa   : > { %v8942_v62 = vadd.f32 %v8941_v21, %v8854_v60  ;;  %v12764_v38 = vpop.f32.mrb[73].mxu1 }
 0x3fb   : > { %v8900_v55 = vpop.f32.mrb[72].mxu0  ;;  %v8944_v25 = vpop.f32.mrb[74].mxu1 }
 0x3fc   : > { %v8901_v32 = vadd.f32 %v8900_v55, %v8813_v52  ;;  %v8902_v31 = vpop.f32.mrb[73].mxu0  ;;  %v12765_v51 = vpop.f32.mrb[75].mxu1 }
 0x3fd   : > { %v8903_v45 = vadd.f32 %v8902_v31, %v8815_v26  ;;  %v8904_v0 = vpop.f32.mrb[74].mxu0 }
 0x3fe   : > { %v8905_v53 = vpop.f32.mrb[75].mxu0 }
 0x401   : > { %v9037_v5 = vpop.f32.mrb[76].mxu1 }
 0x402   : > { %v9045_v47 = vadd.f32 %v9037_v5, %v8942_v62  ;;  %v12770_v28 = vpop.f32.mrb[77].mxu1 }
 0x403   : > { %v8996_v24 = vpop.f32.mrb[76].mxu0  ;;  %v9040_v46 = vpop.f32.mrb[78].mxu1 }
 0x404   : > { %v9043_v3 = vadd.f32 %v8996_v24, %v8901_v32  ;;  %v8998_v20 = vpop.f32.mrb[77].mxu0  ;;  %v12771_v2 = vpop.f32.mrb[79].mxu1 }
 0x405   : > { %v9044_v14 = vadd.f32 %v8998_v20, %v8903_v45  ;;  %v9000_v35 = vpop.f32.mrb[78].mxu0 }
 0x406   : > { %v9001_v41 = vpop.f32.mrb[79].mxu0 }
 0x409   : > { %v9136_v13 = vpop.f32.mrb[80].mxu1 }
 0x40a   : > { %v9144_v6 = vadd.f32 %v9136_v13, %v9045_v47  ;;  %v12776_v16 = vpop.f32.mrb[81].mxu1 }
 0x40b   : > { %v9095_v40 = vpop.f32.mrb[80].mxu0  ;;  %v9139_v1 = vpop.f32.mrb[82].mxu1 }
 0x40c   : > { %v9142_v39 = vadd.f32 %v9095_v40, %v9043_v3  ;;  %v9097_v29 = vpop.f32.mrb[81].mxu0  ;;  %v12777_v43 = vpop.f32.mrb[83].mxu1 }
 0x40d   : > { %v9143_v30 = vadd.f32 %v9097_v29, %v9044_v14  ;;  %v9099_v58 = vpop.f32.mrb[82].mxu0 }
 0x40e   : > { %v9100_v36 = vpop.f32.mrb[83].mxu0 }
 0x411   : > { %v9235_v9 = vpop.f32.mrb[84].mxu1 }
 0x412   : > { %v9243_v34 = vadd.f32 %v9235_v9, %v9144_v6  ;;  %v12782_v44 = vpop.f32.mrb[85].mxu1 }
 0x413   : > { %v9194_v12 = vpop.f32.mrb[84].mxu0  ;;  %v9238_v59 = vpop.f32.mrb[86].mxu1 }
 0x414   : > { %v9241_v27 = vadd.f32 %v9194_v12, %v9142_v39  ;;  %v9196_v10 = vpop.f32.mrb[85].mxu0  ;;  %v12783_v7 = vpop.f32.mrb[87].mxu1 }
 0x415   : > { %v9242_v18 = vadd.f32 %v9196_v10, %v9143_v30  ;;  %v9198_v57 = vpop.f32.mrb[86].mxu0 }
 0x416   : > { %v9199_v22 = vpop.f32.mrb[87].mxu0 }
 0x419   : > { %v9334_v15 = vpop.f32.mrb[88].mxu1 }
 0x41a   : > { %v9342_v17 = vadd.f32 %v9334_v15, %v9243_v34  ;;  %v12788_v61 = vpop.f32.mrb[89].mxu1 }
 0x41b   : > { %v9293_v56 = vpop.f32.mrb[88].mxu0  ;;  %v9337_v33 = vpop.f32.mrb[90].mxu1 }
 0x41c   : > { %v9340_v48 = vadd.f32 %v9293_v56, %v9241_v27  ;;  %v9295_v4 = vpop.f32.mrb[89].mxu0  ;;  %v12789_v19 = vpop.f32.mrb[91].mxu1 }
 0x41d   : > { %v9341_v54 = vadd.f32 %v9295_v4, %v9242_v18  ;;  %v9297_v23 = vpop.f32.mrb[90].mxu0 }
 0x41e   : > { %v9298_v63 = vpop.f32.mrb[91].mxu0 }
 0x421   : > { %v9433_v60 = vpop.f32.mrb[92].mxu1 }
 0x422   : > { %v9441_v37 = vadd.f32 %v9433_v60, %v9342_v17  ;;  %v12794_v52 = vpop.f32.mrb[93].mxu1 }
 0x423   : > { %v9392_v42 = vpop.f32.mrb[92].mxu0  ;;  %v9436_v26 = vpop.f32.mrb[94].mxu1 }
 0x424   : > { %v9439_v49 = vadd.f32 %v9392_v42, %v9340_v48  ;;  %v9394_v8 = vpop.f32.mrb[93].mxu0  ;;  %v12795_v11 = vpop.f32.mrb[95].mxu1 }
 0x425   : > { %v9440_v21 = vadd.f32 %v9394_v8, %v9341_v54  ;;  %v9396_v62 = vpop.f32.mrb[94].mxu0 }
 0x426   : > { %v9397_v38 = vpop.f32.mrb[95].mxu0 }
 0x429   : > { %v9532_v55 = vpop.f32.mrb[96].mxu1 }
 0x42a   : > { %v9540_v25 = vadd.f32 %v9532_v55, %v9441_v37  ;;  %v12800_v32 = vpop.f32.mrb[97].mxu1 }
 0x42b   : > { %v9491_v31 = vpop.f32.mrb[96].mxu0  ;;  %v9535_v51 = vpop.f32.mrb[98].mxu1 }
 0x42c   : > { %v9538_v45 = vadd.f32 %v9491_v31, %v9439_v49  ;;  %v9493_v0 = vpop.f32.mrb[97].mxu0  ;;  %v12801_v53 = vpop.f32.mrb[99].mxu1 }
 0x42d   : > { %v9539_v5 = vadd.f32 %v9493_v0, %v9440_v21  ;;  %v9495_v47 = vpop.f32.mrb[98].mxu0 }
 0x42e   : > { %v9496_v28 = vpop.f32.mrb[99].mxu0 }
 0x431   : > { %v9631_v24 = vpop.f32.mrb[100].mxu1 }
 0x432   : > { %v9639_v46 = vadd.f32 %v9631_v24, %v9540_v25  ;;  %v12806_v3 = vpop.f32.mrb[101].mxu1 }
 0x433   : > { %v9590_v20 = vpop.f32.mrb[100].mxu0  ;;  %v9634_v2 = vpop.f32.mrb[102].mxu1 }
 0x434   : > { %v9637_v14 = vadd.f32 %v9590_v20, %v9538_v45  ;;  %v9592_v35 = vpop.f32.mrb[101].mxu0  ;;  %v12807_v41 = vpop.f32.mrb[103].mxu1 }
 0x435   : > { %v9638_v13 = vadd.f32 %v9592_v35, %v9539_v5  ;;  %v9594_v6 = vpop.f32.mrb[102].mxu0 }
 0x436   : > { %v9595_v16 = vpop.f32.mrb[103].mxu0 }
 0x439   : > { %v9739_v40 = vpop.f32.mrb[104].mxu1 }
 0x43a   : > { %v9747_v1 = vadd.f32 %v9739_v40, %v9639_v46  ;;  %v12812_v39 = vpop.f32.mrb[105].mxu1 }
 0x43b   : > { %v9698_v29 = vpop.f32.mrb[104].mxu0  ;;  %v9742_v43 = vpop.f32.mrb[106].mxu1 }
 0x43c   : > { %v9745_v30 = vadd.f32 %v9698_v29, %v9637_v14  ;;  %v9700_v58 = vpop.f32.mrb[105].mxu0  ;;  %v12813_v36 = vpop.f32.mrb[107].mxu1 }
 0x43d   : > { %v9746_v9 = vadd.f32 %v9700_v58, %v9638_v13  ;;  %v9702_v34 = vpop.f32.mrb[106].mxu0 }
 0x43e   : > { %v9703_v44 = vpop.f32.mrb[107].mxu0 }
 0x441   : > { %v9838_v12 = vpop.f32.mrb[108].mxu1 }
 0x442   : > { %v9846_v59 = vadd.f32 %v9838_v12, %v9747_v1  ;;  %v12818_v27 = vpop.f32.mrb[109].mxu1 }
 0x443   : > { %v9797_v10 = vpop.f32.mrb[108].mxu0  ;;  %v9841_v7 = vpop.f32.mrb[110].mxu1 }
 0x444   : > { %v9844_v18 = vadd.f32 %v9797_v10, %v9745_v30  ;;  %v9799_v57 = vpop.f32.mrb[109].mxu0  ;;  %v12819_v22 = vpop.f32.mrb[111].mxu1 }
 0x445   : > { %v9845_v15 = vadd.f32 %v9799_v57, %v9746_v9  ;;  %v9801_v17 = vpop.f32.mrb[110].mxu0 }
 0x446   : > { %v9802_v61 = vpop.f32.mrb[111].mxu0 }
 0x449   : > { %v9937_v56 = vpop.f32.mrb[112].mxu1 }
 0x44a   : > { %v9945_v33 = vadd.f32 %v9937_v56, %v9846_v59  ;;  %v12824_v48 = vpop.f32.mrb[113].mxu1 }
 0x44b   : > { %v9896_v4 = vpop.f32.mrb[112].mxu0  ;;  %v9940_v19 = vpop.f32.mrb[114].mxu1 }
 0x44c   : > { %v9943_v54 = vadd.f32 %v9896_v4, %v9844_v18  ;;  %v9898_v23 = vpop.f32.mrb[113].mxu0  ;;  %v12825_v63 = vpop.f32.mrb[115].mxu1 }
 0x44d   : > { %v9944_v60 = vadd.f32 %v9898_v23, %v9845_v15  ;;  %v9900_v37 = vpop.f32.mrb[114].mxu0 }
 0x44e   : > { %v9901_v52 = vpop.f32.mrb[115].mxu0 }
 0x451   : > { %v10036_v42 = vpop.f32.mrb[116].mxu1 }
 0x452   : > { %v10044_v26 = vadd.f32 %v10036_v42, %v9945_v33  ;;  %v12830_v49 = vpop.f32.mrb[117].mxu1 }
 0x453   : > { %v9995_v8 = vpop.f32.mrb[116].mxu0  ;;  %v10039_v11 = vpop.f32.mrb[118].mxu1 }
 0x454   : > { %v10042_v21 = vadd.f32 %v9995_v8, %v9943_v54  ;;  %v9997_v62 = vpop.f32.mrb[117].mxu0  ;;  %v12831_v38 = vpop.f32.mrb[119].mxu1 }
 0x455   : > { %v10043_v55 = vadd.f32 %v9997_v62, %v9944_v60  ;;  %v9999_v25 = vpop.f32.mrb[118].mxu0 }
 0x456   : > { %v10000_v32 = vpop.f32.mrb[119].mxu0 }
 0x459   : > { %v10135_v31 = vpop.f32.mrb[120].mxu1 }
 0x45a   : > { %v10143_v51 = vadd.f32 %v10135_v31, %v10044_v26  ;;  %v12836_v45 = vpop.f32.mrb[121].mxu1 }
 0x45b   : > { %v10094_v0 = vpop.f32.mrb[120].mxu0  ;;  %v10138_v53 = vpop.f32.mrb[122].mxu1 }
 0x45c   : > { %v10141_v5 = vadd.f32 %v10094_v0, %v10042_v21  ;;  %v10096_v47 = vpop.f32.mrb[121].mxu0  ;;  %v12837_v28 = vpop.f32.mrb[123].mxu1 }
 0x45d   : > { %v10142_v24 = vadd.f32 %v10096_v47, %v10043_v55  ;;  %v10098_v46 = vpop.f32.mrb[122].mxu0 }
 0x45e   : > { %v10099_v3 = vpop.f32.mrb[123].mxu0 }
 0x461   : > { %v10234_v20 = vpop.f32.mrb[124].mxu1 }
 0x462   : > { %v10242_v2 = vadd.f32 %v10234_v20, %v10143_v51  ;;  %v12842_v14 = vpop.f32.mrb[125].mxu1 }
 0x463   : > { %v10193_v35 = vpop.f32.mrb[124].mxu0  ;;  %v10237_v41 = vpop.f32.mrb[126].mxu1 }
 0x464   : > { %v10240_v13 = vadd.f32 %v10193_v35, %v10141_v5  ;;  %v10195_v6 = vpop.f32.mrb[125].mxu0  ;;  %v12843_v16 = vpop.f32.mrb[127].mxu1 }
 0x465   : > { %v10241_v40 = vadd.f32 %v10195_v6, %v10142_v24  ;;  %v10197_v1 = vpop.f32.mrb[126].mxu0 }
 0x466   : > { %v10198_v39 = vpop.f32.mrb[127].mxu0 }
 0x469   : > { %v10333_v29 = vpop.f32.mrb[128].mxu1 }
 0x46a   : > { %v10341_v43 = vadd.f32 %v10333_v29, %v10242_v2  ;;  %v12848_v30 = vpop.f32.mrb[129].mxu1 }
 0x46b   : > { %v10292_v58 = vpop.f32.mrb[128].mxu0  ;;  %v10336_v36 = vpop.f32.mrb[130].mxu1 }
 0x46c   : > { %v10339_v9 = vadd.f32 %v10292_v58, %v10240_v13  ;;  %v10294_v34 = vpop.f32.mrb[129].mxu0  ;;  %v12849_v44 = vpop.f32.mrb[131].mxu1 }
 0x46d   : > { %v10340_v12 = vadd.f32 %v10294_v34, %v10241_v40  ;;  %v10296_v59 = vpop.f32.mrb[130].mxu0 }
 0x46e   : > { %v10297_v27 = vpop.f32.mrb[131].mxu0 }
 0x471   : > { %v10432_v10 = vpop.f32.mrb[132].mxu1 }
 0x472   : > { %v10440_v7 = vadd.f32 %v10432_v10, %v10341_v43  ;;  %v12854_v18 = vpop.f32.mrb[133].mxu1 }
 0x473   : > { %v10391_v57 = vpop.f32.mrb[132].mxu0  ;;  %v10435_v22 = vpop.f32.mrb[134].mxu1 }
 0x474   : > { %v10438_v15 = vadd.f32 %v10391_v57, %v10339_v9  ;;  %v10393_v17 = vpop.f32.mrb[133].mxu0  ;;  %v12855_v61 = vpop.f32.mrb[135].mxu1 }
 0x475   : > { %v10439_v56 = vadd.f32 %v10393_v17, %v10340_v12  ;;  %v10395_v33 = vpop.f32.mrb[134].mxu0 }
 0x476   : > { %v10396_v48 = vpop.f32.mrb[135].mxu0 }
 0x479   : > { %v10531_v4 = vpop.f32.mrb[136].mxu1 }
 0x47a   : > { %v10539_v19 = vadd.f32 %v10531_v4, %v10440_v7  ;;  %v12860_v54 = vpop.f32.mrb[137].mxu1 }
 0x47b   : > { %v10490_v23 = vpop.f32.mrb[136].mxu0  ;;  %v10534_v63 = vpop.f32.mrb[138].mxu1 }
 0x47c   : > { %v10537_v60 = vadd.f32 %v10490_v23, %v10438_v15  ;;  %v10492_v37 = vpop.f32.mrb[137].mxu0  ;;  %v12861_v52 = vpop.f32.mrb[139].mxu1 }
 0x47d   : > { %v10538_v42 = vadd.f32 %v10492_v37, %v10439_v56  ;;  %v10494_v26 = vpop.f32.mrb[138].mxu0 }
 0x47e   : > { %v10495_v49 = vpop.f32.mrb[139].mxu0 }
 0x481   : > { %v10639_v8 = vpop.f32.mrb[140].mxu1 }
 0x482   : > { %v10647_v11 = vadd.f32 %v10639_v8, %v10539_v19  ;;  %v12866_v21 = vpop.f32.mrb[141].mxu1 }
 0x483   : > { %v10598_v62 = vpop.f32.mrb[140].mxu0  ;;  %v10642_v38 = vpop.f32.mrb[142].mxu1 }
 0x484   : > { %v10645_v55 = vadd.f32 %v10598_v62, %v10537_v60  ;;  %v10600_v25 = vpop.f32.mrb[141].mxu0  ;;  %v12867_v32 = vpop.f32.mrb[143].mxu1 }
 0x485   : > { %v10646_v31 = vadd.f32 %v10600_v25, %v10538_v42  ;;  %v10602_v51 = vpop.f32.mrb[142].mxu0 }
 0x486   : > { %v10603_v45 = vpop.f32.mrb[143].mxu0 }
 0x489   : > { %v10738_v0 = vpop.f32.mrb[144].mxu1 }
 0x48a   : > { %v10746_v53 = vadd.f32 %v10738_v0, %v10647_v11  ;;  %v12872_v5 = vpop.f32.mrb[145].mxu1 }
 0x48b   : > { %v10697_v47 = vpop.f32.mrb[144].mxu0  ;;  %v10741_v28 = vpop.f32.mrb[146].mxu1 }
 0x48c   : > { %v10744_v24 = vadd.f32 %v10697_v47, %v10645_v55  ;;  %v10699_v46 = vpop.f32.mrb[145].mxu0  ;;  %v12873_v3 = vpop.f32.mrb[147].mxu1 }
 0x48d   : > { %v10745_v20 = vadd.f32 %v10699_v46, %v10646_v31  ;;  %v10701_v2 = vpop.f32.mrb[146].mxu0 }
 0x48e   : > { %v10702_v14 = vpop.f32.mrb[147].mxu0 }
 0x491   : > { %v10837_v35 = vpop.f32.mrb[148].mxu1 }
 0x492   : > { %v10845_v41 = vadd.f32 %v10837_v35, %v10746_v53  ;;  %v12878_v13 = vpop.f32.mrb[149].mxu1 }
 0x493   : > { %v10796_v6 = vpop.f32.mrb[148].mxu0  ;;  %v10840_v16 = vpop.f32.mrb[150].mxu1 }
 0x494   : > { %v10843_v40 = vadd.f32 %v10796_v6, %v10744_v24  ;;  %v10798_v1 = vpop.f32.mrb[149].mxu0  ;;  %v12879_v39 = vpop.f32.mrb[151].mxu1 }
 0x495   : > { %v10844_v29 = vadd.f32 %v10798_v1, %v10745_v20  ;;  %v10800_v43 = vpop.f32.mrb[150].mxu0 }
 0x496   : > { %v10801_v30 = vpop.f32.mrb[151].mxu0 }
 0x499   : > { %v10936_v58 = vpop.f32.mrb[152].mxu1 }
 0x49a   : > { %v10944_v36 = vadd.f32 %v10936_v58, %v10845_v41  ;;  %v12884_v9 = vpop.f32.mrb[153].mxu1 }
 0x49b   : > { %v10895_v34 = vpop.f32.mrb[152].mxu0  ;;  %v10939_v44 = vpop.f32.mrb[154].mxu1 }
 0x49c   : > { %v10942_v12 = vadd.f32 %v10895_v34, %v10843_v40  ;;  %v10897_v59 = vpop.f32.mrb[153].mxu0  ;;  %v12885_v27 = vpop.f32.mrb[155].mxu1 }
 0x49d   : > { %v10943_v10 = vadd.f32 %v10897_v59, %v10844_v29  ;;  %v10899_v7 = vpop.f32.mrb[154].mxu0 }
 0x49e   : > { %v10900_v18 = vpop.f32.mrb[155].mxu0 }
 0x4a1   : > { %v11035_v57 = vpop.f32.mrb[156].mxu1 }
 0x4a2   : > { %v11043_v22 = vadd.f32 %v11035_v57, %v10944_v36  ;;  %v12890_v15 = vpop.f32.mrb[157].mxu1 }
 0x4a3   : > { %v10994_v17 = vpop.f32.mrb[156].mxu0  ;;  %v11038_v61 = vpop.f32.mrb[158].mxu1 }
 0x4a4   : > { %v11041_v56 = vadd.f32 %v10994_v17, %v10942_v12  ;;  %v10996_v33 = vpop.f32.mrb[157].mxu0  ;;  %v12891_v48 = vpop.f32.mrb[159].mxu1 }
 0x4a5   : > { %v11042_v4 = vadd.f32 %v10996_v33, %v10943_v10  ;;  %v10998_v19 = vpop.f32.mrb[158].mxu0 }
 0x4a6   : > { %v10999_v54 = vpop.f32.mrb[159].mxu0 }
 0x4a9   : > { %v11134_v23 = vpop.f32.mrb[160].mxu1 }
 0x4aa   : > { %v11142_v63 = vadd.f32 %v11134_v23, %v11043_v22  ;;  %v12896_v60 = vpop.f32.mrb[161].mxu1 }
 0x4ab   : > { %v11093_v37 = vpop.f32.mrb[160].mxu0  ;;  %v11137_v52 = vpop.f32.mrb[162].mxu1 }
 0x4ac   : > { %v11140_v42 = vadd.f32 %v11093_v37, %v11041_v56  ;;  %v11095_v26 = vpop.f32.mrb[161].mxu0  ;;  %v12897_v49 = vpop.f32.mrb[163].mxu1 }
 0x4ad   : > { %v11141_v8 = vadd.f32 %v11095_v26, %v11042_v4  ;;  %v11097_v11 = vpop.f32.mrb[162].mxu0 }
 0x4ae   : > { %v11098_v21 = vpop.f32.mrb[163].mxu0 }
 0x4b1   : > { %v11233_v62 = vpop.f32.mrb[164].mxu1 }
 0x4b2   : > { %v11241_v38 = vadd.f32 %v11233_v62, %v11142_v63  ;;  %v12902_v55 = vpop.f32.mrb[165].mxu1 }
 0x4b3   : > { %v11192_v25 = vpop.f32.mrb[164].mxu0  ;;  %v11236_v32 = vpop.f32.mrb[166].mxu1 }
 0x4b4   : > { %v11239_v31 = vadd.f32 %v11192_v25, %v11140_v42  ;;  %v11194_v51 = vpop.f32.mrb[165].mxu0  ;;  %v12903_v45 = vpop.f32.mrb[167].mxu1 }
 0x4b5   : > { %v11240_v0 = vadd.f32 %v11194_v51, %v11141_v8  ;;  %v11196_v53 = vpop.f32.mrb[166].mxu0 }
 0x4b6   : > { %v11197_v5 = vpop.f32.mrb[167].mxu0 }
 0x4b9   : > { %v11332_v47 = vpop.f32.mrb[168].mxu1 }
 0x4ba   : > { %v11340_v28 = vadd.f32 %v11332_v47, %v11241_v38  ;;  %v12908_v24 = vpop.f32.mrb[169].mxu1 }
 0x4bb   : > { %v11291_v46 = vpop.f32.mrb[168].mxu0  ;;  %v11335_v3 = vpop.f32.mrb[170].mxu1 }
 0x4bc   : > { %v11338_v20 = vadd.f32 %v11291_v46, %v11239_v31  ;;  %v11293_v2 = vpop.f32.mrb[169].mxu0  ;;  %v12909_v14 = vpop.f32.mrb[171].mxu1 }
 0x4bd   : > { %v11339_v35 = vadd.f32 %v11293_v2, %v11240_v0  ;;  %v11295_v41 = vpop.f32.mrb[170].mxu0 }
 0x4be   : > { %v11296_v13 = vpop.f32.mrb[171].mxu0 }
 0x4c1   : > { %v11431_v6 = vpop.f32.mrb[172].mxu1 }
 0x4c2   : > { %v11439_v16 = vadd.f32 %v11431_v6, %v11340_v28  ;;  %v12914_v40 = vpop.f32.mrb[173].mxu1 }
 0x4c3   : > { %v11390_v1 = vpop.f32.mrb[172].mxu0  ;;  %v11434_v39 = vpop.f32.mrb[174].mxu1 }
 0x4c4   : > { %v11442_v29 = vadd.f32 %v11439_v16, %v15127_v50  ;;  %v11437_v43 = vadd.f32 %v11390_v1, %v11338_v20  ;;  %v11392_v30 = vpop.f32.mrb[173].mxu0  ;;  %v12915_v58 = vpop.f32.mrb[175].mxu1 }
 0x4c5   : > { %v11438_v36 = vadd.f32 %v11392_v30, %v11339_v35  ;;  %v11394_v9 = vpop.f32.mrb[174].mxu0 }
 0x4c6   : > { %v11445_v34 = vmax.f32 %v11442_v29, 0.0  ;;  %v11440_v44 = vadd.f32 %v11437_v43, %v15127_v50  ;;  %v11395_v12 = vpop.f32.mrb[175].mxu0 }
 0x4c7   : > { %v11441_v59 = vadd.f32 %v11438_v36, %v15127_v50 }
 0x4c8   : > { %12049 = vst.msk [vmem:[%s15141_s22 + $0x58] sm:$0xff] %vm3336_vm10, %v11445_v34  ;;  %v11443_v27 = vmax.f32 %v11440_v44, 0.0 }
 0x4c9   : > { %v11444_v10 = vmax.f32 %v11441_v59, 0.0 }
 0x4ca   : > { %12047 = vst [vmem:[%s15141_s22 + $0x48] sm:$0xff] %v11443_v27 }
 0x4cb   : > { %12048 = vst [vmem:[%s15141_s22 + $0x50] sm:$0xff] %v11444_v10 }
 0x4cc PF: > { %s18_s9 = sadd.s32 1, %s13078_s9   ;;  %s15750_s27 = smov %s13070_s29 }
 0x4cd   : > { %p15_p13 = scmp.ge.s32.totalorder %s18_s9, 10   ;;  %s15751_s28 = smov %s13074_s30 }
 0x4ce   : > { %s15752_s29 = smov %s15755_s10  ;;  %s15753_s30 = smov %s15759_s11 }
 0x4cf   :  { %17 = sbr.rel (!%p15_p13) target bundleno = 4 (0x4), region = 126 }

</bundles_post_ra>
